<compile_context>
chip_gen: v7x
topology: tpu7x:2x2x1
jax: 0.10.0
libtpu: 0.0.40
codegen_flags: <defaults>
</compile_context>

<pallas_src>
from functools import partial

import jax
import jax.numpy as jnp
from jax import lax
from jax.experimental import pallas as pl
from jax.experimental.pallas import tpu as pltpu

EPS = 1e-5


# ---------------------------------------------------------------------------
# Fused Pallas kernel
# ---------------------------------------------------------------------------

def _block_kernel(xhp_ref, t_ref, m1_ref, m2_ref, m3_ref, wlt_ref, pv_ref, cb_ref,
                  s3_ref, o_ref, h1p_s, h2p_s, *, B, H, W, Cin, Cout, Ho, Wo):
    Hp = H + 2
    WC = W * Cout
    rows = B * H
    inv_n = 1.0 / (B * H * W)
    hi = lax.Precision.HIGHEST

    def bn(acc, g_row, b_row):
        # training-mode batch stats; per-channel sum + broadcast over the W lane
        # groups done as a single (2,WC)@(WC,WC) matmul for [sum, sum_sq].
        ssum = jnp.sum(acc, axis=0, keepdims=True)
        ssq = jnp.sum(acc * acc, axis=0, keepdims=True)
        cs = jnp.dot(jnp.concatenate([ssum, ssq], axis=0), cb_ref[...],
                     precision=hi, preferred_element_type=jnp.float32)
        mean = cs[0:1] * inv_n
        var = cs[1:2] * inv_n - mean * mean
        scale = g_row * lax.rsqrt(var + EPS)
        return acc * scale + (b_row - mean * scale)

    # ---- conv1 (3x3, pad 1): 3 banded matmuls over kh, then bias + ReLU + BN1 ----
    acc = jnp.zeros((rows, WC), jnp.float32)
    for kh in range(3):
        xk = xhp_ref[:, kh:kh + H, :].reshape(rows, W * Cin)
        acc += jnp.dot(xk, m1_ref[kh], precision=hi,
                       preferred_element_type=jnp.float32)
    acc = jnp.maximum(acc + pv_ref[0:1, :], 0.0)
    h1 = bn(acc, pv_ref[1:2, :], pv_ref[2:3, :])

    # ---- time embedding: ReLU(t @ Wl_tiled + bl_tiled), broadcast over rows ----
    temb = jnp.maximum(
        jnp.dot(t_ref[...], wlt_ref[...], precision=hi,
                preferred_element_type=jnp.float32) + pv_ref[6:7, :], 0.0)
    h1_img = h1.reshape(B, H, WC) + temb[:, None, :]

    # ---- H-padded h1 stays resident in VMEM (zero only the 2 border rows) ----
    zrow = jnp.zeros((B, 1, WC), jnp.float32)
    h1p_s[:, 0:1, :] = zrow
    h1p_s[:, Hp - 1:Hp, :] = zrow
    h1p_s[:, 1:H + 1, :] = h1_img

    # ---- conv2 (3x3, pad 1): 3 banded matmuls + bias + ReLU + BN2 ----
    acc2 = jnp.zeros((rows, WC), jnp.float32)
    for kh in range(3):
        hk = h1p_s[:, kh:kh + H, :].reshape(rows, WC)
        acc2 += jnp.dot(hk, m2_ref[kh], precision=hi,
                        preferred_element_type=jnp.float32)
    acc2 = jnp.maximum(acc2 + pv_ref[3:4, :], 0.0)
    h2 = bn(acc2, pv_ref[4:5, :], pv_ref[5:6, :])

    # ---- H-padded h2 stays resident in VMEM ----
    h2p_s[:, 0:1, :] = zrow
    h2p_s[:, Hp - 1:Hp, :] = zrow
    h2p_s[:, 1:H + 1, :] = h2.reshape(B, H, WC)

    # ---- transform conv (4x4, stride 2, pad 1): one-hot row select + banded matmul ----
    b3_row = pv_ref[7:8, 0:Wo * Cout]
    for b in range(B):
        h2b = h2p_s[b]                                   # (Hp, WC), VMEM-resident
        ob = jnp.zeros((Ho, Wo * Cout), jnp.float32)
        for kh in range(4):
            rk = jnp.dot(s3_ref[kh], h2b, precision=hi,
                         preferred_element_type=jnp.float32)        # rows 2*ho+kh
            ob += jnp.dot(rk, m3_ref[kh], precision=hi,
                          preferred_element_type=jnp.float32)
        o_ref[b] = ob + b3_row


# ---------------------------------------------------------------------------
# Wrapper (layout plumbing + one-time weight preprocessing)
# ---------------------------------------------------------------------------

def _banded(w, W, stride, pad, Wo):
    """Banded matmul matrices for a conv along the W (lane) axis.

    w: (Cout, Cin, KH, KW) PyTorch-layout conv weight.  Returns (KH, W*Cin, Wo*Cout)
    with M[kh, win*Cin+ci, wo*Cout+co] = w[co, ci, kh, kw] where win = stride*wo+kw-pad;
    out-of-range taps (the zero W-padding of the reference conv) are simply dropped.
    """
    Cout, Cin, KH, KW = w.shape
    win = stride * jnp.arange(Wo)[None, :] + jnp.arange(KW)[:, None] - pad   # (KW, Wo)
    sel = (jnp.arange(W)[None, None, :] == win[:, :, None]).astype(w.dtype)  # (KW, Wo, W)
    M = jnp.einsum('xwv,oihx->hviwo', sel, w)            # (KH, W, Cin, Wo, Cout)
    return M.reshape(KH, W * Cin, Wo * Cout)


def block_forward(x_nchw, t, p):
    B, Cin, H, W = x_nchw.shape
    Cout = p["w1"].shape[0]
    Ho, Wo = H // 2, W // 2
    WC = W * Cout

    # Activations in row-lane layout (lane dim = W*C), padded along H only.
    x_rows = jnp.transpose(x_nchw, (0, 2, 3, 1)).reshape(B, H, W * Cin)
    xhp = jnp.pad(x_rows, ((0, 0), (1, 1), (0, 0)))

    # Banded conv matrices (one per kh); W-padding folded in.
    M1 = _banded(p["w1"], W, 1, 1, W)        # (3, W*Cin,  W*Cout)
    M2 = _banded(p["w2"], W, 1, 1, W)        # (3, W*Cout, W*Cout)
    M3 = _banded(p["w3"], W, 2, 1, Wo)       # (4, W*Cout, Wo*Cout)

    # Time-MLP weight tiled to the lane layout.
    wlt = jnp.tile(p["wl"].T, (1, W))        # (Tdim, W*Cout)

    # All per-channel vectors packed into one (8, W*Cout) array.
    pv = jnp.stack([
        jnp.tile(p["b1"], W), jnp.tile(p["g1"], W), jnp.tile(p["be1"], W),
        jnp.tile(p["b2"], W), jnp.tile(p["g2"], W), jnp.tile(p["be2"], W),
        jnp.tile(p["bl"], W),
        jnp.pad(jnp.tile(p["b3"], Wo), (0, (W - Wo) * Cout)),
    ])

    # Channel-sum / broadcast-back matrix for the BN batch statistics.
    j = jnp.arange(WC)
    cb = (j[:, None] % Cout == j[None, :] % Cout).astype(jnp.float32)

    # One-hot row-selection matrices for the stride-2 transform conv.
    r = jnp.arange(H + 2)
    s3 = (r[None, None, :] ==
          (2 * jnp.arange(Ho)[None, :, None] + jnp.arange(4)[:, None, None])
          ).astype(jnp.float32)              # (4, Ho, H+2)

    vmem = pl.BlockSpec(memory_space=pltpu.MemorySpace.VMEM)
    out_rows = pl.pallas_call(
        partial(_block_kernel, B=B, H=H, W=W, Cin=Cin, Cout=Cout, Ho=Ho, Wo=Wo),
        out_shape=jax.ShapeDtypeStruct((B, Ho, Wo * Cout), jnp.float32),
        in_specs=[vmem] * 9,
        out_specs=vmem,
        scratch_shapes=[pltpu.VMEM((B, H + 2, WC), jnp.float32),   # padded h1
                        pltpu.VMEM((B, H + 2, WC), jnp.float32)],  # padded h2
        compiler_params=pltpu.CompilerParams(vmem_limit_bytes=32 * 1024 * 1024),
    )(xhp, t, M1, M2, M3, wlt, pv, cb, s3)

    return jnp.transpose(out_rows.reshape(B, Ho, Wo, Cout), (0, 3, 1, 2))  # -> NCHW


# ---------------------------------------------------------------------------
# Pure-JAX reference (f32 / HIGHEST precision ground truth)
# ---------------------------------------------------------------------------

def block_forward_ref(x, t, p):
    dn = ("NCHW", "OIHW", "NCHW")

    def conv(x, w, b, stride, pad):
        y = lax.conv_general_dilated(x, w, (stride, stride),
                                     [(pad, pad), (pad, pad)],
                                     dimension_numbers=dn,
                                     precision=lax.Precision.HIGHEST)
        return y + b[None, :, None, None]

    def bn(x, g, be):
        mean = jnp.mean(x, axis=(0, 2, 3), keepdims=True)
        var = jnp.mean((x - mean) ** 2, axis=(0, 2, 3), keepdims=True)
        return ((x - mean) * lax.rsqrt(var + EPS)
                * g[None, :, None, None] + be[None, :, None, None])

    h = bn(jax.nn.relu(conv(x, p["w1"], p["b1"], 1, 1)), p["g1"], p["be1"])
    temb = jax.nn.relu(jnp.dot(t, p["wl"].T, precision=lax.Precision.HIGHEST) + p["bl"])
    h = h + temb[:, :, None, None]
    h = bn(jax.nn.relu(conv(h, p["w2"], p["b2"], 1, 1)), p["g2"], p["be2"])
    return conv(h, p["w3"], p["b3"], 2, 1)


# ---------------------------------------------------------------------------

if __name__ == "__main__":
    B, Cin, H, W = 2, 4, 16, 16
    Cout, Tdim = 8, 32

    key = jax.random.PRNGKey(0)
    ks = jax.random.split(key, 14)

    def uni(k, shape, fan_in):
        s = 1.0 / (fan_in ** 0.5)
        return jax.random.uniform(k, shape, jnp.float32, -s, s)

    params = {
        "w1": uni(ks[0], (Cout, Cin, 3, 3), Cin * 9),
        "b1": uni(ks[1], (Cout,), Cin * 9),
        "w2": uni(ks[2], (Cout, Cout, 3, 3), Cout * 9),
        "b2": uni(ks[3], (Cout,), Cout * 9),
        "w3": uni(ks[4], (Cout, Cout, 4, 4), Cout * 16),
        "b3": uni(ks[5], (Cout,), Cout * 16),
        "wl": uni(ks[6], (Cout, Tdim), Tdim),
        "bl": uni(ks[7], (Cout,), Tdim),
        "g1": 1.0 + 0.1 * jax.random.normal(ks[8], (Cout,), jnp.float32),
        "be1": 0.1 * jax.random.normal(ks[9], (Cout,), jnp.float32),
        "g2": 1.0 + 0.1 * jax.random.normal(ks[10], (Cout,), jnp.float32),
        "be2": 0.1 * jax.random.normal(ks[11], (Cout,), jnp.float32),
    }

    x = jax.random.normal(ks[12], (B, Cin, H, W), jnp.float32)
    t = jax.random.normal(ks[13], (B, Tdim), jnp.float32)

    out = jax.jit(block_forward)(x, t, params)
    out = jax.block_until_ready(out)

    assert out.shape == (B, Cout, H // 2, W // 2), out.shape
    assert bool(jnp.all(jnp.isfinite(out)))

    ref = block_forward_ref(x, t, params)
    assert jnp.allclose(out, ref, atol=1e-3, rtol=1e-3), (
        float(jnp.max(jnp.abs(out - ref))))

    print("KERNEL_OK")
</pallas_src>

<mosaic_0001>
module attributes {stable_mosaic.version = 11 : i64} {
  func.func @_block_kernel(%arg0: memref<2x18x64xf32, #tpu.memory_space<vmem>>, %arg1: memref<2x32xf32, #tpu.memory_space<vmem>>, %arg2: memref<3x64x128xf32, #tpu.memory_space<vmem>>, %arg3: memref<3x128x128xf32, #tpu.memory_space<vmem>>, %arg4: memref<4x128x64xf32, #tpu.memory_space<vmem>>, %arg5: memref<32x128xf32, #tpu.memory_space<vmem>>, %arg6: memref<8x128xf32, #tpu.memory_space<vmem>>, %arg7: memref<128x128xf32, #tpu.memory_space<vmem>>, %arg8: memref<4x8x18xf32, #tpu.memory_space<vmem>>, %arg9: memref<2x8x64xf32, #tpu.memory_space<vmem>>, %arg10: memref<2x18x128xf32, #tpu.memory_space<vmem>>, %arg11: memref<2x18x128xf32, #tpu.memory_space<vmem>>) attributes {dimension_semantics = [], scalar_prefetch = 0 : i64, scratch_operands = 2 : i64, tpu.core_type = #tpu.core_type<tc>} {
    %cst = arith.constant 0.000000e+00 : f32
    %0 = vector.broadcast %cst : f32 to vector<32x128xf32>
    %c0 = arith.constant 0 : index
    %c0_0 = arith.constant 0 : index
    %c0_1 = arith.constant 0 : index
    %1 = vector.load %arg0[%c0, %c0_0, %c0_1] : memref<2x18x64xf32, #tpu.memory_space<vmem>>, vector<2x16x64xf32>
    %2 = vector.shape_cast %1 : vector<2x16x64xf32> to vector<32x64xf32>
    %c0_2 = arith.constant 0 : index
    %c0_3 = arith.constant 0 : index
    %c0_4 = arith.constant 0 : index
    %3 = vector.load %arg2[%c0_2, %c0_3, %c0_4] : memref<3x64x128xf32, #tpu.memory_space<vmem>>, vector<1x64x128xf32>
    %4 = vector.shape_cast %3 : vector<1x64x128xf32> to vector<64x128xf32>
    %cst_5 = arith.constant dense<0.000000e+00> : vector<32x128xf32>
    %5 = tpu.matmul %2, %4, %cst_5 {dimension_numbers = #tpu.dot_dimension_numbers<[1], [0], [0], [1], [0, 0, 1, 1], [], []>, precision = #tpu.contract_precision<fp32>} : vector<32x64xf32>, vector<64x128xf32>, vector<32x128xf32> -> vector<32x128xf32>
    %6 = arith.addf %0, %5 : vector<32x128xf32>
    %c0_6 = arith.constant 0 : index
    %c1 = arith.constant 1 : index
    %c0_7 = arith.constant 0 : index
    %7 = vector.load %arg0[%c0_6, %c1, %c0_7] : memref<2x18x64xf32, #tpu.memory_space<vmem>>, vector<2x16x64xf32>
    %8 = vector.shape_cast %7 : vector<2x16x64xf32> to vector<32x64xf32>
    %c1_8 = arith.constant 1 : index
    %c0_9 = arith.constant 0 : index
    %c0_10 = arith.constant 0 : index
    %9 = vector.load %arg2[%c1_8, %c0_9, %c0_10] : memref<3x64x128xf32, #tpu.memory_space<vmem>>, vector<1x64x128xf32>
    %10 = vector.shape_cast %9 : vector<1x64x128xf32> to vector<64x128xf32>
    %cst_11 = arith.constant dense<0.000000e+00> : vector<32x128xf32>
    %11 = tpu.matmul %8, %10, %cst_11 {dimension_numbers = #tpu.dot_dimension_numbers<[1], [0], [0], [1], [0, 0, 1, 1], [], []>, precision = #tpu.contract_precision<fp32>} : vector<32x64xf32>, vector<64x128xf32>, vector<32x128xf32> -> vector<32x128xf32>
    %12 = arith.addf %6, %11 : vector<32x128xf32>
    %c0_12 = arith.constant 0 : index
    %c2 = arith.constant 2 : index
    %c0_13 = arith.constant 0 : index
    %13 = vector.load %arg0[%c0_12, %c2, %c0_13] : memref<2x18x64xf32, #tpu.memory_space<vmem>>, vector<2x16x64xf32>
    %14 = vector.shape_cast %13 : vector<2x16x64xf32> to vector<32x64xf32>
    %c2_14 = arith.constant 2 : index
    %c0_15 = arith.constant 0 : index
    %c0_16 = arith.constant 0 : index
    %15 = vector.load %arg2[%c2_14, %c0_15, %c0_16] : memref<3x64x128xf32, #tpu.memory_space<vmem>>, vector<1x64x128xf32>
    %16 = vector.shape_cast %15 : vector<1x64x128xf32> to vector<64x128xf32>
    %cst_17 = arith.constant dense<0.000000e+00> : vector<32x128xf32>
    %17 = tpu.matmul %14, %16, %cst_17 {dimension_numbers = #tpu.dot_dimension_numbers<[1], [0], [0], [1], [0, 0, 1, 1], [], []>, precision = #tpu.contract_precision<fp32>} : vector<32x64xf32>, vector<64x128xf32>, vector<32x128xf32> -> vector<32x128xf32>
    %18 = arith.addf %12, %17 : vector<32x128xf32>
    %c0_18 = arith.constant 0 : index
    %c0_19 = arith.constant 0 : index
    %19 = vector.load %arg6[%c0_18, %c0_19] : memref<8x128xf32, #tpu.memory_space<vmem>>, vector<1x128xf32>
    %20 = vector.broadcast %19 : vector<1x128xf32> to vector<32x128xf32>
    %21 = arith.addf %18, %20 : vector<32x128xf32>
    %cst_20 = arith.constant 0.000000e+00 : f32
    %22 = vector.broadcast %cst_20 : f32 to vector<32x128xf32>
    %23 = arith.maximumf %21, %22 : vector<32x128xf32>
    %c1_21 = arith.constant 1 : index
    %c0_22 = arith.constant 0 : index
    %24 = vector.load %arg6[%c1_21, %c0_22] : memref<8x128xf32, #tpu.memory_space<vmem>>, vector<1x128xf32>
    %c2_23 = arith.constant 2 : index
    %c0_24 = arith.constant 0 : index
    %25 = vector.load %arg6[%c2_23, %c0_24] : memref<8x128xf32, #tpu.memory_space<vmem>>, vector<1x128xf32>
    %cst_25 = arith.constant dense<0.000000e+00> : vector<128xf32>
    %26 = vector.multi_reduction <add>, %23, %cst_25 [0] : vector<32x128xf32> to vector<128xf32>
    %27 = vector.shape_cast %26 : vector<128xf32> to vector<1x128xf32>
    %28 = arith.mulf %23, %23 : vector<32x128xf32>
    %cst_26 = arith.constant dense<0.000000e+00> : vector<128xf32>
    %29 = vector.multi_reduction <add>, %28, %cst_26 [0] : vector<32x128xf32> to vector<128xf32>
    %30 = vector.shape_cast %29 : vector<128xf32> to vector<1x128xf32>
    %31 = tpu.concatenate %27, %30 in 0 : vector<1x128xf32>, vector<1x128xf32> -> vector<2x128xf32>
    %c0_27 = arith.constant 0 : index
    %c0_28 = arith.constant 0 : index
    %32 = vector.load %arg7[%c0_27, %c0_28] : memref<128x128xf32, #tpu.memory_space<vmem>>, vector<128x128xf32>
    %cst_29 = arith.constant dense<0.000000e+00> : vector<2x128xf32>
    %33 = tpu.matmul %31, %32, %cst_29 {dimension_numbers = #tpu.dot_dimension_numbers<[1], [0], [0], [1], [0, 0, 1, 1], [], []>, precision = #tpu.contract_precision<fp32>} : vector<2x128xf32>, vector<128x128xf32>, vector<2x128xf32> -> vector<2x128xf32>
    %34 = vector.extract_strided_slice %33 {offsets = [0, 0], sizes = [1, 128], strides = [1, 1]} : vector<2x128xf32> to vector<1x128xf32>
    %cst_30 = arith.constant 0.001953125 : f32
    %35 = vector.broadcast %cst_30 : f32 to vector<1x128xf32>
    %36 = arith.mulf %34, %35 : vector<1x128xf32>
    %37 = vector.extract_strided_slice %33 {offsets = [1, 0], sizes = [1, 128], strides = [1, 1]} : vector<2x128xf32> to vector<1x128xf32>
    %cst_31 = arith.constant 0.001953125 : f32
    %38 = vector.broadcast %cst_31 : f32 to vector<1x128xf32>
    %39 = arith.mulf %37, %38 : vector<1x128xf32>
    %40 = arith.mulf %36, %36 : vector<1x128xf32>
    %41 = arith.subf %39, %40 : vector<1x128xf32>
    %cst_32 = arith.constant 9.99999974E-6 : f32
    %42 = vector.broadcast %cst_32 : f32 to vector<1x128xf32>
    %43 = arith.addf %41, %42 : vector<1x128xf32>
    %44 = math.rsqrt %43 : vector<1x128xf32>
    %45 = arith.mulf %24, %44 : vector<1x128xf32>
    %46 = vector.broadcast %45 : vector<1x128xf32> to vector<32x128xf32>
    %47 = arith.mulf %23, %46 : vector<32x128xf32>
    %48 = arith.mulf %36, %45 : vector<1x128xf32>
    %49 = arith.subf %25, %48 : vector<1x128xf32>
    %50 = vector.broadcast %49 : vector<1x128xf32> to vector<32x128xf32>
    %51 = arith.addf %47, %50 : vector<32x128xf32>
    %c0_33 = arith.constant 0 : index
    %c0_34 = arith.constant 0 : index
    %52 = vector.load %arg1[%c0_33, %c0_34] : memref<2x32xf32, #tpu.memory_space<vmem>>, vector<2x32xf32>
    %c0_35 = arith.constant 0 : index
    %c0_36 = arith.constant 0 : index
    %53 = vector.load %arg5[%c0_35, %c0_36] : memref<32x128xf32, #tpu.memory_space<vmem>>, vector<32x128xf32>
    %cst_37 = arith.constant dense<0.000000e+00> : vector<2x128xf32>
    %54 = tpu.matmul %52, %53, %cst_37 {dimension_numbers = #tpu.dot_dimension_numbers<[1], [0], [0], [1], [0, 0, 1, 1], [], []>, precision = #tpu.contract_precision<fp32>} : vector<2x32xf32>, vector<32x128xf32>, vector<2x128xf32> -> vector<2x128xf32>
    %c6 = arith.constant 6 : index
    %c0_38 = arith.constant 0 : index
    %55 = vector.load %arg6[%c6, %c0_38] : memref<8x128xf32, #tpu.memory_space<vmem>>, vector<1x128xf32>
    %56 = vector.broadcast %55 : vector<1x128xf32> to vector<2x128xf32>
    %57 = arith.addf %54, %56 : vector<2x128xf32>
    %cst_39 = arith.constant 0.000000e+00 : f32
    %58 = vector.broadcast %cst_39 : f32 to vector<2x128xf32>
    %59 = arith.maximumf %57, %58 : vector<2x128xf32>
    %60 = vector.shape_cast %51 : vector<32x128xf32> to vector<2x16x128xf32>
    %61 = vector.shape_cast %59 : vector<2x128xf32> to vector<2x1x128xf32>
    %62 = vector.broadcast %61 : vector<2x1x128xf32> to vector<2x16x128xf32>
    %63 = arith.addf %60, %62 : vector<2x16x128xf32>
    %cst_40 = arith.constant 0.000000e+00 : f32
    %64 = vector.broadcast %cst_40 : f32 to vector<2x1x128xf32>
    %c0_41 = arith.constant 0 : index
    %c0_42 = arith.constant 0 : index
    %c0_43 = arith.constant 0 : index
    %65 = vector.load %arg10[%c0_41, %c0_42, %c0_43] : memref<2x18x128xf32, #tpu.memory_space<vmem>>, vector<2x1x128xf32>
    tpu.vector_store %arg10[%c0_41, %c0_42, %c0_43], %64 {strides = array<i32>} : memref<2x18x128xf32, #tpu.memory_space<vmem>>, vector<2x1x128xf32>,
    %c0_44 = arith.constant 0 : index
    %c17 = arith.constant 17 : index
    %c0_45 = arith.constant 0 : index
    %66 = vector.load %arg10[%c0_44, %c17, %c0_45] : memref<2x18x128xf32, #tpu.memory_space<vmem>>, vector<2x1x128xf32>
    tpu.vector_store %arg10[%c0_44, %c17, %c0_45], %64 {strides = array<i32>} : memref<2x18x128xf32, #tpu.memory_space<vmem>>, vector<2x1x128xf32>,
    %c0_46 = arith.constant 0 : index
    %c1_47 = arith.constant 1 : index
    %c0_48 = arith.constant 0 : index
    %67 = vector.load %arg10[%c0_46, %c1_47, %c0_48] : memref<2x18x128xf32, #tpu.memory_space<vmem>>, vector<2x16x128xf32>
    tpu.vector_store %arg10[%c0_46, %c1_47, %c0_48], %63 {strides = array<i32>} : memref<2x18x128xf32, #tpu.memory_space<vmem>>, vector<2x16x128xf32>,
    %cst_49 = arith.constant 0.000000e+00 : f32
    %68 = vector.broadcast %cst_49 : f32 to vector<32x128xf32>
    %c0_50 = arith.constant 0 : index
    %c0_51 = arith.constant 0 : index
    %c0_52 = arith.constant 0 : index
    %69 = vector.load %arg10[%c0_50, %c0_51, %c0_52] : memref<2x18x128xf32, #tpu.memory_space<vmem>>, vector<2x16x128xf32>
    %70 = vector.shape_cast %69 : vector<2x16x128xf32> to vector<32x128xf32>
    %c0_53 = arith.constant 0 : index
    %c0_54 = arith.constant 0 : index
    %c0_55 = arith.constant 0 : index
    %71 = vector.load %arg3[%c0_53, %c0_54, %c0_55] : memref<3x128x128xf32, #tpu.memory_space<vmem>>, vector<1x128x128xf32>
    %72 = vector.shape_cast %71 : vector<1x128x128xf32> to vector<128x128xf32>
    %cst_56 = arith.constant dense<0.000000e+00> : vector<32x128xf32>
    %73 = tpu.matmul %70, %72, %cst_56 {dimension_numbers = #tpu.dot_dimension_numbers<[1], [0], [0], [1], [0, 0, 1, 1], [], []>, precision = #tpu.contract_precision<fp32>} : vector<32x128xf32>, vector<128x128xf32>, vector<32x128xf32> -> vector<32x128xf32>
    %74 = arith.addf %68, %73 : vector<32x128xf32>
    %c0_57 = arith.constant 0 : index
    %c1_58 = arith.constant 1 : index
    %c0_59 = arith.constant 0 : index
    %75 = vector.load %arg10[%c0_57, %c1_58, %c0_59] : memref<2x18x128xf32, #tpu.memory_space<vmem>>, vector<2x16x128xf32>
    %76 = vector.shape_cast %75 : vector<2x16x128xf32> to vector<32x128xf32>
    %c1_60 = arith.constant 1 : index
    %c0_61 = arith.constant 0 : index
    %c0_62 = arith.constant 0 : index
    %77 = vector.load %arg3[%c1_60, %c0_61, %c0_62] : memref<3x128x128xf32, #tpu.memory_space<vmem>>, vector<1x128x128xf32>
    %78 = vector.shape_cast %77 : vector<1x128x128xf32> to vector<128x128xf32>
    %cst_63 = arith.constant dense<0.000000e+00> : vector<32x128xf32>
    %79 = tpu.matmul %76, %78, %cst_63 {dimension_numbers = #tpu.dot_dimension_numbers<[1], [0], [0], [1], [0, 0, 1, 1], [], []>, precision = #tpu.contract_precision<fp32>} : vector<32x128xf32>, vector<128x128xf32>, vector<32x128xf32> -> vector<32x128xf32>
    %80 = arith.addf %74, %79 : vector<32x128xf32>
    %c0_64 = arith.constant 0 : index
    %c2_65 = arith.constant 2 : index
    %c0_66 = arith.constant 0 : index
    %81 = vector.load %arg10[%c0_64, %c2_65, %c0_66] : memref<2x18x128xf32, #tpu.memory_space<vmem>>, vector<2x16x128xf32>
    %82 = vector.shape_cast %81 : vector<2x16x128xf32> to vector<32x128xf32>
    %c2_67 = arith.constant 2 : index
    %c0_68 = arith.constant 0 : index
    %c0_69 = arith.constant 0 : index
    %83 = vector.load %arg3[%c2_67, %c0_68, %c0_69] : memref<3x128x128xf32, #tpu.memory_space<vmem>>, vector<1x128x128xf32>
    %84 = vector.shape_cast %83 : vector<1x128x128xf32> to vector<128x128xf32>
    %cst_70 = arith.constant dense<0.000000e+00> : vector<32x128xf32>
    %85 = tpu.matmul %82, %84, %cst_70 {dimension_numbers = #tpu.dot_dimension_numbers<[1], [0], [0], [1], [0, 0, 1, 1], [], []>, precision = #tpu.contract_precision<fp32>} : vector<32x128xf32>, vector<128x128xf32>, vector<32x128xf32> -> vector<32x128xf32>
    %86 = arith.addf %80, %85 : vector<32x128xf32>
    %c3 = arith.constant 3 : index
    %c0_71 = arith.constant 0 : index
    %87 = vector.load %arg6[%c3, %c0_71] : memref<8x128xf32, #tpu.memory_space<vmem>>, vector<1x128xf32>
    %88 = vector.broadcast %87 : vector<1x128xf32> to vector<32x128xf32>
    %89 = arith.addf %86, %88 : vector<32x128xf32>
    %cst_72 = arith.constant 0.000000e+00 : f32
    %90 = vector.broadcast %cst_72 : f32 to vector<32x128xf32>
    %91 = arith.maximumf %89, %90 : vector<32x128xf32>
    %c4 = arith.constant 4 : index
    %c0_73 = arith.constant 0 : index
    %92 = vector.load %arg6[%c4, %c0_73] : memref<8x128xf32, #tpu.memory_space<vmem>>, vector<1x128xf32>
    %c5 = arith.constant 5 : index
    %c0_74 = arith.constant 0 : index
    %93 = vector.load %arg6[%c5, %c0_74] : memref<8x128xf32, #tpu.memory_space<vmem>>, vector<1x128xf32>
    %cst_75 = arith.constant dense<0.000000e+00> : vector<128xf32>
    %94 = vector.multi_reduction <add>, %91, %cst_75 [0] : vector<32x128xf32> to vector<128xf32>
    %95 = vector.shape_cast %94 : vector<128xf32> to vector<1x128xf32>
    %96 = arith.mulf %91, %91 : vector<32x128xf32>
    %cst_76 = arith.constant dense<0.000000e+00> : vector<128xf32>
    %97 = vector.multi_reduction <add>, %96, %cst_76 [0] : vector<32x128xf32> to vector<128xf32>
    %98 = vector.shape_cast %97 : vector<128xf32> to vector<1x128xf32>
    %99 = tpu.concatenate %95, %98 in 0 : vector<1x128xf32>, vector<1x128xf32> -> vector<2x128xf32>
    %c0_77 = arith.constant 0 : index
    %c0_78 = arith.constant 0 : index
    %100 = vector.load %arg7[%c0_77, %c0_78] : memref<128x128xf32, #tpu.memory_space<vmem>>, vector<128x128xf32>
    %cst_79 = arith.constant dense<0.000000e+00> : vector<2x128xf32>
    %101 = tpu.matmul %99, %100, %cst_79 {dimension_numbers = #tpu.dot_dimension_numbers<[1], [0], [0], [1], [0, 0, 1, 1], [], []>, precision = #tpu.contract_precision<fp32>} : vector<2x128xf32>, vector<128x128xf32>, vector<2x128xf32> -> vector<2x128xf32>
    %102 = vector.extract_strided_slice %101 {offsets = [0, 0], sizes = [1, 128], strides = [1, 1]} : vector<2x128xf32> to vector<1x128xf32>
    %cst_80 = arith.constant 0.001953125 : f32
    %103 = vector.broadcast %cst_80 : f32 to vector<1x128xf32>
    %104 = arith.mulf %102, %103 : vector<1x128xf32>
    %105 = vector.extract_strided_slice %101 {offsets = [1, 0], sizes = [1, 128], strides = [1, 1]} : vector<2x128xf32> to vector<1x128xf32>
    %cst_81 = arith.constant 0.001953125 : f32
    %106 = vector.broadcast %cst_81 : f32 to vector<1x128xf32>
    %107 = arith.mulf %105, %106 : vector<1x128xf32>
    %108 = arith.mulf %104, %104 : vector<1x128xf32>
    %109 = arith.subf %107, %108 : vector<1x128xf32>
    %cst_82 = arith.constant 9.99999974E-6 : f32
    %110 = vector.broadcast %cst_82 : f32 to vector<1x128xf32>
    %111 = arith.addf %109, %110 : vector<1x128xf32>
    %112 = math.rsqrt %111 : vector<1x128xf32>
    %113 = arith.mulf %92, %112 : vector<1x128xf32>
    %114 = vector.broadcast %113 : vector<1x128xf32> to vector<32x128xf32>
    %115 = arith.mulf %91, %114 : vector<32x128xf32>
    %116 = arith.mulf %104, %113 : vector<1x128xf32>
    %117 = arith.subf %93, %116 : vector<1x128xf32>
    %118 = vector.broadcast %117 : vector<1x128xf32> to vector<32x128xf32>
    %119 = arith.addf %115, %118 : vector<32x128xf32>
    %c0_83 = arith.constant 0 : index
    %c0_84 = arith.constant 0 : index
    %c0_85 = arith.constant 0 : index
    %120 = vector.load %arg11[%c0_83, %c0_84, %c0_85] : memref<2x18x128xf32, #tpu.memory_space<vmem>>, vector<2x1x128xf32>
    tpu.vector_store %arg11[%c0_83, %c0_84, %c0_85], %64 {strides = array<i32>} : memref<2x18x128xf32, #tpu.memory_space<vmem>>, vector<2x1x128xf32>,
    %c0_86 = arith.constant 0 : index
    %c17_87 = arith.constant 17 : index
    %c0_88 = arith.constant 0 : index
    %121 = vector.load %arg11[%c0_86, %c17_87, %c0_88] : memref<2x18x128xf32, #tpu.memory_space<vmem>>, vector<2x1x128xf32>
    tpu.vector_store %arg11[%c0_86, %c17_87, %c0_88], %64 {strides = array<i32>} : memref<2x18x128xf32, #tpu.memory_space<vmem>>, vector<2x1x128xf32>,
    %122 = vector.shape_cast %119 : vector<32x128xf32> to vector<2x16x128xf32>
    %c0_89 = arith.constant 0 : index
    %c1_90 = arith.constant 1 : index
    %c0_91 = arith.constant 0 : index
    %123 = vector.load %arg11[%c0_89, %c1_90, %c0_91] : memref<2x18x128xf32, #tpu.memory_space<vmem>>, vector<2x16x128xf32>
    tpu.vector_store %arg11[%c0_89, %c1_90, %c0_91], %122 {strides = array<i32>} : memref<2x18x128xf32, #tpu.memory_space<vmem>>, vector<2x16x128xf32>,
    %c7 = arith.constant 7 : index
    %c0_92 = arith.constant 0 : index
    %124 = vector.load %arg6[%c7, %c0_92] : memref<8x128xf32, #tpu.memory_space<vmem>>, vector<1x64xf32>
    %c0_93 = arith.constant 0 : index
    %c0_94 = arith.constant 0 : index
    %c0_95 = arith.constant 0 : index
    %125 = vector.load %arg11[%c0_93, %c0_94, %c0_95] : memref<2x18x128xf32, #tpu.memory_space<vmem>>, vector<1x18x128xf32>
    %126 = vector.shape_cast %125 : vector<1x18x128xf32> to vector<18x128xf32>
    %cst_96 = arith.constant 0.000000e+00 : f32
    %127 = vector.broadcast %cst_96 : f32 to vector<8x64xf32>
    %c0_97 = arith.constant 0 : index
    %c0_98 = arith.constant 0 : index
    %c0_99 = arith.constant 0 : index
    %128 = vector.load %arg8[%c0_97, %c0_98, %c0_99] : memref<4x8x18xf32, #tpu.memory_space<vmem>>, vector<1x8x18xf32>
    %129 = vector.shape_cast %128 : vector<1x8x18xf32> to vector<8x18xf32>
    %cst_100 = arith.constant dense<0.000000e+00> : vector<8x128xf32>
    %130 = tpu.matmul %129, %126, %cst_100 {dimension_numbers = #tpu.dot_dimension_numbers<[1], [0], [0], [1], [0, 0, 1, 1], [], []>, precision = #tpu.contract_precision<fp32>} : vector<8x18xf32>, vector<18x128xf32>, vector<8x128xf32> -> vector<8x128xf32>
    %c0_101 = arith.constant 0 : index
    %c0_102 = arith.constant 0 : index
    %c0_103 = arith.constant 0 : index
    %131 = vector.load %arg4[%c0_101, %c0_102, %c0_103] : memref<4x128x64xf32, #tpu.memory_space<vmem>>, vector<1x128x64xf32>
    %132 = vector.shape_cast %131 : vector<1x128x64xf32> to vector<128x64xf32>
    %cst_104 = arith.constant dense<0.000000e+00> : vector<8x64xf32>
    %133 = tpu.matmul %130, %132, %cst_104 {dimension_numbers = #tpu.dot_dimension_numbers<[1], [0], [0], [1], [0, 0, 1, 1], [], []>, precision = #tpu.contract_precision<fp32>} : vector<8x128xf32>, vector<128x64xf32>, vector<8x64xf32> -> vector<8x64xf32>
    %134 = arith.addf %127, %133 : vector<8x64xf32>
    %c1_105 = arith.constant 1 : index
    %c0_106 = arith.constant 0 : index
    %c0_107 = arith.constant 0 : index
    %135 = vector.load %arg8[%c1_105, %c0_106, %c0_107] : memref<4x8x18xf32, #tpu.memory_space<vmem>>, vector<1x8x18xf32>
    %136 = vector.shape_cast %135 : vector<1x8x18xf32> to vector<8x18xf32>
    %cst_108 = arith.constant dense<0.000000e+00> : vector<8x128xf32>
    %137 = tpu.matmul %136, %126, %cst_108 {dimension_numbers = #tpu.dot_dimension_numbers<[1], [0], [0], [1], [0, 0, 1, 1], [], []>, precision = #tpu.contract_precision<fp32>} : vector<8x18xf32>, vector<18x128xf32>, vector<8x128xf32> -> vector<8x128xf32>
    %c1_109 = arith.constant 1 : index
    %c0_110 = arith.constant 0 : index
    %c0_111 = arith.constant 0 : index
    %138 = vector.load %arg4[%c1_109, %c0_110, %c0_111] : memref<4x128x64xf32, #tpu.memory_space<vmem>>, vector<1x128x64xf32>
    %139 = vector.shape_cast %138 : vector<1x128x64xf32> to vector<128x64xf32>
    %cst_112 = arith.constant dense<0.000000e+00> : vector<8x64xf32>
    %140 = tpu.matmul %137, %139, %cst_112 {dimension_numbers = #tpu.dot_dimension_numbers<[1], [0], [0], [1], [0, 0, 1, 1], [], []>, precision = #tpu.contract_precision<fp32>} : vector<8x128xf32>, vector<128x64xf32>, vector<8x64xf32> -> vector<8x64xf32>
    %141 = arith.addf %134, %140 : vector<8x64xf32>
    %c2_113 = arith.constant 2 : index
    %c0_114 = arith.constant 0 : index
    %c0_115 = arith.constant 0 : index
    %142 = vector.load %arg8[%c2_113, %c0_114, %c0_115] : memref<4x8x18xf32, #tpu.memory_space<vmem>>, vector<1x8x18xf32>
    %143 = vector.shape_cast %142 : vector<1x8x18xf32> to vector<8x18xf32>
    %cst_116 = arith.constant dense<0.000000e+00> : vector<8x128xf32>
    %144 = tpu.matmul %143, %126, %cst_116 {dimension_numbers = #tpu.dot_dimension_numbers<[1], [0], [0], [1], [0, 0, 1, 1], [], []>, precision = #tpu.contract_precision<fp32>} : vector<8x18xf32>, vector<18x128xf32>, vector<8x128xf32> -> vector<8x128xf32>
    %c2_117 = arith.constant 2 : index
    %c0_118 = arith.constant 0 : index
    %c0_119 = arith.constant 0 : index
    %145 = vector.load %arg4[%c2_117, %c0_118, %c0_119] : memref<4x128x64xf32, #tpu.memory_space<vmem>>, vector<1x128x64xf32>
    %146 = vector.shape_cast %145 : vector<1x128x64xf32> to vector<128x64xf32>
    %cst_120 = arith.constant dense<0.000000e+00> : vector<8x64xf32>
    %147 = tpu.matmul %144, %146, %cst_120 {dimension_numbers = #tpu.dot_dimension_numbers<[1], [0], [0], [1], [0, 0, 1, 1], [], []>, precision = #tpu.contract_precision<fp32>} : vector<8x128xf32>, vector<128x64xf32>, vector<8x64xf32> -> vector<8x64xf32>
    %148 = arith.addf %141, %147 : vector<8x64xf32>
    %c3_121 = arith.constant 3 : index
    %c0_122 = arith.constant 0 : index
    %c0_123 = arith.constant 0 : index
    %149 = vector.load %arg8[%c3_121, %c0_122, %c0_123] : memref<4x8x18xf32, #tpu.memory_space<vmem>>, vector<1x8x18xf32>
    %150 = vector.shape_cast %149 : vector<1x8x18xf32> to vector<8x18xf32>
    %cst_124 = arith.constant dense<0.000000e+00> : vector<8x128xf32>
    %151 = tpu.matmul %150, %126, %cst_124 {dimension_numbers = #tpu.dot_dimension_numbers<[1], [0], [0], [1], [0, 0, 1, 1], [], []>, precision = #tpu.contract_precision<fp32>} : vector<8x18xf32>, vector<18x128xf32>, vector<8x128xf32> -> vector<8x128xf32>
    %c3_125 = arith.constant 3 : index
    %c0_126 = arith.constant 0 : index
    %c0_127 = arith.constant 0 : index
    %152 = vector.load %arg4[%c3_125, %c0_126, %c0_127] : memref<4x128x64xf32, #tpu.memory_space<vmem>>, vector<1x128x64xf32>
    %153 = vector.shape_cast %152 : vector<1x128x64xf32> to vector<128x64xf32>
    %cst_128 = arith.constant dense<0.000000e+00> : vector<8x64xf32>
    %154 = tpu.matmul %151, %153, %cst_128 {dimension_numbers = #tpu.dot_dimension_numbers<[1], [0], [0], [1], [0, 0, 1, 1], [], []>, precision = #tpu.contract_precision<fp32>} : vector<8x128xf32>, vector<128x64xf32>, vector<8x64xf32> -> vector<8x64xf32>
    %155 = arith.addf %148, %154 : vector<8x64xf32>
    %156 = vector.broadcast %124 : vector<1x64xf32> to vector<8x64xf32>
    %157 = arith.addf %155, %156 : vector<8x64xf32>
    %c0_129 = arith.constant 0 : index
    %c0_130 = arith.constant 0 : index
    %c0_131 = arith.constant 0 : index
    %158 = vector.load %arg9[%c0_129, %c0_130, %c0_131] : memref<2x8x64xf32, #tpu.memory_space<vmem>>, vector<1x8x64xf32>
    %159 = vector.shape_cast %158 : vector<1x8x64xf32> to vector<8x64xf32>
    %160 = vector.shape_cast %157 : vector<8x64xf32> to vector<1x8x64xf32>
    tpu.vector_store %arg9[%c0_129, %c0_130, %c0_131], %160 {strides = array<i32>} : memref<2x8x64xf32, #tpu.memory_space<vmem>>, vector<1x8x64xf32>,
    %c1_132 = arith.constant 1 : index
    %c0_133 = arith.constant 0 : index
    %c0_134 = arith.constant 0 : index
    %161 = vector.load %arg11[%c1_132, %c0_133, %c0_134] : memref<2x18x128xf32, #tpu.memory_space<vmem>>, vector<1x18x128xf32>
    %162 = vector.shape_cast %161 : vector<1x18x128xf32> to vector<18x128xf32>
    %cst_135 = arith.constant 0.000000e+00 : f32
    %163 = vector.broadcast %cst_135 : f32 to vector<8x64xf32>
    %c0_136 = arith.constant 0 : index
    %c0_137 = arith.constant 0 : index
    %c0_138 = arith.constant 0 : index
    %164 = vector.load %arg8[%c0_136, %c0_137, %c0_138] : memref<4x8x18xf32, #tpu.memory_space<vmem>>, vector<1x8x18xf32>
    %165 = vector.shape_cast %164 : vector<1x8x18xf32> to vector<8x18xf32>
    %cst_139 = arith.constant dense<0.000000e+00> : vector<8x128xf32>
    %166 = tpu.matmul %165, %162, %cst_139 {dimension_numbers = #tpu.dot_dimension_numbers<[1], [0], [0], [1], [0, 0, 1, 1], [], []>, precision = #tpu.contract_precision<fp32>} : vector<8x18xf32>, vector<18x128xf32>, vector<8x128xf32> -> vector<8x128xf32>
    %c0_140 = arith.constant 0 : index
    %c0_141 = arith.constant 0 : index
    %c0_142 = arith.constant 0 : index
    %167 = vector.load %arg4[%c0_140, %c0_141, %c0_142] : memref<4x128x64xf32, #tpu.memory_space<vmem>>, vector<1x128x64xf32>
    %168 = vector.shape_cast %167 : vector<1x128x64xf32> to vector<128x64xf32>
    %cst_143 = arith.constant dense<0.000000e+00> : vector<8x64xf32>
    %169 = tpu.matmul %166, %168, %cst_143 {dimension_numbers = #tpu.dot_dimension_numbers<[1], [0], [0], [1], [0, 0, 1, 1], [], []>, precision = #tpu.contract_precision<fp32>} : vector<8x128xf32>, vector<128x64xf32>, vector<8x64xf32> -> vector<8x64xf32>
    %170 = arith.addf %163, %169 : vector<8x64xf32>
    %c1_144 = arith.constant 1 : index
    %c0_145 = arith.constant 0 : index
    %c0_146 = arith.constant 0 : index
    %171 = vector.load %arg8[%c1_144, %c0_145, %c0_146] : memref<4x8x18xf32, #tpu.memory_space<vmem>>, vector<1x8x18xf32>
    %172 = vector.shape_cast %171 : vector<1x8x18xf32> to vector<8x18xf32>
    %cst_147 = arith.constant dense<0.000000e+00> : vector<8x128xf32>
    %173 = tpu.matmul %172, %162, %cst_147 {dimension_numbers = #tpu.dot_dimension_numbers<[1], [0], [0], [1], [0, 0, 1, 1], [], []>, precision = #tpu.contract_precision<fp32>} : vector<8x18xf32>, vector<18x128xf32>, vector<8x128xf32> -> vector<8x128xf32>
    %c1_148 = arith.constant 1 : index
    %c0_149 = arith.constant 0 : index
    %c0_150 = arith.constant 0 : index
    %174 = vector.load %arg4[%c1_148, %c0_149, %c0_150] : memref<4x128x64xf32, #tpu.memory_space<vmem>>, vector<1x128x64xf32>
    %175 = vector.shape_cast %174 : vector<1x128x64xf32> to vector<128x64xf32>
    %cst_151 = arith.constant dense<0.000000e+00> : vector<8x64xf32>
    %176 = tpu.matmul %173, %175, %cst_151 {dimension_numbers = #tpu.dot_dimension_numbers<[1], [0], [0], [1], [0, 0, 1, 1], [], []>, precision = #tpu.contract_precision<fp32>} : vector<8x128xf32>, vector<128x64xf32>, vector<8x64xf32> -> vector<8x64xf32>
    %177 = arith.addf %170, %176 : vector<8x64xf32>
    %c2_152 = arith.constant 2 : index
    %c0_153 = arith.constant 0 : index
    %c0_154 = arith.constant 0 : index
    %178 = vector.load %arg8[%c2_152, %c0_153, %c0_154] : memref<4x8x18xf32, #tpu.memory_space<vmem>>, vector<1x8x18xf32>
    %179 = vector.shape_cast %178 : vector<1x8x18xf32> to vector<8x18xf32>
    %cst_155 = arith.constant dense<0.000000e+00> : vector<8x128xf32>
    %180 = tpu.matmul %179, %162, %cst_155 {dimension_numbers = #tpu.dot_dimension_numbers<[1], [0], [0], [1], [0, 0, 1, 1], [], []>, precision = #tpu.contract_precision<fp32>} : vector<8x18xf32>, vector<18x128xf32>, vector<8x128xf32> -> vector<8x128xf32>
    %c2_156 = arith.constant 2 : index
    %c0_157 = arith.constant 0 : index
    %c0_158 = arith.constant 0 : index
    %181 = vector.load %arg4[%c2_156, %c0_157, %c0_158] : memref<4x128x64xf32, #tpu.memory_space<vmem>>, vector<1x128x64xf32>
    %182 = vector.shape_cast %181 : vector<1x128x64xf32> to vector<128x64xf32>
    %cst_159 = arith.constant dense<0.000000e+00> : vector<8x64xf32>
    %183 = tpu.matmul %180, %182, %cst_159 {dimension_numbers = #tpu.dot_dimension_numbers<[1], [0], [0], [1], [0, 0, 1, 1], [], []>, precision = #tpu.contract_precision<fp32>} : vector<8x128xf32>, vector<128x64xf32>, vector<8x64xf32> -> vector<8x64xf32>
    %184 = arith.addf %177, %183 : vector<8x64xf32>
    %c3_160 = arith.constant 3 : index
    %c0_161 = arith.constant 0 : index
    %c0_162 = arith.constant 0 : index
    %185 = vector.load %arg8[%c3_160, %c0_161, %c0_162] : memref<4x8x18xf32, #tpu.memory_space<vmem>>, vector<1x8x18xf32>
    %186 = vector.shape_cast %185 : vector<1x8x18xf32> to vector<8x18xf32>
    %cst_163 = arith.constant dense<0.000000e+00> : vector<8x128xf32>
    %187 = tpu.matmul %186, %162, %cst_163 {dimension_numbers = #tpu.dot_dimension_numbers<[1], [0], [0], [1], [0, 0, 1, 1], [], []>, precision = #tpu.contract_precision<fp32>} : vector<8x18xf32>, vector<18x128xf32>, vector<8x128xf32> -> vector<8x128xf32>
    %c3_164 = arith.constant 3 : index
    %c0_165 = arith.constant 0 : index
    %c0_166 = arith.constant 0 : index
    %188 = vector.load %arg4[%c3_164, %c0_165, %c0_166] : memref<4x128x64xf32, #tpu.memory_space<vmem>>, vector<1x128x64xf32>
    %189 = vector.shape_cast %188 : vector<1x128x64xf32> to vector<128x64xf32>
    %cst_167 = arith.constant dense<0.000000e+00> : vector<8x64xf32>
    %190 = tpu.matmul %187, %189, %cst_167 {dimension_numbers = #tpu.dot_dimension_numbers<[1], [0], [0], [1], [0, 0, 1, 1], [], []>, precision = #tpu.contract_precision<fp32>} : vector<8x128xf32>, vector<128x64xf32>, vector<8x64xf32> -> vector<8x64xf32>
    %191 = arith.addf %184, %190 : vector<8x64xf32>
    %192 = vector.broadcast %124 : vector<1x64xf32> to vector<8x64xf32>
    %193 = arith.addf %191, %192 : vector<8x64xf32>
    %c1_168 = arith.constant 1 : index
    %c0_169 = arith.constant 0 : index
    %c0_170 = arith.constant 0 : index
    %194 = vector.load %arg9[%c1_168, %c0_169, %c0_170] : memref<2x8x64xf32, #tpu.memory_space<vmem>>, vector<1x8x64xf32>
    %195 = vector.shape_cast %194 : vector<1x8x64xf32> to vector<8x64xf32>
    %196 = vector.shape_cast %193 : vector<8x64xf32> to vector<1x8x64xf32>
    tpu.vector_store %arg9[%c1_168, %c0_169, %c0_170], %196 {strides = array<i32>} : memref<2x8x64xf32, #tpu.memory_space<vmem>>, vector<1x8x64xf32>,
    return
  }
}

</mosaic_0001>

<bundles_post_ra>
// kernel: tile.53
= control target key start
LH: loop header
LB: loop body
LE: loop exit
PB: predicated region body
PF: predicated region fallthrough
CT: control target
= control target key end

     0   :  { %s28_s0 = inlined_call_operand.vmem [shape: f32[8], index: 0, kind: input, shape index: {}]   ;;  %s29_s1 = inlined_call_operand.vmem [shape: f32[16,8], index: 1, kind: output, shape index: {}]  }
   0x1   :  { %v4_v0 = vld [vmem:[%s28_s0] ss:$0 sm:$0xff] }
   0x2   :  { %5 = vst [vmem:[%s29_s1] sm:$0xff] %v4_v0  ;;  %8 = vst [vmem:[%s29_s1 + $0x8] sm:$0xff] %v4_v0 }

// kernel: tile.83
= control target key start
LH: loop header
LB: loop body
LE: loop exit
PB: predicated region body
PF: predicated region fallthrough
CT: control target
= control target key end

     0   :  { %s131_s10 = smov 120   ;;  %s132_s11 = smov 104   ;;  %vm3_vm0 = vcmask 64512   ;;  %vm9_vm1 = vcmask 1048512   ;;  %vm15_vm2 = vcmask 982912   ;;  %vm21_vm3 = vcmask 917312   ;;  %s207_s0 = inlined_call_operand.vmem [shape: f32[16,8], index: 0, kind: input, shape index: {}]   ;;  %s208_s1 = inlined_call_operand.vmem [shape: f32[1,128], index: 1, kind: output, shape index: {}]  }
   0x1   :  { %v101_v0 = vld [vmem:[%s207_s0 + $0xf] sm:$0x1]   ;;  %v103_v1 = vld [vmem:[%s207_s0 + $0xd] sm:$0x1]   ;;  %v102_v2 = vld [vmem:[%s207_s0 + $0xe] sm:$0x1]  }
   0x2   :  { %7 = vrot.lane.b32.xlu0 %v101_v0, %s131_s10  ;;  %19 = vrot.lane.b32.xlu1 %v103_v1, %s132_s11  ;;  %v104_v3 = vld [vmem:[%s207_s0 + $0xc] sm:$0x1]   ;;  %s133_s16 = smov 112   ;;  %s134_s17 = smov 96   ;;  %v105_v4 = vld [vmem:[%s207_s0 + $0xb] sm:$0x1]  }
   0x3   :  { %v106_v5 = vld [vmem:[%s207_s0 + $0xa] sm:$0x1]   ;;  %v2_v6 = vld [vmem:[%s207_s0] sm:$0x1]   ;;  %s135_s24 = smov 88   ;;  %s136_s25 = smov 80  }
   0x4   :  { %4 = vst.msk [vmem:[#allocation0] sm:$0x1] %vm3_vm0, %v2_v6   ;;  %v107_v7 = vld [vmem:[%s207_s0 + $0x9] sm:$0x1]   ;;  %v108_v8 = vld [vmem:[%s207_s0 + $0x8] sm:$0x1]  }
   0x5   :  { %s137_s30 = smov 72   ;;  %s138_s2 = smov 64   ;;  %v109_v9 = vld [vmem:[%s207_s0 + $0x7] sm:$0x1]   ;;  %v110_v10 = vld [vmem:[%s207_s0 + $0x6] sm:$0x1]  }
   0x6   :  { %13 = vrot.lane.b32.xlu0 %v102_v2, %s133_s16  ;;  %25 = vrot.lane.b32.xlu1 %v104_v3, %s134_s17  ;;  %s139_s7 = smov 56   ;;  %s140_s8 = smov 48   ;;  %v111_v11 = vld [vmem:[%s207_s0 + $0x5] sm:$0x1]   ;;  %v112_v12 = vld [vmem:[%s207_s0 + $0x4] sm:$0x1]  }
   0x7   :  { %s141_s13 = smov 40   ;;  %s142_s14 = smov 32   ;;  %v113_v13 = vld [vmem:[%s207_s0 + $0x3] sm:$0x1]   ;;  %v114_v14 = vld [vmem:[%s207_s0 + $0x2] sm:$0x1]  }
   0x8   :  { %s143_s19 = smov 24   ;;  %s144_s20 = smov 16   ;;  %v115_v15 = vld [vmem:[%s207_s0 + $0x1] sm:$0x1]   ;;  %vm27_vm4 = vcmask 851712   ;;  %vm33_vm5 = vcmask 786112  }
   0x9   :  { %s145_s0 = smov 8   ;;  %vm39_vm6 = vcmask 720512   ;;  %vm45_vm7 = vcmask 654912   ;;  %vm51_vm8 = vcmask 589312   ;;  %vm57_vm9 = vcmask 523712  }
   0xa   :  { %31 = vrot.lane.b32.xlu0 %v105_v4, %s135_s24  ;;  %37 = vrot.lane.b32.xlu1 %v106_v5, %s136_s25  ;;  %vm63_vm10 = vcmask 458112   ;;  %vm69_vm11 = vcmask 392512   ;;  %vm75_vm12 = vcmask 326912   ;;  %vm81_vm13 = vcmask 261312  }
   0xb   :  { %vm87_vm14 = vcmask 195712   ;;  %vm93_vm15 = vcmask 130112  }
   0xe   :  { %43 = vrot.lane.b32.xlu0 %v107_v7, %s137_s30  ;;  %49 = vrot.lane.b32.xlu1 %v108_v8, %s138_s2 }
  0x12   :  { %55 = vrot.lane.b32.xlu0 %v109_v9, %s139_s7  ;;  %61 = vrot.lane.b32.xlu1 %v110_v10, %s140_s8 }
  0x16   :  { %67 = vrot.lane.b32.xlu0 %v111_v11, %s141_s13  ;;  %73 = vrot.lane.b32.xlu1 %v112_v12, %s142_s14 }
  0x1a   :  { %79 = vrot.lane.b32.xlu0 %v113_v13, %s143_s19  ;;  %85 = vrot.lane.b32.xlu1 %v114_v14, %s144_s20 }
  0x1e   :  { %91 = vrot.lane.b32.xlu0 %v115_v15, %s145_s0 }
  0x74   :  { %v8_v16 = vpop.permute.xlu0 %7   ;;  %v20_v17 = vpop.permute.xlu1 %19  }
  0x75   :  { %10 = vst.msk [vmem:[#allocation0] sm:$0x1] %vm9_vm1, %v8_v16  }
  0x78   :  { %v14_v18 = vpop.permute.xlu0 %13   ;;  %v26_v19 = vpop.permute.xlu1 %25  }
  0x79   :  { %16 = vst.msk [vmem:[#allocation0] sm:$0x1] %vm15_vm2, %v14_v18  }
  0x7a   :  { %22 = vst.msk [vmem:[#allocation0] sm:$0x1] %vm21_vm3, %v20_v17  }
  0x7b   :  { %28 = vst.msk [vmem:[#allocation0] sm:$0x1] %vm27_vm4, %v26_v19  }
  0x7c   :  { %v32_v20 = vpop.permute.xlu0 %31   ;;  %v38_v21 = vpop.permute.xlu1 %37  }
  0x7d   :  { %34 = vst.msk [vmem:[#allocation0] sm:$0x1] %vm33_vm5, %v32_v20  }
  0x7e   :  { %40 = vst.msk [vmem:[#allocation0] sm:$0x1] %vm39_vm6, %v38_v21  }
  0x80   :  { %v44_v22 = vpop.permute.xlu0 %43   ;;  %v50_v23 = vpop.permute.xlu1 %49  }
  0x81   :  { %46 = vst.msk [vmem:[#allocation0] sm:$0x1] %vm45_vm7, %v44_v22  }
  0x82   :  { %52 = vst.msk [vmem:[#allocation0] sm:$0x1] %vm51_vm8, %v50_v23  }
  0x84   :  { %v56_v24 = vpop.permute.xlu0 %55   ;;  %v62_v25 = vpop.permute.xlu1 %61  }
  0x85   :  { %58 = vst.msk [vmem:[#allocation0] sm:$0x1] %vm57_vm9, %v56_v24  }
  0x86   :  { %64 = vst.msk [vmem:[#allocation0] sm:$0x1] %vm63_vm10, %v62_v25  }
  0x88   :  { %v68_v26 = vpop.permute.xlu0 %67   ;;  %v74_v27 = vpop.permute.xlu1 %73  }
  0x89   :  { %70 = vst.msk [vmem:[#allocation0] sm:$0x1] %vm69_vm11, %v68_v26  }
  0x8a   :  { %76 = vst.msk [vmem:[#allocation0] sm:$0x1] %vm75_vm12, %v74_v27  }
  0x8c   :  { %v80_v28 = vpop.permute.xlu0 %79   ;;  %v86_v29 = vpop.permute.xlu1 %85  }
  0x8d   :  { %82 = vst.msk [vmem:[#allocation0] sm:$0x1] %vm81_vm13, %v80_v28  }
  0x8e   :  { %88 = vst.msk [vmem:[#allocation0] sm:$0x1] %vm87_vm14, %v86_v29  }
  0x90   :  { %v92_v30 = vpop.permute.xlu0 %91  }
  0x91   :  { %94 = vst.msk [vmem:[#allocation0] sm:$0x1] %vm93_vm15, %v92_v30  }
  0x98   :  { %v98_v31 = vld [vmem:[#allocation0] sm:$0x1] }
  0x99   :  { %100 = vst [vmem:[%s208_s1] sm:$0x1] %v98_v31 }

// kernel: tile.81
= control target key start
LH: loop header
LB: loop body
LE: loop exit
PB: predicated region body
PF: predicated region fallthrough
CT: control target
= control target key end

     0   :  { %s22_s0 = inlined_call_operand.vmem [shape: f32[8], index: 0, kind: input, shape index: {}]   ;;  %s23_s1 = inlined_call_operand.vmem [shape: f32[8,8], index: 1, kind: output, shape index: {}]  }
   0x1   :  { %v4_v0 = vld [vmem:[%s22_s0] ss:$0 sm:$0xff] }
   0x2   :  { %5 = vst [vmem:[%s23_s1] sm:$0xff] %v4_v0 }

// kernel: tile.82
= control target key start
LH: loop header
LB: loop body
LE: loop exit
PB: predicated region body
PF: predicated region fallthrough
CT: control target
= control target key end

     0   :  { %s67_s10 = smov 56   ;;  %s68_s11 = smov 40   ;;  %vm3_vm0 = vcmask 64512   ;;  %vm9_vm1 = vcmask 523712   ;;  %vm15_vm2 = vcmask 458112   ;;  %vm21_vm3 = vcmask 392512   ;;  %s111_s0 = inlined_call_operand.vmem [shape: f32[8,8], index: 0, kind: input, shape index: {}]   ;;  %s112_s1 = inlined_call_operand.vmem [shape: f32[64], index: 1, kind: output, shape index: {}]  }
   0x1   :  { %v53_v0 = vld [vmem:[%s111_s0 + $0x7] sm:$0x1]   ;;  %v55_v1 = vld [vmem:[%s111_s0 + $0x5] sm:$0x1]   ;;  %v54_v2 = vld [vmem:[%s111_s0 + $0x6] sm:$0x1]  }
   0x2   :  { %7 = vrot.lane.b32.xlu0 %v53_v0, %s67_s10  ;;  %19 = vrot.lane.b32.xlu1 %v55_v1, %s68_s11  ;;  %v56_v3 = vld [vmem:[%s111_s0 + $0x4] sm:$0x1]   ;;  %v2_v4 = vld [vmem:[%s111_s0] sm:$0x1]   ;;  %s69_s18 = smov 48   ;;  %s70_s19 = smov 32  }
   0x3   :  { %4 = vst.msk [vmem:[#allocation0] sm:$0x1] %vm3_vm0, %v2_v4   ;;  %v57_v5 = vld [vmem:[%s111_s0 + $0x3] sm:$0x1]   ;;  %v58_v6 = vld [vmem:[%s111_s0 + $0x2] sm:$0x1]  }
   0x4   :  { %s71_s24 = smov 24   ;;  %s72_s25 = smov 16   ;;  %v59_v7 = vld [vmem:[%s111_s0 + $0x1] sm:$0x1]   ;;  %vm27_vm4 = vcmask 326912   ;;  %vm33_vm5 = vcmask 261312  }
   0x5   :  { %s73_s0 = smov 8   ;;  %vm39_vm6 = vcmask 195712   ;;  %vm45_vm7 = vcmask 130112  }
   0x6   :  { %13 = vrot.lane.b32.xlu0 %v54_v2, %s69_s18  ;;  %25 = vrot.lane.b32.xlu1 %v56_v3, %s70_s19 }
   0xa   :  { %31 = vrot.lane.b32.xlu0 %v57_v5, %s71_s24  ;;  %37 = vrot.lane.b32.xlu1 %v58_v6, %s72_s25 }
   0xe   :  { %43 = vrot.lane.b32.xlu0 %v59_v7, %s73_s0 }
  0x74   :  { %v8_v8 = vpop.permute.xlu0 %7   ;;  %v20_v9 = vpop.permute.xlu1 %19  }
  0x75   :  { %10 = vst.msk [vmem:[#allocation0] sm:$0x1] %vm9_vm1, %v8_v8  }
  0x78   :  { %v14_v10 = vpop.permute.xlu0 %13   ;;  %v26_v11 = vpop.permute.xlu1 %25  }
  0x79   :  { %16 = vst.msk [vmem:[#allocation0] sm:$0x1] %vm15_vm2, %v14_v10  }
  0x7a   :  { %22 = vst.msk [vmem:[#allocation0] sm:$0x1] %vm21_vm3, %v20_v9  }
  0x7b   :  { %28 = vst.msk [vmem:[#allocation0] sm:$0x1] %vm27_vm4, %v26_v11  }
  0x7c   :  { %v32_v12 = vpop.permute.xlu0 %31   ;;  %v38_v13 = vpop.permute.xlu1 %37  }
  0x7d   :  { %34 = vst.msk [vmem:[#allocation0] sm:$0x1] %vm33_vm5, %v32_v12  }
  0x7e   :  { %40 = vst.msk [vmem:[#allocation0] sm:$0x1] %vm39_vm6, %v38_v13  }
  0x80   :  { %v44_v14 = vpop.permute.xlu0 %43  }
  0x81   :  { %46 = vst.msk [vmem:[#allocation0] sm:$0x1] %vm45_vm7, %v44_v14  }
  0x88   :  { %v50_v15 = vld [vmem:[#allocation0] sm:$0x1] }
  0x89   :  { %52 = vst [vmem:[%s112_s1] sm:$0x1] %v50_v15 }

// kernel: block_forward.1
= control target key start
LH: loop header
LB: loop body
LE: loop exit
PB: predicated region body
PF: predicated region fallthrough
CT: control target
= control target key end

     0   :  { %vm57_vm0 = vcmask 523264   ;;  %vm23984_vm1 = vmmov 0   ;;  %vm2146_vm2 = vcmask 1040384   ;;  %vm2845_vm3 = vcmask 261120   ;;  %s29839_s2 = inlined_call_operand.vmem [shape: f32[3,64,128], index: 2, kind: input, shape index: {}]   ;;  %s29840_s0 = inlined_call_operand.vmem [shape: f32[2,18,64], index: 0, kind: input, shape index: {}]   ;;  %s29841_s7 = inlined_call_operand.vmem [shape: f32[128,128], index: 7, kind: input, shape index: {}]   ;;  %s29842_s6 = inlined_call_operand.vmem [shape: f32[8,128], index: 6, kind: input, shape index: {}]   ;;  %s29843_s5 = inlined_call_operand.vmem [shape: f32[32,128], index: 5, kind: input, shape index: {}]   ;;  %s29844_s1 = inlined_call_operand.vmem [shape: f32[2,32], index: 1, kind: input, shape index: {}]   ;;  %s29845_s3 = inlined_call_operand.vmem [shape: f32[3,128,128], index: 3, kind: input, shape index: {}]   ;;  %s29846_s4 = inlined_call_operand.vmem [shape: f32[4,128,64], index: 4, kind: input, shape index: {}]   ;;  %s29847_s8 = inlined_call_operand.vmem [shape: f32[4,8,18], index: 8, kind: input, shape index: {}]   ;;  %s29848_s9 = inlined_call_operand.vmem [shape: f32[2,8,64], index: 9, kind: output, shape index: {}]  }
   0x1   :  { %v15592_v0 = vld [vmem:[%s29839_s2 + $0x40] sm:$0xff]  ;;  %v15593_v1 = vld [vmem:[%s29839_s2 + $0x48] sm:$0xff]  ;;  %v15594_v2 = vld [vmem:[%s29839_s2 + $0x50] sm:$0xff]  ;;  %vm6494_vm4 = vcmask 146432   ;;  %vm6498_vm5 = vcmask 1041408  }
   0x2   :  { %v71_v3 = vand.u32 4294901760, %v15592_v0  ;;  %v74_v4 = vand.u32 4294901760, %v15593_v1  ;;  %v15595_v5 = vld [vmem:[%s29839_s2 + $0x58] sm:$0xff]  ;;  %v77_v6 = vand.u32 4294901760, %v15594_v2  ;;  %v15596_v7 = vld [vmem:[%s29839_s2 + $0x60] sm:$0xff]  ;;  %v15597_v8 = vld [vmem:[%s29839_s2 + $0x68] sm:$0xff] }
   0x3   :  { %v80_v9 = vand.u32 4294901760, %v15595_v5  ;;  %v83_v10 = vand.u32 4294901760, %v15596_v7  ;;  %v86_v11 = vand.u32 4294901760, %v15597_v8  ;;  %v15598_v12 = vld [vmem:[%s29839_s2 + $0x70] sm:$0xff]  ;;  %v15599_v13 = vld [vmem:[%s29839_s2 + $0x78] sm:$0xff]  ;;  %v44_v14 = vld [vmem:[%s29840_s0 + $0x1] sm:$0xff] }
   0x4   :  { %v24063_v15 = vpack.c.bf16 %v74_v4, %v71_v3  ;;  %v89_v16 = vand.u32 4294901760, %v15598_v12  ;;  %v59_v17 = vsel %vm57_vm0, %v44_v14, 0  ;;  %v45_v18 = vld [vmem:[%s29840_s0 + $0x9] sm:$0xff]  ;;  %v92_v20 = vand.u32 4294901760, %v15599_v13  ;;  %v46_v41 = vld [vmem:[%s29840_s0 + $0x19] sm:$0xff]  ;;  %v47_v52 = vld [vmem:[%s29840_s0 + $0x21] sm:$0xff] }
   0x5   :  { %v24069_v19 = vpack.c.bf16 %v80_v9, %v77_v6  ;;  %v24071_v21 = vand.u32 4294901760, %v59_v17  ;;  %v24073_v22 = vsub.f32 %v15592_v0, %v71_v3  ;;  %v24076_v23 = vpack.c.bf16 %v86_v11, %v83_v10 }
   0x6   :  { %21244 = vmatprep.subr.bf16.mxu0 %v24063_v15  ;;  %v24078_v24 = vsub.f32 %v15593_v1, %v74_v4  ;;  %v62_v25 = vsel %vm57_vm0, %v45_v18, 0  ;;  %v24081_v26 = vsub.f32 %v15594_v2, %v77_v6  ;;  %v24090_v30 = vsub.f32 %v15595_v5, %v80_v9 }
   0x7   :  { %21246 = vmatpush3.bf16.msra.mxu0 %v24063_v15  ;;  %v24085_v27 = vsub.f32 %v59_v17, %v24071_v21  ;;  %v186_v28 = vand.u32 4294901760, %v24073_v22  ;;  %v24088_v29 = vand.u32 4294901760, %v62_v25  ;;  %v24095_v33 = vsub.f32 %v15596_v7, %v83_v10 }
   0x8   :  { %21248 = vmatprep.subr.bf16.mxu0 %v24069_v19  ;;  %v193_v31 = vand.u32 4294901760, %v24078_v24  ;;  %v200_v32 = vand.u32 4294901760, %v24081_v26  ;;  %v24097_v34 = vsub.f32 %v15597_v8, %v86_v11  ;;  %v207_v38 = vand.u32 4294901760, %v24090_v30 }
   0x9   :  { %v145_v35 = vand.u32 4294901760, %v24085_v27  ;;  %v187_v36 = vsub.f32 %v24073_v22, %v186_v28  ;;  %v24104_v37 = vsub.f32 %v62_v25, %v24088_v29  ;;  %v214_v40 = vand.u32 4294901760, %v24095_v33 }
   0xa   :  { %v194_v39 = vsub.f32 %v24078_v24, %v193_v31  ;;  %v201_v44 = vsub.f32 %v24081_v26, %v200_v32  ;;  %v221_v45 = vand.u32 4294901760, %v24097_v34  ;;  %v24124_v46 = vpack.c.bf16 %v92_v20, %v89_v16 }
   0xb   :  { %21250 = vmatpush3.bf16.msra.mxu0 %v24069_v19  ;;  %v146_v42 = vsub.f32 %v24085_v27, %v145_v35  ;;  %v155_v43 = vand.u32 4294901760, %v24104_v37  ;;  %v188_v47 = vand.u32 4294901760, %v187_v36  ;;  %v208_v49 = vsub.f32 %v24090_v30, %v207_v38 }
   0xc   :  { %21252 = vmatprep.subr.bf16.mxu0 %v24076_v23  ;;  %v195_v48 = vand.u32 4294901760, %v194_v39  ;;  %v65_v51 = vsel %vm57_vm0, %v46_v41, 0  ;;  %v215_v54 = vsub.f32 %v24095_v33, %v214_v40  ;;  %v202_v56 = vand.u32 4294901760, %v201_v44 }
   0xd   :  { %v147_v50 = vand.u32 4294901760, %v146_v42  ;;  %v156_v53 = vsub.f32 %v24104_v37, %v155_v43  ;;  %v24139_v55 = vand.u32 4294901760, %v65_v51  ;;  %v222_v57 = vsub.f32 %v24097_v34, %v221_v45 }
   0xe   :  { %v24145_v58 = vsub.f32 %v15598_v12, %v89_v16  ;;  %v24147_v59 = vsub.f32 %v15599_v13, %v92_v20  ;;  %v21259_v60 = vpack.c.bf16 %v195_v48, %v188_v47  ;;  %v209_v61 = vand.u32 4294901760, %v208_v49 }
   0xf   :  { %21254 = vmatpush3.bf16.msra.mxu0 %v24076_v23  ;;  %17581 = vmatprep.mubr.f32.mxu0 %v147_v50  ;;  %v24151_v62 = vsub.f32 %v65_v51, %v24139_v55  ;;  %v68_v63 = vsel %vm57_vm0, %v47_v52, 0  ;;  %v157_v3 = vand.u32 4294901760, %v156_v53  ;;  %v216_v5 = vand.u32 4294901760, %v215_v54  ;;  %v35_v51 = vld [vmem:[%s29840_s0 + $0x20] sm:$0xff]  ;;  %v41_v52 = vld [vmem:[%s29839_s2 + $0x28] sm:$0xff]  ;;  %v42_v54 = vld [vmem:[%s29839_s2 + $0x30] sm:$0xff] }
  0x10   :  { %21256 = vmatprep.subr.bf16.mxu0 %v24124_v46  ;;  %v228_v0 = vand.u32 4294901760, %v24145_v58  ;;  %v235_v1 = vand.u32 4294901760, %v24147_v59  ;;  %v24156_v2 = vand.u32 4294901760, %v68_v63  ;;  %v223_v6 = vand.u32 4294901760, %v222_v57 }
  0x11   :  { %v165_v4 = vand.u32 4294901760, %v24151_v62  ;;  %v21263_v8 = vpack.c.bf16 %v209_v61, %v202_v56  ;;  %v21275_v36 = vpack.c.bf16 %v24078_v24, %v24073_v22  ;;  %v21279_v39 = vpack.c.bf16 %v24090_v30, %v24081_v26  ;;  %v32_v26 = vld [vmem:[%s29840_s0] sm:$0xff]  ;;  %v43_v56 = vld [vmem:[%s29839_s2 + $0x38] sm:$0xff] }
  0x12   :  { %v174_v7 = vsub.f32 %v68_v63, %v24156_v2  ;;  %v229_v10 = vsub.f32 %v24145_v58, %v228_v0  ;;  %v236_v11 = vsub.f32 %v24147_v59, %v235_v1  ;;  %v21267_v16 = vpack.c.bf16 %v223_v6, %v216_v5 }
  0x13   :  { %21258 = vmatpush3.bf16.msra.mxu0 %v24124_v46  ;;  %v166_v9 = vsub.f32 %v24151_v62, %v165_v4  ;;  %v21283_v41 = vpack.c.bf16 %v24097_v34, %v24095_v33  ;;  %v21287_v42 = vpack.c.bf16 %v24147_v59, %v24145_v58  ;;  %v21307_v44 = vpack.c.bf16 %v193_v31, %v186_v28  ;;  %v36_v31 = vld [vmem:[%s29839_s2] sm:$0xff] }
  0x14   :  { %21260 = vmatprep.subr.bf16.mxu0 %v21259_v60  ;;  %v175_v12 = vand.u32 4294901760, %v174_v7  ;;  %v230_v17 = vand.u32 4294901760, %v229_v10  ;;  %v237_v18 = vand.u32 4294901760, %v236_v11  ;;  %v21315_v22 = vpack.c.bf16 %v221_v45, %v214_v40  ;;  %v40_v40 = vld [vmem:[%s29839_s2 + $0x20] sm:$0xff] }
  0x15   :  { %v167_v13 = vand.u32 4294901760, %v166_v9  ;;  %v21319_v24 = vpack.c.bf16 %v235_v1, %v228_v0  ;;  %v737_v28 = vsel %vm57_vm0, %v32_v26, 0  ;;  %v749_v33 = vand.u32 4294901760, %v36_v31 }
  0x16   :  { %17582 = vmatmul.mubr.f32.vlgmr.msra.gmra.mrb[0].mxu0 %v157_v3  ;;  %v176_v14 = vsub.f32 %v174_v7, %v175_v12  ;;  %v21271_v25 = vpack.c.bf16 %v237_v18, %v230_v17  ;;  %v24220_v30 = vand.u32 4294901760, %v737_v28  ;;  %v761_v53 = vand.u32 4294901760, %v40_v40 }
  0x17   :  { %21262 = vmatpush3.bf16.msra.mxu0 %v21259_v60  ;;  %17584 = vmatprep.mubr.f32.mxu0 %v167_v13  ;;  %v24253_v45 = vsub.f32 %v36_v31, %v749_v33  ;;  %v764_v0 = vand.u32 4294901760, %v41_v52 }
  0x18   :  { %21264 = vmatprep.subr.bf16.mxu0 %v21263_v8  ;;  %v177_v20 = vand.u32 4294901760, %v176_v14 }
  0x19   :  { %v864_v60 = vand.u32 4294901760, %v24253_v45  ;;  %v24306_v11 = vsub.f32 %v41_v52, %v764_v0 }
  0x1a   :  { %17585 = vmatmul.mubr.f32.gmra.mrb[2].mxu0 %v177_v20 }
  0x1b   :  { %21266 = vmatpush3.bf16.msra.mxu0 %v21263_v8  ;;  %17603 = vmatprep.mubr.f32.mxu0 %v24071_v21  ;;  %v865_v10 = vsub.f32 %v24253_v45, %v864_v60 }
  0x1c   :  { %21268 = vmatprep.subr.bf16.mxu0 %v21267_v16 }
  0x1d   :  { %v866_v20 = vand.u32 4294901760, %v865_v10 }
  0x1f   :  { %21270 = vmatpush3.bf16.msra.mxu0 %v21267_v16 }
  0x20   :  { %21272 = vmatprep.subr.bf16.mxu0 %v21271_v25 }
  0x23   :  { %21274 = vmatpush3.bf16.msra.mxu0 %v21271_v25 }
  0x24   :  { %21276 = vmatprep.subr.bf16.mxu0 %v21275_v36 }
  0x26   :  { %17604 = vmatmul.mubr.f32.vlgmr.msra.gmra.mrb[0].mxu0 %v24088_v29 }
  0x27   :  { %21278 = vmatpush3.bf16.msra.mxu0 %v21275_v36  ;;  %17606 = vmatprep.mubr.f32.mxu0 %v24139_v55  ;;  %v899_v36 = vand.u32 4294901760, %v24306_v11 }
  0x28   :  { %21280 = vmatprep.subr.bf16.mxu0 %v21279_v39 }
  0x2a   :  { %17607 = vmatmul.mubr.f32.gmra.mrb[2].mxu0 %v24156_v2 }
  0x2b   :  { %21282 = vmatpush3.bf16.msra.mxu0 %v21279_v39  ;;  %17625 = vmatprep.mubr.f32.mxu0 %v24085_v27  ;;  %v21311_v27 = vpack.c.bf16 %v207_v38, %v200_v32  ;;  %v37_v32 = vld [vmem:[%s29839_s2 + $0x8] sm:$0xff] }
  0x2c   :  { %21284 = vmatprep.subr.bf16.mxu0 %v21283_v41  ;;  %v752_v34 = vand.u32 4294901760, %v37_v32 }
  0x2e   :  { %v24257_v48 = vpack.c.bf16 %v752_v34, %v749_v33  ;;  %v24259_v50 = vsub.f32 %v37_v32, %v752_v34 }
  0x2f   :  { %21286 = vmatpush3.bf16.msra.mxu0 %v21283_v41 }
  0x30   :  { %21288 = vmatprep.subr.bf16.mxu0 %v21287_v42  ;;  %v871_v1 = vand.u32 4294901760, %v24259_v50 }
  0x32   :  { %v872_v13 = vsub.f32 %v24259_v50, %v871_v1 }
  0x33   :  { %21290 = vmatpush3.bf16.msra.mxu0 %v21287_v42 }
  0x34   :  { %21292 = vmatprep.subr.bf16.mxu0 %v24063_v15 }
  0x36   :  { %17626 = vmatmul.mubr.f32.vlgmr.msra.gmra.mrb[0].mxu0 %v24104_v37  ;;  %v33_v37 = vld [vmem:[%s29840_s0 + $0x8] sm:$0xff] }
  0x37   :  { %21294 = vmatpush3.bf16.msra.mxu0 %v24063_v15  ;;  %17628 = vmatprep.mubr.f32.mxu0 %v24151_v62  ;;  %v740_v47 = vsel %vm57_vm0, %v33_v37, 0  ;;  %v746_v62 = vsel %vm57_vm0, %v35_v51, 0 }
  0x38   :  { %21296 = vmatprep.subr.bf16.mxu0 %v24069_v19  ;;  %v24274_v57 = vand.u32 4294901760, %v740_v47  ;;  %v24299_v8 = vand.u32 4294901760, %v746_v62 }
  0x3a   :  { %17629 = vmatmul.mubr.f32.gmra.mrb[2].mxu0 %v174_v7  ;;  %v24294_v5 = vsub.f32 %v740_v47, %v24274_v57  ;;  %v24297_v7 = vsub.f32 %v40_v40, %v761_v53  ;;  %v24326_v18 = vsub.f32 %v746_v62, %v24299_v8 }
  0x3b   :  { %21298 = vmatpush3.bf16.msra.mxu0 %v24069_v19  ;;  %17647 = vmatprep.mubr.f32.mxu0 %v145_v35  ;;  %v38_v35 = vld [vmem:[%s29839_s2 + $0x10] sm:$0xff] }
  0x3c   :  { %21300 = vmatprep.subr.bf16.mxu0 %v24076_v23  ;;  %v755_v38 = vand.u32 4294901760, %v38_v35  ;;  %v833_v16 = vand.u32 4294901760, %v24294_v5  ;;  %v892_v25 = vand.u32 4294901760, %v24297_v7 }
  0x3e   :  { %v24276_v58 = vsub.f32 %v38_v35, %v755_v38  ;;  %v893_v26 = vsub.f32 %v24297_v7, %v892_v25 }
  0x3f   :  { %21302 = vmatpush3.bf16.msra.mxu0 %v24076_v23 }
  0x40   :  { %21304 = vmatprep.subr.bf16.mxu0 %v24124_v46  ;;  %v878_v6 = vand.u32 4294901760, %v24276_v58 }
  0x42   :  { %v879_v17 = vsub.f32 %v24276_v58, %v878_v6 }
  0x43   :  { %21306 = vmatpush3.bf16.msra.mxu0 %v24124_v46 }
  0x44   :  { %21308 = vmatprep.subr.bf16.mxu0 %v21307_v44 }
  0x46   :  { %17648 = vmatmul.mubr.f32.vlgmr.msra.gmra.mrb[0].mxu0 %v155_v43 }
  0x47   :  { %21310 = vmatpush3.bf16.msra.mxu0 %v21307_v44  ;;  %17650 = vmatprep.mubr.f32.mxu0 %v165_v4  ;;  %v770_v4 = vand.u32 4294901760, %v43_v56 }
  0x48   :  { %21312 = vmatprep.subr.bf16.mxu0 %v21311_v27 }
  0x49   :  { %v24338_v44 = vsub.f32 %v43_v56, %v770_v4 }
  0x4a   :  { %17651 = vmatmul.mubr.f32.gmra.mrb[2].mxu0 %v175_v12  ;;  %v24312_v12 = vpack.c.bf16 %v764_v0, %v761_v53  ;;  %v21379_v0 = vpack.c.bf16 %v24306_v11, %v24297_v7  ;;  %v1415_v7 = vld [vmem:[%s29840_s0 + $0xa] sm:$0xff] }
  0x4b   :  { %21314 = vmatpush3.bf16.msra.mxu0 %v21311_v27  ;;  %17669 = vmatprep.mubr.f32.mxu0 %v24071_v21  ;;  %v834_v27 = vsub.f32 %v24294_v5, %v833_v16  ;;  %v913_v35 = vand.u32 4294901760, %v24338_v44 }
  0x4c   :  { %21316 = vmatprep.subr.bf16.mxu0 %v21315_v22 }
  0x4d   :  { %v835_v37 = vand.u32 4294901760, %v834_v27 }
  0x4f   :  { %21318 = vmatpush3.bf16.msra.mxu0 %v21315_v22  ;;  %v853_v22 = vand.u32 4294901760, %v24326_v18 }
  0x50   :  { %21320 = vmatprep.subr.bf16.mxu0 %v21319_v24 }
  0x53   :  { %21322 = vmatpush3.bf16.msra.mxu0 %v21319_v24  ;;  %v880_v24 = vand.u32 4294901760, %v879_v17 }
  0x54   :  { %21324 = vmatprep.subr.bf16.mxu0 %v24063_v15 }
  0x56   :  { %17670 = vmatmul.mubr.f32.vlgmr.msra.gmra.mrb[0].mxu0 %v24088_v29 }
  0x57   :  { %21326 = vmatpush3.bf16.msra.mxu0 %v24063_v15  ;;  %17672 = vmatprep.mubr.f32.mxu0 %v24139_v55  ;;  %v24233_v15 = vsub.f32 %v737_v28, %v24220_v30  ;;  %v900_v28 = vsub.f32 %v24306_v11, %v899_v36 }
  0x58   :  { %21328 = vmatprep.subr.bf16.mxu0 %v24069_v19 }
  0x59   :  { %v823_v43 = vand.u32 4294901760, %v24233_v15  ;;  %v901_v47 = vand.u32 4294901760, %v900_v28 }
  0x5a   :  { %17673 = vmatmul.mubr.f32.gmra.mrb[2].mxu0 %v24156_v2 }
  0x5b   :  { %21330 = vmatpush3.bf16.msra.mxu0 %v24069_v19  ;;  %17691 = vmatprep.mubr.f32.mxu0 %v24071_v21  ;;  %v39_v19 = vld [vmem:[%s29839_s2 + $0x18] sm:$0xff]  ;;  %v824_v59 = vsub.f32 %v24233_v15, %v823_v43 }
  0x5c   :  { %21332 = vmatprep.subr.bf16.mxu0 %v24076_v23  ;;  %v34_v21 = vld [vmem:[%s29840_s0 + $0x18] sm:$0xff]  ;;  %v758_v49 = vand.u32 4294901760, %v39_v19 }
  0x5d   :  { %v825_v9 = vand.u32 4294901760, %v824_v59  ;;  %v21371_v59 = vpack.c.bf16 %v24259_v50, %v24253_v45  ;;  %v1414_v50 = vld [vmem:[%s29840_s0 + $0x2] sm:$0xff] }
  0x5e   :  { %v24287_v63 = vpack.c.bf16 %v758_v49, %v755_v38  ;;  %v24290_v3 = vsub.f32 %v39_v19, %v758_v49  ;;  %v854_v19 = vsub.f32 %v24326_v18, %v853_v22 }
  0x5f   :  { %21334 = vmatpush3.bf16.msra.mxu0 %v24076_v23  ;;  %v743_v23 = vsel %vm57_vm0, %v34_v21, 0  ;;  %v894_v21 = vand.u32 4294901760, %v893_v26 }
  0x60   :  { %21336 = vmatprep.subr.bf16.mxu0 %v24124_v46  ;;  %v24283_v61 = vand.u32 4294901760, %v743_v23  ;;  %v855_v51 = vand.u32 4294901760, %v854_v19  ;;  %v21375_v62 = vpack.c.bf16 %v24290_v3, %v24276_v58  ;;  %v1428_v58 = vsel %vm57_vm0, %v1414_v50, 0 }
  0x61   :  { %v21363_v52 = vpack.c.bf16 %v901_v47, %v894_v21 }
  0x63   :  { %21338 = vmatpush3.bf16.msra.mxu0 %v24124_v46  ;;  %v767_v46 = vand.u32 4294901760, %v42_v54 }
  0x64   :  { %21340 = vmatprep.subr.bf16.mxu0 %v24257_v48 }
  0x65   :  { %v24318_v14 = vpack.c.bf16 %v770_v4, %v767_v46  ;;  %v24336_v42 = vsub.f32 %v42_v54, %v767_v46  ;;  %v21403_v4 = vpack.c.bf16 %v871_v1, %v864_v60  ;;  %v24424_v60 = vand.u32 4294901760, %v1428_v58  ;;  %v15600_v1 = vld [vmem:[%s29839_s2 + $0x80] sm:$0xff] }
  0x66   :  { %17692 = vmatmul.mubr.f32.vlgmr.msra.gmra.mrb[0].mxu0 %v24088_v29  ;;  %v24309_v29 = vsub.f32 %v743_v23, %v24283_v61  ;;  %v914_v23 = vsub.f32 %v24338_v44, %v913_v35 }
  0x67   :  { %21342 = vmatpush3.bf16.msra.mxu0 %v24257_v48  ;;  %17694 = vmatprep.mubr.f32.mxu0 %v24139_v55  ;;  %v885_v55 = vand.u32 4294901760, %v24290_v3  ;;  %v906_v34 = vand.u32 4294901760, %v24336_v42  ;;  %v21383_v46 = vpack.c.bf16 %v24338_v44, %v24336_v42 }
  0x68   :  { %21344 = vmatprep.subr.bf16.mxu0 %v24287_v63  ;;  %v843_v39 = vand.u32 4294901760, %v24309_v29  ;;  %v915_v54 = vand.u32 4294901760, %v914_v23 }
  0x69   :  { %v886_v41 = vsub.f32 %v24290_v3, %v885_v55  ;;  %v907_v49 = vsub.f32 %v24336_v42, %v906_v34  ;;  %v21415_v45 = vpack.c.bf16 %v913_v35, %v906_v34  ;;  %v15601_v3 = vld [vmem:[%s29839_s2 + $0x88] sm:$0xff] }
  0x6a   :  { %17695 = vmatmul.mubr.f32.gmra.mrb[2].mxu0 %v24156_v2  ;;  %v873_v2 = vand.u32 4294901760, %v872_v13  ;;  %v844_v31 = vsub.f32 %v24309_v29, %v843_v39  ;;  %v1431_v13 = vsel %vm57_vm0, %v1415_v7, 0 }
  0x6b   :  { %21346 = vmatpush3.bf16.msra.mxu0 %v24287_v63  ;;  %17713 = vmatprep.mubr.f32.mxu0 %v825_v9  ;;  %v887_v33 = vand.u32 4294901760, %v886_v41  ;;  %v908_v53 = vand.u32 4294901760, %v907_v49  ;;  %v15602_v9 = vld [vmem:[%s29839_s2 + $0x90] sm:$0xff]  ;;  %v24480_v42 = vand.u32 4294901760, %v1431_v13 }
  0x6c   :  { %21348 = vmatprep.subr.bf16.mxu0 %v24312_v12  ;;  %v21355_v32 = vpack.c.bf16 %v873_v2, %v866_v20  ;;  %v845_v38 = vand.u32 4294901760, %v844_v31  ;;  %v1417_v20 = vld [vmem:[%s29840_s0 + $0x22] sm:$0xff] }
  0x6d   :  { %v21359_v40 = vpack.c.bf16 %v887_v33, %v880_v24  ;;  %v21367_v56 = vpack.c.bf16 %v915_v54, %v908_v53  ;;  %v1437_v26 = vsel %vm57_vm0, %v1417_v20, 0 }
  0x6e   :  { %v24506_v19 = vand.u32 4294901760, %v1437_v26 }
  0x6f   :  { %21350 = vmatpush3.bf16.msra.mxu0 %v24312_v12 }
  0x70   :  { %21352 = vmatprep.subr.bf16.mxu0 %v24318_v14  ;;  %v24527_v53 = vsub.f32 %v1437_v26, %v24506_v19 }
  0x73   :  { %21354 = vmatpush3.bf16.msra.mxu0 %v24318_v14 }
  0x74   :  { %21356 = vmatprep.subr.bf16.mxu0 %v21355_v32 }
  0x76   :  { %17714 = vmatmul.mubr.f32.vlgmr.msra.gmra.mrb[0].mxu0 %v835_v37  ;;  %v24504_v37 = vsub.f32 %v1431_v13, %v24480_v42 }
  0x77   :  { %21358 = vmatpush3.bf16.msra.mxu0 %v21355_v32  ;;  %17716 = vmatprep.mubr.f32.mxu0 %v845_v38 }
  0x78   :  { %21360 = vmatprep.subr.bf16.mxu0 %v21359_v40 }
  0x7a   :  { %17717 = vmatmul.mubr.f32.gmra.mrb[2].mxu0 %v855_v51 }
  0x7b   :  { %21362 = vmatpush3.bf16.msra.mxu0 %v21359_v40  ;;  %17735 = vmatprep.mubr.f32.mxu0 %v24220_v30 }
  0x7c   :  { %21364 = vmatprep.subr.bf16.mxu0 %v21363_v52 }
  0x7f   :  { %21366 = vmatpush3.bf16.msra.mxu0 %v21363_v52  ;;  %v1524_v52 = vand.u32 4294901760, %v24504_v37 }
  0x80   :  { %21368 = vmatprep.subr.bf16.mxu0 %v21367_v56 }
  0x83   :  { %21370 = vmatpush3.bf16.msra.mxu0 %v21367_v56 }
  0x84   :  { %21372 = vmatprep.subr.bf16.mxu0 %v21371_v59 }
  0x86   :  { %17736 = vmatmul.mubr.f32.vlgmr.msra.gmra.mrb[0].mxu0 %v24274_v57 }
  0x87   :  { %21374 = vmatpush3.bf16.msra.mxu0 %v21371_v59  ;;  %17738 = vmatprep.mubr.f32.mxu0 %v24283_v61 }
  0x88   :  { %21376 = vmatprep.subr.bf16.mxu0 %v21375_v62 }
  0x8a   :  { %17739 = vmatmul.mubr.f32.gmra.mrb[2].mxu0 %v24299_v8 }
  0x8b   :  { %21378 = vmatpush3.bf16.msra.mxu0 %v21375_v62  ;;  %17757 = vmatprep.mubr.f32.mxu0 %v24233_v15  ;;  %v21407_v15 = vpack.c.bf16 %v885_v55, %v878_v6  ;;  %v1443_v6 = vand.u32 4294901760, %v15601_v3 }
  0x8c   :  { %21380 = vmatprep.subr.bf16.mxu0 %v21379_v0 }
  0x8d   :  { %v24454_v11 = vsub.f32 %v15601_v3, %v1443_v6 }
  0x8f   :  { %21382 = vmatpush3.bf16.msra.mxu0 %v21379_v0  ;;  %v1562_v41 = vand.u32 4294901760, %v24454_v11 }
  0x90   :  { %21384 = vmatprep.subr.bf16.mxu0 %v21383_v46 }
  0x91   :  { %v1563_v35 = vsub.f32 %v24454_v11, %v1562_v41 }
  0x93   :  { %21386 = vmatpush3.bf16.msra.mxu0 %v21383_v46  ;;  %v1564_v54 = vand.u32 4294901760, %v1563_v35  ;;  %v2152_v35 = vld [vmem:[%s29841_s7 + $0x20] sm:$0xff] }
  0x94   :  { %21388 = vmatprep.subr.bf16.mxu0 %v24257_v48 }
  0x96   :  { %17758 = vmatmul.mubr.f32.vlgmr.msra.gmra.mrb[0].mxu0 %v24294_v5  ;;  %v1440_v5 = vand.u32 4294901760, %v15600_v1 }
  0x97   :  { %21390 = vmatpush3.bf16.msra.mxu0 %v24257_v48  ;;  %17760 = vmatprep.mubr.f32.mxu0 %v24309_v29 }
  0x98   :  { %21392 = vmatprep.subr.bf16.mxu0 %v24287_v63  ;;  %v24452_v10 = vsub.f32 %v15600_v1, %v1440_v5  ;;  %v24460_v55 = vpack.c.bf16 %v1443_v6, %v1440_v5 }
  0x9a   :  { %17761 = vmatmul.mubr.f32.gmra.mrb[2].mxu0 %v24326_v18  ;;  %v1555_v2 = vand.u32 4294901760, %v24452_v10  ;;  %v21467_v26 = vpack.c.bf16 %v24454_v11, %v24452_v10 }
  0x9b   :  { %21394 = vmatpush3.bf16.msra.mxu0 %v24287_v63  ;;  %17779 = vmatprep.mubr.f32.mxu0 %v823_v43  ;;  %v21411_v43 = vpack.c.bf16 %v899_v36, %v892_v25  ;;  %v15605_v25 = vld [vmem:[%s29839_s2 + $0xa8] sm:$0xff]  ;;  %v15606_v36 = vld [vmem:[%s29839_s2 + $0xb0] sm:$0xff] }
  0x9c   :  { %21396 = vmatprep.subr.bf16.mxu0 %v24312_v12  ;;  %v1455_v32 = vand.u32 4294901760, %v15605_v25  ;;  %v1458_v33 = vand.u32 4294901760, %v15606_v36 }
  0x9e   :  { %v24520_v23 = vsub.f32 %v15605_v25, %v1455_v32  ;;  %v24540_v46 = vsub.f32 %v15606_v36, %v1458_v33 }
  0x9f   :  { %21398 = vmatpush3.bf16.msra.mxu0 %v24312_v12 }
  0xa0   :  { %21400 = vmatprep.subr.bf16.mxu0 %v24318_v14  ;;  %v1590_v0 = vand.u32 4294901760, %v24520_v23  ;;  %v1597_v6 = vand.u32 4294901760, %v24540_v46 }
  0xa2   :  { %v1591_v5 = vsub.f32 %v24520_v23, %v1590_v0 }
  0xa3   :  { %21402 = vmatpush3.bf16.msra.mxu0 %v24318_v14 }
  0xa4   :  { %21404 = vmatprep.subr.bf16.mxu0 %v21403_v4 }
  0xa6   :  { %17780 = vmatmul.mubr.f32.vlgmr.msra.gmra.mrb[0].mxu0 %v833_v16  ;;  %v1446_v16 = vand.u32 4294901760, %v15602_v9 }
  0xa7   :  { %21406 = vmatpush3.bf16.msra.mxu0 %v21403_v4  ;;  %17782 = vmatprep.mubr.f32.mxu0 %v843_v39  ;;  %v15607_v39 = vld [vmem:[%s29839_s2 + $0xb8] sm:$0xff] }
  0xa8   :  { %21408 = vmatprep.subr.bf16.mxu0 %v21407_v15  ;;  %v24482_v44 = vsub.f32 %v15602_v9, %v1446_v16  ;;  %v1461_v34 = vand.u32 4294901760, %v15607_v39 }
  0xaa   :  { %17783 = vmatmul.mubr.f32.gmra.mrb[2].mxu0 %v853_v22  ;;  %v24522_v51 = vpack.c.bf16 %v1461_v34, %v1458_v33  ;;  %v24542_v4 = vsub.f32 %v15607_v39, %v1461_v34  ;;  %v21499_v34 = vpack.c.bf16 %v1562_v41, %v1555_v2 }
  0xab   :  { %21410 = vmatpush3.bf16.msra.mxu0 %v21407_v15  ;;  %17801 = vmatprep.mubr.f32.mxu0 %v24220_v30  ;;  %v1525_v15 = vsub.f32 %v24504_v37, %v1524_v52 }
  0xac   :  { %21412 = vmatprep.subr.bf16.mxu0 %v21411_v43  ;;  %v1604_v7 = vand.u32 4294901760, %v24542_v4  ;;  %v21479_v33 = vpack.c.bf16 %v24542_v4, %v24540_v46 }
  0xad   :  { %v1526_v9 = vand.u32 4294901760, %v1525_v15 }
  0xae   :  { %v1605_v20 = vsub.f32 %v24542_v4, %v1604_v7  ;;  %v21511_v11 = vpack.c.bf16 %v1604_v7, %v1597_v6 }
  0xaf   :  { %21414 = vmatpush3.bf16.msra.mxu0 %v21411_v43  ;;  %v1544_v43 = vand.u32 4294901760, %v24527_v53 }
  0xb0   :  { %21416 = vmatprep.subr.bf16.mxu0 %v21415_v45  ;;  %v1606_v39 = vand.u32 4294901760, %v1605_v20 }
  0xb3   :  { %21418 = vmatpush3.bf16.msra.mxu0 %v21415_v45 }
  0xb4   :  { %21420 = vmatprep.subr.bf16.mxu0 %v24257_v48 }
  0xb6   :  { %17802 = vmatmul.mubr.f32.vlgmr.msra.gmra.mrb[0].mxu0 %v24274_v57 }
  0xb7   :  { %21422 = vmatpush3.bf16.msra.mxu0 %v24257_v48  ;;  %17804 = vmatprep.mubr.f32.mxu0 %v24283_v61  ;;  %v24437_v48 = vsub.f32 %v1428_v58, %v24424_v60 }
  0xb8   :  { %21424 = vmatprep.subr.bf16.mxu0 %v24287_v63 }
  0xb9   :  { %v1514_v29 = vand.u32 4294901760, %v24437_v48 }
  0xba   :  { %17805 = vmatmul.mubr.f32.gmra.mrb[2].mxu0 %v24299_v8 }
  0xbb   :  { %21426 = vmatpush3.bf16.msra.mxu0 %v24287_v63  ;;  %17823 = vmatprep.mubr.f32.mxu0 %v24220_v30  ;;  %v15603_v63 = vld [vmem:[%s29839_s2 + $0x98] sm:$0xff]  ;;  %v1515_v27 = vsub.f32 %v24437_v48, %v1514_v29 }
  0xbc   :  { %21428 = vmatprep.subr.bf16.mxu0 %v24312_v12  ;;  %v1416_v30 = vld [vmem:[%s29840_s0 + $0x1a] sm:$0xff]  ;;  %v1449_v17 = vand.u32 4294901760, %v15603_v63 }
  0xbd   :  { %v1434_v18 = vsel %vm57_vm0, %v1416_v30, 0  ;;  %v1516_v21 = vand.u32 4294901760, %v1515_v27 }
  0xbe   :  { %v24488_v22 = vsub.f32 %v15603_v63, %v1449_v17  ;;  %v24490_v24 = vand.u32 4294901760, %v1434_v18  ;;  %v24494_v28 = vpack.c.bf16 %v1449_v17, %v1446_v16  ;;  %v1545_v63 = vsub.f32 %v24527_v53, %v1544_v43 }
  0xbf   :  { %21430 = vmatpush3.bf16.msra.mxu0 %v24312_v12  ;;  %v15604_v12 = vld [vmem:[%s29839_s2 + $0xa0] sm:$0xff]  ;;  %v1592_v17 = vand.u32 4294901760, %v1591_v5 }
  0xc0   :  { %21432 = vmatprep.subr.bf16.mxu0 %v24318_v14  ;;  %v1452_v31 = vand.u32 4294901760, %v15604_v12  ;;  %v1576_v38 = vand.u32 4294901760, %v24488_v22  ;;  %v24513_v40 = vsub.f32 %v1434_v18, %v24490_v24  ;;  %v1598_v18 = vsub.f32 %v24540_v46, %v1597_v6  ;;  %v2163_v6 = vld [vmem:[%s29841_s7 + $0x78] sm:$0xff] }
  0xc1   :  { %v2210_v20 = vand.u32 4294901760, %v2163_v6 }
  0xc2   :  { %v24516_v47 = vpack.c.bf16 %v1455_v32, %v1452_v31  ;;  %v24518_v49 = vsub.f32 %v15604_v12, %v1452_v31  ;;  %v1577_v59 = vsub.f32 %v24488_v22, %v1576_v38  ;;  %v1546_v12 = vand.u32 4294901760, %v1545_v63 }
  0xc3   :  { %21434 = vmatpush3.bf16.msra.mxu0 %v24318_v14  ;;  %v1556_v14 = vsub.f32 %v24452_v10, %v1555_v2  ;;  %v1599_v36 = vand.u32 4294901760, %v1598_v18  ;;  %v21471_v31 = vpack.c.bf16 %v24488_v22, %v24482_v44  ;;  %v2151_v22 = vld [vmem:[%s29841_s7 + $0x18] sm:$0xff] }
  0xc4   :  { %21436 = vmatprep.subr.bf16.mxu0 %v24460_v55  ;;  %v1583_v62 = vand.u32 4294901760, %v24518_v49  ;;  %v1578_v58 = vand.u32 4294901760, %v1577_v59  ;;  %v21475_v32 = vpack.c.bf16 %v24520_v23, %v24518_v49  ;;  %v2159_v59 = vld [vmem:[%s29841_s7 + $0x58] sm:$0xff] }
  0xc5   :  { %v21463_v27 = vpack.c.bf16 %v1606_v39, %v1599_v36 }
  0xc6   :  { %17824 = vmatmul.mubr.f32.vlgmr.msra.gmra.mrb[0].mxu0 %v24274_v57  ;;  %v1569_v57 = vand.u32 4294901760, %v24482_v44  ;;  %v1584_v3 = vsub.f32 %v24518_v49, %v1583_v62  ;;  %v21507_v10 = vpack.c.bf16 %v1590_v0, %v1583_v62  ;;  %v2198_v62 = vand.u32 4294901760, %v2159_v59 }
  0xc7   :  { %21438 = vmatpush3.bf16.msra.mxu0 %v24460_v55  ;;  %17826 = vmatprep.mubr.f32.mxu0 %v24283_v61  ;;  %v1557_v61 = vand.u32 4294901760, %v1556_v14 }
  0xc8   :  { %21440 = vmatprep.subr.bf16.mxu0 %v24494_v28  ;;  %v1570_v56 = vsub.f32 %v24482_v44, %v1569_v57  ;;  %v1585_v16 = vand.u32 4294901760, %v1584_v3  ;;  %v29867_v44 = vmov 0.0|0.0  }
  0xc9   :  { %v21451_v45 = vpack.c.bf16 %v1564_v54, %v1557_v61  ;;  %21531 = vmatprep.subr.bf16.mxu1 %v29867_v44  ;;  %v2157_v61 = vld [vmem:[%s29841_s7 + $0x48] sm:$0xff] }
  0xca   :  { %17827 = vmatmul.mubr.f32.gmra.mrb[2].mxu0 %v24299_v8  ;;  %v1534_v8 = vand.u32 4294901760, %v24513_v40  ;;  %v1571_v50 = vand.u32 4294901760, %v1570_v56  ;;  %v21459_v25 = vpack.c.bf16 %v1592_v17, %v1585_v16  ;;  %v2158_v56 = vld [vmem:[%s29841_s7 + $0x50] sm:$0xff] }
  0xcb   :  { %21442 = vmatpush3.bf16.msra.mxu0 %v24494_v28  ;;  %17845 = vmatprep.mubr.f32.mxu0 %v1516_v21 }
  0xcc   :  { %21444 = vmatprep.subr.bf16.mxu0 %v24516_v47  ;;  %v1535_v1 = vsub.f32 %v24513_v40, %v1534_v8  ;;  %v21455_v30 = vpack.c.bf16 %v1578_v58, %v1571_v50  ;;  %v2162_v50 = vld [vmem:[%s29841_s7 + $0x70] sm:$0xff] }
  0xcd   :  { %v2207_v18 = vand.u32 4294901760, %v2162_v50 }
  0xce   :  { %v1536_v13 = vand.u32 4294901760, %v1535_v1 }
  0xcf   :  { %21446 = vmatpush3.bf16.msra.mxu0 %v24516_v47  ;;  %v24739_v39 = vsub.f32 %v2162_v50, %v2207_v18 }
  0xd0   :  { %21448 = vmatprep.subr.bf16.mxu0 %v24522_v51 }
  0xd3   :  { %21450 = vmatpush3.bf16.msra.mxu0 %v24522_v51 }
  0xd4   :  { %21452 = vmatprep.subr.bf16.mxu0 %v21451_v45 }
  0xd6   :  { %17846 = vmatmul.mubr.f32.vlgmr.msra.gmra.mrb[0].mxu0 %v1526_v9 }
  0xd7   :  { %21454 = vmatpush3.bf16.msra.mxu0 %v21451_v45  ;;  %17848 = vmatprep.mubr.f32.mxu0 %v1536_v13  ;;  %v2161_v45 = vld [vmem:[%s29841_s7 + $0x68] sm:$0xff]  ;;  %v24729_v13 = vsub.f32 %v2159_v59, %v2198_v62 }
  0xd8   :  { %21456 = vmatprep.subr.bf16.mxu0 %v21455_v30  ;;  %v2204_v17 = vand.u32 4294901760, %v2161_v45 }
  0xda   :  { %17849 = vmatmul.mubr.f32.gmra.mrb[2].mxu0 %v1546_v12  ;;  %v24737_v36 = vsub.f32 %v2161_v45, %v2204_v17 }
  0xdb   :  { %21458 = vmatpush3.bf16.msra.mxu0 %v21455_v30  ;;  %17867 = vmatprep.mubr.f32.mxu0 %v24424_v60 }
  0xdc   :  { %21460 = vmatprep.subr.bf16.mxu0 %v21459_v25 }
  0xdf   :  { %21462 = vmatpush3.bf16.msra.mxu0 %v21459_v25 }
  0xe0   :  { %21464 = vmatprep.subr.bf16.mxu0 %v21463_v27 }
  0xe3   :  { %21466 = vmatpush3.bf16.msra.mxu0 %v21463_v27  ;;  %v29865_v27 = vmov 0.0  }
  0xe4   :  { %21468 = vmatprep.subr.bf16.mxu0 %v21467_v26  ;;  %3372 = vst [vmem:[#allocation2] sm:$0x1] %v29865_v27  ;;  %3373 = vst [vmem:[#allocation2 + $0x18] sm:$0x1] %v29865_v27  ;;  %17993 = vmatprep.mubr.msk.f32.mxu1 %vm23984_vm1, %v29865_v27 }
  0xe5   :  { %3374 = vst [vmem:[#allocation2 + $0x11] sm:$0x1] %v29865_v27  ;;  %3375 = vst [vmem:[#allocation2 + $0x29] sm:$0x1] %v29865_v27 }
  0xe6   :  { %17868 = vmatmul.mubr.f32.vlgmr.msra.gmra.mrb[0].mxu0 %v24480_v42  ;;  %6481 = vst [vmem:[#allocation3] sm:$0x1] %v29865_v27  ;;  %6482 = vst [vmem:[#allocation3 + $0x18] sm:$0x1] %v29865_v27 }
  0xe7   :  { %21470 = vmatpush3.bf16.msra.mxu0 %v21467_v26  ;;  %17870 = vmatprep.mubr.f32.mxu0 %v24490_v24  ;;  %6483 = vst [vmem:[#allocation3 + $0x11] sm:$0x1] %v29865_v27  ;;  %6484 = vst [vmem:[#allocation3 + $0x29] sm:$0x1] %v29865_v27  ;;  %v24749_v26 = vsub.f32 %v2163_v6, %v2210_v20 }
  0xe8   :  { %21472 = vmatprep.subr.bf16.mxu0 %v21471_v31 }
  0xea   :  { %17871 = vmatmul.mubr.f32.gmra.mrb[2].mxu0 %v24506_v19 }
  0xeb   :  { %21474 = vmatpush3.bf16.msra.mxu0 %v21471_v31  ;;  %17889 = vmatprep.mubr.f32.mxu0 %v24437_v48  ;;  %v21503_v48 = vpack.c.bf16 %v1576_v38, %v1569_v57  ;;  %v2154_v38 = vld [vmem:[%s29841_s7 + $0x30] sm:$0xff] }
  0xec   :  { %21476 = vmatprep.subr.bf16.mxu0 %v21475_v32 }
  0xef   :  { %21478 = vmatpush3.bf16.msra.mxu0 %v21475_v32 }
  0xf0   :  { %21480 = vmatprep.subr.bf16.mxu0 %v21479_v33 }
  0xf3   :  { %21482 = vmatpush3.bf16.msra.mxu0 %v21479_v33  ;;  %v24758_v33 = vpack.c.bf16 %v2210_v20, %v2207_v18 }
  0xf4   :  { %21484 = vmatprep.subr.bf16.mxu0 %v24460_v55 }
  0xf6   :  { %17890 = vmatmul.mubr.f32.vlgmr.msra.gmra.mrb[0].mxu0 %v24504_v37  ;;  %v2153_v37 = vld [vmem:[%s29841_s7 + $0x28] sm:$0xff] }
  0xf7   :  { %21486 = vmatpush3.bf16.msra.mxu0 %v24460_v55  ;;  %17892 = vmatprep.mubr.f32.mxu0 %v24513_v40  ;;  %v2180_v21 = vand.u32 4294901760, %v2153_v37  ;;  %v2155_v40 = vld [vmem:[%s29841_s7 + $0x38] sm:$0xff] }
  0xf8   :  { %21488 = vmatprep.subr.bf16.mxu0 %v24494_v28  ;;  %v2186_v49 = vand.u32 4294901760, %v2155_v40 }
  0xf9   :  { %v24712_v1 = vsub.f32 %v2153_v37, %v2180_v21 }
  0xfa   :  { %17893 = vmatmul.mubr.f32.gmra.mrb[2].mxu0 %v24527_v53  ;;  %v2192_v53 = vand.u32 4294901760, %v2157_v61  ;;  %v24716_v5 = vsub.f32 %v2155_v40, %v2186_v49 }
  0xfb   :  { %21490 = vmatpush3.bf16.msra.mxu0 %v24494_v28  ;;  %17911 = vmatprep.mubr.f32.mxu0 %v1514_v29  ;;  %v2148_v29 = vld [vmem:[%s29841_s7] sm:$0xff] }
  0xfc   :  { %21492 = vmatprep.subr.bf16.mxu0 %v24516_v47  ;;  %v24723_v9 = vsub.f32 %v2157_v61, %v2192_v53 }
  0xff   :  { %21494 = vmatpush3.bf16.msra.mxu0 %v24516_v47 }
 0x100   :  { %21496 = vmatprep.subr.bf16.mxu0 %v24522_v51 }
 0x103   :  { %21498 = vmatpush3.bf16.msra.mxu0 %v24522_v51 }
 0x104   :  { %21500 = vmatprep.subr.bf16.mxu0 %v21499_v34 }
 0x106   :  { %17912 = vmatmul.mubr.f32.vlgmr.msra.gmra.mrb[0].mxu0 %v1524_v52 }
 0x107   :  { %21502 = vmatpush3.bf16.msra.mxu0 %v21499_v34  ;;  %17914 = vmatprep.mubr.f32.mxu0 %v1534_v8  ;;  %v2195_v8 = vand.u32 4294901760, %v2158_v56 }
 0x108   :  { %21504 = vmatprep.subr.bf16.mxu0 %v21503_v48 }
 0x109   :  { %v24725_v63 = vpack.c.bf16 %v2198_v62, %v2195_v8  ;;  %v24727_v30 = vsub.f32 %v2158_v56, %v2195_v8  ;;  %v29855_v8 = vand.u32 4294901760, %v24723_v9 }
 0x10a   :  { %17915 = vmatmul.mubr.f32.gmra.mrb[2].mxu0 %v1544_v43  ;;  %v2160_v43 = vld [vmem:[%s29841_s7 + $0x60] sm:$0xff] }
 0x10b   :  { %21506 = vmatpush3.bf16.msra.mxu0 %v21503_v48  ;;  %17933 = vmatprep.mubr.f32.mxu0 %v24424_v60  ;;  %v2201_v16 = vand.u32 4294901760, %v2160_v43  ;;  %v2322_v45 = vsub.f32 %v24723_v9, %v29855_v8 }
 0x10c   :  { %21508 = vmatprep.subr.bf16.mxu0 %v21507_v10 }
 0x10d   :  { %v24733_v12 = vpack.c.bf16 %v2204_v17, %v2201_v16  ;;  %v24735_v25 = vsub.f32 %v2160_v43, %v2201_v16  ;;  %v2323_v6 = vand.u32 4294901760, %v2322_v45  ;;  %v29854_v16 = vand.u32 4294901760, %v24727_v30 }
 0x10e   :  { %v29853_v17 = vand.u32 4294901760, %v24729_v13 }
 0x10f   :  { %21510 = vmatpush3.bf16.msra.mxu0 %v21507_v10  ;;  %v2329_v20 = vsub.f32 %v24727_v30, %v29854_v16 }
 0x110   :  { %21512 = vmatprep.subr.bf16.mxu0 %v21511_v11 }
 0x113   :  { %21514 = vmatpush3.bf16.msra.mxu0 %v21511_v11 }
 0x114   :  { %21516 = vmatprep.subr.bf16.mxu0 %v24460_v55 }
 0x116   :  { %17934 = vmatmul.mubr.f32.vlgmr.msra.gmra.mrb[0].mxu0 %v24480_v42 }
 0x117   :  { %21518 = vmatpush3.bf16.msra.mxu0 %v24460_v55  ;;  %17936 = vmatprep.mubr.f32.mxu0 %v24490_v24  ;;  %v2165_v55 = vand.u32 4294901760, %v2148_v29 }
 0x118   :  { %21520 = vmatprep.subr.bf16.mxu0 %v24494_v28 }
 0x119   :  { %v24692_v0 = vsub.f32 %v2148_v29, %v2165_v55 }
 0x11a   :  { %17937 = vmatmul.mubr.f32.gmra.mrb[2].mxu0 %v24506_v19 }
 0x11b   :  { %21522 = vmatpush3.bf16.msra.mxu0 %v24494_v28  ;;  %17955 = vmatprep.mubr.f32.mxu0 %v24424_v60  ;;  %v2149_v60 = vld [vmem:[%s29841_s7 + $0x8] sm:$0xff]  ;;  %v2174_v28 = vand.u32 4294901760, %v2151_v22  ;;  %v29864_v31 = vand.u32 4294901760, %v24692_v0 }
 0x11c   :  { %21524 = vmatprep.subr.bf16.mxu0 %v24516_v47  ;;  %v2168_v2 = vand.u32 4294901760, %v2149_v60 }
 0x11d   :  { %v24698_v15 = vsub.f32 %v2151_v22, %v2174_v28  ;;  %v2259_v34 = vsub.f32 %v24692_v0, %v29864_v31 }
 0x11e   :  { %v24641_v41 = vpack.c.bf16 %v2168_v2, %v2165_v55  ;;  %v24694_v46 = vsub.f32 %v2149_v60, %v2168_v2 }
 0x11f   :  { %21526 = vmatpush3.bf16.msra.mxu0 %v24516_v47  ;;  %v2183_v47 = vand.u32 4294901760, %v2154_v38  ;;  %v2260_v10 = vand.u32 4294901760, %v2259_v34  ;;  %v29861_v60 = vand.u32 4294901760, %v24698_v15  ;;  %v2336_v34 = vsub.f32 %v24729_v13, %v29853_v17 }
 0x120   :  { %21528 = vmatprep.subr.bf16.mxu0 %v24522_v51  ;;  %21533 = vmatpush3.bf16.msra.mxu1 %v24641_v41  ;;  %v29863_v32 = vand.u32 4294901760, %v24694_v46 }
 0x121   :  { %21534 = vmatprep.subr.bf16.mxu1 %v29867_v44  ;;  %v24673_v23 = vpack.c.bf16 %v2186_v49, %v2183_v47  ;;  %v24714_v3 = vsub.f32 %v2154_v38, %v2183_v47  ;;  %v29857_v49 = vand.u32 4294901760, %v24716_v5 }
 0x122   :  { %v2266_v48 = vsub.f32 %v24694_v46, %v29863_v32 }
 0x123   :  { %21530 = vmatpush3.bf16.msra.mxu0 %v24522_v51  ;;  %v2156_v51 = vld [vmem:[%s29841_s7 + $0x40] sm:$0xff]  ;;  %v29858_v47 = vand.u32 4294901760, %v24714_v3 }
 0x124   :  { %22287 = vmatprep.subr.bf16.mxu0 %v29867_v44  ;;  %v2189_v52 = vand.u32 4294901760, %v2156_v51  ;;  %v2267_v11 = vand.u32 4294901760, %v2266_v48  ;;  %v2330_v48 = vand.u32 4294901760, %v2329_v20 }
 0x125   :  { %v2301_v61 = vsub.f32 %v24714_v3, %v29858_v47 }
 0x126   :  { %17956 = vmatmul.mubr.f32.vlgmr.msra.gmra.mrb[0].mxu0 %v24480_v42  ;;  %v2150_v42 = vld [vmem:[%s29841_s7 + $0x10] sm:$0xff]  ;;  %v24683_v54 = vpack.c.bf16 %v2192_v53, %v2189_v52  ;;  %v24721_v7 = vsub.f32 %v2156_v51, %v2189_v52  ;;  %v24771_v55 = vpack.c.bf16 %v2267_v11, %v2260_v10  ;;  %v2308_v52 = vsub.f32 %v24716_v5, %v29857_v49 }
 0x127   :  { %17958 = vmatprep.mubr.f32.mxu0 %v24490_v24  ;;  %v2171_v24 = vand.u32 4294901760, %v2150_v42  ;;  %v2302_v53 = vand.u32 4294901760, %v2301_v61  ;;  %v2337_v10 = vand.u32 4294901760, %v2336_v34  ;;  %v29852_v11 = vand.u32 4294901760, %v24735_v25 }
 0x128   :  { %v2309_v56 = vand.u32 4294901760, %v2308_v52  ;;  %v29856_v59 = vand.u32 4294901760, %v24721_v7  ;;  %v21589_v34 = vpack.c.bf16 %v24716_v5, %v24714_v3 }
 0x129   :  { %v24653_v14 = vpack.c.bf16 %v2174_v28, %v2171_v24  ;;  %v24696_v4 = vsub.f32 %v2150_v42, %v2171_v24  ;;  %v2280_v42 = vsub.f32 %v24698_v15, %v29861_v60 }
 0x12a   :  { %17959 = vmatmul.mubr.f32.gmra.mrb[2].mxu0 %v24506_v19  ;;  %v2177_v19 = vand.u32 4294901760, %v2152_v35  ;;  %v24801_v62 = vpack.c.bf16 %v2309_v56, %v2302_v53  ;;  %v2315_v43 = vsub.f32 %v24721_v7, %v29856_v59 }
 0x12b   :  { %21536 = vmatpush3.bf16.msra.mxu1 %v24653_v14  ;;  %18953 = vmatprep.mubr.msk.f32.mxu0 %vm23984_vm1, %v29865_v27  ;;  %v29862_v29 = vand.u32 4294901760, %v24696_v4  ;;  %v2281_v24 = vand.u32 4294901760, %v2280_v42  ;;  %v24821_v42 = vpack.c.bf16 %v2337_v10, %v2330_v48  ;;  %v21592_v48 = vpack.c.bf16 %v24723_v9, %v24721_v7 }
 0x12c   :  { %21537 = vmatprep.subr.bf16.mxu1 %v29867_v44  ;;  %v24663_v57 = vpack.c.bf16 %v2180_v21, %v2177_v19  ;;  %v24710_v58 = vsub.f32 %v2152_v35, %v2177_v19  ;;  %v29859_v35 = vand.u32 4294901760, %v24712_v1  ;;  %v2316_v50 = vand.u32 4294901760, %v2315_v43 }
 0x12d   :  { %v2273_v2 = vsub.f32 %v24696_v4, %v29862_v29 }
 0x12e   :  { %v29860_v28 = vand.u32 4294901760, %v24710_v58  ;;  %v2294_v21 = vsub.f32 %v24712_v1, %v29859_v35  ;;  %v24811_v18 = vpack.c.bf16 %v2323_v6, %v2316_v50  ;;  %v21580_v50 = vpack.c.bf16 %v24694_v46, %v24692_v0 }
 0x12f   :  { %21539 = vmatpush3.bf16.msra.mxu1 %v24663_v57  ;;  %v2274_v22 = vand.u32 4294901760, %v2273_v2  ;;  %v29851_v2 = vand.u32 4294901760, %v24737_v36  ;;  %v21583_v6 = vpack.c.bf16 %v24698_v15, %v24696_v4  ;;  %v21586_v20 = vpack.c.bf16 %v24712_v1, %v24710_v58 }
 0x130   :  { %21540 = vmatprep.subr.bf16.mxu1 %v29867_v44  ;;  %v2287_v19 = vsub.f32 %v24710_v58, %v29860_v28  ;;  %v2295_v40 = vand.u32 4294901760, %v2294_v21 }
 0x131   :  { %v24781_v37 = vpack.c.bf16 %v2281_v24, %v2274_v22  ;;  %v2343_v22 = vsub.f32 %v24735_v25, %v29852_v11  ;;  %v2350_v24 = vsub.f32 %v24737_v36, %v29851_v2 }
 0x132   :  { %v2288_v38 = vand.u32 4294901760, %v2287_v19 }
 0x133   :  { %21542 = vmatpush3.bf16.msra.mxu1 %v24673_v23  ;;  %v2344_v19 = vand.u32 4294901760, %v2343_v22  ;;  %v2351_v21 = vand.u32 4294901760, %v2350_v24 }
 0x134   :  { %21543 = vmatprep.subr.bf16.mxu1 %v29867_v44  ;;  %v24791_v51 = vpack.c.bf16 %v2295_v40, %v2288_v38  ;;  %v29850_v38 = vand.u32 4294901760, %v24739_v39  ;;  %v29849_v40 = vand.u32 4294901760, %v24749_v26 }
 0x135   :  { %v24831_v61 = vpack.c.bf16 %v2351_v21, %v2344_v19  ;;  %v15608_v19 = vld [vmem:[%s29842_s6] ss:$0 sm:$0xff] }
 0x136   :  { %v2357_v52 = vsub.f32 %v24739_v39, %v29850_v38  ;;  %v2364_v53 = vsub.f32 %v24749_v26, %v29849_v40 }
 0x137   :  { %21545 = vmatpush3.bf16.msra.mxu1 %v24683_v54 }
 0x138   :  { %21546 = vmatprep.subr.bf16.mxu1 %v29867_v44  ;;  %v2358_v56 = vand.u32 4294901760, %v2357_v52  ;;  %v2365_v43 = vand.u32 4294901760, %v2364_v53 }
 0x13a   :  { %v24839_v45 = vpack.c.bf16 %v2365_v43, %v2358_v56 }
 0x13b   :  { %21548 = vmatpush3.bf16.msra.mxu1 %v24725_v63 }
 0x13c   :  { %21549 = vmatprep.subr.bf16.mxu1 %v29867_v44 }
 0x13f   :  { %21551 = vmatpush3.bf16.msra.mxu1 %v24733_v12 }
 0x140   :  { %21552 = vmatprep.subr.bf16.mxu1 %v29867_v44 }
 0x143   :  { %21554 = vmatpush3.bf16.msra.mxu1 %v24758_v33 }
 0x144   :  { %21555 = vmatprep.subr.bf16.mxu1 %v29867_v44 }
 0x1f9   :  { %v17957_v21 = vpop.f32.mrb[0].mxu0 }
 0x1fa   :  { %v2115_v52 = vadd.f32 %v17957_v21, %v15608_v19  ;;  %v2083_v53 = vpop.f32.mrb[1].mxu0 }
 0x1fb   :  { %v2114_v56 = vadd.f32 %v15608_v19, %v2083_v53 }
 0x1fc   :  { %v24860_v43 = vmax.f32 %v2115_v52, 0.0 }
 0x1fd   :  { %v24862_v40 = vmax.f32 %v2114_v56, 0.0  ;;  %v17960_v38 = vpop.f32.mrb[2].mxu0 }
 0x1fe   :  { %v2117_v2 = vadd.f32 %v17960_v38, %v15608_v19  ;;  %v2095_v11 = vpop.f32.mrb[3].mxu0  ;;  %v2134_v17 = vmul.f32 %v24860_v43, %v24860_v43 }
 0x1ff   :  { %v2133_v16 = vmul.f32 %v24862_v40, %v24862_v40  ;;  %v2116_v8 = vadd.f32 %v15608_v19, %v2095_v11  ;;  %v2124_v59 = vadd.f32 %v24860_v43, %v24862_v40 }
 0x200   :  { %v24870_v21 = vmax.f32 %v2117_v2, 0.0 }
 0x201   :  { %v24872_v53 = vmax.f32 %v2116_v8, 0.0  ;;  %v2137_v52 = vadd.f32 %v2134_v17, %v2133_v16 }
 0x202   :  { %v2136_v49 = vmul.f32 %v24870_v21, %v24870_v21 }
 0x203   :  { %v2125_v56 = vadd.f32 %v2124_v59, %v24872_v53  ;;  %v2135_v38 = vmul.f32 %v24872_v53, %v24872_v53 }
 0x205   :  { %v2126_v47 = vadd.f32 %v2125_v56, %v24870_v21  ;;  %v2138_v35 = vadd.f32 %v2137_v52, %v2135_v38 }
 0x207   :  { %v2127_v11 = vrot.slane %v2126_v47, 4  ;;  %v2139_v19 = vadd.f32 %v2138_v35, %v2136_v49  ;;  %v30044_v49 = vand.u32 4294901760, %v24698_v15 }
 0x209   :  { %v2128_v28 = vadd.f32 %v2127_v11, %v2126_v47  ;;  %v2140_v60 = vrot.slane %v2139_v19, 4 }
 0x20b   :  { %v2129_v2 = vrot.slane %v2128_v28, 2  ;;  %v2141_v29 = vadd.f32 %v2140_v60, %v2139_v19  ;;  %v30041_v60 = vand.u32 4294901760, %v24692_v0  ;;  %v30045_v0 = vand.u32 4294901760, %v24710_v58 }
 0x20c   :  { %v30051_v58 = vand.u32 4294901760, %v24727_v30 }
 0x20d   :  { %v2130_v8 = vadd.f32 %v2129_v2, %v2128_v28  ;;  %v2142_v32 = vrot.slane %v2141_v29, 2 }
 0x20f   :  { %v2131_v16 = vrot.slane %v2130_v8, 1  ;;  %v2143_v17 = vadd.f32 %v2142_v32, %v2141_v29  ;;  %v30039_v32 = vpack.c.bf16 %v24737_v36, %v24735_v25  ;;  %v30040_v29 = vpack.c.bf16 %v24749_v26, %v24739_v39 }
 0x211   :  { %v2144_v59 = vrot.slane %v2143_v17, 1  ;;  %v2132_v31 = vadd.f32 %v2131_v16, %v2130_v8 }
 0x213   :  { %v2145_v24 = vadd.f32 %v2144_v59, %v2143_v17 }
 0x215   :  { %v2147_v22 = vsel %vm2146_vm2, %v2132_v31, %v2145_v24  ;;  %v30038_v31 = vpack.c.bf16 %v24729_v13, %v24727_v30  ;;  %v2837_v30 = vld [vmem:[%s29843_s5 + $0x8] sm:$0xff] }
 0x216   :  { %v24881_v10 = vand.u32 4294901760, %v2147_v22 }
 0x218   :  { %v2246_v52 = vsub.f32 %v2147_v22, %v24881_v10 }
 0x21a   :  { %v2247_v56 = vand.u32 4294901760, %v2246_v52 }
 0x21c   :  { %v2248_v35 = vsub.f32 %v2246_v52, %v2247_v56 }
 0x21e   :  { %v2249_v47 = vand.u32 4294901760, %v2248_v35 }
 0x220   :  { %17994 = vmatmul.mubr.f32.vlgmr.msra.gmra.mrb[0].mxu1 %v2249_v47 }
 0x221   :  { %21557 = vmatpush3.bf16.msra.mxu1 %v24771_v55  ;;  %18028 = vmatprep.mubr.msk.f32.mxu1 %vm23984_vm1, %v29865_v27  ;;  %v30042_v55 = vand.u32 4294901760, %v24694_v46  ;;  %v30046_v46 = vand.u32 4294901760, %v24712_v1  ;;  %v30052_v1 = vand.u32 4294901760, %v24729_v13  ;;  %v2853_v13 = vand.u32 4294901760, %v2837_v30 }
 0x222   :  { %21558 = vmatprep.subr.bf16.mxu1 %v29867_v44 }
 0x223   :  { %v21628_v28 = vpack.c.bf16 %v30042_v55, %v30041_v60 }
 0x225   :  { %21560 = vmatpush3.bf16.msra.mxu1 %v24781_v37  ;;  %v30043_v37 = vand.u32 4294901760, %v24696_v4  ;;  %v30048_v4 = vand.u32 4294901760, %v24716_v5  ;;  %v30054_v5 = vand.u32 4294901760, %v24737_v36  ;;  %v2839_v36 = vld [vmem:[%s29843_s5 + $0x18] sm:$0xff] }
 0x226   :  { %21561 = vmatprep.subr.bf16.mxu1 %v29867_v44 }
 0x229   :  { %21563 = vmatpush3.bf16.msra.mxu1 %v24791_v51  ;;  %v21631_v51 = vpack.c.bf16 %v30044_v49, %v30043_v37 }
 0x22a   :  { %21564 = vmatprep.subr.bf16.mxu1 %v29867_v44 }
 0x22d   :  { %21566 = vmatpush3.bf16.msra.mxu1 %v24801_v62  ;;  %v21634_v62 = vpack.c.bf16 %v30046_v46, %v30045_v0  ;;  %v15611_v0 = vld [vmem:[%s29845_s3 + $0x88] sm:$0xff] }
 0x22e   :  { %21567 = vmatprep.subr.bf16.mxu1 %v29867_v44 }
 0x231   :  { %21569 = vmatpush3.bf16.msra.mxu1 %v24811_v18  ;;  %v30047_v18 = vand.u32 4294901760, %v24714_v3  ;;  %v30053_v3 = vand.u32 4294901760, %v24735_v25  ;;  %v2838_v25 = vld [vmem:[%s29843_s5 + $0x10] sm:$0xff] }
 0x232   :  { %21570 = vmatprep.subr.bf16.mxu1 %v29867_v44 }
 0x233   :  { %v21637_v15 = vpack.c.bf16 %v30048_v4, %v30047_v18  ;;  %v15612_v4 = vld [vmem:[%s29845_s3 + $0x90] sm:$0xff] }
 0x235   :  { %21572 = vmatpush3.bf16.msra.mxu1 %v24821_v42  ;;  %v30049_v42 = vand.u32 4294901760, %v24721_v7  ;;  %v30055_v7 = vand.u32 4294901760, %v24739_v39 }
 0x236   :  { %21573 = vmatprep.subr.bf16.mxu1 %v29867_v44 }
 0x239   :  { %21575 = vmatpush3.bf16.msra.mxu1 %v24831_v61  ;;  %v30050_v61 = vand.u32 4294901760, %v24723_v9  ;;  %v30056_v9 = vand.u32 4294901760, %v24749_v26 }
 0x23a   :  { %21576 = vmatprep.subr.bf16.mxu1 %v29867_v44 }
 0x23d   :  { %21578 = vmatpush3.bf16.msra.mxu1 %v24839_v45  ;;  %v21640_v45 = vpack.c.bf16 %v30050_v61, %v30049_v42  ;;  %v3428_v42 = vand.u32 4294901760, %v15612_v4 }
 0x23e   :  { %21579 = vmatprep.subr.bf16.mxu1 %v29867_v44 }
 0x240   :  { %18029 = vmatmul.mubr.f32.vlgmr.msra.gmra.mrb[0].mxu1 %v24881_v10 }
 0x241   :  { %21581 = vmatpush3.bf16.msra.mxu1 %v21580_v50  ;;  %18063 = vmatprep.mubr.msk.f32.mxu1 %vm23984_vm1, %v29865_v27  ;;  %v21643_v50 = vpack.c.bf16 %v30052_v1, %v30051_v58  ;;  %v15614_v58 = vld [vmem:[%s29845_s3 + $0xa0] sm:$0xff]  ;;  %v15615_v1 = vld [vmem:[%s29845_s3 + $0xa8] sm:$0xff] }
 0x242   :  { %21582 = vmatprep.subr.bf16.mxu1 %v29867_v44 }
 0x245   :  { %21584 = vmatpush3.bf16.msra.mxu1 %v21583_v6  ;;  %v21646_v6 = vpack.c.bf16 %v30054_v5, %v30053_v3  ;;  %v3437_v3 = vand.u32 4294901760, %v15615_v1 }
 0x246   :  { %21585 = vmatprep.subr.bf16.mxu1 %v29867_v44 }
 0x249   :  { %21587 = vmatpush3.bf16.msra.mxu1 %v21586_v20  ;;  %v21649_v20 = vpack.c.bf16 %v30056_v9, %v30055_v7  ;;  %v15617_v7 = vld [vmem:[%s29845_s3 + $0xb8] sm:$0xff] }
 0x24a   :  { %21588 = vmatprep.subr.bf16.mxu1 %v29867_v44 }
 0x24d   :  { %21590 = vmatpush3.bf16.msra.mxu1 %v21589_v34  ;;  %v2937_v34 = vsub.f32 %v2837_v30, %v2853_v13  ;;  %v25102_v30 = vld [vmem:[%s29845_s3 + $0xc0] sm:$0xff] }
 0x24e   :  { %21591 = vmatprep.subr.bf16.mxu1 %v29867_v44 }
 0x24f   :  { %v2938_v19 = vand.u32 4294901760, %v2937_v34 }
 0x251   :  { %21593 = vmatpush3.bf16.msra.mxu1 %v21592_v48  ;;  %v2859_v48 = vand.u32 4294901760, %v2839_v36  ;;  %v2939_v16 = vsub.f32 %v2937_v34, %v2938_v19 }
 0x252   :  { %21594 = vmatprep.subr.bf16.mxu1 %v29867_v44 }
 0x253   :  { %v2951_v38 = vsub.f32 %v2839_v36, %v2859_v48  ;;  %v2940_v35 = vand.u32 4294901760, %v2939_v16  ;;  %v25123_v36 = vld [vmem:[%s29845_s3 + $0xd8] sm:$0xff] }
 0x255   :  { %21596 = vmatpush3.bf16.msra.mxu1 %v30038_v31  ;;  %v2952_v59 = vand.u32 4294901760, %v2951_v38 }
 0x256   :  { %21597 = vmatprep.subr.bf16.mxu1 %v29867_v44 }
 0x257   :  { %v2953_v31 = vsub.f32 %v2951_v38, %v2952_v59 }
 0x259   :  { %21599 = vmatpush3.bf16.msra.mxu1 %v30039_v32  ;;  %v2954_v60 = vand.u32 4294901760, %v2953_v31 }
 0x25a   :  { %21600 = vmatprep.subr.bf16.mxu1 %v29867_v44 }
 0x25d   :  { %21602 = vmatpush3.bf16.msra.mxu1 %v30040_v29 }
 0x25e   :  { %21603 = vmatprep.subr.bf16.mxu1 %v29867_v44 }
 0x260   :  { %18064 = vmatmul.mubr.f32.vlgmr.msra.gmra.mrb[0].mxu1 %v2246_v52 }
 0x261   :  { %21605 = vmatpush3.bf16.msra.mxu1 %v24641_v41  ;;  %18098 = vmatprep.mubr.msk.f32.mxu1 %vm23984_vm1, %v29865_v27 }
 0x262   :  { %21606 = vmatprep.subr.bf16.mxu1 %v29867_v44 }
 0x265   :  { %21608 = vmatpush3.bf16.msra.mxu1 %v24653_v14 }
 0x266   :  { %21609 = vmatprep.subr.bf16.mxu1 %v29867_v44 }
 0x269   :  { %21611 = vmatpush3.bf16.msra.mxu1 %v24663_v57 }
 0x26a   :  { %21612 = vmatprep.subr.bf16.mxu1 %v29867_v44 }
 0x26d   :  { %21614 = vmatpush3.bf16.msra.mxu1 %v24673_v23 }
 0x26e   :  { %21615 = vmatprep.subr.bf16.mxu1 %v29867_v44 }
 0x271   :  { %21617 = vmatpush3.bf16.msra.mxu1 %v24683_v54 }
 0x272   :  { %21618 = vmatprep.subr.bf16.mxu1 %v29867_v44 }
 0x275   :  { %21620 = vmatpush3.bf16.msra.mxu1 %v24725_v63 }
 0x276   :  { %21621 = vmatprep.subr.bf16.mxu1 %v29867_v44 }
 0x279   :  { %21623 = vmatpush3.bf16.msra.mxu1 %v24733_v12 }
 0x27a   :  { %21624 = vmatprep.subr.bf16.mxu1 %v29867_v44 }
 0x27d   :  { %21626 = vmatpush3.bf16.msra.mxu1 %v24758_v33 }
 0x27e   :  { %21627 = vmatprep.subr.bf16.mxu1 %v29867_v44 }
 0x280   :  { %18099 = vmatmul.mubr.f32.vlgmr.msra.gmra.mrb[0].mxu1 %v2247_v56 }
 0x281   :  { %21629 = vmatpush3.bf16.msra.mxu1 %v21628_v28  ;;  %18133 = vmatprep.mubr.msk.f32.mxu1 %vm23984_vm1, %v29865_v27 }
 0x282   :  { %21630 = vmatprep.subr.bf16.mxu1 %v29867_v44 }
 0x285   :  { %21632 = vmatpush3.bf16.msra.mxu1 %v21631_v51  ;;  %v15610_v51 = vld [vmem:[%s29845_s3 + $0x80] sm:$0xff] }
 0x286   :  { %21633 = vmatprep.subr.bf16.mxu1 %v29867_v44  ;;  %v3422_v46 = vand.u32 4294901760, %v15610_v51 }
 0x289   :  { %21635 = vmatpush3.bf16.msra.mxu1 %v21634_v62  ;;  %v3425_v62 = vand.u32 4294901760, %v15611_v0 }
 0x28a   :  { %21636 = vmatprep.subr.bf16.mxu1 %v29867_v44 }
 0x28b   :  { %v25067_v18 = vpack.c.bf16 %v3425_v62, %v3422_v46 }
 0x28d   :  { %21638 = vmatpush3.bf16.msra.mxu1 %v21637_v15  ;;  %v15613_v15 = vld [vmem:[%s29845_s3 + $0x98] sm:$0xff] }
 0x28e   :  { %21639 = vmatprep.subr.bf16.mxu1 %v29867_v44  ;;  %v3431_v61 = vand.u32 4294901760, %v15613_v15 }
 0x291   :  { %21641 = vmatpush3.bf16.msra.mxu1 %v21640_v45  ;;  %v25077_v45 = vpack.c.bf16 %v3431_v61, %v3428_v42 }
 0x292   :  { %21642 = vmatprep.subr.bf16.mxu1 %v29867_v44 }
 0x295   :  { %21644 = vmatpush3.bf16.msra.mxu1 %v21643_v50  ;;  %v3434_v50 = vand.u32 4294901760, %v15614_v58 }
 0x296   :  { %21645 = vmatprep.subr.bf16.mxu1 %v29867_v44 }
 0x297   :  { %v25087_v5 = vpack.c.bf16 %v3437_v3, %v3434_v50 }
 0x299   :  { %21647 = vmatpush3.bf16.msra.mxu1 %v21646_v6  ;;  %v15616_v6 = vld [vmem:[%s29845_s3 + $0xb0] sm:$0xff] }
 0x29a   :  { %21648 = vmatprep.subr.bf16.mxu1 %v29867_v44  ;;  %v3440_v9 = vand.u32 4294901760, %v15616_v6 }
 0x29d   :  { %21650 = vmatpush3.bf16.msra.mxu1 %v21649_v20  ;;  %v3443_v20 = vand.u32 4294901760, %v15617_v7 }
 0x29e   :  { %21651 = vmatprep.subr.bf16.mxu1 %v29867_v44 }
 0x2a0   :  { %18134 = vmatmul.mubr.f32.vlgmr.msra.gmra.mrb[0].mxu1 %v24881_v10 }
 0x2a1   :  { %21653 = vmatpush3.bf16.msra.mxu1 %v24641_v41  ;;  %18168 = vmatprep.mubr.msk.f32.mxu1 %vm23984_vm1, %v29865_v27  ;;  %v2836_v41 = vld [vmem:[%s29843_s5] sm:$0xff] }
 0x2a2   :  { %21654 = vmatprep.subr.bf16.mxu1 %v29867_v44 }
 0x2a5   :  { %21656 = vmatpush3.bf16.msra.mxu1 %v24653_v14  ;;  %v2835_v14 = vld [vmem:[%s29844_s1] sm:$0x3] }
 0x2a6   :  { %21657 = vmatprep.subr.bf16.mxu1 %v29867_v44 }
 0x2a9   :  { %21659 = vmatpush3.bf16.msra.mxu1 %v24663_v57  ;;  %v2850_v57 = vand.u32 4294901760, %v2836_v41 }
 0x2aa   :  { %21660 = vmatprep.subr.bf16.mxu1 %v29867_v44 }
 0x2ab   :  { %v2930_v26 = vsub.f32 %v2836_v41, %v2850_v57  ;;  %v21676_v2 = vpack.c.bf16 %v2853_v13, %v2850_v57  ;;  %v25097_v41 = vpack.c.bf16 %v3443_v20, %v3440_v9  ;;  %v3446_v57 = vand.u32 4294901760, %v25102_v30 }
 0x2ad   :  { %21662 = vmatpush3.bf16.msra.mxu1 %v24673_v23  ;;  %v2847_v23 = vsel %vm2845_vm3, %v2835_v14, 0  ;;  %v2931_v11 = vand.u32 4294901760, %v2930_v26  ;;  %v21688_v55 = vpack.c.bf16 %v2937_v34, %v2930_v26  ;;  %v25107_v14 = vld [vmem:[%s29845_s3 + $0xc8] sm:$0xff] }
 0x2ae   :  { %21663 = vmatprep.subr.bf16.mxu1 %v29867_v44  ;;  %v25025_v39 = vand.u32 4294901760, %v2847_v23  ;;  %v3449_v13 = vand.u32 4294901760, %v25107_v14 }
 0x2af   :  { %v21700_v37 = vpack.c.bf16 %v2938_v19, %v2931_v11  ;;  %v25153_v19 = vsub.f32 %v15611_v0, %v3425_v62 }
 0x2b0   :  { %v2919_v22 = vsub.f32 %v2847_v23, %v25025_v39  ;;  %v25113_v23 = vpack.c.bf16 %v3449_v13, %v3446_v57 }
 0x2b1   :  { %21665 = vmatpush3.bf16.msra.mxu1 %v24683_v54  ;;  %v2856_v54 = vand.u32 4294901760, %v2838_v25 }
 0x2b2   :  { %21666 = vmatprep.subr.bf16.mxu1 %v29867_v44  ;;  %v2920_v8 = vand.u32 4294901760, %v2919_v22 }
 0x2b3   :  { %v2944_v24 = vsub.f32 %v2838_v25, %v2856_v54  ;;  %v21679_v52 = vpack.c.bf16 %v2859_v48, %v2856_v54  ;;  %v25118_v25 = vld [vmem:[%s29845_s3 + $0xd0] sm:$0xff]  ;;  %v25134_v54 = vld [vmem:[%s29845_s3 + $0xe0] sm:$0xff]  ;;  %v25139_v48 = vld [vmem:[%s29845_s3 + $0xe8] sm:$0xff] }
 0x2b5   :  { %21668 = vmatpush3.bf16.msra.mxu1 %v24725_v63  ;;  %v2932_v63 = vsub.f32 %v2930_v26, %v2931_v11  ;;  %v2945_v17 = vand.u32 4294901760, %v2944_v24  ;;  %v21691_v28 = vpack.c.bf16 %v2951_v38, %v2944_v24  ;;  %v3455_v26 = vand.u32 4294901760, %v25123_v36 }
 0x2b6   :  { %21669 = vmatprep.subr.bf16.mxu1 %v29867_v44  ;;  %v25151_v11 = vsub.f32 %v15610_v51, %v3422_v46 }
 0x2b7   :  { %v2933_v56 = vand.u32 4294901760, %v2932_v63  ;;  %v2946_v47 = vsub.f32 %v2944_v24, %v2945_v17  ;;  %v21703_v49 = vpack.c.bf16 %v2952_v59, %v2945_v17  ;;  %v3461_v24 = vand.u32 4294901760, %v25139_v48 }
 0x2b8   :  { %v29884_v17 = vand.u32 4294901760, %v25151_v11  ;;  %v29883_v59 = vand.u32 4294901760, %v25153_v19 }
 0x2b9   :  { %21671 = vmatpush3.bf16.msra.mxu1 %v24733_v12  ;;  %v2921_v12 = vsub.f32 %v2919_v22, %v2920_v8  ;;  %v21682_v32 = vpack.c.bf16 %v2940_v35, %v2933_v56  ;;  %v2947_v29 = vand.u32 4294901760, %v2946_v47  ;;  %v25183_v35 = vsub.f32 %v15612_v4, %v3428_v42 }
 0x2ba   :  { %21672 = vmatprep.subr.bf16.mxu1 %v29867_v44  ;;  %v3553_v56 = vsub.f32 %v25153_v19, %v29883_v59  ;;  %v25185_v47 = vsub.f32 %v15613_v15, %v3431_v61  ;;  %v25212_v15 = vsub.f32 %v15616_v6, %v3440_v9  ;;  %v25214_v42 = vsub.f32 %v15617_v7, %v3443_v20 }
 0x2bb   :  { %v25229_v7 = vsub.f32 %v25102_v30, %v3446_v57  ;;  %v25232_v9 = vsub.f32 %v25107_v14, %v3449_v13  ;;  %v25245_v30 = vsub.f32 %v25123_v36, %v3455_v26 }
 0x2bd   :  { %21674 = vmatpush3.bf16.msra.mxu1 %v24758_v33  ;;  %v2922_v33 = vand.u32 4294901760, %v2921_v12  ;;  %v3546_v12 = vsub.f32 %v25151_v11, %v29884_v17 }
 0x2be   :  { %21675 = vmatprep.subr.bf16.mxu1 %v29867_v44 }
 0x2bf   :  { %v3547_v31 = vand.u32 4294901760, %v3546_v12 }
 0x2c0   :  { %18169 = vmatmul.mubr.f32.vlgmr.msra.gmra.mrb[0].mxu1 %v24881_v10  ;;  %v21685_v10 = vpack.c.bf16 %v2954_v60, %v2947_v29  ;;  %v29881_v29 = vand.u32 4294901760, %v25185_v47 }
 0x2c1   :  { %21677 = vmatpush3.bf16.msra.mxu1 %v21676_v2  ;;  %18179 = vmatprep.mubr.msk.f32.mxu1 %vm23984_vm1, %v29865_v27 }
 0x2c2   :  { %21678 = vmatprep.subr.bf16.mxu1 %v29867_v44 }
 0x2c5   :  { %21680 = vmatpush3.bf16.msra.mxu1 %v21679_v52 }
 0x2c6   :  { %21681 = vmatprep.subr.bf16.mxu1 %v29867_v44 }
 0x2c8   :  { %18180 = vmatmul.mubr.f32.vlgmr.msra.gmra.mrb[2].mxu1 %v2922_v33  ;;  %v3554_v33 = vand.u32 4294901760, %v3553_v56 }
 0x2c9   :  { %21683 = vmatpush3.bf16.msra.mxu1 %v21682_v32  ;;  %18190 = vmatprep.mubr.msk.f32.mxu1 %vm23984_vm1, %v29865_v27  ;;  %v29882_v32 = vand.u32 4294901760, %v25183_v35 }
 0x2ca   :  { %21684 = vmatprep.subr.bf16.mxu1 %v29867_v44  ;;  %v25191_v60 = vpack.c.bf16 %v3554_v33, %v3547_v31  ;;  %v29876_v33 = vand.u32 4294901760, %v25229_v7 }
 0x2cd   :  { %21686 = vmatpush3.bf16.msra.mxu1 %v21685_v10  ;;  %v3560_v10 = vsub.f32 %v25183_v35, %v29882_v32 }
 0x2ce   :  { %21687 = vmatprep.subr.bf16.mxu1 %v29867_v44 }
 0x2d0   :  { %18191 = vmatmul.mubr.f32.vlgmr.msra.gmra.mrb[2].mxu1 %v25025_v39 }
 0x2d1   :  { %21689 = vmatpush3.bf16.msra.mxu1 %v21688_v55  ;;  %18201 = vmatprep.mubr.msk.f32.mxu1 %vm23984_vm1, %v29865_v27  ;;  %v25196_v55 = vsub.f32 %v15614_v58, %v3434_v50  ;;  %v29878_v50 = vand.u32 4294901760, %v25212_v15 }
 0x2d2   :  { %21690 = vmatprep.subr.bf16.mxu1 %v29867_v44 }
 0x2d3   :  { %v29880_v51 = vand.u32 4294901760, %v25196_v55  ;;  %v3588_v56 = vsub.f32 %v25212_v15, %v29878_v50 }
 0x2d5   :  { %21692 = vmatpush3.bf16.msra.mxu1 %v21691_v28  ;;  %v25198_v28 = vsub.f32 %v15615_v1, %v3437_v3  ;;  %v3574_v62 = vsub.f32 %v25196_v55, %v29880_v51  ;;  %v29877_v3 = vand.u32 4294901760, %v25214_v42  ;;  %v3589_v20 = vand.u32 4294901760, %v3588_v56 }
 0x2d6   :  { %21693 = vmatprep.subr.bf16.mxu1 %v29867_v44 }
 0x2d7   :  { %v29879_v0 = vand.u32 4294901760, %v25198_v28  ;;  %v3575_v58 = vand.u32 4294901760, %v3574_v62  ;;  %v3595_v6 = vsub.f32 %v25214_v42, %v29877_v3  ;;  %v29873_v62 = vand.u32 4294901760, %v25245_v30 }
 0x2d8   :  { %18202 = vmatmul.mubr.f32.vlgmr.msra.gmra.mrb[2].mxu1 %v2919_v22  ;;  %v3458_v22 = vand.u32 4294901760, %v25134_v54  ;;  %v23985_v3 = vmov 1966171168  }
 0x2d9   :  { %21695 = vmatpush3.bf16.msra.mxu1 %v21676_v2  ;;  %18212 = vmatprep.mubr.msk.f32.mxu1 %vm23984_vm1, %v29865_v27  ;;  %v3581_v4 = vsub.f32 %v25198_v28, %v29879_v0  ;;  %v3596_v31 = vand.u32 4294901760, %v3595_v6 }
 0x2da   :  { %21696 = vmatprep.subr.bf16.mxu1 %v29867_v44  ;;  %v25149_v38 = vpack.c.bf16 %v3461_v24, %v3458_v22  ;;  %v25261_v36 = vsub.f32 %v25134_v54, %v3458_v22 }
 0x2db   :  { %v3582_v1 = vand.u32 4294901760, %v3581_v4 }
 0x2dc   :  { %v29872_v6 = vand.u32 4294901760, %v25261_v36 }
 0x2dd   :  { %21698 = vmatpush3.bf16.msra.mxu1 %v21679_v52  ;;  %v25220_v12 = vpack.c.bf16 %v3582_v1, %v3575_v58 }
 0x2de   :  { %21699 = vmatprep.subr.bf16.mxu1 %v29867_v44  ;;  %v3630_v54 = vsub.f32 %v25261_v36, %v29872_v6 }
 0x2e0   :  { %18213 = vmatmul.mubr.f32.vlgmr.msra.gmra.mrb[2].mxu1 %v2920_v8  ;;  %v25163_v8 = vld [vmem:[%s29845_s3 + $0xf8] sm:$0xff] }
 0x2e1   :  { %21701 = vmatpush3.bf16.msra.mxu1 %v21700_v37  ;;  %18223 = vmatprep.mubr.msk.f32.mxu1 %vm23984_vm1, %v29865_v27  ;;  %v3467_v16 = vand.u32 4294901760, %v25163_v8  ;;  %v3567_v37 = vsub.f32 %v25185_v47, %v29881_v29 }
 0x2e2   :  { %21702 = vmatprep.subr.bf16.mxu1 %v29867_v44 }
 0x2e3   :  { %v3568_v46 = vand.u32 4294901760, %v3567_v37  ;;  %v25236_v37 = vpack.c.bf16 %v3596_v31, %v3589_v20 }
 0x2e5   :  { %21704 = vmatpush3.bf16.msra.mxu1 %v21703_v49  ;;  %v3561_v49 = vand.u32 4294901760, %v3560_v10  ;;  %v29875_v10 = vand.u32 4294901760, %v25232_v9 }
 0x2e6   :  { %21705 = vmatprep.subr.bf16.mxu1 %v29867_v44 }
 0x2e7   :  { %v25216_v61 = vpack.c.bf16 %v3568_v46, %v3561_v49  ;;  %v3602_v49 = vsub.f32 %v25229_v7, %v29876_v33  ;;  %v3609_v14 = vsub.f32 %v25232_v9, %v29875_v10  ;;  %v2817_v10 = vlaneseq }
 0x2e8   :  { %18224 = vmatmul.mubr.f32.vlgmr.msra.gmra.mrb[2].mxu1 %v25025_v39 }
 0x2e9   :  { %21707 = vmatpush3.bf16.msra.mxu1 %v21676_v2  ;;  %18234 = vmatprep.mubr.msk.f32.mxu1 %vm23984_vm1, %v29865_v27  ;;  %v25158_v2 = vld [vmem:[%s29845_s3 + $0xf0] sm:$0xff]  ;;  %v3603_v57 = vand.u32 4294901760, %v3602_v49  ;;  %v3610_v4 = vand.u32 4294901760, %v3609_v14  ;;  %v3631_v49 = vand.u32 4294901760, %v3630_v54  ;;  %v25312_v54 = vpack.c.bf16 %v25198_v28, %v25196_v55 }
 0x2ea   :  { %21708 = vmatprep.subr.bf16.mxu1 %v29867_v44  ;;  %v3464_v63 = vand.u32 4294901760, %v25158_v2  ;;  %v2818_v50 = vshrl.u32 %v2817_v10, 7 }
 0x2ed   :  { %21710 = vmatpush3.bf16.msra.mxu1 %v21679_v52  ;;  %v25175_v52 = vpack.c.bf16 %v3467_v16, %v3464_v63 }
 0x2ee   :  { %21712 = vmatprep.subr.bf16.mxu1 %v25067_v18 }
 0x2f0   :  { %18235 = vmatmul.mubr.f32.vlgmr.msra.gmra.mrb[2].mxu1 %v25025_v39  ;;  %v3452_v39 = vand.u32 4294901760, %v25118_v25 }
 0x2f1   :  { %21714 = vmatpush3.bf16.msra.mxu1 %v25067_v18 }
 0x2f2   :  { %21716 = vmatprep.subr.bf16.mxu1 %v25077_v45  ;;  %v25129_v34 = vpack.c.bf16 %v3455_v26, %v3452_v39  ;;  %v25242_v46 = vsub.f32 %v25118_v25, %v3452_v39  ;;  %v3623_v25 = vsub.f32 %v25245_v30, %v29873_v62  ;;  %v25266_v39 = vsub.f32 %v25139_v48, %v3461_v24 }
 0x2f3   :  { %v25268_v26 = vpack.c.bf16 %v3610_v4, %v3603_v57  ;;  %v25283_v48 = vsub.f32 %v25158_v2, %v3464_v63  ;;  %v25288_v24 = vsub.f32 %v25163_v8, %v3467_v16  ;;  %v25304_v16 = vpack.c.bf16 %v25153_v19, %v25151_v11 }
 0x2f4   :  { %v29874_v13 = vand.u32 4294901760, %v25242_v46  ;;  %v3624_v56 = vand.u32 4294901760, %v3623_v25  ;;  %v29871_v20 = vand.u32 4294901760, %v25266_v39 }
 0x2f5   :  { %21718 = vmatpush3.bf16.msra.mxu1 %v25077_v45  ;;  %30057 = vst [vmem:[#allocation4_spill] sm:$0xff] %v25283_v48  ;;  %30058 = vst [vmem:[#allocation5_spill] sm:$0xff] %v25288_v24  ;;  %v29870_v57 = vand.u32 4294901760, %v25283_v48  ;;  %v29869_v4 = vand.u32 4294901760, %v25288_v24 }
 0x2f6   :  { %21720 = vmatprep.subr.bf16.mxu1 %v25087_v5  ;;  %v3616_v58 = vsub.f32 %v25242_v46, %v29874_v13  ;;  %v3637_v22 = vsub.f32 %v25266_v39, %v29871_v20  ;;  %v2122_v13 = vld [vmem:[%s29842_s6 + $0x1] sm:$0x1] }
 0x2f7   :  { %v3644_v25 = vsub.f32 %v25283_v48, %v29870_v57  ;;  %v3651_v2 = vsub.f32 %v25288_v24, %v29869_v4 }
 0x2f8   :  { %v3617_v1 = vand.u32 4294901760, %v3616_v58  ;;  %v3638_v14 = vand.u32 4294901760, %v3637_v22  ;;  %v25316_v22 = vpack.c.bf16 %v25214_v42, %v25212_v15 }
 0x2f9   :  { %21722 = vmatpush3.bf16.msra.mxu1 %v25087_v5  ;;  %v3645_v63 = vand.u32 4294901760, %v3644_v25  ;;  %v25328_v25 = vpack.c.bf16 %v25266_v39, %v25261_v36 }
 0x2fa   :  { %21724 = vmatprep.subr.bf16.mxu1 %v25097_v41  ;;  %v25272_v31 = vpack.c.bf16 %v3624_v56, %v3617_v1  ;;  %v25292_v58 = vpack.c.bf16 %v3638_v14, %v3631_v49  ;;  %v3652_v1 = vand.u32 4294901760, %v3651_v2  ;;  %v25308_v56 = vpack.c.bf16 %v25185_v47, %v25183_v35 }
 0x2fb   :  { %v25320_v49 = vpack.c.bf16 %v25232_v9, %v25229_v7  ;;  %v25324_v14 = vpack.c.bf16 %v25245_v30, %v25242_v46 }
 0x2fc   :  { %v25300_v8 = vpack.c.bf16 %v3652_v1, %v3645_v63  ;;  %v25332_v1 = vpack.c.bf16 %v25288_v24, %v25283_v48 }
 0x2fd   :  { %21726 = vmatpush3.bf16.msra.mxu1 %v25097_v41 }
 0x2fe   :  { %21728 = vmatprep.subr.bf16.mxu1 %v25113_v23 }
 0x301   :  { %21730 = vmatpush3.bf16.msra.mxu1 %v25113_v23 }
 0x302   :  { %21732 = vmatprep.subr.bf16.mxu1 %v25129_v34 }
 0x305   :  { %21734 = vmatpush3.bf16.msra.mxu1 %v25129_v34 }
 0x306   :  { %21736 = vmatprep.subr.bf16.mxu1 %v25149_v38 }
 0x309   :  { %21738 = vmatpush3.bf16.msra.mxu1 %v25149_v38 }
 0x30a   :  { %21740 = vmatprep.subr.bf16.mxu1 %v25175_v52 }
 0x30d   :  { %21742 = vmatpush3.bf16.msra.mxu1 %v25175_v52 }
 0x30e   :  { %21744 = vmatprep.subr.bf16.mxu1 %v25191_v60 }
 0x393   :  { %v2801_v2 = vpop.f32.mrb[0].mxu1 }
 0x394   :  { %v18170_v63 = vpop.f32.mrb[1].mxu1  ;;  %v2805_v27 = vmul.f32 0.001953125, %v2801_v2 }
 0x395   :  { %v3337_v63 = vunpack.c.l.s4 %v23985_v3 }
 0x396   :  { %v2806_v44 = vmul.f32 %v2805_v27, %v2805_v27 }
 0x397   :  { %v3338_v51 = vunpack.c.0.s8 %v3337_v63 }
 0x398   :  { %v2808_v4 = vrot.slane %v2806_v44, 7  ;;  %v2123_v44 = vld [vmem:[%s29842_s6 + $0x2] sm:$0x1] }
 0x399   :  { %v3341_v29 = vsub.s32 %v3338_v51, %v2818_v50 }
 0x39a   :  { %v2810_v57 = vsub.f32 %v2805_v27, %v2808_v4 }
 0x39c   :  { %v2811_v20 = vadd.f32 1e-05, %v2810_v57 }
 0x39e   :  { %23977 = vrsqrt.f32 %v2811_v20  ;;  %v15609_v20 = vld [vmem:[%s29842_s6 + $0x6] ss:$0 sm:$0xff] }
 0x3a8   :  { %v23978_v6 = vpop.eup %23977 }
 0x3a9   :  { %v2814_v62 = vrot.slane %v23978_v6, 1  ;;  %v25343_v6 = vsub.s32 0, %v2818_v50 }
 0x3ab   :  { %v2816_v33 = vmul.f32 %v2814_v62, %v2122_v13 }
 0x3ad   :  { %v2825_v0 = vmul.f32 %v2816_v33, %v2805_v27  ;;  %v2820_v3 = vrot.slane %v2816_v33, %v25343_v6 }
 0x3af   :  { %v2826_v4 = vsub.f32 %v2123_v44, %v2825_v0  ;;  %v2821_v63 = vmul.f32 %v2820_v3, %v24862_v40  ;;  %v2822_v32 = vmul.f32 %v2820_v3, %v24860_v43  ;;  %v2823_v24 = vmul.f32 %v2820_v3, %v24872_v53 }
 0x3b0   :  { %v2824_v48 = vmul.f32 %v2820_v3, %v24870_v21 }
 0x3b1   :  { %v2830_v27 = vrot.slane %v2826_v4, %v25343_v6 }
 0x3b3   :  { %v2831_v0 = vadd.f32 %v2830_v27, %v2821_v63  ;;  %v2832_v44 = vadd.f32 %v2830_v27, %v2822_v32  ;;  %v2833_v33 = vadd.f32 %v2830_v27, %v2823_v24 }
 0x3c3   :  { %v3330_v57 = vpop.f32.mrb[2].mxu1 }
 0x3c4   :  { %v23727_v2 = vadd.f32 %v15609_v20, %v3330_v57  ;;  %v18236_v13 = vpop.f32.mrb[3].mxu1  ;;  %v2834_v20 = vadd.f32 %v2830_v27, %v2824_v48 }
 0x3c6   :  { %v3334_v10 = vmax.f32 %v23727_v2, 0.0 }
 0x3c8   :  { %v3342_v62 = vrot.slane %v3334_v10, %v3341_v29 }
 0x3ca   :  { %v3343_v59 = vcombine.high %v3342_v62, %v3342_v62  ;;  %v3350_v17 = vrot.slane %v3342_v62, %v3341_v29 }
 0x3cc   :  { %v3357_v51 = vrot.slane %v3343_v59, %v3341_v29  ;;  %v3361_v50 = vrot.slane %v3350_v17, %v25343_v6 }
 0x3ce   :  { %v3365_v57 = vrot.slane %v3357_v51, %v25343_v6  ;;  %v3368_v4 = vadd.f32 %v3361_v50, %v2831_v0  ;;  %v3369_v2 = vadd.f32 %v3361_v50, %v2832_v44 }
 0x3d0   :  { %v3370_v40 = vadd.f32 %v3365_v57, %v2833_v33  ;;  %v3371_v13 = vadd.f32 %v3365_v57, %v2834_v20  ;;  %3376 = vst [vmem:[#allocation2 + $0x1] sm:$0xff] %v3368_v4  ;;  %3377 = vst [vmem:[#allocation2 + $0x9] sm:$0xff] %v3369_v2  ;;  %v25353_v43 = vand.u32 4294901760, %v3368_v4  ;;  %v25355_v53 = vand.u32 4294901760, %v3369_v2 }
 0x3d2   :  { %3378 = vst [vmem:[#allocation2 + $0x19] sm:$0xff] %v3370_v40  ;;  %3379 = vst [vmem:[#allocation2 + $0x21] sm:$0xff] %v3371_v13  ;;  %v25358_v21 = vsub.f32 %v3368_v4, %v25353_v43  ;;  %v25361_v17 = vsub.f32 %v3369_v2, %v25355_v53  ;;  %v25363_v59 = vand.u32 4294901760, %v3370_v40  ;;  %v25365_v32 = vand.u32 4294901760, %v3371_v13 }
 0x3d4   :  { %v3504_v29 = vand.u32 4294901760, %v25358_v21  ;;  %v3514_v48 = vand.u32 4294901760, %v25361_v17  ;;  %v25370_v24 = vsub.f32 %v3370_v40, %v25363_v59  ;;  %v25373_v3 = vsub.f32 %v3371_v13, %v25365_v32  ;;  %v25523_v40 = vld [vmem:[%s29845_s3 + $0x20] sm:$0xff]  ;;  %v25528_v13 = vld [vmem:[%s29845_s3 + $0x28] sm:$0xff] }
 0x3d6   :  { %v3505_v10 = vsub.f32 %v25358_v21, %v3504_v29  ;;  %v3515_v27 = vsub.f32 %v25361_v17, %v3514_v48  ;;  %v3524_v62 = vand.u32 4294901760, %v25370_v24  ;;  %v3534_v63 = vand.u32 4294901760, %v25373_v3 }
 0x3d8   :  { %v3506_v0 = vand.u32 4294901760, %v3505_v10  ;;  %v3516_v44 = vand.u32 4294901760, %v3515_v27  ;;  %v3525_v51 = vsub.f32 %v25370_v24, %v3524_v62  ;;  %v3535_v50 = vsub.f32 %v25373_v3, %v3534_v63  ;;  %v25554_v27 = vld [vmem:[%s29845_s3 + $0x40] sm:$0xff] }
 0x3da   :  { %18269 = vmatprep.mubr.f32.mxu1 %v3506_v0  ;;  %v3526_v33 = vand.u32 4294901760, %v3525_v51  ;;  %v3536_v20 = vand.u32 4294901760, %v3535_v50  ;;  %v25571_v0 = vld [vmem:[%s29845_s3 + $0x50] sm:$0xff]  ;;  %v25587_v51 = vld [vmem:[%s29845_s3 + $0x68] sm:$0xff] }
 0x3db   :  { %18270 = vmatmul.mubr.f32.vlgmr.msra.gmra.mrb[4].mxu1 %v3516_v44  ;;  %v25582_v44 = vld [vmem:[%s29845_s3 + $0x60] sm:$0xff]  ;;  %v3381_v50 = vld [vmem:[#allocation2 + $0x8] sm:$0xff] }
 0x3dc   :  { %21746 = vmatpush3.bf16.msra.mxu1 %v25191_v60  ;;  %18272 = vmatprep.mubr.f32.mxu1 %v3526_v33  ;;  %v30059_v60 = vand.u32 4294901760, %v25151_v11  ;;  %v30063_v11 = vand.u32 4294901760, %v25196_v55  ;;  %v30068_v55 = vand.u32 4294901760, %v25232_v9  ;;  %v30075_v9 = vld [vmem:[#allocation5_spill] sm:$0xff] }
 0x3dd   :  { %21748 = vmatprep.subr.bf16.mxu1 %v25216_v61 }
 0x3df   :  { %18273 = vmatmul.mubr.f32.gmra.mrb[6].mxu1 %v3536_v20 }
 0x3e0   :  { %21750 = vmatpush3.bf16.msra.mxu1 %v25216_v61  ;;  %18307 = vmatprep.mubr.f32.mxu1 %v25353_v43  ;;  %v30060_v61 = vand.u32 4294901760, %v25153_v19  ;;  %v30064_v19 = vand.u32 4294901760, %v25198_v28 }
 0x3e1   :  { %21752 = vmatprep.subr.bf16.mxu1 %v25220_v12 }
 0x3e4   :  { %21754 = vmatpush3.bf16.msra.mxu1 %v25220_v12  ;;  %v21839_v12 = vpack.c.bf16 %v30060_v61, %v30059_v60  ;;  %v4222_v61 = vand.u32 4294901760, %v25571_v0 }
 0x3e5   :  { %21756 = vmatprep.subr.bf16.mxu1 %v25236_v37 }
 0x3e8   :  { %21758 = vmatpush3.bf16.msra.mxu1 %v25236_v37  ;;  %v30061_v37 = vand.u32 4294901760, %v25183_v35  ;;  %v30065_v35 = vand.u32 4294901760, %v25212_v15  ;;  %v30071_v15 = vand.u32 4294901760, %v25261_v36  ;;  %v3387_v36 = vld [vmem:[%s29845_s3 + $0x18] sm:$0xff] }
 0x3e9   :  { %21760 = vmatprep.subr.bf16.mxu1 %v25268_v26  ;;  %v4201_v4 = vand.u32 4294901760, %v3387_v36 }
 0x3ec   :  { %21762 = vmatpush3.bf16.msra.mxu1 %v25268_v26  ;;  %v30062_v26 = vand.u32 4294901760, %v25185_v47  ;;  %v30066_v47 = vand.u32 4294901760, %v25214_v42  ;;  %v30072_v42 = vand.u32 4294901760, %v25266_v39 }
 0x3ed   :  { %21764 = vmatprep.subr.bf16.mxu1 %v25272_v31 }
 0x3f0   :  { %21766 = vmatpush3.bf16.msra.mxu1 %v25272_v31  ;;  %v21843_v31 = vpack.c.bf16 %v30062_v26, %v30061_v37  ;;  %v4228_v37 = vand.u32 4294901760, %v25582_v44  ;;  %v4231_v26 = vand.u32 4294901760, %v25587_v51 }
 0x3f1   :  { %21768 = vmatprep.subr.bf16.mxu1 %v25292_v58 }
 0x3f4   :  { %21770 = vmatpush3.bf16.msra.mxu1 %v25292_v58  ;;  %v21847_v58 = vpack.c.bf16 %v30064_v19, %v30063_v11  ;;  %v3382_v11 = vld [vmem:[#allocation2 + $0x18] sm:$0xff] }
 0x3f5   :  { %21772 = vmatprep.subr.bf16.mxu1 %v25300_v8 }
 0x3f8   :  { %21774 = vmatpush3.bf16.msra.mxu1 %v25300_v8  ;;  %v21851_v8 = vpack.c.bf16 %v30066_v47, %v30065_v35  ;;  %v3383_v35 = vld [vmem:[#allocation2 + $0x20] sm:$0xff] }
 0x3f9   :  { %21776 = vmatprep.subr.bf16.mxu1 %v25304_v16 }
 0x3fb   :  { %18308 = vmatmul.mubr.f32.vlgmr.msra.gmra.mrb[4].mxu1 %v25355_v53 }
 0x3fc   :  { %18310 = vmatprep.mubr.f32.mxu1 %v25363_v59  ;;  %21778 = vmatpush3.bf16.msra.mxu1 %v25304_v16  ;;  %v30067_v16 = vand.u32 4294901760, %v25229_v7  ;;  %v30073_v7 = vld [vmem:[#allocation4_spill] sm:$0xff] }
 0x3fd   :  { %21780 = vmatprep.subr.bf16.mxu1 %v25308_v56 }
 0x3fe   :  { %v21855_v28 = vpack.c.bf16 %v30068_v55, %v30067_v16  ;;  %v25624_v16 = vld [vmem:[%s29845_s3 + $0x78] sm:$0xff] }
 0x3ff   :  { %18311 = vmatmul.mubr.f32.gmra.mrb[6].mxu1 %v25365_v32 }
 0x400   :  { %21782 = vmatpush3.bf16.msra.mxu1 %v25308_v56  ;;  %18345 = vmatprep.mubr.f32.mxu1 %v25358_v21  ;;  %v30069_v56 = vand.u32 4294901760, %v25242_v46  ;;  %v3380_v46 = vld [vmem:[#allocation2] sm:$0xff]  ;;  %v4207_v21 = vand.u32 4294901760, %v25528_v13 }
 0x401   :  { %21784 = vmatprep.subr.bf16.mxu1 %v25312_v54 }
 0x404   :  { %21786 = vmatpush3.bf16.msra.mxu1 %v25312_v54  ;;  %v30070_v54 = vand.u32 4294901760, %v25245_v30 }
 0x405   :  { %21788 = vmatprep.subr.bf16.mxu1 %v25316_v22 }
 0x408   :  { %21790 = vmatpush3.bf16.msra.mxu1 %v25316_v22  ;;  %v21859_v22 = vpack.c.bf16 %v30070_v54, %v30069_v56  ;;  %v25630_v56 = vand.u32 4294901760, %v3382_v11  ;;  %v25636_v54 = vpack.c.bf16 %v4231_v26, %v4228_v37 }
 0x409   :  { %21792 = vmatprep.subr.bf16.mxu1 %v25320_v49 }
 0x40c   :  { %21794 = vmatpush3.bf16.msra.mxu1 %v25320_v49  ;;  %v21863_v49 = vpack.c.bf16 %v30072_v42, %v30071_v15  ;;  %v25641_v15 = vand.u32 4294901760, %v3383_v35 }
 0x40d   :  { %21796 = vmatprep.subr.bf16.mxu1 %v25324_v14 }
 0x410   :  { %21798 = vmatpush3.bf16.msra.mxu1 %v25324_v14  ;;  %v30074_v14 = vand.u32 4294901760, %v30073_v7 }
 0x411   :  { %21800 = vmatprep.subr.bf16.mxu1 %v25328_v25 }
 0x414   :  { %21802 = vmatpush3.bf16.msra.mxu1 %v25328_v25  ;;  %v30076_v25 = vand.u32 4294901760, %v30075_v9 }
 0x415   :  { %21804 = vmatprep.subr.bf16.mxu1 %v25332_v1 }
 0x418   :  { %21806 = vmatpush3.bf16.msra.mxu1 %v25332_v1  ;;  %v21867_v1 = vpack.c.bf16 %v30076_v25, %v30074_v14 }
 0x419   :  { %21808 = vmatprep.subr.bf16.mxu1 %v25067_v18 }
 0x41b   :  { %18346 = vmatmul.mubr.f32.vlgmr.msra.gmra.mrb[4].mxu1 %v25361_v17 }
 0x41c   :  { %18348 = vmatprep.mubr.f32.mxu1 %v25370_v24  ;;  %21810 = vmatpush3.bf16.msra.mxu1 %v25067_v18 }
 0x41d   :  { %21812 = vmatprep.subr.bf16.mxu1 %v25077_v45 }
 0x41f   :  { %18349 = vmatmul.mubr.f32.gmra.mrb[6].mxu1 %v25373_v3 }
 0x420   :  { %21814 = vmatpush3.bf16.msra.mxu1 %v25077_v45  ;;  %18383 = vmatprep.mubr.f32.mxu1 %v3504_v29  ;;  %v3390_v29 = vld [vmem:[%s29845_s3 + $0x30] sm:$0xff] }
 0x421   :  { %21816 = vmatprep.subr.bf16.mxu1 %v25087_v5  ;;  %v4210_v24 = vand.u32 4294901760, %v3390_v29 }
 0x424   :  { %21818 = vmatpush3.bf16.msra.mxu1 %v25087_v5 }
 0x425   :  { %21820 = vmatprep.subr.bf16.mxu1 %v25097_v41 }
 0x428   :  { %21822 = vmatpush3.bf16.msra.mxu1 %v25097_v41 }
 0x429   :  { %21824 = vmatprep.subr.bf16.mxu1 %v25113_v23 }
 0x42c   :  { %21826 = vmatpush3.bf16.msra.mxu1 %v25113_v23 }
 0x42d   :  { %21828 = vmatprep.subr.bf16.mxu1 %v25129_v34 }
 0x430   :  { %21830 = vmatpush3.bf16.msra.mxu1 %v25129_v34 }
 0x431   :  { %21832 = vmatprep.subr.bf16.mxu1 %v25149_v38 }
 0x434   :  { %21834 = vmatpush3.bf16.msra.mxu1 %v25149_v38 }
 0x435   :  { %21836 = vmatprep.subr.bf16.mxu1 %v25175_v52 }
 0x438   :  { %21838 = vmatpush3.bf16.msra.mxu1 %v25175_v52 }
 0x439   :  { %21840 = vmatprep.subr.bf16.mxu1 %v21839_v12 }
 0x43b   :  { %18384 = vmatmul.mubr.f32.vlgmr.msra.gmra.mrb[4].mxu1 %v3514_v48 }
 0x43c   :  { %18386 = vmatprep.mubr.f32.mxu1 %v3524_v62  ;;  %21842 = vmatpush3.bf16.msra.mxu1 %v21839_v12  ;;  %v4216_v62 = vand.u32 4294901760, %v25554_v27 }
 0x43d   :  { %21844 = vmatprep.subr.bf16.mxu1 %v21843_v31 }
 0x43f   :  { %18387 = vmatmul.mubr.f32.gmra.mrb[6].mxu1 %v3534_v63 }
 0x440   :  { %21846 = vmatpush3.bf16.msra.mxu1 %v21843_v31  ;;  %18421 = vmatprep.mubr.f32.mxu1 %v25353_v43  ;;  %v25604_v31 = vand.u32 4294901760, %v3381_v50 }
 0x441   :  { %21848 = vmatprep.subr.bf16.mxu1 %v21847_v58 }
 0x444   :  { %21850 = vmatpush3.bf16.msra.mxu1 %v21847_v58 }
 0x445   :  { %21852 = vmatprep.subr.bf16.mxu1 %v21851_v8 }
 0x448   :  { %21854 = vmatpush3.bf16.msra.mxu1 %v21851_v8  ;;  %v25619_v8 = vld [vmem:[%s29845_s3 + $0x70] sm:$0xff] }
 0x449   :  { %21856 = vmatprep.subr.bf16.mxu1 %v21855_v28  ;;  %v4234_v42 = vand.u32 4294901760, %v25619_v8 }
 0x44c   :  { %21858 = vmatpush3.bf16.msra.mxu1 %v21855_v28  ;;  %v25628_v28 = vsub.f32 %v3387_v36, %v4201_v4 }
 0x44d   :  { %21860 = vmatprep.subr.bf16.mxu1 %v21859_v22 }
 0x44e   :  { %v29894_v25 = vand.u32 4294901760, %v25628_v28 }
 0x450   :  { %21862 = vmatpush3.bf16.msra.mxu1 %v21859_v22  ;;  %v25639_v22 = vsub.f32 %v3381_v50, %v25604_v31  ;;  %v25699_v50 = vsub.f32 %v25554_v27, %v4216_v62 }
 0x451   :  { %21864 = vmatprep.subr.bf16.mxu1 %v21863_v49 }
 0x452   :  { %v29893_v36 = vand.u32 4294901760, %v25639_v22 }
 0x454   :  { %21866 = vmatpush3.bf16.msra.mxu1 %v21863_v49  ;;  %v4237_v49 = vand.u32 4294901760, %v25624_v16 }
 0x455   :  { %21868 = vmatprep.subr.bf16.mxu1 %v21867_v1 }
 0x458   :  { %21870 = vmatpush3.bf16.msra.mxu1 %v21867_v1 }
 0x459   :  { %21872 = vmatprep.subr.bf16.mxu1 %v25067_v18 }
 0x45b   :  { %18422 = vmatmul.mubr.f32.vlgmr.msra.gmra.mrb[4].mxu1 %v25355_v53 }
 0x45c   :  { %18424 = vmatprep.mubr.f32.mxu1 %v25363_v59  ;;  %21874 = vmatpush3.bf16.msra.mxu1 %v25067_v18  ;;  %v3384_v18 = vld [vmem:[%s29845_s3] sm:$0xff] }
 0x45d   :  { %21876 = vmatprep.subr.bf16.mxu1 %v25077_v45 }
 0x45f   :  { %18425 = vmatmul.mubr.f32.gmra.mrb[6].mxu1 %v25365_v32 }
 0x460   :  { %21878 = vmatpush3.bf16.msra.mxu1 %v25077_v45  ;;  %18459 = vmatprep.mubr.f32.mxu1 %v25353_v43  ;;  %v3385_v45 = vld [vmem:[%s29845_s3 + $0x8] sm:$0xff]  ;;  %v4204_v43 = vand.u32 4294901760, %v25523_v40 }
 0x461   :  { %21880 = vmatprep.subr.bf16.mxu1 %v25087_v5  ;;  %v4195_v30 = vand.u32 4294901760, %v3385_v45 }
 0x462   :  { %v25549_v48 = vpack.c.bf16 %v4207_v21, %v4204_v43  ;;  %v25656_v1 = vsub.f32 %v25523_v40, %v4204_v43 }
 0x463   :  { %v25591_v20 = vsub.f32 %v3385_v45, %v4195_v30  ;;  %v25665_v45 = vsub.f32 %v3383_v35, %v25641_v15 }
 0x464   :  { %21882 = vmatpush3.bf16.msra.mxu1 %v25087_v5  ;;  %v25502_v5 = vand.u32 4294901760, %v3380_v46  ;;  %v29891_v43 = vand.u32 4294901760, %v25656_v1 }
 0x465   :  { %21884 = vmatprep.subr.bf16.mxu1 %v25097_v41  ;;  %v4322_v58 = vand.u32 4294901760, %v25591_v20 }
 0x466   :  { %v25513_v39 = vsub.f32 %v3380_v46, %v25502_v5  ;;  %v25659_v46 = vsub.f32 %v25528_v13, %v4207_v21  ;;  %v4337_v13 = vsub.f32 %v25628_v28, %v29894_v25 }
 0x467   :  { %v4323_v14 = vsub.f32 %v25591_v20, %v4322_v58 }
 0x468   :  { %21886 = vmatpush3.bf16.msra.mxu1 %v25097_v41  ;;  %v4192_v41 = vand.u32 4294901760, %v3384_v18  ;;  %v4274_v2 = vand.u32 4294901760, %v25513_v39  ;;  %v29889_v21 = vand.u32 4294901760, %v25659_v46 }
 0x469   :  { %21888 = vmatprep.subr.bf16.mxu1 %v25113_v23 }
 0x46a   :  { %v4275_v17 = vsub.f32 %v25513_v39, %v4274_v2  ;;  %v25589_v33 = vsub.f32 %v3384_v18, %v4192_v41  ;;  %v25662_v18 = vsub.f32 %v3382_v11, %v25630_v56 }
 0x46c   :  { %21890 = vmatpush3.bf16.msra.mxu1 %v25113_v23  ;;  %v3386_v23 = vld [vmem:[%s29845_s3 + $0x10] sm:$0xff]  ;;  %v4276_v10 = vand.u32 4294901760, %v4275_v17  ;;  %v4315_v19 = vand.u32 4294901760, %v25589_v33  ;;  %v29892_v17 = vand.u32 4294901760, %v25662_v18 }
 0x46d   :  { %21892 = vmatprep.subr.bf16.mxu1 %v25129_v34  ;;  %v4198_v57 = vand.u32 4294901760, %v3386_v23 }
 0x46e   :  { %v4316_v7 = vsub.f32 %v25589_v33, %v4315_v19  ;;  %v4295_v27 = vsub.f32 %v25662_v18, %v29892_v17 }
 0x46f   :  { %v25626_v55 = vsub.f32 %v3386_v23, %v4198_v57  ;;  %v25676_v23 = vpack.c.bf16 %v4237_v49, %v4234_v42 }
 0x470   :  { %21894 = vmatpush3.bf16.msra.mxu1 %v25129_v34  ;;  %v25517_v34 = vpack.c.bf16 %v4195_v30, %v4192_v41  ;;  %v25667_v41 = vsub.f32 %v3390_v29, %v4210_v24  ;;  %v29887_v29 = vand.u32 4294901760, %v25665_v45  ;;  %v4296_v17 = vand.u32 4294901760, %v4295_v27 }
 0x471   :  { %21896 = vmatprep.subr.bf16.mxu1 %v25149_v38  ;;  %v4329_v9 = vand.u32 4294901760, %v25626_v55 }
 0x473   :  { %v4330_v40 = vsub.f32 %v25626_v55, %v4329_v9 }
 0x474   :  { %21898 = vmatpush3.bf16.msra.mxu1 %v25149_v38  ;;  %v25532_v38 = vpack.c.bf16 %v4201_v4, %v4198_v57  ;;  %v4317_v57 = vand.u32 4294901760, %v4316_v7  ;;  %v4324_v4 = vand.u32 4294901760, %v4323_v14  ;;  %v4338_v7 = vand.u32 4294901760, %v4337_v13 }
 0x475   :  { %21900 = vmatprep.subr.bf16.mxu1 %v25175_v52  ;;  %v4331_v35 = vand.u32 4294901760, %v4330_v40  ;;  %v4344_v14 = vsub.f32 %v25656_v1, %v29891_v43  ;;  %v25731_v13 = vsub.f32 %v25571_v0, %v4222_v61 }
 0x478   :  { %21902 = vmatpush3.bf16.msra.mxu1 %v25175_v52  ;;  %v3391_v52 = vld [vmem:[%s29845_s3 + $0x38] sm:$0xff] }
 0x479   :  { %21904 = vmatprep.subr.bf16.mxu1 %v25517_v34  ;;  %v4213_v3 = vand.u32 4294901760, %v3391_v52 }
 0x47b   :  { %18460 = vmatmul.mubr.f32.vlgmr.msra.gmra.mrb[4].mxu1 %v25355_v53  ;;  %v25559_v53 = vld [vmem:[%s29845_s3 + $0x48] sm:$0xff]  ;;  %v25669_v30 = vsub.f32 %v3391_v52, %v4213_v3  ;;  %v29888_v52 = vand.u32 4294901760, %v25667_v41 }
 0x47c   :  { %18462 = vmatprep.mubr.f32.mxu1 %v25363_v59  ;;  %21906 = vmatpush3.bf16.msra.mxu1 %v25517_v34  ;;  %v25564_v59 = vpack.c.bf16 %v4213_v3, %v4210_v24  ;;  %v4219_v63 = vand.u32 4294901760, %v25559_v53  ;;  %v4285_v3 = vsub.f32 %v25639_v22, %v29893_v36 }
 0x47d   :  { %21908 = vmatprep.subr.bf16.mxu1 %v25532_v38  ;;  %v29890_v24 = vand.u32 4294901760, %v25669_v30 }
 0x47e   :  { %v25598_v60 = vpack.c.bf16 %v4219_v63, %v4216_v62  ;;  %v25704_v11 = vsub.f32 %v25559_v53, %v4219_v63  ;;  %v4305_v53 = vsub.f32 %v25665_v45, %v29887_v29  ;;  %v4358_v62 = vsub.f32 %v25667_v41, %v29888_v52 }
 0x47f   :  { %18463 = vmatmul.mubr.f32.gmra.mrb[6].mxu1 %v25365_v32  ;;  %v25576_v32 = vld [vmem:[%s29845_s3 + $0x58] sm:$0xff]  ;;  %v4365_v63 = vsub.f32 %v25669_v30, %v29890_v24  ;;  %v4286_v52 = vand.u32 4294901760, %v4285_v3  ;;  %v4345_v24 = vand.u32 4294901760, %v4344_v14 }
 0x480   :  { %21910 = vmatpush3.bf16.msra.mxu1 %v25532_v38  ;;  %18497 = vmatprep.mubr.f32.mxu1 %v4276_v10  ;;  %v4225_v12 = vand.u32 4294901760, %v25576_v32  ;;  %v21935_v10 = vpack.c.bf16 %v4324_v4, %v4317_v57  ;;  %v4351_v57 = vsub.f32 %v25659_v46, %v29889_v21  ;;  %v4371_v4 = vand.u32 4294901760, %v25699_v50 }
 0x481   :  { %21912 = vmatprep.subr.bf16.mxu1 %v25549_v48  ;;  %v4378_v40 = vand.u32 4294901760, %v25704_v11  ;;  %v21939_v21 = vpack.c.bf16 %v4338_v7, %v4331_v35  ;;  %v4359_v36 = vand.u32 4294901760, %v4358_v62  ;;  %v4366_v25 = vand.u32 4294901760, %v4365_v63 }
 0x482   :  { %v25614_v47 = vpack.c.bf16 %v4225_v12, %v4222_v61  ;;  %v25736_v29 = vsub.f32 %v25576_v32, %v4225_v12  ;;  %v4352_v43 = vand.u32 4294901760, %v4351_v57  ;;  %v4372_v0 = vsub.f32 %v25699_v50, %v4371_v4 }
 0x483   :  { %v4379_v32 = vsub.f32 %v25704_v11, %v4378_v40  ;;  %v4385_v61 = vand.u32 4294901760, %v25731_v13  ;;  %v4306_v3 = vand.u32 4294901760, %v4305_v53 }
 0x484   :  { %21914 = vmatpush3.bf16.msra.mxu1 %v25549_v48  ;;  %v4392_v12 = vand.u32 4294901760, %v25736_v29  ;;  %v21943_v35 = vpack.c.bf16 %v4352_v43, %v4345_v24  ;;  %v4373_v7 = vand.u32 4294901760, %v4372_v0 }
 0x485   :  { %21916 = vmatprep.subr.bf16.mxu1 %v25564_v59  ;;  %v4380_v14 = vand.u32 4294901760, %v4379_v32  ;;  %v4386_v43 = vsub.f32 %v25731_v13, %v4385_v61 }
 0x488   :  { %21918 = vmatpush3.bf16.msra.mxu1 %v25564_v59 }
 0x489   :  { %21920 = vmatprep.subr.bf16.mxu1 %v25598_v60 }
 0x48c   :  { %21922 = vmatpush3.bf16.msra.mxu1 %v25598_v60 }
 0x48d   :  { %21924 = vmatprep.subr.bf16.mxu1 %v25614_v47 }
 0x490   :  { %21926 = vmatpush3.bf16.msra.mxu1 %v25614_v47 }
 0x491   :  { %21928 = vmatprep.subr.bf16.mxu1 %v25636_v54 }
 0x494   :  { %21930 = vmatpush3.bf16.msra.mxu1 %v25636_v54 }
 0x495   :  { %21932 = vmatprep.subr.bf16.mxu1 %v25676_v23 }
 0x498   :  { %21934 = vmatpush3.bf16.msra.mxu1 %v25676_v23 }
 0x499   :  { %21936 = vmatprep.subr.bf16.mxu1 %v21935_v10 }
 0x49b   :  { %18498 = vmatmul.mubr.f32.vlgmr.msra.gmra.mrb[4].mxu1 %v4286_v52  ;;  %v25754_v52 = vsub.f32 %v25587_v51, %v4231_v26  ;;  %v25768_v26 = vsub.f32 %v25619_v8, %v4234_v42 }
 0x49c   :  { %18500 = vmatprep.mubr.f32.mxu1 %v4296_v17  ;;  %21938 = vmatpush3.bf16.msra.mxu1 %v21935_v10  ;;  %v25749_v17 = vsub.f32 %v25582_v44, %v4228_v37  ;;  %v21947_v10 = vpack.c.bf16 %v4366_v25, %v4359_v36  ;;  %v4393_v44 = vsub.f32 %v25736_v29, %v4392_v12 }
 0x49d   :  { %21940 = vmatprep.subr.bf16.mxu1 %v21939_v21  ;;  %v4406_v51 = vand.u32 4294901760, %v25754_v52  ;;  %v25773_v25 = vsub.f32 %v25624_v16, %v4237_v49  ;;  %v21951_v36 = vpack.c.bf16 %v4380_v14, %v4373_v7  ;;  %v4413_v8 = vand.u32 4294901760, %v25768_v26 }
 0x49e   :  { %v4399_v37 = vand.u32 4294901760, %v25749_v17  ;;  %v4394_v24 = vand.u32 4294901760, %v4393_v44  ;;  %v21971_v7 = vpack.c.bf16 %v25628_v28, %v25626_v55  ;;  %v21975_v14 = vpack.c.bf16 %v25659_v46, %v25656_v1 }
 0x49f   :  { %18501 = vmatmul.mubr.f32.gmra.mrb[6].mxu1 %v4306_v3  ;;  %v4407_v27 = vsub.f32 %v25754_v52, %v4406_v51  ;;  %v4420_v42 = vand.u32 4294901760, %v25773_v25  ;;  %v4414_v62 = vsub.f32 %v25768_v26, %v4413_v8  ;;  %v21983_v44 = vpack.c.bf16 %v25704_v11, %v25699_v50 }
 0x4a0   :  { %21942 = vmatpush3.bf16.msra.mxu1 %v21939_v21  ;;  %18535 = vmatprep.mubr.f32.mxu1 %v25502_v5  ;;  %v4387_v21 = vand.u32 4294901760, %v4386_v43  ;;  %v4400_v57 = vsub.f32 %v25749_v17, %v4399_v37  ;;  %v21979_v43 = vpack.c.bf16 %v25669_v30, %v25667_v41  ;;  %v30083_v55 = vand.u32 4294901760, %v25667_v41  ;;  %v15629_v41 = vld [vmem:[%s29845_s3 + $0x118] sm:$0xff] }
 0x4a1   :  { %21944 = vmatprep.subr.bf16.mxu1 %v21943_v35  ;;  %v4408_v53 = vand.u32 4294901760, %v4407_v27  ;;  %v4421_v63 = vsub.f32 %v25773_v25, %v4420_v42  ;;  %v4415_v32 = vand.u32 4294901760, %v4414_v62  ;;  %v30078_v27 = vand.u32 4294901760, %v25639_v22  ;;  %v25975_v62 = vld [vmem:[%s29845_s3 + $0x168] sm:$0xff] }
 0x4a2   :  { %v21955_v16 = vpack.c.bf16 %v4394_v24, %v4387_v21  ;;  %v4401_v49 = vand.u32 4294901760, %v4400_v57  ;;  %v21991_v21 = vpack.c.bf16 %v25754_v52, %v25749_v17  ;;  %v21995_v24 = vpack.c.bf16 %v25773_v25, %v25768_v26  ;;  %v15632_v17 = vld [vmem:[%s29845_s3 + $0x130] sm:$0xff]  ;;  %v25942_v25 = vld [vmem:[%s29845_s3 + $0x140] sm:$0xff] }
 0x4a3   :  { %v4422_v3 = vand.u32 4294901760, %v4421_v63  ;;  %v4992_v50 = vand.u32 4294901760, %v15629_v41  ;;  %v4962_v63 = vld [vmem:[#allocation2 + $0xa] sm:$0xff] }
 0x4a4   :  { %21946 = vmatpush3.bf16.msra.mxu1 %v21943_v35  ;;  %v21959_v0 = vpack.c.bf16 %v4408_v53, %v4401_v49  ;;  %v25959_v49 = vld [vmem:[%s29845_s3 + $0x150] sm:$0xff]  ;;  %v25970_v53 = vld [vmem:[%s29845_s3 + $0x160] sm:$0xff] }
 0x4a5   :  { %21948 = vmatprep.subr.bf16.mxu1 %v21947_v10  ;;  %v21963_v35 = vpack.c.bf16 %v4422_v3, %v4415_v32 }
 0x4a8   :  { %21950 = vmatpush3.bf16.msra.mxu1 %v21947_v10  ;;  %v21967_v10 = vpack.c.bf16 %v25591_v20, %v25589_v33  ;;  %v30080_v33 = vand.u32 4294901760, %v25656_v1  ;;  %v30081_v20 = vand.u32 4294901760, %v25659_v46  ;;  %v22051_v1 = vpack.c.bf16 %v4392_v12, %v4385_v61 }
 0x4a9   :  { %21952 = vmatprep.subr.bf16.mxu1 %v21951_v36  ;;  %v22055_v46 = vpack.c.bf16 %v4406_v51, %v4399_v37  ;;  %v5001_v37 = vand.u32 4294901760, %v15632_v17 }
 0x4ac   :  { %21954 = vmatpush3.bf16.msra.mxu1 %v21951_v36  ;;  %v21987_v36 = vpack.c.bf16 %v25736_v29, %v25731_v13 }
 0x4ad   :  { %21956 = vmatprep.subr.bf16.mxu1 %v21955_v16 }
 0x4b0   :  { %21958 = vmatpush3.bf16.msra.mxu1 %v21955_v16  ;;  %v30079_v16 = vand.u32 4294901760, %v25662_v18 }
 0x4b1   :  { %21960 = vmatprep.subr.bf16.mxu1 %v21959_v0 }
 0x4b4   :  { %21962 = vmatpush3.bf16.msra.mxu1 %v21959_v0 }
 0x4b5   :  { %21964 = vmatprep.subr.bf16.mxu1 %v21963_v35 }
 0x4b8   :  { %21966 = vmatpush3.bf16.msra.mxu1 %v21963_v35  ;;  %v5013_v35 = vand.u32 4294901760, %v25959_v49 }
 0x4b9   :  { %21968 = vmatprep.subr.bf16.mxu1 %v21967_v10 }
 0x4bb   :  { %18536 = vmatmul.mubr.f32.vlgmr.msra.gmra.mrb[4].mxu1 %v25604_v31 }
 0x4bc   :  { %18538 = vmatprep.mubr.f32.mxu1 %v25630_v56  ;;  %21970 = vmatpush3.bf16.msra.mxu1 %v21967_v10 }
 0x4bd   :  { %21972 = vmatprep.subr.bf16.mxu1 %v21971_v7 }
 0x4bf   :  { %18539 = vmatmul.mubr.f32.gmra.mrb[6].mxu1 %v25641_v15 }
 0x4c0   :  { %21974 = vmatpush3.bf16.msra.mxu1 %v21971_v7  ;;  %18573 = vmatprep.mubr.f32.mxu1 %v25513_v39  ;;  %v22031_v39 = vpack.c.bf16 %v4322_v58, %v4315_v19  ;;  %v22039_v19 = vpack.c.bf16 %v30081_v20, %v30080_v33  ;;  %v30082_v58 = vand.u32 4294901760, %v25665_v45  ;;  %v5019_v7 = vand.u32 4294901760, %v25970_v53 }
 0x4c1   :  { %21976 = vmatprep.subr.bf16.mxu1 %v21975_v14 }
 0x4c4   :  { %21978 = vmatpush3.bf16.msra.mxu1 %v21975_v14  ;;  %v5022_v14 = vand.u32 4294901760, %v25975_v62 }
 0x4c5   :  { %21980 = vmatprep.subr.bf16.mxu1 %v21979_v43 }
 0x4c6   :  { %v26024_v20 = vpack.c.bf16 %v5022_v14, %v5019_v7 }
 0x4c8   :  { %21982 = vmatpush3.bf16.msra.mxu1 %v21979_v43  ;;  %v25992_v43 = vand.u32 4294901760, %v4962_v63 }
 0x4c9   :  { %21984 = vmatprep.subr.bf16.mxu1 %v21983_v44 }
 0x4cc   :  { %21986 = vmatpush3.bf16.msra.mxu1 %v21983_v44  ;;  %v4963_v44 = vld [vmem:[#allocation2 + $0x1a] sm:$0xff] }
 0x4cd   :  { %21988 = vmatprep.subr.bf16.mxu1 %v21987_v36  ;;  %v26018_v33 = vand.u32 4294901760, %v4963_v44 }
 0x4d0   :  { %21990 = vmatpush3.bf16.msra.mxu1 %v21987_v36 }
 0x4d1   :  { %21992 = vmatprep.subr.bf16.mxu1 %v21991_v21 }
 0x4d4   :  { %21994 = vmatpush3.bf16.msra.mxu1 %v21991_v21 }
 0x4d5   :  { %21996 = vmatprep.subr.bf16.mxu1 %v21995_v24 }
 0x4d8   :  { %21998 = vmatpush3.bf16.msra.mxu1 %v21995_v24  ;;  %v4964_v24 = vld [vmem:[#allocation2 + $0x22] sm:$0xff] }
 0x4d9   :  { %22000 = vmatprep.subr.bf16.mxu1 %v25517_v34 }
 0x4db   :  { %18574 = vmatmul.mubr.f32.vlgmr.msra.gmra.mrb[4].mxu1 %v25639_v22 }
 0x4dc   :  { %18576 = vmatprep.mubr.f32.mxu1 %v25662_v18  ;;  %22002 = vmatpush3.bf16.msra.mxu1 %v25517_v34  ;;  %v22059_v18 = vpack.c.bf16 %v4420_v42, %v4413_v8  ;;  %v5007_v8 = vand.u32 4294901760, %v25942_v25 }
 0x4dd   :  { %22004 = vmatprep.subr.bf16.mxu1 %v25532_v38 }
 0x4df   :  { %18577 = vmatmul.mubr.f32.gmra.mrb[6].mxu1 %v25665_v45  ;;  %v4961_v45 = vld [vmem:[#allocation2 + $0x2] sm:$0xff] }
 0x4e0   :  { %22006 = vmatpush3.bf16.msra.mxu1 %v25532_v38  ;;  %18611 = vmatprep.mubr.f32.mxu1 %v4274_v2  ;;  %v30077_v2 = vand.u32 4294901760, %v25628_v28  ;;  %v30084_v28 = vand.u32 4294901760, %v25669_v30 }
 0x4e1   :  { %22008 = vmatprep.subr.bf16.mxu1 %v25549_v48 }
 0x4e2   :  { %v22035_v57 = vpack.c.bf16 %v30077_v2, %v4329_v9  ;;  %v22043_v22 = vpack.c.bf16 %v30084_v28, %v30083_v55  ;;  %v22047_v9 = vpack.c.bf16 %v4378_v40, %v4371_v4  ;;  %v25911_v4 = vld [vmem:[%s29845_s3 + $0x120] sm:$0xff]  ;;  %v25916_v40 = vld [vmem:[%s29845_s3 + $0x128] sm:$0xff]  ;;  %v26007_v2 = vld [vmem:[%s29845_s3 + $0x170] sm:$0xff] }
 0x4e3   :  { %v4995_v13 = vand.u32 4294901760, %v25911_v4  ;;  %v4998_v61 = vand.u32 4294901760, %v25916_v40  ;;  %v5025_v55 = vand.u32 4294901760, %v26007_v2 }
 0x4e4   :  { %22010 = vmatpush3.bf16.msra.mxu1 %v25549_v48 }
 0x4e5   :  { %22012 = vmatprep.subr.bf16.mxu1 %v25564_v59  ;;  %v25937_v52 = vpack.c.bf16 %v4998_v61, %v4995_v13 }
 0x4e8   :  { %22014 = vmatpush3.bf16.msra.mxu1 %v25564_v59 }
 0x4e9   :  { %22016 = vmatprep.subr.bf16.mxu1 %v25598_v60 }
 0x4ec   :  { %22018 = vmatpush3.bf16.msra.mxu1 %v25598_v60 }
 0x4ed   :  { %22020 = vmatprep.subr.bf16.mxu1 %v25614_v47 }
 0x4f0   :  { %22022 = vmatpush3.bf16.msra.mxu1 %v25614_v47 }
 0x4f1   :  { %22024 = vmatprep.subr.bf16.mxu1 %v25636_v54 }
 0x4f4   :  { %22026 = vmatpush3.bf16.msra.mxu1 %v25636_v54 }
 0x4f5   :  { %22028 = vmatprep.subr.bf16.mxu1 %v25676_v23 }
 0x4f8   :  { %22030 = vmatpush3.bf16.msra.mxu1 %v25676_v23 }
 0x4f9   :  { %22032 = vmatprep.subr.bf16.mxu1 %v22031_v39 }
 0x4fb   :  { %18612 = vmatmul.mubr.f32.vlgmr.msra.gmra.mrb[4].mxu1 %v30078_v27 }
 0x4fc   :  { %18614 = vmatprep.mubr.f32.mxu1 %v30079_v16  ;;  %22034 = vmatpush3.bf16.msra.mxu1 %v22031_v39  ;;  %v26016_v16 = vsub.f32 %v15629_v41, %v4992_v50 }
 0x4fd   :  { %22036 = vmatprep.subr.bf16.mxu1 %v22035_v57 }
 0x4ff   :  { %18615 = vmatmul.mubr.f32.gmra.mrb[6].mxu1 %v30082_v58  ;;  %v26029_v58 = vand.u32 4294901760, %v4964_v24 }
 0x500   :  { %22038 = vmatpush3.bf16.msra.mxu1 %v22035_v57  ;;  %18649 = vmatprep.mubr.f32.mxu1 %v25502_v5  ;;  %v26012_v57 = vld [vmem:[%s29845_s3 + $0x178] sm:$0xff] }
 0x501   :  { %22040 = vmatprep.subr.bf16.mxu1 %v22039_v19  ;;  %v5028_v28 = vand.u32 4294901760, %v26012_v57 }
 0x504   :  { %22042 = vmatpush3.bf16.msra.mxu1 %v22039_v19  ;;  %v26027_v19 = vsub.f32 %v4962_v63, %v25992_v43  ;;  %v26087_v63 = vsub.f32 %v25942_v25, %v5007_v8 }
 0x505   :  { %22044 = vmatprep.subr.bf16.mxu1 %v22043_v22 }
 0x508   :  { %22046 = vmatpush3.bf16.msra.mxu1 %v22043_v22 }
 0x509   :  { %22048 = vmatprep.subr.bf16.mxu1 %v22047_v9 }
 0x50c   :  { %22050 = vmatpush3.bf16.msra.mxu1 %v22047_v9 }
 0x50d   :  { %22052 = vmatprep.subr.bf16.mxu1 %v22051_v1 }
 0x510   :  { %22054 = vmatpush3.bf16.msra.mxu1 %v22051_v1 }
 0x511   :  { %22056 = vmatprep.subr.bf16.mxu1 %v22055_v46 }
 0x514   :  { %22058 = vmatpush3.bf16.msra.mxu1 %v22055_v46  ;;  %v29901_v46 = vand.u32 4294901760, %v26016_v16 }
 0x515   :  { %22060 = vmatprep.subr.bf16.mxu1 %v22059_v18 }
 0x518   :  { %22062 = vmatpush3.bf16.msra.mxu1 %v22059_v18  ;;  %v26044_v18 = vsub.f32 %v25911_v4, %v4995_v13 }
 0x519   :  { %22064 = vmatprep.subr.bf16.mxu1 %v25517_v34 }
 0x51a   :  { %v29898_v13 = vand.u32 4294901760, %v26044_v18 }
 0x51b   :  { %18650 = vmatmul.mubr.f32.vlgmr.msra.gmra.mrb[4].mxu1 %v25604_v31 }
 0x51c   :  { %18652 = vmatprep.mubr.f32.mxu1 %v25630_v56  ;;  %22066 = vmatpush3.bf16.msra.mxu1 %v25517_v34  ;;  %v15626_v34 = vld [vmem:[%s29845_s3 + $0x100] sm:$0xff] }
 0x51d   :  { %22068 = vmatprep.subr.bf16.mxu1 %v25532_v38 }
 0x51f   :  { %18653 = vmatmul.mubr.f32.gmra.mrb[6].mxu1 %v25641_v15 }
 0x520   :  { %22070 = vmatpush3.bf16.msra.mxu1 %v25532_v38  ;;  %18687 = vmatprep.mubr.f32.mxu1 %v25502_v5  ;;  %v15627_v5 = vld [vmem:[%s29845_s3 + $0x108] sm:$0xff]  ;;  %v25890_v38 = vand.u32 4294901760, %v4961_v45 }
 0x521   :  { %22072 = vmatprep.subr.bf16.mxu1 %v25549_v48 }
 0x522   :  { %v25901_v30 = vsub.f32 %v4961_v45, %v25890_v38  ;;  %v26047_v45 = vsub.f32 %v25916_v40, %v4998_v61  ;;  %v5128_v40 = vsub.f32 %v26016_v16, %v29901_v46 }
 0x524   :  { %22074 = vmatpush3.bf16.msra.mxu1 %v25549_v48  ;;  %v4983_v48 = vand.u32 4294901760, %v15626_v34  ;;  %v5065_v11 = vand.u32 4294901760, %v25901_v30  ;;  %v29897_v61 = vand.u32 4294901760, %v26047_v45 }
 0x525   :  { %22076 = vmatprep.subr.bf16.mxu1 %v25564_v59 }
 0x526   :  { %v5066_v12 = vsub.f32 %v25901_v30, %v5065_v11  ;;  %v25977_v0 = vsub.f32 %v15626_v34, %v4983_v48  ;;  %v26050_v34 = vsub.f32 %v4963_v44, %v26018_v33 }
 0x528   :  { %22078 = vmatpush3.bf16.msra.mxu1 %v25564_v59  ;;  %v4986_v59 = vand.u32 4294901760, %v15627_v5  ;;  %v5067_v26 = vand.u32 4294901760, %v5066_v12  ;;  %v5106_v36 = vand.u32 4294901760, %v25977_v0  ;;  %v29899_v12 = vand.u32 4294901760, %v26050_v34 }
 0x529   :  { %22080 = vmatprep.subr.bf16.mxu1 %v25598_v60 }
 0x52a   :  { %v25979_v32 = vsub.f32 %v15627_v5, %v4986_v59  ;;  %v5107_v22 = vsub.f32 %v25977_v0, %v5106_v36  ;;  %v29900_v5 = vand.u32 4294901760, %v26027_v19  ;;  %v5086_v25 = vsub.f32 %v26050_v34, %v29899_v12 }
 0x52c   :  { %22082 = vmatpush3.bf16.msra.mxu1 %v25598_v60  ;;  %v15628_v60 = vld [vmem:[%s29845_s3 + $0x110] sm:$0xff]  ;;  %v5113_v21 = vand.u32 4294901760, %v25979_v32  ;;  %v5108_v41 = vand.u32 4294901760, %v5107_v22  ;;  %v5129_v22 = vand.u32 4294901760, %v5128_v40  ;;  %v26116_v40 = vsub.f32 %v25959_v49, %v5013_v35 }
 0x52d   :  { %22084 = vmatprep.subr.bf16.mxu1 %v25614_v47  ;;  %v4989_v29 = vand.u32 4294901760, %v15628_v60  ;;  %v5087_v12 = vand.u32 4294901760, %v5086_v25 }
 0x52e   :  { %v5114_v9 = vsub.f32 %v25979_v32, %v5113_v21 }
 0x52f   :  { %v26014_v27 = vsub.f32 %v15628_v60, %v4989_v29  ;;  %v26062_v60 = vpack.c.bf16 %v5028_v28, %v5025_v55 }
 0x530   :  { %22086 = vmatpush3.bf16.msra.mxu1 %v25614_v47  ;;  %v25905_v47 = vpack.c.bf16 %v4986_v59, %v4983_v48  ;;  %v26053_v48 = vsub.f32 %v15632_v17, %v5001_v37  ;;  %v5076_v17 = vsub.f32 %v26027_v19, %v29900_v5 }
 0x531   :  { %22088 = vmatprep.subr.bf16.mxu1 %v25636_v54  ;;  %v5120_v1 = vand.u32 4294901760, %v26014_v27 }
 0x533   :  { %v5121_v4 = vsub.f32 %v26014_v27, %v5120_v1 }
 0x534   :  { %22090 = vmatpush3.bf16.msra.mxu1 %v25636_v54  ;;  %v25920_v54 = vpack.c.bf16 %v4992_v50, %v4989_v29  ;;  %v5115_v29 = vand.u32 4294901760, %v5114_v9  ;;  %v26065_v50 = vsub.f32 %v4964_v24, %v26029_v58  ;;  %v5135_v9 = vsub.f32 %v26044_v18, %v29898_v13 }
 0x535   :  { %22092 = vmatprep.subr.bf16.mxu1 %v25676_v23  ;;  %v5122_v24 = vand.u32 4294901760, %v5121_v4 }
 0x538   :  { %22094 = vmatpush3.bf16.msra.mxu1 %v25676_v23  ;;  %v15633_v23 = vld [vmem:[%s29845_s3 + $0x138] sm:$0xff] }
 0x539   :  { %22096 = vmatprep.subr.bf16.mxu1 %v25905_v47  ;;  %v5004_v51 = vand.u32 4294901760, %v15633_v23 }
 0x53b   :  { %18688 = vmatmul.mubr.f32.vlgmr.msra.gmra.mrb[4].mxu1 %v25604_v31  ;;  %v25947_v31 = vld [vmem:[%s29845_s3 + $0x148] sm:$0xff]  ;;  %v26055_v59 = vsub.f32 %v15633_v23, %v5004_v51  ;;  %v29896_v23 = vand.u32 4294901760, %v26053_v48 }
 0x53c   :  { %18690 = vmatprep.mubr.f32.mxu1 %v25630_v56  ;;  %22098 = vmatpush3.bf16.msra.mxu1 %v25905_v47  ;;  %v25952_v56 = vpack.c.bf16 %v5004_v51, %v5001_v37  ;;  %v5010_v42 = vand.u32 4294901760, %v25947_v31  ;;  %v22127_v51 = vpack.c.bf16 %v5115_v29, %v5108_v41  ;;  %v5142_v41 = vsub.f32 %v26047_v45, %v29897_v61 }
 0x53d   :  { %22100 = vmatprep.subr.bf16.mxu1 %v25920_v54  ;;  %v29895_v37 = vand.u32 4294901760, %v26055_v59  ;;  %v5162_v29 = vand.u32 4294901760, %v26087_v63  ;;  %v5136_v61 = vand.u32 4294901760, %v5135_v9 }
 0x53e   :  { %v25986_v3 = vpack.c.bf16 %v5010_v42, %v5007_v8  ;;  %v26092_v44 = vsub.f32 %v25947_v31, %v5010_v42  ;;  %v5077_v8 = vand.u32 4294901760, %v5076_v17  ;;  %v5149_v31 = vsub.f32 %v26053_v48, %v29896_v23 }
 0x53f   :  { %18691 = vmatmul.mubr.f32.gmra.mrb[6].mxu1 %v25641_v15  ;;  %v25964_v15 = vld [vmem:[%s29845_s3 + $0x158] sm:$0xff]  ;;  %v5156_v42 = vsub.f32 %v26055_v59, %v29895_v37  ;;  %v22131_v23 = vpack.c.bf16 %v5129_v22, %v5122_v24  ;;  %v5143_v13 = vand.u32 4294901760, %v5142_v41  ;;  %v5163_v49 = vsub.f32 %v26087_v63, %v5162_v29 }
 0x540   :  { %22102 = vmatpush3.bf16.msra.mxu1 %v25920_v54  ;;  %18725 = vmatprep.mubr.f32.mxu1 %v5067_v26  ;;  %v5016_v10 = vand.u32 4294901760, %v25964_v15  ;;  %v5095_v26 = vand.u32 4294901760, %v26065_v50  ;;  %v5169_v4 = vand.u32 4294901760, %v26092_v44  ;;  %v5150_v5 = vand.u32 4294901760, %v5149_v31 }
 0x541   :  { %22104 = vmatprep.subr.bf16.mxu1 %v25937_v52  ;;  %v5157_v46 = vand.u32 4294901760, %v5156_v42  ;;  %v22135_v22 = vpack.c.bf16 %v5143_v13, %v5136_v61  ;;  %v5164_v41 = vand.u32 4294901760, %v5163_v49 }
 0x542   :  { %v26002_v39 = vpack.c.bf16 %v5016_v10, %v5013_v35  ;;  %v26121_v17 = vsub.f32 %v25964_v15, %v5016_v10  ;;  %v5096_v37 = vsub.f32 %v26065_v50, %v5095_v26  ;;  %v5170_v15 = vsub.f32 %v26092_v44, %v5169_v4 }
 0x543   :  { %v5176_v35 = vand.u32 4294901760, %v26116_v40  ;;  %v22139_v9 = vpack.c.bf16 %v5157_v46, %v5150_v5  ;;  %v26161_v46 = vsub.f32 %v26012_v57, %v5028_v28 }
 0x544   :  { %22106 = vmatpush3.bf16.msra.mxu1 %v25937_v52  ;;  %v5183_v10 = vand.u32 4294901760, %v26121_v17  ;;  %v5097_v24 = vand.u32 4294901760, %v5096_v37  ;;  %v5171_v25 = vand.u32 4294901760, %v5170_v15 }
 0x545   :  { %22108 = vmatprep.subr.bf16.mxu1 %v25952_v56  ;;  %v5177_v13 = vsub.f32 %v26116_v40, %v5176_v35 }
 0x546   :  { %v22143_v5 = vpack.c.bf16 %v5171_v25, %v5164_v41  ;;  %v22159_v41 = vpack.c.bf16 %v25979_v32, %v25977_v0  ;;  %v22163_v25 = vpack.c.bf16 %v26016_v16, %v26014_v27  ;;  %v30088_v0 = vand.u32 4294901760, %v26044_v18 }
 0x547   :  { %v5178_v61 = vand.u32 4294901760, %v5177_v13  ;;  %v22167_v13 = vpack.c.bf16 %v26047_v45, %v26044_v18  ;;  %v30089_v32 = vand.u32 4294901760, %v26047_v45  ;;  %v30091_v27 = vand.u32 4294901760, %v26055_v59 }
 0x548   :  { %22110 = vmatpush3.bf16.msra.mxu1 %v25952_v56 }
 0x549   :  { %22112 = vmatprep.subr.bf16.mxu1 %v25986_v3 }
 0x54c   :  { %22114 = vmatpush3.bf16.msra.mxu1 %v25986_v3 }
 0x54d   :  { %22116 = vmatprep.subr.bf16.mxu1 %v26002_v39 }
 0x550   :  { %22118 = vmatpush3.bf16.msra.mxu1 %v26002_v39 }
 0x551   :  { %22120 = vmatprep.subr.bf16.mxu1 %v26024_v20 }
 0x554   :  { %22122 = vmatpush3.bf16.msra.mxu1 %v26024_v20 }
 0x555   :  { %22124 = vmatprep.subr.bf16.mxu1 %v26062_v60 }
 0x558   :  { %22126 = vmatpush3.bf16.msra.mxu1 %v26062_v60 }
 0x559   :  { %22128 = vmatprep.subr.bf16.mxu1 %v22127_v51 }
 0x55b   :  { %18726 = vmatmul.mubr.f32.vlgmr.msra.gmra.mrb[4].mxu1 %v5077_v8 }
 0x55c   :  { %18728 = vmatprep.mubr.f32.mxu1 %v5087_v12  ;;  %22130 = vmatpush3.bf16.msra.mxu1 %v22127_v51  ;;  %v26137_v12 = vsub.f32 %v25970_v53, %v5019_v7  ;;  %v26142_v51 = vsub.f32 %v25975_v62, %v5022_v14  ;;  %v5184_v53 = vsub.f32 %v26121_v17, %v5183_v10 }
 0x55d   :  { %22132 = vmatprep.subr.bf16.mxu1 %v22131_v23  ;;  %v26156_v14 = vsub.f32 %v26007_v2, %v5025_v55  ;;  %v5211_v55 = vand.u32 4294901760, %v26161_v46 }
 0x55e   :  { %v5190_v7 = vand.u32 4294901760, %v26137_v12  ;;  %v5197_v62 = vand.u32 4294901760, %v26142_v51 }
 0x55f   :  { %18729 = vmatmul.mubr.f32.gmra.mrb[6].mxu1 %v5097_v24  ;;  %v5204_v2 = vand.u32 4294901760, %v26156_v14  ;;  %v5212_v49 = vsub.f32 %v26161_v46, %v5211_v55 }
 0x560   :  { %22134 = vmatpush3.bf16.msra.mxu1 %v22131_v23  ;;  %18763 = vmatprep.mubr.f32.mxu1 %v25890_v38  ;;  %v5185_v23 = vand.u32 4294901760, %v5184_v53  ;;  %v5191_v37 = vsub.f32 %v26137_v12, %v5190_v7  ;;  %v5198_v8 = vsub.f32 %v26142_v51, %v5197_v62  ;;  %v22171_v53 = vpack.c.bf16 %v26055_v59, %v26053_v48  ;;  %v5799_v59 = vld [vmem:[%s29841_s7 + $0x28] sm:$0xff] }
 0x561   :  { %22136 = vmatprep.subr.bf16.mxu1 %v22135_v22  ;;  %v5205_v42 = vsub.f32 %v26156_v14, %v5204_v2  ;;  %v22247_v18 = vpack.c.bf16 %v5197_v62, %v5190_v7  ;;  %v22251_v45 = vpack.c.bf16 %v5211_v55, %v5204_v2  ;;  %v5804_v7 = vld [vmem:[%s29841_s7 + $0x50] sm:$0xff]  ;;  %v5805_v62 = vld [vmem:[%s29841_s7 + $0x58] sm:$0xff] }
 0x562   :  { %v22147_v57 = vpack.c.bf16 %v5185_v23, %v5178_v61  ;;  %v5192_v28 = vand.u32 4294901760, %v5191_v37  ;;  %v5199_v31 = vand.u32 4294901760, %v5198_v8  ;;  %v22179_v61 = vpack.c.bf16 %v26121_v17, %v26116_v40  ;;  %v5802_v17 = vld [vmem:[%s29841_s7 + $0x40] sm:$0xff] }
 0x563   :  { %v5206_v24 = vand.u32 4294901760, %v5205_v42  ;;  %v22183_v23 = vpack.c.bf16 %v26142_v51, %v26137_v12  ;;  %v22187_v37 = vpack.c.bf16 %v26161_v46, %v26156_v14  ;;  %v5841_v14 = vand.u32 4294901760, %v5804_v7 }
 0x564   :  { %22138 = vmatpush3.bf16.msra.mxu1 %v22135_v22  ;;  %v22151_v15 = vpack.c.bf16 %v5199_v31, %v5192_v28  ;;  %v5213_v22 = vand.u32 4294901760, %v5212_v49  ;;  %v30087_v28 = vand.u32 4294901760, %v26050_v34  ;;  %v5844_v46 = vand.u32 4294901760, %v5805_v62  ;;  %v5806_v49 = vld [vmem:[%s29841_s7 + $0x60] sm:$0xff] }
 0x565   :  { %22140 = vmatprep.subr.bf16.mxu1 %v22139_v9 }
 0x568   :  { %22142 = vmatpush3.bf16.msra.mxu1 %v22139_v9  ;;  %v22155_v9 = vpack.c.bf16 %v5213_v22, %v5206_v24  ;;  %v5808_v24 = vld [vmem:[%s29841_s7 + $0x70] sm:$0xff] }
 0x569   :  { %22144 = vmatprep.subr.bf16.mxu1 %v22143_v5 }
 0x56c   :  { %22146 = vmatpush3.bf16.msra.mxu1 %v22143_v5  ;;  %v22175_v5 = vpack.c.bf16 %v26092_v44, %v26087_v63  ;;  %v5800_v63 = vld [vmem:[%s29841_s7 + $0x30] sm:$0xff]  ;;  %v5801_v44 = vld [vmem:[%s29841_s7 + $0x38] sm:$0xff] }
 0x56d   :  { %22148 = vmatprep.subr.bf16.mxu1 %v22147_v57 }
 0x570   :  { %22150 = vmatpush3.bf16.msra.mxu1 %v22147_v57  ;;  %v30086_v57 = vand.u32 4294901760, %v26027_v19 }
 0x571   :  { %22152 = vmatprep.subr.bf16.mxu1 %v22151_v15 }
 0x574   :  { %22154 = vmatpush3.bf16.msra.mxu1 %v22151_v15  ;;  %v5807_v15 = vld [vmem:[%s29841_s7 + $0x68] sm:$0xff] }
 0x575   :  { %22156 = vmatprep.subr.bf16.mxu1 %v22155_v9 }
 0x578   :  { %22158 = vmatpush3.bf16.msra.mxu1 %v22155_v9 }
 0x579   :  { %22160 = vmatprep.subr.bf16.mxu1 %v22159_v41 }
 0x57b   :  { %18764 = vmatmul.mubr.f32.vlgmr.msra.gmra.mrb[4].mxu1 %v25992_v43 }
 0x57c   :  { %18766 = vmatprep.mubr.f32.mxu1 %v26018_v33  ;;  %22162 = vmatpush3.bf16.msra.mxu1 %v22159_v41 }
 0x57d   :  { %22164 = vmatprep.subr.bf16.mxu1 %v22163_v25 }
 0x57f   :  { %18767 = vmatmul.mubr.f32.gmra.mrb[6].mxu1 %v26029_v58 }
 0x580   :  { %22166 = vmatpush3.bf16.msra.mxu1 %v22163_v25  ;;  %18801 = vmatprep.mubr.f32.mxu1 %v25901_v30  ;;  %v22223_v30 = vpack.c.bf16 %v5113_v21, %v5106_v36  ;;  %v22231_v36 = vpack.c.bf16 %v30089_v32, %v30088_v0  ;;  %v30090_v21 = vand.u32 4294901760, %v26053_v48  ;;  %v5798_v48 = vld [vmem:[%s29841_s7 + $0x20] sm:$0xff] }
 0x581   :  { %22168 = vmatprep.subr.bf16.mxu1 %v22167_v13 }
 0x584   :  { %22170 = vmatpush3.bf16.msra.mxu1 %v22167_v13  ;;  %v5809_v13 = vld [vmem:[%s29841_s7 + $0x78] sm:$0xff] }
 0x585   :  { %22172 = vmatprep.subr.bf16.mxu1 %v22171_v53 }
 0x588   :  { %22174 = vmatpush3.bf16.msra.mxu1 %v22171_v53 }
 0x589   :  { %22176 = vmatprep.subr.bf16.mxu1 %v22175_v5 }
 0x58c   :  { %22178 = vmatpush3.bf16.msra.mxu1 %v22175_v5 }
 0x58d   :  { %22180 = vmatprep.subr.bf16.mxu1 %v22179_v61 }
 0x590   :  { %22182 = vmatpush3.bf16.msra.mxu1 %v22179_v61  ;;  %v26371_v61 = vpack.c.bf16 %v5844_v46, %v5841_v14 }
 0x591   :  { %22184 = vmatprep.subr.bf16.mxu1 %v22183_v23 }
 0x594   :  { %22186 = vmatpush3.bf16.msra.mxu1 %v22183_v23  ;;  %v26373_v23 = vsub.f32 %v5804_v7, %v5841_v14 }
 0x595   :  { %22188 = vmatprep.subr.bf16.mxu1 %v22187_v37 }
 0x598   :  { %22190 = vmatpush3.bf16.msra.mxu1 %v22187_v37  ;;  %v26375_v37 = vsub.f32 %v5805_v62, %v5844_v46 }
 0x599   :  { %22192 = vmatprep.subr.bf16.mxu1 %v25905_v47 }
 0x59b   :  { %18802 = vmatmul.mubr.f32.vlgmr.msra.gmra.mrb[4].mxu1 %v26027_v19  ;;  %v22239_v19 = vpack.c.bf16 %v5169_v4, %v5162_v29  ;;  %v5829_v29 = vand.u32 4294901760, %v5800_v63  ;;  %v5832_v4 = vand.u32 4294901760, %v5801_v44 }
 0x59c   :  { %18804 = vmatprep.mubr.f32.mxu1 %v26050_v34  ;;  %22194 = vmatpush3.bf16.msra.mxu1 %v25905_v47 }
 0x59d   :  { %22196 = vmatprep.subr.bf16.mxu1 %v25920_v54  ;;  %v26319_v40 = vpack.c.bf16 %v5832_v4, %v5829_v29  ;;  %v26360_v41 = vsub.f32 %v5800_v63, %v5829_v29  ;;  %v26362_v25 = vsub.f32 %v5801_v44, %v5832_v4 }
 0x59f   :  { %18805 = vmatmul.mubr.f32.gmra.mrb[6].mxu1 %v26065_v50  ;;  %v5826_v50 = vand.u32 4294901760, %v5799_v59  ;;  %v29911_v4 = vand.u32 4294901760, %v26360_v41 }
 0x5a0   :  { %22198 = vmatpush3.bf16.msra.mxu1 %v25920_v54  ;;  %18839 = vmatprep.mubr.f32.mxu1 %v5065_v11  ;;  %v30085_v11 = vand.u32 4294901760, %v26016_v16  ;;  %v22235_v16 = vpack.c.bf16 %v30091_v27, %v30090_v21 }
 0x5a1   :  { %22200 = vmatprep.subr.bf16.mxu1 %v25937_v52  ;;  %v26358_v9 = vsub.f32 %v5799_v59, %v5826_v50 }
 0x5a2   :  { %v22227_v8 = vpack.c.bf16 %v30085_v11, %v5120_v1  ;;  %v22243_v1 = vpack.c.bf16 %v5183_v10, %v5176_v35  ;;  %v5803_v35 = vld [vmem:[%s29841_s7 + $0x48] sm:$0xff]  ;;  %v5835_v10 = vand.u32 4294901760, %v5802_v17  ;;  %v5850_v11 = vand.u32 4294901760, %v5807_v15 }
 0x5a3   :  { %v5838_v12 = vand.u32 4294901760, %v5803_v35  ;;  %v29912_v59 = vand.u32 4294901760, %v26358_v9 }
 0x5a4   :  { %22202 = vmatpush3.bf16.msra.mxu1 %v25937_v52  ;;  %v26367_v53 = vsub.f32 %v5802_v17, %v5835_v10  ;;  %v26383_v32 = vsub.f32 %v5807_v15, %v5850_v11  ;;  %v29910_v17 = vand.u32 4294901760, %v26362_v25 }
 0x5a5   :  { %22204 = vmatprep.subr.bf16.mxu1 %v25952_v56  ;;  %v26329_v51 = vpack.c.bf16 %v5838_v12, %v5835_v10  ;;  %v26369_v5 = vsub.f32 %v5803_v35, %v5838_v12  ;;  %v5940_v63 = vsub.f32 %v26358_v9, %v29912_v59  ;;  %v5947_v10 = vsub.f32 %v26360_v41, %v29911_v4 }
 0x5a6   :  { %v5954_v12 = vsub.f32 %v26362_v25, %v29910_v17  ;;  %v29909_v14 = vand.u32 4294901760, %v26367_v53 }
 0x5a7   :  { %v5941_v29 = vand.u32 4294901760, %v5940_v63  ;;  %v5948_v7 = vand.u32 4294901760, %v5947_v10  ;;  %v29908_v46 = vand.u32 4294901760, %v26369_v5 }
 0x5a8   :  { %22206 = vmatpush3.bf16.msra.mxu1 %v25952_v56  ;;  %v5955_v62 = vand.u32 4294901760, %v5954_v12  ;;  %v5961_v15 = vsub.f32 %v26367_v53, %v29909_v14 }
 0x5a9   :  { %22208 = vmatprep.subr.bf16.mxu1 %v25986_v3 }
 0x5ac   :  { %22210 = vmatpush3.bf16.msra.mxu1 %v25986_v3 }
 0x5ad   :  { %22212 = vmatprep.subr.bf16.mxu1 %v26002_v39 }
 0x5b0   :  { %22214 = vmatpush3.bf16.msra.mxu1 %v26002_v39 }
 0x5b1   :  { %22216 = vmatprep.subr.bf16.mxu1 %v26024_v20 }
 0x5b4   :  { %22218 = vmatpush3.bf16.msra.mxu1 %v26024_v20 }
 0x5b5   :  { %22220 = vmatprep.subr.bf16.mxu1 %v26062_v60 }
 0x5b8   :  { %22222 = vmatpush3.bf16.msra.mxu1 %v26062_v60 }
 0x5b9   :  { %22224 = vmatprep.subr.bf16.mxu1 %v22223_v30 }
 0x5bb   :  { %18840 = vmatmul.mubr.f32.vlgmr.msra.gmra.mrb[4].mxu1 %v30086_v57  ;;  %v5856_v57 = vand.u32 4294901760, %v5809_v13 }
 0x5bc   :  { %18842 = vmatprep.mubr.f32.mxu1 %v30087_v28  ;;  %22226 = vmatpush3.bf16.msra.mxu1 %v22223_v30  ;;  %v5847_v30 = vand.u32 4294901760, %v5806_v49 }
 0x5bd   :  { %22228 = vmatprep.subr.bf16.mxu1 %v22227_v8  ;;  %v26387_v21 = vsub.f32 %v5809_v13, %v5856_v57  ;;  %v5962_v13 = vand.u32 4294901760, %v5961_v15 }
 0x5be   :  { %v26379_v28 = vpack.c.bf16 %v5850_v11, %v5847_v30  ;;  %v26381_v0 = vsub.f32 %v5806_v49, %v5847_v30  ;;  %v26435_v49 = vpack.c.bf16 %v5955_v62, %v5948_v7  ;;  %v29907_v11 = vand.u32 4294901760, %v26373_v23 }
 0x5bf   :  { %18843 = vmatmul.mubr.f32.gmra.mrb[6].mxu1 %v5095_v26  ;;  %v29902_v10 = vand.u32 4294901760, %v26387_v21 }
 0x5c0   :  { %22230 = vmatpush3.bf16.msra.mxu1 %v22227_v8  ;;  %18877 = vmatprep.mubr.f32.mxu1 %v25890_v38  ;;  %v5853_v8 = vand.u32 4294901760, %v5808_v24 }
 0x5c1   :  { %22232 = vmatprep.subr.bf16.mxu1 %v22231_v36  ;;  %v6010_v62 = vsub.f32 %v26387_v21, %v29902_v10 }
 0x5c4   :  { %22234 = vmatpush3.bf16.msra.mxu1 %v22231_v36  ;;  %v26385_v36 = vsub.f32 %v5808_v24, %v5853_v8  ;;  %v5968_v24 = vsub.f32 %v26369_v5, %v29908_v46 }
 0x5c5   :  { %22236 = vmatprep.subr.bf16.mxu1 %v22235_v16 }
 0x5c6   :  { %v5969_v30 = vand.u32 4294901760, %v5968_v24  ;;  %v6011_v24 = vand.u32 4294901760, %v6010_v62 }
 0x5c8   :  { %22238 = vmatpush3.bf16.msra.mxu1 %v22235_v16 }
 0x5c9   :  { %22240 = vmatprep.subr.bf16.mxu1 %v22239_v19 }
 0x5cc   :  { %22242 = vmatpush3.bf16.msra.mxu1 %v22239_v19  ;;  %v26392_v19 = vpack.c.bf16 %v5856_v57, %v5853_v8  ;;  %v29906_v8 = vand.u32 4294901760, %v26375_v37  ;;  %v26445_v57 = vpack.c.bf16 %v5969_v30, %v5962_v13 }
 0x5cd   :  { %22244 = vmatprep.subr.bf16.mxu1 %v22243_v1 }
 0x5d0   :  { %22246 = vmatpush3.bf16.msra.mxu1 %v22243_v1 }
 0x5d1   :  { %22248 = vmatprep.subr.bf16.mxu1 %v22247_v18 }
 0x5d4   :  { %22250 = vmatpush3.bf16.msra.mxu1 %v22247_v18 }
 0x5d5   :  { %22252 = vmatprep.subr.bf16.mxu1 %v22251_v45 }
 0x5d8   :  { %22254 = vmatpush3.bf16.msra.mxu1 %v22251_v45 }
 0x5d9   :  { %22256 = vmatprep.subr.bf16.mxu1 %v25905_v47 }
 0x5db   :  { %18878 = vmatmul.mubr.f32.vlgmr.msra.gmra.mrb[4].mxu1 %v25992_v43 }
 0x5dc   :  { %18880 = vmatprep.mubr.f32.mxu1 %v26018_v33  ;;  %22258 = vmatpush3.bf16.msra.mxu1 %v25905_v47  ;;  %v30093_v47 = vmov 0.0  }
 0x5dd   :  { %22260 = vmatprep.subr.bf16.mxu1 %v25920_v54 }
 0x5df   :  { %18881 = vmatmul.mubr.f32.gmra.mrb[6].mxu1 %v26029_v58 }
 0x5e0   :  { %22262 = vmatpush3.bf16.msra.mxu1 %v25920_v54  ;;  %18915 = vmatprep.mubr.f32.mxu1 %v25890_v38  ;;  %v30092_v38 = vmov 0.0|0.0   ;;  %v5794_v54 = vld [vmem:[%s29841_s7] sm:$0xff] }
 0x5e1   :  { %22264 = vmatprep.subr.bf16.mxu1 %v25937_v52 }
 0x5e4   :  { %22266 = vmatpush3.bf16.msra.mxu1 %v25937_v52  ;;  %v5795_v52 = vld [vmem:[%s29841_s7 + $0x8] sm:$0xff] }
 0x5e5   :  { %22268 = vmatprep.subr.bf16.mxu1 %v25952_v56 }
 0x5e8   :  { %22270 = vmatpush3.bf16.msra.mxu1 %v25952_v56  ;;  %v5811_v56 = vand.u32 4294901760, %v5794_v54 }
 0x5e9   :  { %22272 = vmatprep.subr.bf16.mxu1 %v25986_v3 }
 0x5ea   :  { %v26339_v2 = vsub.f32 %v5794_v54, %v5811_v56 }
 0x5ec   :  { %22274 = vmatpush3.bf16.msra.mxu1 %v25986_v3  ;;  %v5814_v3 = vand.u32 4294901760, %v5795_v52  ;;  %v29917_v27 = vand.u32 4294901760, %v26339_v2 }
 0x5ed   :  { %22276 = vmatprep.subr.bf16.mxu1 %v26002_v39 }
 0x5ee   :  { %v26341_v55 = vsub.f32 %v5795_v52, %v5814_v3  ;;  %v5905_v1 = vsub.f32 %v26339_v2, %v29917_v27 }
 0x5f0   :  { %22278 = vmatpush3.bf16.msra.mxu1 %v26002_v39  ;;  %v26289_v39 = vpack.c.bf16 %v5814_v3, %v5811_v56  ;;  %v29916_v16 = vand.u32 4294901760, %v26341_v55  ;;  %v5906_v45 = vand.u32 4294901760, %v5905_v1  ;;  %v5975_v1 = vsub.f32 %v26373_v23, %v29907_v11 }
 0x5f1   :  { %22280 = vmatprep.subr.bf16.mxu1 %v26024_v20  ;;  %v22336_v30 = vpack.c.bf16 %v26341_v55, %v26339_v2 }
 0x5f2   :  { %22289 = vmatpush3.bf16.msra.mxu0 %v26289_v39  ;;  %v5912_v18 = vsub.f32 %v26341_v55, %v29916_v16 }
 0x5f3   :  { %22290 = vmatprep.subr.bf16.mxu0 %v30092_v38 }
 0x5f4   :  { %22282 = vmatpush3.bf16.msra.mxu1 %v26024_v20  ;;  %v5913_v54 = vand.u32 4294901760, %v5912_v18  ;;  %v5982_v18 = vsub.f32 %v26375_v37, %v29906_v8 }
 0x5f5   :  { %22284 = vmatprep.subr.bf16.mxu1 %v26062_v60 }
 0x5f6   :  { %v26404_v3 = vpack.c.bf16 %v5913_v54, %v5906_v45  ;;  %v5976_v45 = vand.u32 4294901760, %v5975_v1  ;;  %v5983_v54 = vand.u32 4294901760, %v5982_v18 }
 0x5f8   :  { %22286 = vmatpush3.bf16.msra.mxu1 %v26062_v60  ;;  %v5823_v60 = vand.u32 4294901760, %v5798_v48 }
 0x5f9   :  { %22683 = vmatprep.subr.bf16.mxu1 %v30092_v38 }
 0x5fa   :  { %v26309_v26 = vpack.c.bf16 %v5826_v50, %v5823_v60  ;;  %v26356_v22 = vsub.f32 %v5798_v48, %v5823_v60 }
 0x5fb   :  { %18916 = vmatmul.mubr.f32.vlgmr.msra.gmra.mrb[4].mxu1 %v25992_v43  ;;  %v5796_v43 = vld [vmem:[%s29841_s7 + $0x10] sm:$0xff] }
 0x5fc   :  { %18918 = vmatprep.mubr.f32.mxu1 %v26018_v33  ;;  %v5797_v33 = vld [vmem:[%s29841_s7 + $0x18] sm:$0xff]  ;;  %v5817_v20 = vand.u32 4294901760, %v5796_v43  ;;  %v29913_v48 = vand.u32 4294901760, %v26356_v22  ;;  %v22342_v18 = vpack.c.bf16 %v26358_v9, %v26356_v22 }
 0x5fe   :  { %v26343_v31 = vsub.f32 %v5796_v43, %v5817_v20  ;;  %v5933_v50 = vsub.f32 %v26356_v22, %v29913_v48 }
 0x5ff   :  { %18919 = vmatmul.mubr.f32.gmra.mrb[6].mxu1 %v26029_v58  ;;  %v5820_v58 = vand.u32 4294901760, %v5797_v33 }
 0x600   :  { %19586 = vmatprep.mubr.msk.f32.mxu1 %vm23984_vm1, %v30093_v47  ;;  %v29915_v52 = vand.u32 4294901760, %v26343_v31  ;;  %v5934_v44 = vand.u32 4294901760, %v5933_v50 }
 0x601   :  { %v26299_v34 = vpack.c.bf16 %v5820_v58, %v5817_v20  ;;  %v26345_v42 = vsub.f32 %v5797_v33, %v5820_v58 }
 0x602   :  { %v5919_v43 = vsub.f32 %v26343_v31, %v29915_v52  ;;  %v26425_v35 = vpack.c.bf16 %v5941_v29, %v5934_v44  ;;  %v29903_v29 = vand.u32 4294901760, %v26385_v36 }
 0x603   :  { %22292 = vmatpush3.bf16.msra.mxu0 %v26299_v34  ;;  %v29914_v56 = vand.u32 4294901760, %v26345_v42  ;;  %v22339_v1 = vpack.c.bf16 %v26345_v42, %v26343_v31 }
 0x604   :  { %22293 = vmatprep.subr.bf16.mxu0 %v30092_v38  ;;  %v5920_v20 = vand.u32 4294901760, %v5919_v43  ;;  %v29905_v43 = vand.u32 4294901760, %v26381_v0  ;;  %v6003_v7 = vsub.f32 %v26385_v36, %v29903_v29 }
 0x605   :  { %v5926_v33 = vsub.f32 %v26345_v42, %v29914_v56 }
 0x606   :  { %v6004_v15 = vand.u32 4294901760, %v6003_v7 }
 0x607   :  { %22295 = vmatpush3.bf16.msra.mxu0 %v26309_v26  ;;  %v5927_v58 = vand.u32 4294901760, %v5926_v33  ;;  %v29904_v33 = vand.u32 4294901760, %v26383_v32 }
 0x608   :  { %22296 = vmatprep.subr.bf16.mxu0 %v30092_v38  ;;  %v26473_v13 = vpack.c.bf16 %v6011_v24, %v6004_v15 }
 0x609   :  { %v26415_v60 = vpack.c.bf16 %v5927_v58, %v5920_v20  ;;  %v26455_v20 = vpack.c.bf16 %v5983_v54, %v5976_v45  ;;  %v5989_v58 = vsub.f32 %v26381_v0, %v29905_v43  ;;  %v5996_v50 = vsub.f32 %v26383_v32, %v29904_v33 }
 0x60a   :  { %v22345_v45 = vpack.c.bf16 %v26362_v25, %v26360_v41 }
 0x60b   :  { %22298 = vmatpush3.bf16.msra.mxu0 %v26319_v40  ;;  %v5990_v63 = vand.u32 4294901760, %v5989_v58  ;;  %v5997_v44 = vand.u32 4294901760, %v5996_v50 }
 0x60c   :  { %22299 = vmatprep.subr.bf16.mxu0 %v30092_v38 }
 0x60d   :  { %v26465_v12 = vpack.c.bf16 %v5997_v44, %v5990_v63  ;;  %v15642_v44 = vld [vmem:[%s29842_s6 + $0x3] ss:$0 sm:$0xff] }
 0x60f   :  { %22301 = vmatpush3.bf16.msra.mxu0 %v26329_v51 }
 0x610   :  { %22302 = vmatprep.subr.bf16.mxu0 %v30092_v38 }
 0x613   :  { %22304 = vmatpush3.bf16.msra.mxu0 %v26371_v61 }
 0x614   :  { %22305 = vmatprep.subr.bf16.mxu0 %v30092_v38 }
 0x617   :  { %22307 = vmatpush3.bf16.msra.mxu0 %v26379_v28 }
 0x618   :  { %22308 = vmatprep.subr.bf16.mxu0 %v30092_v38 }
 0x61b   :  { %22310 = vmatpush3.bf16.msra.mxu0 %v26392_v19 }
 0x61c   :  { %22311 = vmatprep.subr.bf16.mxu0 %v30092_v38 }
 0x6ce   :  { %v18917_v7 = vpop.f32.mrb[4].mxu1 }
 0x6cf   :  { %v5762_v62 = vadd.f32 %v18917_v7, %v15642_v44  ;;  %v5730_v15 = vpop.f32.mrb[5].mxu1 }
 0x6d0   :  { %v5761_v24 = vadd.f32 %v15642_v44, %v5730_v15 }
 0x6d1   :  { %v26494_v10 = vmax.f32 %v5762_v62, 0.0 }
 0x6d2   :  { %v26496_v29 = vmax.f32 %v5761_v24, 0.0  ;;  %v18920_v33 = vpop.f32.mrb[6].mxu1 }
 0x6d3   :  { %v5764_v43 = vadd.f32 %v18920_v33, %v15642_v44  ;;  %v5742_v8 = vpop.f32.mrb[7].mxu1  ;;  %v5781_v11 = vmul.f32 %v26494_v10, %v26494_v10 }
 0x6d4   :  { %v5780_v46 = vmul.f32 %v26496_v29, %v26496_v29  ;;  %v5763_v14 = vadd.f32 %v15642_v44, %v5742_v8  ;;  %v5771_v17 = vadd.f32 %v26494_v10, %v26496_v29 }
 0x6d5   :  { %v26504_v7 = vmax.f32 %v5764_v43, 0.0 }
 0x6d6   :  { %v26506_v15 = vmax.f32 %v5763_v14, 0.0  ;;  %v5784_v62 = vadd.f32 %v5781_v11, %v5780_v46 }
 0x6d7   :  { %v5783_v4 = vmul.f32 %v26504_v7, %v26504_v7 }
 0x6d8   :  { %v5772_v24 = vadd.f32 %v5771_v17, %v26506_v15  ;;  %v5782_v33 = vmul.f32 %v26506_v15, %v26506_v15 }
 0x6da   :  { %v5773_v59 = vadd.f32 %v5772_v24, %v26504_v7  ;;  %v5785_v48 = vadd.f32 %v5784_v62, %v5782_v33 }
 0x6dc   :  { %v5774_v8 = vrot.slane %v5773_v59, 4  ;;  %v5786_v44 = vadd.f32 %v5785_v48, %v5783_v4  ;;  %v30100_v4 = vand.u32 4294901760, %v26343_v31  ;;  %v30105_v31 = vand.u32 4294901760, %v26362_v25 }
 0x6dd   :  { %v30111_v25 = vand.u32 4294901760, %v26383_v32 }
 0x6de   :  { %v5775_v56 = vadd.f32 %v5774_v8, %v5773_v59  ;;  %v5787_v52 = vrot.slane %v5786_v44, 4  ;;  %v30099_v59 = vand.u32 4294901760, %v26341_v55  ;;  %v30103_v55 = vand.u32 4294901760, %v26358_v9 }
 0x6df   :  { %v30109_v9 = vand.u32 4294901760, %v26375_v37 }
 0x6e0   :  { %v5776_v43 = vrot.slane %v5775_v56, 2  ;;  %v5788_v16 = vadd.f32 %v5787_v52, %v5786_v44  ;;  %v30096_v52 = vpack.c.bf16 %v26383_v32, %v26381_v0  ;;  %v6980_v44 = vld [vmem:[%s29846_s4 + $0x30] sm:$0xff] }
 0x6e2   :  { %v5777_v14 = vadd.f32 %v5776_v43, %v5775_v56  ;;  %v5789_v27 = vrot.slane %v5788_v16, 2  ;;  %v30097_v56 = vpack.c.bf16 %v26387_v21, %v26385_v36  ;;  %v6981_v43 = vld [vmem:[%s29846_s4 + $0x38] sm:$0xff] }
 0x6e4   :  { %v5778_v46 = vrot.slane %v5777_v14, 1  ;;  %v5790_v11 = vadd.f32 %v5789_v27, %v5788_v16  ;;  %v30094_v27 = vpack.c.bf16 %v26369_v5, %v26367_v53  ;;  %v30095_v16 = vpack.c.bf16 %v26375_v37, %v26373_v23  ;;  %v6974_v37 = vld [vmem:[%s29846_s4] sm:$0xff] }
 0x6e5   :  { %v8126_v32 = vand.u32 4294901760, %v6974_v37 }
 0x6e6   :  { %v5791_v17 = vrot.slane %v5790_v11, 1  ;;  %v5779_v63 = vadd.f32 %v5778_v46, %v5777_v14  ;;  %v6982_v14 = vld [vmem:[%s29846_s4 + $0x40] sm:$0xff] }
 0x6e8   :  { %v5792_v50 = vadd.f32 %v5791_v17, %v5790_v11  ;;  %v26687_v11 = vsub.f32 %v6974_v37, %v8126_v32 }
 0x6ea   :  { %v5793_v58 = vsel %vm2146_vm2, %v5779_v63, %v5792_v50 }
 0x6eb   :  { %v26515_v54 = vand.u32 4294901760, %v5793_v58 }
 0x6ed   :  { %v5892_v24 = vsub.f32 %v5793_v58, %v26515_v54  ;;  %v6979_v58 = vld [vmem:[%s29846_s4 + $0x28] sm:$0xff] }
 0x6ee   :  { %v8141_v8 = vand.u32 4294901760, %v6979_v58 }
 0x6ef   :  { %v5893_v62 = vand.u32 4294901760, %v5892_v24 }
 0x6f1   :  { %v5894_v33 = vsub.f32 %v5892_v24, %v5893_v62 }
 0x6f3   :  { %v5895_v48 = vand.u32 4294901760, %v5894_v33  ;;  %v6984_v33 = vld [vmem:[%s29846_s4 + $0x50] sm:$0xff] }
 0x6f5   :  { %18954 = vmatmul.mubr.f32.vlgmr.msra.gmra.mrb[4].mxu0 %v5895_v48  ;;  %v6985_v48 = vld [vmem:[%s29846_s4 + $0x58] sm:$0xff] }
 0x6f6   :  { %22313 = vmatpush3.bf16.msra.mxu0 %v26404_v3  ;;  %18988 = vmatprep.mubr.msk.f32.mxu0 %vm23984_vm1, %v30093_v47  ;;  %v30098_v3 = vand.u32 4294901760, %v26339_v2  ;;  %v30102_v2 = vand.u32 4294901760, %v26356_v22  ;;  %v30108_v22 = vand.u32 4294901760, %v26373_v23 }
 0x6f7   :  { %22314 = vmatprep.subr.bf16.mxu0 %v30092_v38 }
 0x6fa   :  { %22316 = vmatpush3.bf16.msra.mxu0 %v26415_v60  ;;  %v22384_v60 = vpack.c.bf16 %v30099_v59, %v30098_v3  ;;  %v26712_v3 = vsub.f32 %v6979_v58, %v8141_v8  ;;  %v8144_v59 = vand.u32 4294901760, %v6980_v44 }
 0x6fb   :  { %22317 = vmatprep.subr.bf16.mxu0 %v30092_v38 }
 0x6fe   :  { %22319 = vmatpush3.bf16.msra.mxu0 %v26425_v35  ;;  %v30101_v35 = vand.u32 4294901760, %v26345_v42 }
 0x6ff   :  { %22320 = vmatprep.subr.bf16.mxu0 %v30092_v38 }
 0x702   :  { %22322 = vmatpush3.bf16.msra.mxu0 %v26435_v49  ;;  %v22387_v49 = vpack.c.bf16 %v30101_v35, %v30100_v4  ;;  %v8150_v4 = vand.u32 4294901760, %v6982_v14 }
 0x703   :  { %22323 = vmatprep.subr.bf16.mxu0 %v30092_v38 }
 0x706   :  { %22325 = vmatpush3.bf16.msra.mxu0 %v26445_v57  ;;  %v22390_v57 = vpack.c.bf16 %v30103_v55, %v30102_v2  ;;  %v8159_v2 = vand.u32 4294901760, %v6985_v48  ;;  %v6987_v55 = vld [vmem:[%s29846_s4 + $0x68] sm:$0xff] }
 0x707   :  { %22326 = vmatprep.subr.bf16.mxu0 %v30092_v38 }
 0x70a   :  { %22328 = vmatpush3.bf16.msra.mxu0 %v26455_v20  ;;  %v30104_v20 = vand.u32 4294901760, %v26360_v41  ;;  %v30110_v41 = vand.u32 4294901760, %v26381_v0  ;;  %v6976_v0 = vld [vmem:[%s29846_s4 + $0x10] sm:$0xff] }
 0x70b   :  { %22329 = vmatprep.subr.bf16.mxu0 %v30092_v38 }
 0x70c   :  { %v22393_v42 = vpack.c.bf16 %v30105_v31, %v30104_v20  ;;  %v26722_v31 = vsub.f32 %v6982_v14, %v8150_v4 }
 0x70e   :  { %22331 = vmatpush3.bf16.msra.mxu0 %v26465_v12  ;;  %v30106_v12 = vand.u32 4294901760, %v26367_v53  ;;  %v30112_v53 = vand.u32 4294901760, %v26385_v36 }
 0x70f   :  { %22332 = vmatprep.subr.bf16.mxu0 %v30092_v38 }
 0x712   :  { %22334 = vmatpush3.bf16.msra.mxu0 %v26473_v13  ;;  %v30107_v13 = vand.u32 4294901760, %v26369_v5  ;;  %v30113_v5 = vand.u32 4294901760, %v26387_v21  ;;  %v6977_v21 = vld [vmem:[%s29846_s4 + $0x18] sm:$0xff] }
 0x713   :  { %22335 = vmatprep.subr.bf16.mxu0 %v30092_v38  ;;  %v8135_v50 = vand.u32 4294901760, %v6977_v21 }
 0x715   :  { %18989 = vmatmul.mubr.f32.vlgmr.msra.gmra.mrb[4].mxu0 %v26515_v54 }
 0x716   :  { %22337 = vmatpush3.bf16.msra.mxu0 %v22336_v30  ;;  %19023 = vmatprep.mubr.msk.f32.mxu0 %vm23984_vm1, %v30093_v47  ;;  %v22396_v30 = vpack.c.bf16 %v30107_v13, %v30106_v12 }
 0x717   :  { %22338 = vmatprep.subr.bf16.mxu0 %v30092_v38 }
 0x71a   :  { %22340 = vmatpush3.bf16.msra.mxu0 %v22339_v1  ;;  %v22399_v1 = vpack.c.bf16 %v30109_v9, %v30108_v22  ;;  %v26731_v22 = vsub.f32 %v6985_v48, %v8159_v2  ;;  %v8165_v9 = vand.u32 4294901760, %v6987_v55 }
 0x71b   :  { %22341 = vmatprep.subr.bf16.mxu0 %v30092_v38 }
 0x71e   :  { %22343 = vmatpush3.bf16.msra.mxu0 %v22342_v18  ;;  %v22402_v18 = vpack.c.bf16 %v30111_v25, %v30110_v41  ;;  %v5769_v25 = vld [vmem:[%s29842_s6 + $0x4] sm:$0x1] }
 0x71f   :  { %22344 = vmatprep.subr.bf16.mxu0 %v30092_v38 }
 0x722   :  { %22346 = vmatpush3.bf16.msra.mxu0 %v22345_v45  ;;  %v22405_v45 = vpack.c.bf16 %v30113_v5, %v30112_v53  ;;  %v26739_v53 = vsub.f32 %v6987_v55, %v8165_v9 }
 0x723   :  { %22347 = vmatprep.subr.bf16.mxu0 %v30092_v38 }
 0x726   :  { %22349 = vmatpush3.bf16.msra.mxu0 %v30094_v27 }
 0x727   :  { %22350 = vmatprep.subr.bf16.mxu0 %v30092_v38 }
 0x72a   :  { %22352 = vmatpush3.bf16.msra.mxu0 %v30095_v16  ;;  %v26704_v16 = vsub.f32 %v6977_v21, %v8135_v50 }
 0x72b   :  { %22353 = vmatprep.subr.bf16.mxu0 %v30092_v38 }
 0x72e   :  { %22355 = vmatpush3.bf16.msra.mxu0 %v30096_v52 }
 0x72f   :  { %22356 = vmatprep.subr.bf16.mxu0 %v30092_v38 }
 0x732   :  { %22358 = vmatpush3.bf16.msra.mxu0 %v30097_v56  ;;  %v6986_v56 = vld [vmem:[%s29846_s4 + $0x60] sm:$0xff] }
 0x733   :  { %22359 = vmatprep.subr.bf16.mxu0 %v30092_v38 }
 0x735   :  { %19024 = vmatmul.mubr.f32.vlgmr.msra.gmra.mrb[4].mxu0 %v5892_v24 }
 0x736   :  { %22361 = vmatpush3.bf16.msra.mxu0 %v26289_v39  ;;  %19058 = vmatprep.mubr.msk.f32.mxu0 %vm23984_vm1, %v30093_v47 }
 0x737   :  { %22362 = vmatprep.subr.bf16.mxu0 %v30092_v38 }
 0x73a   :  { %22364 = vmatpush3.bf16.msra.mxu0 %v26299_v34 }
 0x73b   :  { %22365 = vmatprep.subr.bf16.mxu0 %v30092_v38 }
 0x73e   :  { %22367 = vmatpush3.bf16.msra.mxu0 %v26309_v26 }
 0x73f   :  { %22368 = vmatprep.subr.bf16.mxu0 %v30092_v38 }
 0x742   :  { %22370 = vmatpush3.bf16.msra.mxu0 %v26319_v40 }
 0x743   :  { %22371 = vmatprep.subr.bf16.mxu0 %v30092_v38 }
 0x746   :  { %22373 = vmatpush3.bf16.msra.mxu0 %v26329_v51 }
 0x747   :  { %22374 = vmatprep.subr.bf16.mxu0 %v30092_v38 }
 0x74a   :  { %22376 = vmatpush3.bf16.msra.mxu0 %v26371_v61 }
 0x74b   :  { %22377 = vmatprep.subr.bf16.mxu0 %v30092_v38 }
 0x74e   :  { %22379 = vmatpush3.bf16.msra.mxu0 %v26379_v28 }
 0x74f   :  { %22380 = vmatprep.subr.bf16.mxu0 %v30092_v38 }
 0x752   :  { %22382 = vmatpush3.bf16.msra.mxu0 %v26392_v19 }
 0x753   :  { %22383 = vmatprep.subr.bf16.mxu0 %v30092_v38 }
 0x755   :  { %19059 = vmatmul.mubr.f32.vlgmr.msra.gmra.mrb[4].mxu0 %v5893_v62  ;;  %v6983_v62 = vld [vmem:[%s29846_s4 + $0x48] sm:$0xff] }
 0x756   :  { %22385 = vmatpush3.bf16.msra.mxu0 %v22384_v60  ;;  %19093 = vmatprep.mubr.msk.f32.mxu0 %vm23984_vm1, %v30093_v47  ;;  %v8147_v60 = vand.u32 4294901760, %v6981_v43  ;;  %v8153_v35 = vand.u32 4294901760, %v6983_v62 }
 0x757   :  { %22386 = vmatprep.subr.bf16.mxu0 %v30092_v38 }
 0x758   :  { %v26720_v20 = vsub.f32 %v6981_v43, %v8147_v60  ;;  %v26724_v12 = vsub.f32 %v6983_v62, %v8153_v35 }
 0x75a   :  { %22388 = vmatpush3.bf16.msra.mxu0 %v22387_v49  ;;  %v8156_v49 = vand.u32 4294901760, %v6984_v33 }
 0x75b   :  { %22389 = vmatprep.subr.bf16.mxu0 %v30092_v38 }
 0x75c   :  { %v26726_v13 = vsub.f32 %v6984_v33, %v8156_v49 }
 0x75e   :  { %22391 = vmatpush3.bf16.msra.mxu0 %v22390_v57  ;;  %v26718_v57 = vsub.f32 %v6980_v44, %v8144_v59 }
 0x75f   :  { %22392 = vmatprep.subr.bf16.mxu0 %v30092_v38 }
 0x762   :  { %22394 = vmatpush3.bf16.msra.mxu0 %v22393_v42  ;;  %v8162_v42 = vand.u32 4294901760, %v6986_v56 }
 0x763   :  { %22395 = vmatprep.subr.bf16.mxu0 %v30092_v38 }
 0x766   :  { %22397 = vmatpush3.bf16.msra.mxu0 %v22396_v30 }
 0x767   :  { %22398 = vmatprep.subr.bf16.mxu0 %v30092_v38 }
 0x76a   :  { %22400 = vmatpush3.bf16.msra.mxu0 %v22399_v1  ;;  %v26733_v1 = vsub.f32 %v6986_v56, %v8162_v42 }
 0x76b   :  { %22401 = vmatprep.subr.bf16.mxu0 %v30092_v38 }
 0x76e   :  { %22403 = vmatpush3.bf16.msra.mxu0 %v22402_v18 }
 0x76f   :  { %22404 = vmatprep.subr.bf16.mxu0 %v30092_v38 }
 0x772   :  { %22406 = vmatpush3.bf16.msra.mxu0 %v22405_v45  ;;  %v26742_v45 = vpack.c.bf16 %v8147_v60, %v8144_v59 }
 0x773   :  { %22407 = vmatprep.subr.bf16.mxu0 %v30092_v38 }
 0x775   :  { %19094 = vmatmul.mubr.f32.vlgmr.msra.gmra.mrb[4].mxu0 %v26515_v54 }
 0x776   :  { %22409 = vmatpush3.bf16.msra.mxu0 %v26289_v39  ;;  %19128 = vmatprep.mubr.msk.f32.mxu0 %vm23984_vm1, %v30093_v47 }
 0x777   :  { %22410 = vmatprep.subr.bf16.mxu0 %v30092_v38 }
 0x77a   :  { %22412 = vmatpush3.bf16.msra.mxu0 %v26299_v34 }
 0x77b   :  { %22413 = vmatprep.subr.bf16.mxu0 %v30092_v38 }
 0x77e   :  { %22415 = vmatpush3.bf16.msra.mxu0 %v26309_v26 }
 0x77f   :  { %22416 = vmatprep.subr.bf16.mxu0 %v30092_v38 }
 0x782   :  { %22418 = vmatpush3.bf16.msra.mxu0 %v26319_v40 }
 0x783   :  { %22419 = vmatprep.subr.bf16.mxu0 %v30092_v38 }
 0x786   :  { %22421 = vmatpush3.bf16.msra.mxu0 %v26329_v51 }
 0x787   :  { %22422 = vmatprep.subr.bf16.mxu0 %v30092_v38 }
 0x78a   :  { %22424 = vmatpush3.bf16.msra.mxu0 %v26371_v61 }
 0x78b   :  { %22425 = vmatprep.subr.bf16.mxu0 %v30092_v38 }
 0x78e   :  { %22427 = vmatpush3.bf16.msra.mxu0 %v26379_v28  ;;  %v6975_v28 = vld [vmem:[%s29846_s4 + $0x8] sm:$0xff] }
 0x78f   :  { %22428 = vmatprep.subr.bf16.mxu0 %v30092_v38  ;;  %v8129_v36 = vand.u32 4294901760, %v6975_v28 }
 0x791   :  { %v26685_v46 = vpack.c.bf16 %v8129_v36, %v8126_v32  ;;  %v26689_v17 = vsub.f32 %v6975_v28, %v8129_v36 }
 0x792   :  { %22430 = vmatpush3.bf16.msra.mxu0 %v26392_v19  ;;  %v8132_v19 = vand.u32 4294901760, %v6976_v0 }
 0x793   :  { %22431 = vmatprep.subr.bf16.mxu0 %v30092_v38  ;;  %22685 = vmatpush3.bf16.msra.mxu1 %v26685_v46 }
 0x794   :  { %v26691_v24 = vsub.f32 %v6976_v0, %v8132_v19  ;;  %v26702_v27 = vpack.c.bf16 %v8135_v50, %v8132_v19  ;;  %22686 = vmatprep.subr.bf16.mxu1 %v30092_v38  ;;  %v26766_v19 = vpack.c.bf16 %v8159_v2, %v8156_v49 }
 0x795   :  { %19129 = vmatmul.mubr.f32.vlgmr.msra.gmra.mrb[4].mxu0 %v26515_v54  ;;  %v6978_v54 = vld [vmem:[%s29846_s4 + $0x20] sm:$0xff] }
 0x796   :  { %19137 = vmatprep.mubr.msk.f32.mxu0 %vm23984_vm1, %v30093_v47  ;;  %v8138_v63 = vand.u32 4294901760, %v6978_v54 }
 0x797   :  { %22688 = vmatpush3.bf16.msra.mxu1 %v26702_v27 }
 0x798   :  { %v26706_v52 = vsub.f32 %v6978_v54, %v8138_v63  ;;  %v26729_v30 = vpack.c.bf16 %v8141_v8, %v8138_v63  ;;  %22689 = vmatprep.subr.bf16.mxu1 %v30092_v38 }
 0x79b   :  { %22691 = vmatpush3.bf16.msra.mxu1 %v26729_v30 }
 0x79c   :  { %22692 = vmatprep.subr.bf16.mxu1 %v30092_v38 }
 0x79f   :  { %22694 = vmatpush3.bf16.msra.mxu1 %v26742_v45 }
 0x7a0   :  { %22695 = vmatprep.subr.bf16.mxu1 %v30092_v38 }
 0x868   :  { %v6447_v39 = vpop.f32.mrb[4].mxu0 }
 0x869   :  { %v26653_v34 = vmul.f32 0.001953125, %v6447_v39  ;;  %v19130_v26 = vpop.f32.mrb[5].mxu0  ;;  %v5770_v39 = vld [vmem:[%s29842_s6 + $0x5] sm:$0x1] }
 0x86b   :  { %v6452_v40 = vmul.f32 %v26653_v34, %v26653_v34 }
 0x86d   :  { %v6454_v51 = vrot.slane %v6452_v40, 7 }
 0x86f   :  { %v6456_v61 = vsub.f32 %v26653_v34, %v6454_v51  ;;  %v6493_v51 = vld [vmem:[%s29847_s8] sm:$0xff] }
 0x870   :  { %v6496_v37 = vsel %vm6494_vm4, %v6493_v51, 0 }
 0x871   :  { %v6457_v23 = vadd.f32 1e-05, %v6456_v61  ;;  %v26754_v61 = vpack.c.bf16 %v8153_v35, %v8150_v4  ;;  %v26763_v21 = vand.u32 4294901760, %v6496_v37 }
 0x873   :  { %23979 = vrsqrt.f32 %v6457_v23  ;;  %22697 = vmatpush3.bf16.msra.mxu1 %v26754_v61 }
 0x874   :  { %22698 = vmatprep.subr.bf16.mxu1 %v30092_v38 }
 0x877   :  { %22700 = vmatpush3.bf16.msra.mxu1 %v26766_v19 }
 0x878   :  { %22701 = vmatprep.subr.bf16.mxu1 %v30092_v38 }
 0x87d   :  { %v23980_v41 = vpop.eup %23979 }
 0x87e   :  { %v6460_v18 = vrot.slane %v23980_v41, 1 }
 0x880   :  { %v6462_v5 = vmul.f32 %v6460_v18, %v5769_v25 }
 0x882   :  { %v6466_v26 = vrot.slane %v6462_v5, %v25343_v6  ;;  %v6471_v40 = vmul.f32 %v6462_v5, %v26653_v34 }
 0x884   :  { %v6472_v23 = vsub.f32 %v5770_v39, %v6471_v40  ;;  %v6467_v28 = vmul.f32 %v6466_v26, %v26496_v29  ;;  %v6468_v0 = vmul.f32 %v6466_v26, %v26494_v10  ;;  %v6469_v34 = vmul.f32 %v6466_v26, %v26506_v15 }
 0x885   :  { %v6470_v32 = vmul.f32 %v6466_v26, %v26504_v7  ;;  %v6571_v29 = vsub.f32 %v6496_v37, %v26763_v21  ;;  %v15643_v26 = vld [vmem:[%s29847_s8 + $0x8] sm:$0xff] }
 0x886   :  { %v6476_v36 = vrot.slane %v6472_v23, %v25343_v6  ;;  %v26771_v6 = vpack.c.bf16 %v8165_v9, %v8162_v42  ;;  %v6993_v51 = vsel %vm6494_vm4, %v15643_v26, 0 }
 0x887   :  { %v6572_v10 = vand.u32 4294901760, %v6571_v29  ;;  %v7063_v23 = vand.u32 4294901760, %v6993_v51 }
 0x888   :  { %v6477_v54 = vadd.f32 %v6476_v36, %v6467_v28  ;;  %v6478_v58 = vadd.f32 %v6476_v36, %v6468_v0  ;;  %v6479_v50 = vadd.f32 %v6476_v36, %v6469_v34  ;;  %v6480_v63 = vadd.f32 %v6476_v36, %v6470_v32  ;;  %22703 = vmatpush3.bf16.msra.mxu1 %v26771_v6  ;;  %v6988_v32 = vld [vmem:[%s29846_s4 + $0x70] sm:$0xff]  ;;  %v6989_v36 = vld [vmem:[%s29846_s4 + $0x78] sm:$0xff] }
 0x889   :  { %22704 = vmatprep.subr.bf16.mxu1 %v30092_v38  ;;  %v6573_v33 = vsub.f32 %v6571_v29, %v6572_v10  ;;  %v7064_v37 = vsub.f32 %v6993_v51, %v7063_v23 }
 0x88a   :  { %6485 = vst [vmem:[#allocation3 + $0x1] sm:$0xff] %v6477_v54  ;;  %6486 = vst [vmem:[#allocation3 + $0x9] sm:$0xff] %v6478_v58  ;;  %v8171_v54 = vand.u32 4294901760, %v6989_v36 }
 0x88b   :  { %6487 = vst [vmem:[#allocation3 + $0x19] sm:$0xff] %v6479_v50  ;;  %6488 = vst [vmem:[#allocation3 + $0x21] sm:$0xff] %v6480_v63  ;;  %v6574_v49 = vand.u32 4294901760, %v6573_v33  ;;  %v7065_v28 = vand.u32 4294901760, %v7064_v37  ;;  %v15647_v33 = vld [vmem:[%s29846_s4 + $0x98] sm:$0xff] }
 0x88c   :  { %v26888_v63 = vsub.f32 %v6989_v36, %v8171_v54 }
 0x88d   :  { %v7066_v0 = vsub.f32 %v7064_v37, %v7065_v28 }
 0x88e   :  { %30123 = vst [vmem:[#allocation13_spill] sm:$0xff] %v26888_v63 }
 0x88f   :  { %v7067_v34 = vand.u32 4294901760, %v7066_v0 }
 0x891   :  { %v6490_v7 = vld [vmem:[#allocation3] sm:$0xff]  ;;  %v6491_v15 = vld [vmem:[#allocation3 + $0x8] sm:$0xff]  ;;  %v6492_v8 = vld [vmem:[#allocation3 + $0x10] sm:$0x3] }
 0x892   :  { %v6500_v44 = vsel %vm6498_vm5, %v6492_v8, 0  ;;  %v6503_v43 = vand.u32 4294901760, %v6490_v7  ;;  %v6506_v14 = vand.u32 4294901760, %v6491_v15 }
 0x893   :  { %v26777_v62 = vand.u32 4294901760, %v6500_v44 }
 0x894   :  { %v26779_v48 = vpack.c.bf16 %v6506_v14, %v6503_v43  ;;  %v6582_v56 = vsub.f32 %v6490_v7, %v6503_v43  ;;  %v6589_v59 = vsub.f32 %v6491_v15, %v6506_v14  ;;  %v15646_v14 = vld [vmem:[%s29846_s4 + $0x90] sm:$0xff] }
 0x895   :  { %30114 = vst [vmem:[#allocation4_spill] sm:$0xff] %v26777_v62  ;;  %v26782_v60 = vsub.f32 %v6500_v44, %v26777_v62 }
 0x896   :  { %30115 = vst [vmem:[#allocation5_spill] sm:$0xff] %v26779_v48  ;;  %22433 = vmatpush3.bf16.msra.mxu0 %v26779_v48  ;;  %v6583_v4 = vand.u32 4294901760, %v6582_v56  ;;  %v6590_v35 = vand.u32 4294901760, %v6589_v59  ;;  %v26802_v39 = vpack.c.bf16 %v6589_v59, %v6582_v56 }
 0x897   :  { %30116 = vst [vmem:[#allocation6_spill] sm:$0xff] %v26782_v60  ;;  %19135 = vmatprep.subr.mxu0 %v30093_v47  ;;  %v26787_v42 = vand.u32 4294901760, %v26782_v60 }
 0x898   :  { %v6584_v2 = vsub.f32 %v6582_v56, %v6583_v4  ;;  %v6591_v55 = vsub.f32 %v6589_v59, %v6590_v35  ;;  %30120 = vst [vmem:[#allocation10_spill] sm:$0xff] %v26802_v39  ;;  %v26821_v40 = vpack.c.bf16 %v6590_v35, %v6583_v4  ;;  %v7491_v56 = vand.u32 4294901760, %v15646_v14 }
 0x899   :  { %30117 = vst [vmem:[#allocation7_spill] sm:$0xff] %v26787_v42  ;;  %v6598_v18 = vsub.f32 %v26782_v60, %v26787_v42  ;;  %v7494_v59 = vand.u32 4294901760, %v15647_v33 }
 0x89a   :  { %19136 = vmatpush3.msra.mxu0 %v26777_v62  ;;  %v6585_v9 = vand.u32 4294901760, %v6584_v2  ;;  %v6592_v41 = vand.u32 4294901760, %v6591_v55  ;;  %30121 = vst [vmem:[#allocation11_spill] sm:$0xff] %v26821_v40  ;;  %v26912_v35 = vsub.f32 %v15646_v14, %v7491_v56  ;;  %v15648_v2 = vld [vmem:[%s29846_s4 + $0xa0] sm:$0xff]  ;;  %v15649_v55 = vld [vmem:[%s29846_s4 + $0xa8] sm:$0xff] }
 0x89b   :  { %19138 = vmatmul.mubr.f32.vlgmr.msra.gmra.mrb[6].mxu0 %v6574_v49  ;;  %22434 = vmatprep.subr.bf16.mxu0 %v30092_v38  ;;  %v26799_v5 = vand.u32 4294901760, %v6598_v18  ;;  %v26910_v4 = vpack.c.bf16 %v7494_v59, %v7491_v56  ;;  %v26914_v49 = vsub.f32 %v15647_v33, %v7494_v59 }
 0x89c   :  { %v26791_v25 = vpack.c.bf16 %v6592_v41, %v6585_v9  ;;  %19146 = vmatprep.mubr.msk.f32.mxu0 %vm23984_vm1, %v30093_v47  ;;  %v7497_v9 = vand.u32 4294901760, %v15648_v2  ;;  %v7500_v41 = vand.u32 4294901760, %v15649_v55 }
 0x89d   :  { %30119 = vst [vmem:[#allocation9_spill] sm:$0xff] %v26799_v5 }
 0x89e   :  { %30118 = vst [vmem:[#allocation8_spill] sm:$0xff] %v26791_v25  ;;  %22436 = vmatpush3.bf16.msra.mxu0 %v26791_v25  ;;  %v26924_v18 = vpack.c.bf16 %v7500_v41, %v7497_v9  ;;  %v26926_v26 = vsub.f32 %v15648_v2, %v7497_v9  ;;  %v26928_v51 = vsub.f32 %v15649_v55, %v7500_v41 }
 0x89f   :  { %19144 = vmatprep.subr.mxu0 %v30093_v47 }
 0x8a0   :  { %30124 = vst [vmem:[#allocation14_spill] sm:$0xff] %v26928_v51 }
 0x8a2   :  { %19145 = vmatpush3.msra.mxu0 %v26799_v5 }
 0x8a3   :  { %19147 = vmatmul.mubr.f32.vlgmr.msra.gmra.mrb[6].mxu0 %v26763_v21  ;;  %22437 = vmatprep.subr.bf16.mxu0 %v30092_v38 }
 0x8a4   :  { %22439 = vmatpush3.bf16.msra.mxu0 %v26802_v39  ;;  %19155 = vmatprep.mubr.msk.f32.mxu0 %vm23984_vm1, %v30093_v47 }
 0x8a5   :  { %19153 = vmatprep.subr.mxu0 %v30093_v47 }
 0x8a8   :  { %19154 = vmatpush3.msra.mxu0 %v26782_v60 }
 0x8a9   :  { %22440 = vmatprep.subr.bf16.mxu0 %v30092_v38 }
 0x8ab   :  { %19156 = vmatmul.mubr.f32.vlgmr.msra.gmra.mrb[6].mxu0 %v6571_v29  ;;  %v15644_v29 = vld [vmem:[%s29846_s4 + $0x80] sm:$0xff] }
 0x8ac   :  { %22442 = vmatpush3.bf16.msra.mxu0 %v26779_v48  ;;  %19164 = vmatprep.mubr.msk.f32.mxu0 %vm23984_vm1, %v30093_v47  ;;  %v7485_v7 = vand.u32 4294901760, %v15644_v29 }
 0x8ad   :  { %19162 = vmatprep.subr.mxu0 %v30093_v47 }
 0x8ae   :  { %v26898_v44 = vsub.f32 %v15644_v29, %v7485_v7 }
 0x8b0   :  { %19163 = vmatpush3.msra.mxu0 %v26777_v62 }
 0x8b1   :  { %22443 = vmatprep.subr.bf16.mxu0 %v30092_v38 }
 0x8b3   :  { %19165 = vmatmul.mubr.f32.vlgmr.msra.gmra.mrb[6].mxu0 %v6572_v10  ;;  %v15645_v10 = vld [vmem:[%s29846_s4 + $0x88] sm:$0xff] }
 0x8b4   :  { %22445 = vmatpush3.bf16.msra.mxu0 %v26821_v40  ;;  %19173 = vmatprep.mubr.msk.f32.mxu0 %vm23984_vm1, %v30093_v47  ;;  %v7488_v15 = vand.u32 4294901760, %v15645_v10 }
 0x8b5   :  { %19171 = vmatprep.subr.mxu0 %v30093_v47 }
 0x8b6   :  { %v26896_v8 = vpack.c.bf16 %v7488_v15, %v7485_v7  ;;  %v26900_v43 = vsub.f32 %v15645_v10, %v7488_v15  ;;  %v15654_v7 = vld [vmem:[%s29846_s4 + $0xd0] sm:$0xff]  ;;  %v15655_v15 = vld [vmem:[%s29846_s4 + $0xd8] sm:$0xff] }
 0x8b7   :  { %v7515_v59 = vand.u32 4294901760, %v15654_v7  ;;  %v7518_v2 = vand.u32 4294901760, %v15655_v15 }
 0x8b8   :  { %19172 = vmatpush3.msra.mxu0 %v26787_v42 }
 0x8b9   :  { %22446 = vmatprep.subr.bf16.mxu0 %v30092_v38  ;;  %v26965_v55 = vsub.f32 %v15654_v7, %v7515_v59  ;;  %v26968_v9 = vpack.c.bf16 %v7518_v2, %v7515_v59  ;;  %v26970_v41 = vsub.f32 %v15655_v15, %v7518_v2  ;;  %v29937_v15 = vand.u32 4294901760, %v26898_v44 }
 0x8ba   :  { %v29945_v59 = vand.u32 4294901760, %v26900_v43 }
 0x8bb   :  { %19174 = vmatmul.mubr.f32.vlgmr.msra.gmra.mrb[6].mxu0 %v26763_v21  ;;  %30126 = vst [vmem:[#allocation16_spill] sm:$0xff] %v26968_v9 }
 0x8bc   :  { %22448 = vmatpush3.bf16.msra.mxu0 %v26779_v48  ;;  %19182 = vmatprep.mubr.msk.f32.mxu0 %vm23984_vm1, %v30093_v47 }
 0x8bd   :  { %19180 = vmatprep.subr.mxu0 %v30093_v47 }
 0x8c0   :  { %19181 = vmatpush3.msra.mxu0 %v26777_v62 }
 0x8c1   :  { %22449 = vmatprep.subr.bf16.mxu0 %v30092_v38 }
 0x8c3   :  { %19183 = vmatmul.mubr.f32.vlgmr.msra.gmra.mrb[6].mxu0 %v26763_v21  ;;  %v8168_v21 = vand.u32 4294901760, %v6988_v32 }
 0x8c4   :  { %22451 = vmatpush3.bf16.msra.mxu0 %v26779_v48  ;;  %19191 = vmatprep.mubr.msk.f32.mxu0 %vm23984_vm1, %v30093_v47 }
 0x8c5   :  { %19189 = vmatprep.subr.mxu0 %v30093_v47  ;;  %v26882_v58 = vpack.c.bf16 %v8171_v54, %v8168_v21  ;;  %v26886_v50 = vsub.f32 %v6988_v32, %v8168_v21  ;;  %v15652_v21 = vld [vmem:[%s29846_s4 + $0xc0] sm:$0xff]  ;;  %v15653_v54 = vld [vmem:[%s29846_s4 + $0xc8] sm:$0xff] }
 0x8c6   :  { %v7509_v29 = vand.u32 4294901760, %v15652_v21  ;;  %v7512_v10 = vand.u32 4294901760, %v15653_v54 }
 0x8c7   :  { %22706 = vmatpush3.bf16.msra.mxu1 %v26882_v58  ;;  %30122 = vst [vmem:[#allocation12_spill] sm:$0xff] %v26886_v50 }
 0x8c8   :  { %19190 = vmatpush3.msra.mxu0 %v26777_v62  ;;  %22731 = vmatprep.subr.bf16.mxu1 %v30092_v38  ;;  %v26958_v14 = vpack.c.bf16 %v7512_v10, %v7509_v29  ;;  %v26960_v33 = vsub.f32 %v15652_v21, %v7509_v29  ;;  %v26962_v56 = vsub.f32 %v15653_v54, %v7512_v10  ;;  %v15658_v54 = vld [vmem:[%s29846_s4 + $0xf0] sm:$0xff]  ;;  %v15659_v29 = vld [vmem:[%s29846_s4 + $0xf8] sm:$0xff] }
 0x8c9   :  { %19192 = vmatmul.mubr.f32.vlgmr.msra.gmra.mrb[8].mxu0 %v7067_v34  ;;  %22452 = vmatprep.subr.bf16.mxu0 %v30092_v38  ;;  %v7527_v10 = vand.u32 4294901760, %v15658_v54  ;;  %v7530_v7 = vand.u32 4294901760, %v15659_v29 }
 0x8ca   :  { %22454 = vmatpush3.bf16.msra.mxu0 %v26791_v25  ;;  %19200 = vmatprep.mubr.msk.f32.mxu0 %vm23984_vm1, %v30093_v47  ;;  %v29939_v25 = vand.u32 4294901760, %v26914_v49 }
 0x8cb   :  { %19198 = vmatprep.subr.mxu0 %v30093_v47  ;;  %v26992_v2 = vpack.c.bf16 %v7530_v7, %v7527_v10  ;;  %v27009_v63 = vsub.f32 %v15659_v29, %v7530_v7 }
 0x8cd   :  { %30128 = vst [vmem:[#allocation18_spill] sm:$0xff] %v26992_v2 }
 0x8ce   :  { %19199 = vmatpush3.msra.mxu0 %v26799_v5  ;;  %v29942_v5 = vand.u32 4294901760, %v26912_v35 }
 0x8cf   :  { %22455 = vmatprep.subr.bf16.mxu0 %v30092_v38 }
 0x8d1   :  { %19201 = vmatmul.mubr.f32.vlgmr.msra.gmra.mrb[8].mxu0 %v7063_v23 }
 0x8d2   :  { %22457 = vmatpush3.bf16.msra.mxu0 %v26802_v39  ;;  %19209 = vmatprep.mubr.msk.f32.mxu0 %vm23984_vm1, %v30093_v47 }
 0x8d3   :  { %19207 = vmatprep.subr.mxu0 %v30093_v47 }
 0x8d6   :  { %19208 = vmatpush3.msra.mxu0 %v26782_v60 }
 0x8d7   :  { %22458 = vmatprep.subr.bf16.mxu0 %v30092_v38 }
 0x8d9   :  { %19210 = vmatmul.mubr.f32.vlgmr.msra.gmra.mrb[8].mxu0 %v7064_v37  ;;  %v15651_v37 = vld [vmem:[%s29846_s4 + $0xb8] sm:$0xff] }
 0x8da   :  { %22460 = vmatpush3.bf16.msra.mxu0 %v26779_v48  ;;  %19218 = vmatprep.mubr.msk.f32.mxu0 %vm23984_vm1, %v30093_v47  ;;  %v7506_v0 = vand.u32 4294901760, %v15651_v37 }
 0x8db   :  { %19216 = vmatprep.subr.mxu0 %v30093_v47 }
 0x8dc   :  { %v26942_v36 = vsub.f32 %v15651_v37, %v7506_v0  ;;  %v15657_v37 = vld [vmem:[%s29846_s4 + $0xe8] sm:$0xff] }
 0x8de   :  { %19217 = vmatpush3.msra.mxu0 %v26777_v62  ;;  %30125 = vst [vmem:[#allocation15_spill] sm:$0xff] %v26942_v36 }
 0x8df   :  { %22461 = vmatprep.subr.bf16.mxu0 %v30092_v38 }
 0x8e1   :  { %19219 = vmatmul.mubr.f32.vlgmr.msra.gmra.mrb[8].mxu0 %v7065_v28 }
 0x8e2   :  { %22463 = vmatpush3.bf16.msra.mxu0 %v26821_v40  ;;  %19227 = vmatprep.mubr.msk.f32.mxu0 %vm23984_vm1, %v30093_v47  ;;  %v7586_v40 = vsub.f32 %v26900_v43, %v29945_v59 }
 0x8e3   :  { %19225 = vmatprep.subr.mxu0 %v30093_v47 }
 0x8e4   :  { %v7587_v39 = vand.u32 4294901760, %v7586_v40  ;;  %v7600_v40 = vsub.f32 %v26914_v49, %v29939_v25 }
 0x8e6   :  { %19226 = vmatpush3.msra.mxu0 %v26787_v42  ;;  %v7579_v42 = vsub.f32 %v26898_v44, %v29937_v15 }
 0x8e7   :  { %22464 = vmatprep.subr.bf16.mxu0 %v30092_v38 }
 0x8e8   :  { %v7580_v60 = vand.u32 4294901760, %v7579_v42  ;;  %v7593_v42 = vsub.f32 %v26912_v35, %v29942_v5 }
 0x8e9   :  { %19228 = vmatmul.mubr.f32.vlgmr.msra.gmra.mrb[8].mxu0 %v7063_v23 }
 0x8ea   :  { %22466 = vmatpush3.bf16.msra.mxu0 %v26779_v48  ;;  %19236 = vmatprep.mubr.msk.f32.mxu0 %vm23984_vm1, %v30093_v47  ;;  %v27012_v15 = vpack.c.bf16 %v7587_v39, %v7580_v60 }
 0x8eb   :  { %19234 = vmatprep.subr.mxu0 %v30093_v47 }
 0x8ee   :  { %19235 = vmatpush3.msra.mxu0 %v26777_v62 }
 0x8ef   :  { %22467 = vmatprep.subr.bf16.mxu0 %v30092_v38 }
 0x8f1   :  { %19237 = vmatmul.mubr.f32.vlgmr.msra.gmra.mrb[8].mxu0 %v7063_v23  ;;  %v15650_v23 = vld [vmem:[%s29846_s4 + $0xb0] sm:$0xff] }
 0x8f2   :  { %19271 = vmatprep.mubr.msk.f32.mxu0 %vm23984_vm1, %v30093_v47  ;;  %22469 = vmatpush3.bf16.msra.mxu0 %v26896_v8  ;;  %v7503_v28 = vand.u32 4294901760, %v15650_v23 }
 0x8f3   :  { %22470 = vmatprep.subr.bf16.mxu0 %v30092_v38 }
 0x8f4   :  { %v26938_v34 = vpack.c.bf16 %v7506_v0, %v7503_v28  ;;  %v26940_v32 = vsub.f32 %v15650_v23, %v7503_v28  ;;  %v15656_v23 = vld [vmem:[%s29846_s4 + $0xe0] sm:$0xff]  ;;  %v7524_v0 = vand.u32 4294901760, %v15657_v37 }
 0x8f5   :  { %v7521_v28 = vand.u32 4294901760, %v15656_v23 }
 0x8f6   :  { %22472 = vmatpush3.bf16.msra.mxu0 %v26910_v4  ;;  %v27005_v48 = vsub.f32 %v15657_v37, %v7524_v0  ;;  %v29938_v37 = vand.u32 4294901760, %v26926_v26  ;;  %v29941_v7 = vand.u32 4294901760, %v26940_v32 }
 0x8f7   :  { %22473 = vmatprep.subr.bf16.mxu0 %v30092_v38  ;;  %v26980_v21 = vpack.c.bf16 %v7524_v0, %v7521_v28  ;;  %v27003_v62 = vsub.f32 %v15656_v23, %v7521_v28  ;;  %v7594_v23 = vand.u32 4294901760, %v7593_v42  ;;  %v7601_v28 = vand.u32 4294901760, %v7600_v40 }
 0x8f8   :  { %v29940_v0 = vand.u32 4294901760, %v26928_v51  ;;  %v7607_v60 = vsub.f32 %v26926_v26, %v29938_v37  ;;  %v29943_v42 = vand.u32 4294901760, %v26942_v36 }
 0x8f9   :  { %30127 = vst [vmem:[#allocation17_spill] sm:$0xff] %v26980_v21 }
 0x8fa   :  { %22475 = vmatpush3.bf16.msra.mxu0 %v26924_v18  ;;  %v7614_v39 = vsub.f32 %v26928_v51, %v29940_v0  ;;  %v7608_v29 = vand.u32 4294901760, %v7607_v60  ;;  %v29944_v0 = vand.u32 4294901760, %v26960_v33  ;;  %v29946_v60 = vand.u32 4294901760, %v26962_v56 }
 0x8fb   :  { %22476 = vmatprep.subr.bf16.mxu0 %v30092_v38 }
 0x8fe   :  { %22478 = vmatpush3.bf16.msra.mxu0 %v26938_v34 }
 0x8ff   :  { %22479 = vmatprep.subr.bf16.mxu0 %v30092_v38 }
 0x902   :  { %22481 = vmatpush3.bf16.msra.mxu0 %v26958_v14 }
 0x903   :  { %22482 = vmatprep.subr.bf16.mxu0 %v30092_v38 }
 0x906   :  { %22484 = vmatpush3.bf16.msra.mxu0 %v26968_v9 }
 0x907   :  { %22485 = vmatprep.subr.bf16.mxu0 %v30092_v38 }
 0x90a   :  { %22487 = vmatpush3.bf16.msra.mxu0 %v26980_v21  ;;  %v27007_v21 = vsub.f32 %v15658_v54, %v7527_v10  ;;  %v27022_v54 = vpack.c.bf16 %v7601_v28, %v7594_v23  ;;  %v7615_v10 = vand.u32 4294901760, %v7614_v39  ;;  %v7621_v23 = vsub.f32 %v26940_v32, %v29941_v7 }
 0x90b   :  { %22488 = vmatprep.subr.bf16.mxu0 %v30092_v38  ;;  %v7628_v28 = vsub.f32 %v26942_v36, %v29943_v42  ;;  %v29947_v42 = vand.u32 4294901760, %v26965_v55 }
 0x90c   :  { %v27032_v40 = vpack.c.bf16 %v7615_v10, %v7608_v29  ;;  %v7622_v37 = vand.u32 4294901760, %v7621_v23  ;;  %v7635_v29 = vsub.f32 %v26960_v33, %v29944_v0  ;;  %v7642_v10 = vsub.f32 %v26962_v56, %v29946_v60 }
 0x90d   :  { %v7629_v25 = vand.u32 4294901760, %v7628_v28  ;;  %v29950_v23 = vand.u32 4294901760, %v26970_v41  ;;  %v29951_v60 = vand.u32 4294901760, %v27003_v62 }
 0x90e   :  { %22490 = vmatpush3.bf16.msra.mxu0 %v26992_v2  ;;  %v7636_v7 = vand.u32 4294901760, %v7635_v29  ;;  %v7643_v5 = vand.u32 4294901760, %v7642_v10  ;;  %v29957_v29 = vand.u32 4294901760, %v27005_v48 }
 0x90f   :  { %22491 = vmatprep.subr.bf16.mxu0 %v30092_v38  ;;  %v27042_v39 = vpack.c.bf16 %v7629_v25, %v7622_v37  ;;  %v7649_v25 = vsub.f32 %v26965_v55, %v29947_v42  ;;  %v7656_v37 = vsub.f32 %v26970_v41, %v29950_v23  ;;  %v29955_v23 = vand.u32 4294901760, %v27007_v21 }
 0x910   :  { %v27052_v28 = vpack.c.bf16 %v7643_v5, %v7636_v7  ;;  %v7663_v5 = vsub.f32 %v27003_v62, %v29951_v60  ;;  %v7670_v7 = vsub.f32 %v27005_v48, %v29957_v29 }
 0x911   :  { %v7650_v0 = vand.u32 4294901760, %v7649_v25  ;;  %v7657_v59 = vand.u32 4294901760, %v7656_v37  ;;  %v29956_v25 = vand.u32 4294901760, %v27009_v63 }
 0x912   :  { %v7664_v42 = vand.u32 4294901760, %v7663_v5  ;;  %v7671_v2 = vand.u32 4294901760, %v7670_v7  ;;  %v22516_v5 = vpack.c.bf16 %v26900_v43, %v26898_v44  ;;  %v22519_v7 = vpack.c.bf16 %v26914_v49, %v26912_v35 }
 0x913   :  { %v27062_v10 = vpack.c.bf16 %v7657_v59, %v7650_v0  ;;  %v7677_v59 = vsub.f32 %v27007_v21, %v29955_v23  ;;  %v7684_v0 = vsub.f32 %v27009_v63, %v29956_v25 }
 0x914   :  { %v22510_v37 = vpack.c.bf16 %v7671_v2, %v7664_v42  ;;  %v22522_v2 = vpack.c.bf16 %v26928_v51, %v26926_v26  ;;  %v22525_v42 = vpack.c.bf16 %v26942_v36, %v26940_v32 }
 0x915   :  { %v7678_v60 = vand.u32 4294901760, %v7677_v59  ;;  %v7685_v50 = vand.u32 4294901760, %v7684_v0 }
 0x917   :  { %v22513_v9 = vpack.c.bf16 %v7685_v50, %v7678_v60 }
 0x996   :  { %v6970_v0 = vpop.f32.mrb[6].mxu0 }
 0x997   :  { %v27094_v25 = vand.u32 4294901760, %v6970_v0  ;;  %v19184_v29 = vpop.f32.mrb[7].mxu0 }
 0x999   :  { %30129 = vst [vmem:[#allocation19_spill] sm:$0xff] %v27094_v25  ;;  %v27097_v51 = vsub.f32 %v6970_v0, %v27094_v25 }
 0x99b   :  { %v29960_v36 = vand.u32 4294901760, %v27097_v51 }
 0x99d   :  { %19587 = vmatmul.mubr.f32.vlgmr.msra.gmra.mrb[8].mxu1 %v29960_v36 }
 0x99e   :  { %22733 = vmatpush3.bf16.msra.mxu1 %v26685_v46  ;;  %19656 = vmatprep.mubr.msk.f32.mxu1 %vm23984_vm1, %v30093_v47 }
 0x99f   :  { %22734 = vmatprep.subr.bf16.mxu1 %v30092_v38 }
 0x9a2   :  { %22736 = vmatpush3.bf16.msra.mxu1 %v26702_v27 }
 0x9a3   :  { %22737 = vmatprep.subr.bf16.mxu1 %v30092_v38 }
 0x9a6   :  { %22739 = vmatpush3.bf16.msra.mxu1 %v26729_v30 }
 0x9a7   :  { %22740 = vmatprep.subr.bf16.mxu1 %v30092_v38 }
 0x9aa   :  { %22742 = vmatpush3.bf16.msra.mxu1 %v26742_v45 }
 0x9ab   :  { %22743 = vmatprep.subr.bf16.mxu1 %v30092_v38 }
 0x9ae   :  { %22745 = vmatpush3.bf16.msra.mxu1 %v26754_v61 }
 0x9af   :  { %22746 = vmatprep.subr.bf16.mxu1 %v30092_v38 }
 0x9b2   :  { %22748 = vmatpush3.bf16.msra.mxu1 %v26766_v19 }
 0x9b3   :  { %22749 = vmatprep.subr.bf16.mxu1 %v30092_v38 }
 0x9b6   :  { %22751 = vmatpush3.bf16.msra.mxu1 %v26771_v6 }
 0x9b7   :  { %22752 = vmatprep.subr.bf16.mxu1 %v30092_v38 }
 0x9ba   :  { %22754 = vmatpush3.bf16.msra.mxu1 %v26882_v58 }
 0x9bb   :  { %22773 = vmatprep.subr.bf16.mxu1 %v30092_v38 }
 0x9bd   :  { %19657 = vmatmul.mubr.f32.vlgmr.msra.gmra.mrb[10].mxu1 %v27094_v25  ;;  %v30139_v25 = vld [vmem:[#allocation13_spill] sm:$0xff] }
 0x9be   :  { %19745 = vmatprep.mubr.msk.f32.mxu1 %vm23984_vm1, %v30093_v47 }
 0x9c4   :  { %v7463_v29 = vpop.f32.mrb[8].mxu0 }
 0x9c5   :  { %v27123_v0 = vand.u32 4294901760, %v7463_v29  ;;  %v19238_v36 = vpop.f32.mrb[9].mxu0 }
 0x9c6   :  { %v30130_v36 = vpack.c.bf16 %v26962_v56, %v26960_v33 }
 0x9c7   :  { %v27126_v60 = vsub.f32 %v7463_v29, %v27123_v0 }
 0x9c9   :  { %v29973_v50 = vand.u32 4294901760, %v27126_v60 }
 0x9cb   :  { %v7568_v59 = vsub.f32 %v27126_v60, %v29973_v50 }
 0x9cd   :  { %v7569_v23 = vand.u32 4294901760, %v7568_v59 }
 0x9cf   :  { %19272 = vmatmul.mubr.f32.vlgmr.msra.gmra.mrb[10].mxu0 %v7569_v23 }
 0x9d0   :  { %22493 = vmatpush3.bf16.msra.mxu0 %v27012_v15  ;;  %19306 = vmatprep.mubr.msk.f32.mxu0 %vm23984_vm1, %v30093_v47  ;;  %v30132_v15 = vpack.c.bf16 %v27005_v48, %v27003_v62 }
 0x9d1   :  { %22494 = vmatprep.subr.bf16.mxu0 %v30092_v38 }
 0x9d4   :  { %22496 = vmatpush3.bf16.msra.mxu0 %v27022_v54  ;;  %v29972_v54 = vand.u32 4294901760, %v26687_v11 }
 0x9d5   :  { %22497 = vmatprep.subr.bf16.mxu0 %v30092_v38 }
 0x9d8   :  { %22499 = vmatpush3.bf16.msra.mxu0 %v27032_v40  ;;  %v29969_v40 = vand.u32 4294901760, %v26689_v17 }
 0x9d9   :  { %22500 = vmatprep.subr.bf16.mxu0 %v30092_v38 }
 0x9da   :  { %v8227_v23 = vsub.f32 %v26689_v17, %v29969_v40  ;;  %v29976_v40 = vand.u32 4294901760, %v26739_v53 }
 0x9dc   :  { %22502 = vmatpush3.bf16.msra.mxu0 %v27042_v39  ;;  %v8220_v39 = vsub.f32 %v26687_v11, %v29972_v54  ;;  %v30138_v54 = vld [vmem:[#allocation12_spill] sm:$0xff] }
 0x9dd   :  { %22503 = vmatprep.subr.bf16.mxu0 %v30092_v38  ;;  %v29979_v50 = vand.u32 4294901760, %v30138_v54 }
 0x9e0   :  { %22505 = vmatpush3.bf16.msra.mxu0 %v27052_v28  ;;  %v30133_v28 = vpack.c.bf16 %v27009_v63, %v27007_v21 }
 0x9e1   :  { %22506 = vmatprep.subr.bf16.mxu0 %v30092_v38 }
 0x9e4   :  { %22508 = vmatpush3.bf16.msra.mxu0 %v27062_v10  ;;  %v8221_v10 = vand.u32 4294901760, %v8220_v39 }
 0x9e5   :  { %22509 = vmatprep.subr.bf16.mxu0 %v30092_v38 }
 0x9e8   :  { %22511 = vmatpush3.bf16.msra.mxu0 %v22510_v37  ;;  %v8228_v37 = vand.u32 4294901760, %v8227_v23 }
 0x9e9   :  { %22512 = vmatprep.subr.bf16.mxu0 %v30092_v38 }
 0x9ec   :  { %22514 = vmatpush3.bf16.msra.mxu0 %v22513_v9  ;;  %v30131_v9 = vpack.c.bf16 %v26970_v41, %v26965_v55 }
 0x9ed   :  { %22515 = vmatprep.subr.bf16.mxu0 %v30092_v38 }
 0x9ef   :  { %19307 = vmatmul.mubr.f32.vlgmr.msra.gmra.mrb[12].mxu0 %v27123_v0 }
 0x9f0   :  { %22517 = vmatpush3.bf16.msra.mxu0 %v22516_v5  ;;  %19341 = vmatprep.mubr.msk.f32.mxu0 %vm23984_vm1, %v30093_v47  ;;  %v29966_v5 = vand.u32 4294901760, %v26691_v24 }
 0x9f1   :  { %22518 = vmatprep.subr.bf16.mxu0 %v30092_v38 }
 0x9f4   :  { %22520 = vmatpush3.bf16.msra.mxu0 %v22519_v7  ;;  %v29963_v7 = vand.u32 4294901760, %v26704_v16 }
 0x9f5   :  { %22521 = vmatprep.subr.bf16.mxu0 %v30092_v38 }
 0x9f6   :  { %v8241_v59 = vsub.f32 %v26704_v16, %v29963_v7  ;;  %v29967_v7 = vand.u32 4294901760, %v26724_v12 }
 0x9f8   :  { %22523 = vmatpush3.bf16.msra.mxu0 %v22522_v2  ;;  %v27181_v2 = vpack.c.bf16 %v8228_v37, %v8221_v10 }
 0x9f9   :  { %22524 = vmatprep.subr.bf16.mxu0 %v30092_v38 }
 0x9fc   :  { %22526 = vmatpush3.bf16.msra.mxu0 %v22525_v42  ;;  %v8234_v42 = vsub.f32 %v26691_v24, %v29966_v5  ;;  %v29970_v5 = vand.u32 4294901760, %v26731_v22 }
 0x9fd   :  { %22527 = vmatprep.subr.bf16.mxu0 %v30092_v38 }
 0x9fe   :  { %v8235_v29 = vand.u32 4294901760, %v8234_v42  ;;  %v29965_v42 = vand.u32 4294901760, %v26718_v57 }
 0xa00   :  { %22529 = vmatpush3.bf16.msra.mxu0 %v30130_v36  ;;  %v8242_v36 = vand.u32 4294901760, %v8241_v59  ;;  %v29964_v59 = vand.u32 4294901760, %v26720_v20 }
 0xa01   :  { %22530 = vmatprep.subr.bf16.mxu0 %v30092_v38 }
 0xa02   :  { %v27196_v39 = vpack.c.bf16 %v8242_v36, %v8235_v29  ;;  %v8262_v36 = vsub.f32 %v26718_v57, %v29965_v42  ;;  %v29971_v42 = vand.u32 4294901760, %v26726_v13 }
 0xa04   :  { %22532 = vmatpush3.bf16.msra.mxu0 %v30131_v9  ;;  %v29962_v9 = vand.u32 4294901760, %v26706_v52 }
 0xa05   :  { %22533 = vmatprep.subr.bf16.mxu0 %v30092_v38 }
 0xa06   :  { %v8248_v23 = vsub.f32 %v26706_v52, %v29962_v9  ;;  %v29968_v9 = vand.u32 4294901760, %v26722_v31 }
 0xa08   :  { %22535 = vmatpush3.bf16.msra.mxu0 %v30132_v15  ;;  %v29961_v15 = vand.u32 4294901760, %v26712_v3  ;;  %v8249_v10 = vand.u32 4294901760, %v8248_v23  ;;  %v8263_v23 = vand.u32 4294901760, %v8262_v36 }
 0xa09   :  { %22536 = vmatprep.subr.bf16.mxu0 %v30092_v38 }
 0xa0c   :  { %22538 = vmatpush3.bf16.msra.mxu0 %v30133_v28  ;;  %v8255_v28 = vsub.f32 %v26712_v3, %v29961_v15  ;;  %v8269_v15 = vsub.f32 %v26720_v20, %v29964_v59  ;;  %v8283_v59 = vsub.f32 %v26724_v12, %v29967_v7  ;;  %v8297_v7 = vsub.f32 %v26731_v22, %v29970_v5 }
 0xa0d   :  { %22539 = vmatprep.subr.bf16.mxu0 %v30092_v38  ;;  %v8311_v5 = vsub.f32 %v26739_v53, %v29976_v40 }
 0xa0e   :  { %v8256_v37 = vand.u32 4294901760, %v8255_v28  ;;  %v8270_v28 = vand.u32 4294901760, %v8269_v15  ;;  %v8284_v15 = vand.u32 4294901760, %v8283_v59  ;;  %v8298_v59 = vand.u32 4294901760, %v8297_v7 }
 0xa0f   :  { %19342 = vmatmul.mubr.f32.vlgmr.msra.gmra.mrb[14].mxu0 %v27126_v60  ;;  %v8312_v7 = vand.u32 4294901760, %v8311_v5 }
 0xa10   :  { %22541 = vmatpush3.bf16.msra.mxu0 %v26896_v8  ;;  %19376 = vmatprep.mubr.msk.f32.mxu0 %vm23984_vm1, %v30093_v47  ;;  %v27208_v29 = vpack.c.bf16 %v8256_v37, %v8249_v10  ;;  %v27220_v10 = vpack.c.bf16 %v8270_v28, %v8263_v23  ;;  %v8276_v37 = vsub.f32 %v26722_v31, %v29968_v9  ;;  %v29977_v9 = vand.u32 4294901760, %v26733_v1 }
 0xa11   :  { %22542 = vmatprep.subr.bf16.mxu0 %v30092_v38  ;;  %v8290_v28 = vsub.f32 %v26726_v13, %v29971_v42  ;;  %v30137_v42 = vld [vmem:[#allocation16_spill] sm:$0xff] }
 0xa12   :  { %30134 = vst [vmem:[#allocation20_spill] sm:$0xff] %v27220_v10  ;;  %v8277_v36 = vand.u32 4294901760, %v8276_v37  ;;  %v30142_v10 = vld [vmem:[#allocation18_spill] sm:$0xff] }
 0xa13   :  { %v8291_v37 = vand.u32 4294901760, %v8290_v28 }
 0xa14   :  { %22544 = vmatpush3.bf16.msra.mxu0 %v26910_v4  ;;  %v27232_v23 = vpack.c.bf16 %v8284_v15, %v8277_v36  ;;  %v8304_v15 = vsub.f32 %v26733_v1, %v29977_v9  ;;  %v30141_v9 = vld [vmem:[#allocation17_spill] sm:$0xff] }
 0xa15   :  { %22545 = vmatprep.subr.bf16.mxu0 %v30092_v38  ;;  %v27244_v36 = vpack.c.bf16 %v8298_v59, %v8291_v37  ;;  %v8318_v59 = vsub.f32 %v30138_v54, %v29979_v50  ;;  %v30145_v50 = vand.u32 4294901760, %v27126_v60 }
 0xa16   :  { %30135 = vst [vmem:[#allocation21_spill] sm:$0xff] %v27232_v23  ;;  %v8305_v28 = vand.u32 4294901760, %v8304_v15  ;;  %v29978_v23 = vand.u32 4294901760, %v30139_v25 }
 0xa17   :  { %30136 = vst [vmem:[#allocation22_spill] sm:$0xff] %v27244_v36  ;;  %v8319_v15 = vand.u32 4294901760, %v8318_v59  ;;  %v30147_v59 = vand.u32 4294901760, %v26914_v49  ;;  %v30151_v49 = vand.u32 4294901760, %v26940_v32  ;;  %v30156_v32 = vand.u32 4294901760, %v26965_v55 }
 0xa18   :  { %22547 = vmatpush3.bf16.msra.mxu0 %v26924_v18  ;;  %v27256_v37 = vpack.c.bf16 %v8312_v7, %v8305_v28  ;;  %v8325_v40 = vsub.f32 %v30139_v25, %v29978_v23  ;;  %v30143_v28 = vand.u32 4294901760, %v26898_v44  ;;  %v30144_v7 = vand.u32 4294901760, %v26900_v43 }
 0xa19   :  { %22548 = vmatprep.subr.bf16.mxu0 %v30092_v38  ;;  %v22660_v23 = vpack.c.bf16 %v26689_v17, %v26687_v11  ;;  %v22663_v44 = vpack.c.bf16 %v26704_v16, %v26691_v24  ;;  %v30148_v43 = vand.u32 4294901760, %v26926_v26  ;;  %v30154_v26 = vand.u32 4294901760, %v26960_v33 }
 0xa1a   :  { %30140 = vst [vmem:[#allocation16_spill] sm:$0xff] %v27256_v37  ;;  %v8326_v5 = vand.u32 4294901760, %v8325_v40  ;;  %v22564_v37 = vpack.c.bf16 %v30144_v7, %v30143_v28  ;;  %v30146_v40 = vand.u32 4294901760, %v26912_v35  ;;  %v22666_v35 = vpack.c.bf16 %v26712_v3, %v26706_v52 }
 0xa1b   :  { %v30158_v33 = vand.u32 4294901760, %v27003_v62  ;;  %v30160_v55 = vand.u32 4294901760, %v27007_v21 }
 0xa1c   :  { %22550 = vmatpush3.bf16.msra.mxu0 %v26938_v34  ;;  %v27266_v36 = vpack.c.bf16 %v8326_v5, %v8319_v15  ;;  %v22567_v15 = vpack.c.bf16 %v30147_v59, %v30146_v40  ;;  %v30149_v5 = vld [vmem:[#allocation14_spill] sm:$0xff]  ;;  %v22669_v40 = vpack.c.bf16 %v26720_v20, %v26718_v57  ;;  %v30155_v59 = vand.u32 4294901760, %v26962_v56 }
 0xa1d   :  { %22551 = vmatprep.subr.bf16.mxu0 %v30092_v38  ;;  %v30150_v60 = vand.u32 4294901760, %v30149_v5  ;;  %v30157_v5 = vand.u32 4294901760, %v26970_v41  ;;  %v30159_v56 = vand.u32 4294901760, %v27005_v48  ;;  %v30161_v41 = vand.u32 4294901760, %v27009_v63 }
 0xa20   :  { %22553 = vmatpush3.bf16.msra.mxu0 %v26958_v14 }
 0xa21   :  { %22554 = vmatprep.subr.bf16.mxu0 %v30092_v38 }
 0xa24   :  { %22556 = vmatpush3.bf16.msra.mxu0 %v30137_v42 }
 0xa25   :  { %22557 = vmatprep.subr.bf16.mxu0 %v30092_v38 }
 0xa28   :  { %22559 = vmatpush3.bf16.msra.mxu0 %v30141_v9 }
 0xa29   :  { %22560 = vmatprep.subr.bf16.mxu0 %v30092_v38 }
 0xa2c   :  { %22562 = vmatpush3.bf16.msra.mxu0 %v30142_v10 }
 0xa2d   :  { %22563 = vmatprep.subr.bf16.mxu0 %v30092_v38 }
 0xa2f   :  { %19377 = vmatmul.mubr.f32.vlgmr.msra.gmra.mrb[16].mxu0 %v30145_v50  ;;  %v22570_v50 = vpack.c.bf16 %v30150_v60, %v30148_v43  ;;  %v22672_v43 = vpack.c.bf16 %v26724_v12, %v26722_v31  ;;  %v22579_v60 = vpack.c.bf16 %v30157_v5, %v30156_v32 }
 0xa30   :  { %22565 = vmatpush3.bf16.msra.mxu0 %v22564_v37  ;;  %19411 = vmatprep.mubr.msk.f32.mxu0 %vm23984_vm1, %v30093_v47  ;;  %v30152_v37 = vld [vmem:[#allocation15_spill] sm:$0xff] }
 0xa31   :  { %22566 = vmatprep.subr.bf16.mxu0 %v30092_v38  ;;  %v30153_v28 = vand.u32 4294901760, %v30152_v37  ;;  %v22678_v37 = vpack.c.bf16 %v26739_v53, %v26733_v1 }
 0xa33   :  { %v22573_v7 = vpack.c.bf16 %v30153_v28, %v30151_v49  ;;  %v22582_v49 = vpack.c.bf16 %v30159_v56, %v30158_v33  ;;  %v22585_v28 = vpack.c.bf16 %v30161_v41, %v30160_v55  ;;  %v30187_v33 = vld [vmem:[#allocation9_spill] sm:$0xff]  ;;  %v30188_v56 = vld [vmem:[#allocation10_spill] sm:$0xff] }
 0xa34   :  { %22568 = vmatpush3.bf16.msra.mxu0 %v22567_v15  ;;  %v22576_v15 = vpack.c.bf16 %v30155_v59, %v30154_v26 }
 0xa35   :  { %22569 = vmatprep.subr.bf16.mxu0 %v30092_v38 }
 0xa38   :  { %22571 = vmatpush3.bf16.msra.mxu0 %v22570_v50  ;;  %v22675_v50 = vpack.c.bf16 %v26731_v22, %v26726_v13 }
 0xa39   :  { %22572 = vmatprep.subr.bf16.mxu0 %v30092_v38 }
 0xa3c   :  { %22574 = vmatpush3.bf16.msra.mxu0 %v22573_v7  ;;  %v22681_v7 = vpack.c.bf16 %v30139_v25, %v30138_v54 }
 0xa3d   :  { %22575 = vmatprep.subr.bf16.mxu0 %v30092_v38 }
 0xa40   :  { %22577 = vmatpush3.bf16.msra.mxu0 %v22576_v15 }
 0xa41   :  { %22578 = vmatprep.subr.bf16.mxu0 %v30092_v38 }
 0xa44   :  { %22580 = vmatpush3.bf16.msra.mxu0 %v22579_v60 }
 0xa45   :  { %22581 = vmatprep.subr.bf16.mxu0 %v30092_v38 }
 0xa48   :  { %22583 = vmatpush3.bf16.msra.mxu0 %v22582_v49  ;;  %v30189_v49 = vld [vmem:[#allocation6_spill] sm:$0xff] }
 0xa49   :  { %22584 = vmatprep.subr.bf16.mxu0 %v30092_v38 }
 0xa4c   :  { %22586 = vmatpush3.bf16.msra.mxu0 %v22585_v28  ;;  %v30190_v28 = vld [vmem:[#allocation11_spill] sm:$0xff] }
 0xa4d   :  { %22587 = vmatprep.subr.bf16.mxu0 %v30092_v38 }
 0xa4f   :  { %19412 = vmatmul.mubr.f32.vlgmr.msra.gmra.mrb[18].mxu0 %v27123_v0 }
 0xa50   :  { %22589 = vmatpush3.bf16.msra.mxu0 %v26896_v8  ;;  %19446 = vmatprep.mubr.msk.f32.mxu0 %vm23984_vm1, %v30093_v47  ;;  %v30165_v8 = vld [vmem:[#allocation22_spill] sm:$0xff] }
 0xa51   :  { %22590 = vmatprep.subr.bf16.mxu0 %v30092_v38 }
 0xa54   :  { %22592 = vmatpush3.bf16.msra.mxu0 %v26910_v4  ;;  %v30166_v4 = vld [vmem:[#allocation16_spill] sm:$0xff] }
 0xa55   :  { %22593 = vmatprep.subr.bf16.mxu0 %v30092_v38 }
 0xa58   :  { %22595 = vmatpush3.bf16.msra.mxu0 %v26924_v18  ;;  %v30167_v18 = vld [vmem:[#allocation19_spill] sm:$0xff] }
 0xa59   :  { %22596 = vmatprep.subr.bf16.mxu0 %v30092_v38 }
 0xa5c   :  { %22598 = vmatpush3.bf16.msra.mxu0 %v26938_v34 }
 0xa5d   :  { %22599 = vmatprep.subr.bf16.mxu0 %v30092_v38 }
 0xa60   :  { %22601 = vmatpush3.bf16.msra.mxu0 %v26958_v14 }
 0xa61   :  { %22602 = vmatprep.subr.bf16.mxu0 %v30092_v38 }
 0xa64   :  { %22604 = vmatpush3.bf16.msra.mxu0 %v30137_v42  ;;  %v30171_v42 = vand.u32 4294901760, %v26704_v16 }
 0xa65   :  { %22605 = vmatprep.subr.bf16.mxu0 %v30092_v38 }
 0xa68   :  { %22607 = vmatpush3.bf16.msra.mxu0 %v30141_v9 }
 0xa69   :  { %22608 = vmatprep.subr.bf16.mxu0 %v30092_v38 }
 0xa6c   :  { %22610 = vmatpush3.bf16.msra.mxu0 %v30142_v10 }
 0xa6d   :  { %22611 = vmatprep.subr.bf16.mxu0 %v30092_v38 }
 0xa6f   :  { %19447 = vmatmul.mubr.f32.vlgmr.msra.gmra.mrb[20].mxu0 %v27123_v0  ;;  %v30168_v0 = vand.u32 4294901760, %v26687_v11  ;;  %v30172_v11 = vand.u32 4294901760, %v26706_v52  ;;  %v30176_v52 = vand.u32 4294901760, %v26722_v31  ;;  %v30180_v31 = vand.u32 4294901760, %v26733_v1  ;;  %v30184_v1 = vld [vmem:[#allocation5_spill] sm:$0xff] }
 0xa70   :  { %22613 = vmatpush3.bf16.msra.mxu0 %v26685_v46  ;;  %v27351_v62 = vpop.f32.mrb[8].mxu1  ;;  %19481 = vmatprep.mubr.msk.f32.mxu0 %vm23984_vm1, %v30093_v47  ;;  %v30162_v46 = vand.u32 4294901760, %v27097_v51 }
 0xa71   :  { %22614 = vmatprep.subr.bf16.mxu0 %v30092_v38  ;;  %v19588_v48 = vpop.f32.mrb[9].mxu1 }
 0xa74   :  { %22616 = vmatpush3.bf16.msra.mxu0 %v26702_v27  ;;  %v8209_v27 = vsub.f32 %v27097_v51, %v30162_v46 }
 0xa75   :  { %22617 = vmatprep.subr.bf16.mxu0 %v30092_v38 }
 0xa78   :  { %22619 = vmatpush3.bf16.msra.mxu0 %v26729_v30  ;;  %v8210_v30 = vand.u32 4294901760, %v8209_v27 }
 0xa79   :  { %22620 = vmatprep.subr.bf16.mxu0 %v30092_v38 }
 0xa7c   :  { %22622 = vmatpush3.bf16.msra.mxu0 %v26742_v45 }
 0xa7d   :  { %22623 = vmatprep.subr.bf16.mxu0 %v30092_v38 }
 0xa80   :  { %22625 = vmatpush3.bf16.msra.mxu0 %v26754_v61 }
 0xa81   :  { %22626 = vmatprep.subr.bf16.mxu0 %v30092_v38 }
 0xa84   :  { %22628 = vmatpush3.bf16.msra.mxu0 %v26766_v19  ;;  %v30163_v19 = vld [vmem:[#allocation20_spill] sm:$0xff] }
 0xa85   :  { %22629 = vmatprep.subr.bf16.mxu0 %v30092_v38 }
 0xa88   :  { %22631 = vmatpush3.bf16.msra.mxu0 %v26771_v6  ;;  %v30164_v6 = vld [vmem:[#allocation21_spill] sm:$0xff] }
 0xa89   :  { %22632 = vmatprep.subr.bf16.mxu0 %v30092_v38 }
 0xa8c   :  { %22634 = vmatpush3.bf16.msra.mxu0 %v26882_v58 }
 0xa8d   :  { %22635 = vmatprep.subr.bf16.mxu0 %v30092_v38 }
 0xa8f   :  { %19482 = vmatmul.mubr.f32.vlgmr.msra.gmra.mrb[22].mxu0 %v8210_v30 }
 0xa90   :  { %22637 = vmatpush3.bf16.msra.mxu0 %v27181_v2  ;;  %v27374_v45 = vpop.f32.mrb[10].mxu1  ;;  %19516 = vmatprep.mubr.msk.f32.mxu0 %vm23984_vm1, %v30093_v47  ;;  %v30169_v2 = vand.u32 4294901760, %v26689_v17  ;;  %v30173_v17 = vand.u32 4294901760, %v26712_v3  ;;  %v30177_v3 = vand.u32 4294901760, %v26724_v12  ;;  %v30181_v12 = vand.u32 4294901760, %v26739_v53 }
 0xa91   :  { %v19658_v61 = vpop.f32.mrb[11].mxu1  ;;  %22638 = vmatprep.subr.bf16.mxu0 %v30092_v38 }
 0xa92   :  { %v22708_v9 = vpack.c.bf16 %v30169_v2, %v30168_v0  ;;  %v22714_v10 = vpack.c.bf16 %v30173_v17, %v30172_v11 }
 0xa94   :  { %22640 = vmatpush3.bf16.msra.mxu0 %v27196_v39  ;;  %v30170_v39 = vand.u32 4294901760, %v26691_v24  ;;  %v30175_v24 = vand.u32 4294901760, %v26720_v20  ;;  %v30179_v20 = vand.u32 4294901760, %v26731_v22  ;;  %v30183_v22 = vand.u32 4294901760, %v30139_v25  ;;  %v30186_v25 = vld [vmem:[#allocation8_spill] sm:$0xff] }
 0xa95   :  { %22641 = vmatprep.subr.bf16.mxu0 %v30092_v38 }
 0xa98   :  { %22643 = vmatpush3.bf16.msra.mxu0 %v27208_v29  ;;  %v22711_v29 = vpack.c.bf16 %v30171_v42, %v30170_v39  ;;  %v15667_v39 = vld [vmem:[%s29846_s4 + $0x130] sm:$0xff] }
 0xa99   :  { %22644 = vmatprep.subr.bf16.mxu0 %v30092_v38 }
 0xa9c   :  { %22646 = vmatpush3.bf16.msra.mxu0 %v30163_v19 }
 0xa9d   :  { %22647 = vmatprep.subr.bf16.mxu0 %v30092_v38 }
 0xaa0   :  { %22649 = vmatpush3.bf16.msra.mxu0 %v30164_v6  ;;  %v15661_v6 = vld [vmem:[%s29846_s4 + $0x100] sm:$0xff] }
 0xaa1   :  { %22650 = vmatprep.subr.bf16.mxu0 %v30092_v38 }
 0xaa2   :  { %v7571_v58 = vpop.f32.mrb[10].mxu0 }
 0xaa3   :  { %v19273_v63 = vpop.f32.mrb[11].mxu0 }
 0xaa4   :  { %22652 = vmatpush3.bf16.msra.mxu0 %v30165_v8  ;;  %v15663_v63 = vld [vmem:[%s29846_s4 + $0x110] sm:$0xff]  ;;  %v9261_v8 = vand.u32 4294901760, %v15661_v6 }
 0xaa5   :  { %22653 = vmatprep.subr.bf16.mxu0 %v30092_v38 }
 0xaa6   :  { %v27537_v42 = vsub.f32 %v15661_v6, %v9261_v8  ;;  %v15672_v6 = vld [vmem:[%s29846_s4 + $0x158] sm:$0xff] }
 0xaa8   :  { %22655 = vmatpush3.bf16.msra.mxu0 %v30166_v4 }
 0xaa9   :  { %22656 = vmatprep.subr.bf16.mxu0 %v30092_v38 }
 0xaac   :  { %22658 = vmatpush3.bf16.msra.mxu0 %v27266_v36  ;;  %v22720_v36 = vpack.c.bf16 %v30177_v3, %v30176_v52  ;;  %v9354_v52 = vand.u32 4294901760, %v27537_v42 }
 0xaad   :  { %22659 = vmatprep.subr.bf16.mxu0 %v30092_v38 }
 0xaaf   :  { %19517 = vmatmul.mubr.f32.vlgmr.msra.gmra.mrb[24].mxu0 %v30167_v18 }
 0xab0   :  { %22661 = vmatpush3.bf16.msra.mxu0 %v22660_v23  ;;  %19551 = vmatprep.mubr.msk.f32.mxu0 %vm23984_vm1, %v30093_v47  ;;  %v15660_v23 = vld [vmem:[%s29847_s8 + $0x10] sm:$0xff] }
 0xab1   :  { %22662 = vmatprep.subr.bf16.mxu0 %v30092_v38 }
 0xab4   :  { %22664 = vmatpush3.bf16.msra.mxu0 %v22663_v44  ;;  %v8769_v44 = vsel %vm6494_vm4, %v15660_v23, 0 }
 0xab5   :  { %22665 = vmatprep.subr.bf16.mxu0 %v30092_v38 }
 0xab8   :  { %22667 = vmatpush3.bf16.msra.mxu0 %v22666_v35 }
 0xab9   :  { %22668 = vmatprep.subr.bf16.mxu0 %v30092_v38 }
 0xabc   :  { %22670 = vmatpush3.bf16.msra.mxu0 %v22669_v40  ;;  %v8839_v40 = vand.u32 4294901760, %v8769_v44 }
 0xabd   :  { %22671 = vmatprep.subr.bf16.mxu0 %v30092_v38 }
 0xabe   :  { %v8840_v32 = vsub.f32 %v8769_v44, %v8839_v40  ;;  %v9279_v44 = vand.u32 4294901760, %v15667_v39 }
 0xac0   :  { %22673 = vmatpush3.bf16.msra.mxu0 %v22672_v43  ;;  %v22726_v43 = vpack.c.bf16 %v30181_v12, %v30180_v31  ;;  %v8841_v60 = vand.u32 4294901760, %v8840_v32  ;;  %v27573_v31 = vsub.f32 %v15667_v39, %v9279_v44 }
 0xac1   :  { %22674 = vmatprep.subr.bf16.mxu0 %v30092_v38 }
 0xac2   :  { %v7722_v34 = vpop.f32.mrb[12].mxu0 }
 0xac3   :  { %v7723_v14 = vadd.f32 %v7722_v34, %v7571_v58  ;;  %v19308_v21 = vpop.f32.mrb[13].mxu0  ;;  %v15662_v58 = vld [vmem:[%s29846_s4 + $0x108] sm:$0xff]  ;;  %v9267_v34 = vand.u32 4294901760, %v15663_v63 }
 0xac4   :  { %22676 = vmatpush3.bf16.msra.mxu0 %v22675_v50  ;;  %v8842_v50 = vsub.f32 %v8840_v32, %v8841_v60  ;;  %v9264_v4 = vand.u32 4294901760, %v15662_v58  ;;  %v15666_v21 = vld [vmem:[%s29846_s4 + $0x128] sm:$0xff] }
 0xac5   :  { %22677 = vmatprep.subr.bf16.mxu0 %v30092_v38  ;;  %v27541_v11 = vsub.f32 %v15663_v63, %v9267_v34 }
 0xac6   :  { %v8843_v53 = vand.u32 4294901760, %v8842_v50  ;;  %v27543_v17 = vpack.c.bf16 %v9264_v4, %v9261_v8 }
 0xac8   :  { %22679 = vmatpush3.bf16.msra.mxu0 %v22678_v37  ;;  %22775 = vmatpush3.bf16.msra.mxu1 %v27543_v17 }
 0xac9   :  { %22680 = vmatprep.subr.bf16.mxu0 %v30092_v38  ;;  %22776 = vmatprep.subr.bf16.mxu1 %v30092_v38 }
 0xacc   :  { %22682 = vmatpush3.bf16.msra.mxu0 %v22681_v7  ;;  %v30191_v7 = vld [vmem:[#allocation7_spill] sm:$0xff] }
 0xacd   :  { %22707 = vmatprep.subr.bf16.mxu0 %v30092_v38 }
 0xacf   :  { %19552 = vmatmul.mubr.f32.vlgmr.msra.gmra.mrb[26].mxu0 %v27097_v51  ;;  %v30174_v51 = vand.u32 4294901760, %v26718_v57  ;;  %v30178_v57 = vand.u32 4294901760, %v26726_v13  ;;  %v30182_v13 = vand.u32 4294901760, %v30138_v54  ;;  %v30185_v54 = vld [vmem:[#allocation4_spill] sm:$0xff] }
 0xad0   :  { %22709 = vmatpush3.bf16.msra.mxu0 %v22708_v9  ;;  %19621 = vmatprep.mubr.msk.f32.mxu0 %vm23984_vm1, %v30093_v47  ;;  %v9276_v9 = vand.u32 4294901760, %v15666_v21 }
 0xad1   :  { %22710 = vmatprep.subr.bf16.mxu0 %v30092_v38  ;;  %v22717_v16 = vpack.c.bf16 %v30175_v24, %v30174_v51  ;;  %v22723_v35 = vpack.c.bf16 %v30179_v20, %v30178_v57  ;;  %v22729_v5 = vpack.c.bf16 %v30183_v22, %v30182_v13  ;;  %v15669_v22 = vld [vmem:[%s29846_s4 + $0x140] sm:$0xff] }
 0xad4   :  { %22712 = vmatpush3.bf16.msra.mxu0 %v22711_v29  ;;  %v27539_v29 = vsub.f32 %v15662_v58, %v9264_v4 }
 0xad5   :  { %22713 = vmatprep.subr.bf16.mxu0 %v30092_v38 }
 0xad6   :  { %v9361_v3 = vand.u32 4294901760, %v27539_v29 }
 0xad8   :  { %22715 = vmatpush3.bf16.msra.mxu0 %v22714_v10  ;;  %v15668_v10 = vld [vmem:[%s29846_s4 + $0x138] sm:$0xff] }
 0xad9   :  { %22716 = vmatprep.subr.bf16.mxu0 %v30092_v38 }
 0xadc   :  { %22718 = vmatpush3.bf16.msra.mxu0 %v22717_v16  ;;  %v27552_v16 = vsub.f32 %v15666_v21, %v9276_v9 }
 0xadd   :  { %22719 = vmatprep.subr.bf16.mxu0 %v30092_v38 }
 0xae0   :  { %22721 = vmatpush3.bf16.msra.mxu0 %v22720_v36  ;;  %v9368_v36 = vand.u32 4294901760, %v27541_v11 }
 0xae1   :  { %22722 = vmatprep.subr.bf16.mxu0 %v30092_v38 }
 0xae2   :  { %v7826_v26 = vpop.f32.mrb[14].mxu0 }
 0xae3   :  { %v7827_v59 = vadd.f32 %v7826_v26, %v7723_v14  ;;  %v19343_v15 = vpop.f32.mrb[15].mxu0  ;;  %v15665_v14 = vld [vmem:[%s29846_s4 + $0x120] sm:$0xff]  ;;  %v9355_v26 = vsub.f32 %v27537_v42, %v9354_v52 }
 0xae4   :  { %22724 = vmatpush3.bf16.msra.mxu0 %v22723_v35  ;;  %v9273_v2 = vand.u32 4294901760, %v15665_v14  ;;  %v9389_v35 = vand.u32 4294901760, %v27552_v16  ;;  %v9369_v15 = vsub.f32 %v27541_v11, %v9368_v36 }
 0xae5   :  { %22725 = vmatprep.subr.bf16.mxu0 %v30092_v38 }
 0xae6   :  { %v27550_v24 = vsub.f32 %v15665_v14, %v9273_v2  ;;  %v9370_v50 = vand.u32 4294901760, %v9369_v15 }
 0xae8   :  { %22727 = vmatpush3.bf16.msra.mxu0 %v22726_v43  ;;  %v9382_v20 = vand.u32 4294901760, %v27550_v24 }
 0xae9   :  { %22728 = vmatprep.subr.bf16.mxu0 %v30092_v38 }
 0xaea   :  { %v9383_v43 = vsub.f32 %v27550_v24, %v9382_v20 }
 0xaec   :  { %22730 = vmatpush3.bf16.msra.mxu0 %v22729_v5  ;;  %v9356_v5 = vand.u32 4294901760, %v9355_v26  ;;  %v9384_v58 = vand.u32 4294901760, %v9383_v43  ;;  %v9294_v26 = vand.u32 4294901760, %v15672_v6 }
 0xaed   :  { %22755 = vmatprep.subr.bf16.mxu0 %v30092_v38 }
 0xaef   :  { %19622 = vmatmul.mubr.f32.vlgmr.msra.gmra.mrb[28].mxu0 %v30167_v18  ;;  %v15664_v18 = vld [vmem:[%s29846_s4 + $0x118] sm:$0xff] }
 0xaf0   :  { %22757 = vmatpush3.bf16.msra.mxu0 %v30184_v1  ;;  %19665 = vmatprep.mubr.msk.f32.mxu0 %vm23984_vm1, %v30093_v47  ;;  %v9270_v0 = vand.u32 4294901760, %v15664_v18 }
 0xaf1   :  { %19663 = vmatprep.subr.mxu0 %v30093_v47 }
 0xaf2   :  { %v27548_v51 = vsub.f32 %v15664_v18, %v9270_v0  ;;  %v27554_v23 = vpack.c.bf16 %v9270_v0, %v9267_v34  ;;  %v27613_v18 = vld [vmem:[%s29846_s4 + $0x160] sm:$0xff]  ;;  %v27618_v34 = vld [vmem:[%s29846_s4 + $0x168] sm:$0xff] }
 0xaf3   :  { %v9300_v43 = vand.u32 4294901760, %v27618_v34 }
 0xaf4   :  { %19664 = vmatpush3.msra.mxu0 %v30185_v54  ;;  %v9375_v57 = vand.u32 4294901760, %v27548_v51  ;;  %22778 = vmatpush3.bf16.msra.mxu1 %v27554_v23 }
 0xaf5   :  { %19666 = vmatmul.mubr.f32.vlgmr.msra.gmra.mrb[30].mxu0 %v8843_v53  ;;  %22758 = vmatprep.subr.bf16.mxu0 %v30092_v38  ;;  %v29987_v53 = vand.u32 4294901760, %v27573_v31 }
 0xaf6   :  { %22760 = vmatpush3.bf16.msra.mxu0 %v30186_v25  ;;  %19674 = vmatprep.mubr.msk.f32.mxu0 %vm23984_vm1, %v30093_v47  ;;  %v9376_v12 = vsub.f32 %v27548_v51, %v9375_v57 }
 0xaf7   :  { %19672 = vmatprep.subr.mxu0 %v30093_v47  ;;  %22779 = vmatprep.subr.bf16.mxu1 %v30092_v38 }
 0xafa   :  { %19673 = vmatpush3.msra.mxu0 %v30187_v33 }
 0xafb   :  { %22761 = vmatprep.subr.bf16.mxu0 %v30092_v38 }
 0xafd   :  { %19675 = vmatmul.mubr.f32.vlgmr.msra.gmra.mrb[30].mxu0 %v8839_v40 }
 0xafe   :  { %22763 = vmatpush3.bf16.msra.mxu0 %v30188_v56  ;;  %19683 = vmatprep.mubr.msk.f32.mxu0 %vm23984_vm1, %v30093_v47 }
 0xaff   :  { %19681 = vmatprep.subr.mxu0 %v30093_v47 }
 0xb02   :  { %19682 = vmatpush3.msra.mxu0 %v30189_v49  ;;  %v7915_v37 = vpop.f32.mrb[16].mxu0 }
 0xb03   :  { %v7916_v55 = vadd.f32 %v7915_v37, %v7827_v59  ;;  %v19378_v41 = vpop.f32.mrb[17].mxu0  ;;  %22764 = vmatprep.subr.bf16.mxu0 %v30092_v38  ;;  %v9362_v59 = vsub.f32 %v27539_v29, %v9361_v3  ;;  %v15670_v37 = vld [vmem:[%s29846_s4 + $0x148] sm:$0xff] }
 0xb04   :  { %v9288_v4 = vand.u32 4294901760, %v15670_v37 }
 0xb05   :  { %19684 = vmatmul.mubr.f32.vlgmr.msra.gmra.mrb[30].mxu0 %v8840_v32  ;;  %v9390_v32 = vsub.f32 %v27552_v16, %v9389_v35 }
 0xb06   :  { %22766 = vmatpush3.bf16.msra.mxu0 %v30184_v1  ;;  %19692 = vmatprep.mubr.msk.f32.mxu0 %vm23984_vm1, %v30093_v47 }
 0xb07   :  { %19690 = vmatprep.subr.mxu0 %v30093_v47  ;;  %v9391_v63 = vand.u32 4294901760, %v9390_v32 }
 0xb09   :  { %v22804_v32 = vpack.c.bf16 %v9391_v63, %v9384_v58 }
 0xb0a   :  { %19691 = vmatpush3.msra.mxu0 %v30185_v54 }
 0xb0b   :  { %22767 = vmatprep.subr.bf16.mxu0 %v30092_v38 }
 0xb0d   :  { %19693 = vmatmul.mubr.f32.vlgmr.msra.gmra.mrb[30].mxu0 %v8841_v60  ;;  %v9363_v60 = vand.u32 4294901760, %v9362_v59 }
 0xb0e   :  { %22769 = vmatpush3.bf16.msra.mxu0 %v30190_v28  ;;  %19701 = vmatprep.mubr.msk.f32.mxu0 %vm23984_vm1, %v30093_v47 }
 0xb0f   :  { %19699 = vmatprep.subr.mxu0 %v30093_v47 }
 0xb12   :  { %19700 = vmatpush3.msra.mxu0 %v30191_v7 }
 0xb13   :  { %22770 = vmatprep.subr.bf16.mxu0 %v30092_v38 }
 0xb15   :  { %19702 = vmatmul.mubr.f32.vlgmr.msra.gmra.mrb[30].mxu0 %v8839_v40 }
 0xb16   :  { %22772 = vmatpush3.bf16.msra.mxu0 %v30184_v1  ;;  %19710 = vmatprep.mubr.msk.f32.mxu0 %vm23984_vm1, %v30093_v47 }
 0xb17   :  { %19708 = vmatprep.subr.mxu0 %v30093_v47 }
 0xb1a   :  { %19709 = vmatpush3.msra.mxu0 %v30185_v54 }
 0xb1b   :  { %22797 = vmatprep.subr.bf16.mxu0 %v30092_v38 }
 0xb1d   :  { %19711 = vmatmul.mubr.f32.vlgmr.msra.gmra.mrb[30].mxu0 %v8839_v40  ;;  %v9282_v40 = vand.u32 4294901760, %v15668_v10 }
 0xb1e   :  { %19780 = vmatprep.mubr.msk.f32.mxu0 %vm23984_vm1, %v30093_v47 }
 0xb1f   :  { %v27584_v13 = vsub.f32 %v15668_v10, %v9282_v40  ;;  %v27623_v0 = vpack.c.bf16 %v9282_v40, %v9279_v44  ;;  %v27626_v10 = vsub.f32 %v15670_v37, %v9288_v4  ;;  %v27637_v44 = vld [vmem:[%s29846_s4 + $0x170] sm:$0xff]  ;;  %v27642_v40 = vld [vmem:[%s29846_s4 + $0x178] sm:$0xff] }
 0xb21   :  { %v29982_v41 = vand.u32 4294901760, %v27584_v13 }
 0xb22   :  { %v8034_v48 = vpop.f32.mrb[18].mxu0 }
 0xb23   :  { %v8035_v46 = vadd.f32 %v8034_v48, %v7916_v55  ;;  %v19413_v27 = vpop.f32.mrb[19].mxu0  ;;  %v9377_v55 = vand.u32 4294901760, %v9376_v12  ;;  %v15671_v48 = vld [vmem:[%s29846_s4 + $0x150] sm:$0xff]  ;;  %v9404_v8 = vsub.f32 %v27584_v13, %v29982_v41  ;;  %v9297_v12 = vand.u32 4294901760, %v27613_v18 }
 0xb24   :  { %v9397_v27 = vsub.f32 %v27573_v31, %v29987_v53 }
 0xb25   :  { %v22801_v14 = vpack.c.bf16 %v9377_v55, %v9370_v50  ;;  %v9405_v39 = vand.u32 4294901760, %v9404_v8  ;;  %v27657_v55 = vsub.f32 %v27613_v18, %v9297_v12  ;;  %v22825_v18 = vpack.c.bf16 %v27548_v51, %v27541_v11 }
 0xb26   :  { %v30193_v11 = vand.u32 4294901760, %v27584_v13 }
 0xb42   :  { %v8121_v30 = vpop.f32.mrb[20].mxu0 }
 0xb43   :  { %v27514_v61 = vadd.f32 %v8121_v30, %v8035_v46  ;;  %v19448_v19 = vpop.f32.mrb[21].mxu0  ;;  %v22798_v46 = vpack.c.bf16 %v9363_v60, %v9356_v5  ;;  %v27602_v30 = vpack.c.bf16 %v9276_v9, %v9273_v2  ;;  %v9291_v2 = vand.u32 4294901760, %v15671_v48 }
 0xb44   :  { %v9285_v19 = vand.u32 4294901760, %v15669_v22  ;;  %v9398_v9 = vand.u32 4294901760, %v9397_v27  ;;  %v27645_v5 = vsub.f32 %v15672_v6, %v9294_v26  ;;  %v9306_v6 = vand.u32 4294901760, %v27642_v40 }
 0xb45   :  { %22799 = vmatpush3.bf16.msra.mxu0 %v22798_v46  ;;  %22781 = vmatpush3.bf16.msra.mxu1 %v27602_v30  ;;  %v27630_v15 = vsub.f32 %v15671_v48, %v9291_v2  ;;  %v27662_v48 = vsub.f32 %v27618_v34, %v9300_v43  ;;  %v27672_v63 = vpack.c.bf16 %v9294_v26, %v9291_v2 }
 0xb46   :  { %v27621_v21 = vsub.f32 %v15669_v22, %v9285_v19  ;;  %22800 = vmatprep.subr.bf16.mxu0 %v30092_v38  ;;  %22782 = vmatprep.subr.bf16.mxu1 %v30092_v38  ;;  %v29980_v22 = vand.u32 4294901760, %v27626_v10  ;;  %v27647_v60 = vpack.c.bf16 %v9288_v4, %v9285_v19  ;;  %v29983_v27 = vand.u32 4294901760, %v27645_v5 }
 0xb47   :  { %v29985_v37 = vand.u32 4294901760, %v27630_v15  ;;  %v9303_v19 = vand.u32 4294901760, %v27637_v44  ;;  %v22807_v58 = vpack.c.bf16 %v9405_v39, %v9398_v9  ;;  %v27687_v9 = vsub.f32 %v27642_v40, %v9306_v6 }
 0xb48   :  { %v29981_v59 = vand.u32 4294901760, %v27621_v21  ;;  %v9418_v46 = vsub.f32 %v27626_v10, %v29980_v22  ;;  %v29986_v22 = vand.u32 4294901760, %v27662_v48  ;;  %v9432_v41 = vsub.f32 %v27645_v5, %v29983_v27 }
 0xb49   :  { %22802 = vmatpush3.bf16.msra.mxu0 %v22801_v14  ;;  %22784 = vmatpush3.bf16.msra.mxu1 %v27623_v0  ;;  %v9425_v4 = vsub.f32 %v27630_v15, %v29985_v37  ;;  %v29984_v14 = vand.u32 4294901760, %v27657_v55  ;;  %v27684_v2 = vsub.f32 %v27637_v44, %v9303_v19  ;;  %v22828_v34 = vpack.c.bf16 %v27552_v16, %v27550_v24  ;;  %v15677_v24 = vld [vmem:[%s29847_s8 + $0x18] sm:$0xff] }
 0xb4a   :  { %v9411_v50 = vsub.f32 %v27621_v21, %v29981_v59  ;;  %22803 = vmatprep.subr.bf16.mxu0 %v30092_v38  ;;  %22785 = vmatprep.subr.bf16.mxu1 %v30092_v38  ;;  %v9419_v59 = vand.u32 4294901760, %v9418_v46  ;;  %v9433_v44 = vand.u32 4294901760, %v9432_v41  ;;  %v29988_v46 = vand.u32 4294901760, %v27687_v9 }
 0xb4b   :  { %v9426_v39 = vand.u32 4294901760, %v9425_v4  ;;  %v9439_v26 = vsub.f32 %v27657_v55, %v29984_v14  ;;  %v9452_v40 = vand.u32 4294901760, %v27684_v2  ;;  %v30194_v16 = vand.u32 4294901760, %v27621_v21 }
 0xb4c   :  { %v9412_v8 = vand.u32 4294901760, %v9411_v50  ;;  %v9460_v41 = vsub.f32 %v27687_v9, %v29988_v46 }
 0xb4d   :  { %22805 = vmatpush3.bf16.msra.mxu0 %v22804_v32  ;;  %22787 = vmatpush3.bf16.msra.mxu1 %v27647_v60  ;;  %v9446_v32 = vsub.f32 %v27662_v48, %v29986_v22  ;;  %v9440_v4 = vand.u32 4294901760, %v9439_v26  ;;  %v22813_v14 = vpack.c.bf16 %v9433_v44, %v9426_v39 }
 0xb4e   :  { %22806 = vmatprep.subr.bf16.mxu0 %v30092_v38  ;;  %22788 = vmatprep.subr.bf16.mxu1 %v30092_v38  ;;  %v22810_v50 = vpack.c.bf16 %v9419_v59, %v9412_v8  ;;  %v9453_v59 = vsub.f32 %v27684_v2, %v9452_v40  ;;  %v9461_v53 = vand.u32 4294901760, %v9460_v41 }
 0xb4f   :  { %v9447_v37 = vand.u32 4294901760, %v9446_v32  ;;  %v22843_v32 = vpack.c.bf16 %v27687_v9, %v27684_v2 }
 0xb50   :  { %v9454_v26 = vand.u32 4294901760, %v9453_v59 }
 0xb51   :  { %22808 = vmatpush3.bf16.msra.mxu0 %v22807_v58  ;;  %22790 = vmatpush3.bf16.msra.mxu1 %v27672_v63  ;;  %v22816_v22 = vpack.c.bf16 %v9447_v37, %v9440_v4  ;;  %v27721_v37 = vpack.c.bf16 %v9306_v6, %v9303_v19  ;;  %v22834_v19 = vpack.c.bf16 %v27626_v10, %v27621_v21  ;;  %v30199_v21 = vand.u32 4294901760, %v27662_v48 }
 0xb52   :  { %22809 = vmatprep.subr.bf16.mxu0 %v30092_v38  ;;  %22791 = vmatprep.subr.bf16.mxu1 %v30092_v38  ;;  %v22819_v39 = vpack.c.bf16 %v9461_v53, %v9454_v26  ;;  %v22822_v53 = vpack.c.bf16 %v27539_v29, %v27537_v42  ;;  %v22837_v6 = vpack.c.bf16 %v27645_v5, %v27630_v15  ;;  %v30192_v29 = vand.u32 4294901760, %v27573_v31 }
 0xb53   :  { %v22876_v42 = vpack.c.bf16 %v9389_v35, %v9382_v20  ;;  %v30197_v20 = vand.u32 4294901760, %v27645_v5 }
 0xb54   :  { %v22879_v51 = vpack.c.bf16 %v30193_v11, %v30192_v29 }
 0xb55   :  { %22811 = vmatpush3.bf16.msra.mxu0 %v22810_v50 }
 0xb56   :  { %22812 = vmatprep.subr.bf16.mxu0 %v30092_v38 }
 0xb59   :  { %22814 = vmatpush3.bf16.msra.mxu0 %v22813_v14  ;;  %v22840_v14 = vpack.c.bf16 %v27662_v48, %v27657_v55 }
 0xb5a   :  { %22815 = vmatprep.subr.bf16.mxu0 %v30092_v38 }
 0xb5d   :  { %22817 = vmatpush3.bf16.msra.mxu0 %v22816_v22 }
 0xb5e   :  { %22818 = vmatprep.subr.bf16.mxu0 %v30092_v38 }
 0xb61   :  { %22820 = vmatpush3.bf16.msra.mxu0 %v22819_v39 }
 0xb62   :  { %v8212_v27 = vpop.f32.mrb[22].mxu0  ;;  %22845 = vmatprep.subr.bf16.mxu0 %v30092_v38 }
 0xb63   :  { %v8213_v58 = vadd.f32 %v8212_v27, %v27514_v61  ;;  %v19483_v8 = vpop.f32.mrb[23].mxu0  ;;  %v27717_v61 = vpack.c.bf16 %v9300_v43, %v9297_v12  ;;  %v22831_v27 = vpack.c.bf16 %v27584_v13, %v27573_v31 }
 0xb65   :  { %22793 = vmatpush3.bf16.msra.mxu1 %v27717_v61 }
 0xb66   :  { %22794 = vmatprep.subr.bf16.mxu1 %v30092_v38 }
 0xb69   :  { %22796 = vmatpush3.bf16.msra.mxu1 %v27721_v37 }
 0xb6a   :  { %22821 = vmatprep.subr.bf16.mxu1 %v30092_v38 }
 0xb82   :  { %v8363_v12 = vpop.f32.mrb[24].mxu0 }
 0xb83   :  { %v8364_v43 = vadd.f32 %v8363_v12, %v8213_v58  ;;  %v19518_v22 = vpop.f32.mrb[25].mxu0 }
 0xba2   :  { %v8467_v50 = vpop.f32.mrb[26].mxu0 }
 0xba3   :  { %v8468_v44 = vadd.f32 %v8467_v50, %v8364_v43  ;;  %v19553_v4 = vpop.f32.mrb[27].mxu0 }
 0xba5   :  { %v8557_v59 = vadd.f32 %v27351_v62, %v8468_v44 }
 0xbc2   :  { %v8675_v41 = vpop.f32.mrb[28].mxu0 }
 0xbc3   :  { %v8676_v58 = vadd.f32 %v8675_v41, %v8557_v59  ;;  %v19623_v8 = vpop.f32.mrb[29].mxu0 }
 0xbc5   :  { %v27743_v26 = vadd.f32 %v27374_v45, %v8676_v58 }
 0xbf0   :  { %v9239_v39 = vpop.f32.mrb[30].mxu0 }
 0xbf1   :  { %v27745_v12 = vand.u32 4294901760, %v9239_v39  ;;  %v19712_v22 = vpop.f32.mrb[31].mxu0 }
 0xbf2   :  { %v15686_v22 = vld [vmem:[%s29846_s4 + $0x1c0] sm:$0xff] }
 0xbf3   :  { %v9342_v46 = vsub.f32 %v9239_v39, %v27745_v12  ;;  %19781 = vmatmul.mubr.f32.vlgmr.msra.gmra.mrb[32].mxu0 %v27745_v12 }
 0xbf4   :  { %22847 = vmatpush3.bf16.msra.mxu0 %v27543_v17  ;;  %19850 = vmatprep.mubr.msk.f32.mxu0 %vm23984_vm1, %v30093_v47 }
 0xbf5   :  { %v9343_v62 = vand.u32 4294901760, %v9342_v46  ;;  %22848 = vmatprep.subr.bf16.mxu0 %v30092_v38 }
 0xbf7   :  { %v9344_v43 = vsub.f32 %v9342_v46, %v9343_v62 }
 0xbf8   :  { %22850 = vmatpush3.bf16.msra.mxu0 %v27554_v23 }
 0xbf9   :  { %v9345_v45 = vand.u32 4294901760, %v9344_v43  ;;  %22851 = vmatprep.subr.bf16.mxu0 %v30092_v38 }
 0xbfb   :  { %19746 = vmatmul.mubr.f32.vlgmr.msra.gmra.mrb[12].mxu1 %v9345_v45 }
 0xbfc   :  { %22823 = vmatpush3.bf16.msra.mxu1 %v22822_v53  ;;  %22853 = vmatpush3.bf16.msra.mxu0 %v27602_v30  ;;  %v22870_v53 = vpack.c.bf16 %v9361_v3, %v9354_v52  ;;  %v9905_v3 = vsel %vm6494_vm4, %v15677_v24, 0 }
 0xbfd   :  { %22824 = vmatprep.subr.bf16.mxu1 %v30092_v38  ;;  %22854 = vmatprep.subr.bf16.mxu0 %v30092_v38 }
 0xbfe   :  { %19815 = vmatprep.mubr.msk.f32.mxu1 %vm23984_vm1, %v30093_v47 }
 0xc00   :  { %22826 = vmatpush3.bf16.msra.mxu1 %v22825_v18  ;;  %22856 = vmatpush3.bf16.msra.mxu0 %v27623_v0 }
 0xc01   :  { %22827 = vmatprep.subr.bf16.mxu1 %v30092_v38  ;;  %22857 = vmatprep.subr.bf16.mxu0 %v30092_v38 }
 0xc04   :  { %22829 = vmatpush3.bf16.msra.mxu1 %v22828_v34  ;;  %22859 = vmatpush3.bf16.msra.mxu0 %v27647_v60 }
 0xc05   :  { %22830 = vmatprep.subr.bf16.mxu1 %v30092_v38  ;;  %22860 = vmatprep.subr.bf16.mxu0 %v30092_v38 }
 0xc08   :  { %22832 = vmatpush3.bf16.msra.mxu1 %v22831_v27  ;;  %22862 = vmatpush3.bf16.msra.mxu0 %v27672_v63 }
 0xc09   :  { %22833 = vmatprep.subr.bf16.mxu1 %v30092_v38  ;;  %22863 = vmatprep.subr.bf16.mxu0 %v30092_v38 }
 0xc0c   :  { %22835 = vmatpush3.bf16.msra.mxu1 %v22834_v19  ;;  %22865 = vmatpush3.bf16.msra.mxu0 %v27717_v61  ;;  %v15685_v19 = vld [vmem:[%s29846_s4 + $0x1b8] sm:$0xff] }
 0xc0d   :  { %22836 = vmatprep.subr.bf16.mxu1 %v30092_v38  ;;  %22866 = vmatprep.subr.bf16.mxu0 %v30092_v38  ;;  %v10418_v39 = vand.u32 4294901760, %v15685_v19 }
 0xc10   :  { %22838 = vmatpush3.bf16.msra.mxu1 %v22837_v6  ;;  %22868 = vmatpush3.bf16.msra.mxu0 %v27721_v37 }
 0xc11   :  { %22839 = vmatprep.subr.bf16.mxu1 %v30092_v38  ;;  %22893 = vmatprep.subr.bf16.mxu0 %v30092_v38 }
 0xc13   :  { %19851 = vmatmul.mubr.f32.vlgmr.msra.gmra.mrb[34].mxu0 %v9343_v62  ;;  %v15687_v62 = vld [vmem:[%s29846_s4 + $0x1c8] sm:$0xff] }
 0xc14   :  { %22841 = vmatpush3.bf16.msra.mxu1 %v22840_v14  ;;  %22895 = vmatpush3.bf16.msra.mxu0 %v27543_v17  ;;  %v22873_v17 = vpack.c.bf16 %v9375_v57, %v9368_v36  ;;  %v9975_v36 = vand.u32 4294901760, %v9905_v3  ;;  %v30196_v57 = vand.u32 4294901760, %v27630_v15  ;;  %v30200_v15 = vand.u32 4294901760, %v27687_v9 }
 0xc15   :  { %22842 = vmatprep.subr.bf16.mxu1 %v30092_v38  ;;  %22896 = vmatprep.subr.bf16.mxu0 %v30092_v38 }
 0xc16   :  { %19920 = vmatprep.mubr.msk.f32.mxu0 %vm23984_vm1, %v30093_v47  ;;  %v22885_v35 = vpack.c.bf16 %v30197_v20, %v30196_v57  ;;  %v9976_v31 = vsub.f32 %v9905_v3, %v9975_v36  ;;  %v22891_v5 = vpack.c.bf16 %v30200_v15, %v9452_v40  ;;  %v15682_v40 = vld [vmem:[%s29846_s4 + $0x1a0] sm:$0xff] }
 0xc17   :  { %v10409_v6 = vand.u32 4294901760, %v15682_v40 }
 0xc18   :  { %22844 = vmatpush3.bf16.msra.mxu1 %v22843_v32  ;;  %22898 = vmatpush3.bf16.msra.mxu0 %v27554_v23  ;;  %v30195_v23 = vand.u32 4294901760, %v27626_v10  ;;  %v9977_v13 = vand.u32 4294901760, %v9976_v31 }
 0xc19   :  { %22869 = vmatprep.subr.bf16.mxu1 %v30092_v38  ;;  %22899 = vmatprep.subr.bf16.mxu0 %v30092_v38  ;;  %v27931_v58 = vsub.f32 %v15682_v40, %v10409_v6 }
 0xc1a   :  { %v22882_v52 = vpack.c.bf16 %v30195_v23, %v30194_v16  ;;  %v9978_v10 = vsub.f32 %v9976_v31, %v9977_v13  ;;  %v10421_v23 = vand.u32 4294901760, %v15686_v22 }
 0xc1b   :  { %19816 = vmatmul.mubr.f32.vlgmr.msra.gmra.mrb[14].mxu1 %v9342_v46  ;;  %v15683_v46 = vld [vmem:[%s29846_s4 + $0x1a8] sm:$0xff] }
 0xc1c   :  { %22871 = vmatpush3.bf16.msra.mxu1 %v22870_v53  ;;  %22901 = vmatpush3.bf16.msra.mxu0 %v27602_v30  ;;  %v30198_v30 = vand.u32 4294901760, %v27657_v55  ;;  %v10412_v14 = vand.u32 4294901760, %v15683_v46 }
 0xc1d   :  { %22872 = vmatprep.subr.bf16.mxu1 %v30092_v38  ;;  %22902 = vmatprep.subr.bf16.mxu0 %v30092_v38 }
 0xc1e   :  { %19885 = vmatprep.mubr.msk.f32.mxu1 %vm23984_vm1, %v30093_v47  ;;  %v27933_v8 = vsub.f32 %v15683_v46, %v10412_v14 }
 0xc20   :  { %22874 = vmatpush3.bf16.msra.mxu1 %v22873_v17  ;;  %22904 = vmatpush3.bf16.msra.mxu0 %v27623_v0  ;;  %v22888_v0 = vpack.c.bf16 %v30199_v21, %v30198_v30  ;;  %v27949_v17 = vpack.c.bf16 %v10412_v14, %v10409_v6  ;;  %v10525_v29 = vand.u32 4294901760, %v27933_v8  ;;  %v27979_v30 = vsub.f32 %v15686_v22, %v10421_v23 }
 0xc21   :  { %22875 = vmatprep.subr.bf16.mxu1 %v30092_v38  ;;  %22905 = vmatprep.subr.bf16.mxu0 %v30092_v38 }
 0xc24   :  { %22877 = vmatpush3.bf16.msra.mxu1 %v22876_v42  ;;  %22907 = vmatpush3.bf16.msra.mxu0 %v27647_v60  ;;  %v9979_v60 = vand.u32 4294901760, %v9978_v10  ;;  %v10518_v42 = vand.u32 4294901760, %v27931_v58  ;;  %v27988_v10 = vld [vmem:[%s29846_s4 + $0x1e0] sm:$0xff] }
 0xc25   :  { %22878 = vmatprep.subr.bf16.mxu1 %v30092_v38  ;;  %22908 = vmatprep.subr.bf16.mxu0 %v30092_v38  ;;  %v10433_v40 = vand.u32 4294901760, %v27988_v10 }
 0xc26   :  { %v10519_v3 = vsub.f32 %v27931_v58, %v10518_v42 }
 0xc28   :  { %22880 = vmatpush3.bf16.msra.mxu1 %v22879_v51  ;;  %22910 = vmatpush3.bf16.msra.mxu0 %v27672_v63  ;;  %v27955_v51 = vsub.f32 %v15685_v19, %v10418_v39  ;;  %v10520_v15 = vand.u32 4294901760, %v10519_v3 }
 0xc29   :  { %22881 = vmatprep.subr.bf16.mxu1 %v30092_v38  ;;  %22911 = vmatprep.subr.bf16.mxu0 %v30092_v38 }
 0xc2a   :  { %v10539_v20 = vand.u32 4294901760, %v27955_v51 }
 0xc2c   :  { %22883 = vmatpush3.bf16.msra.mxu1 %v22882_v52  ;;  %22913 = vmatpush3.bf16.msra.mxu0 %v27717_v61  ;;  %v15684_v61 = vld [vmem:[%s29846_s4 + $0x1b0] sm:$0xff]  ;;  %v10424_v52 = vand.u32 4294901760, %v15687_v62 }
 0xc2d   :  { %22884 = vmatprep.subr.bf16.mxu1 %v30092_v38  ;;  %22914 = vmatprep.subr.bf16.mxu0 %v30092_v38  ;;  %v10415_v50 = vand.u32 4294901760, %v15684_v61 }
 0xc2e   :  { %v27981_v21 = vsub.f32 %v15687_v62, %v10424_v52  ;;  %v28019_v6 = vpack.c.bf16 %v10424_v52, %v10421_v23 }
 0xc30   :  { %22886 = vmatpush3.bf16.msra.mxu1 %v22885_v35  ;;  %22916 = vmatpush3.bf16.msra.mxu0 %v27721_v37  ;;  %v27972_v35 = vld [vmem:[%s29846_s4 + $0x1d0] sm:$0xff] }
 0xc31   :  { %22887 = vmatprep.subr.bf16.mxu1 %v30092_v38  ;;  %22917 = vmatprep.subr.bf16.mxu0 %v30092_v38 }
 0xc33   :  { %19921 = vmatmul.mubr.f32.vlgmr.msra.gmra.mrb[36].mxu0 %v27745_v12 }
 0xc34   :  { %22889 = vmatpush3.bf16.msra.mxu1 %v22888_v0  ;;  %22919 = vmatpush3.bf16.msra.mxu0 %v30184_v1  ;;  %v27983_v0 = vpack.c.bf16 %v10418_v39, %v10415_v50 }
 0xc35   :  { %22890 = vmatprep.subr.bf16.mxu1 %v30092_v38  ;;  %19927 = vmatprep.subr.mxu0 %v30093_v47 }
 0xc36   :  { %19929 = vmatprep.mubr.msk.f32.mxu0 %vm23984_vm1, %v30093_v47 }
 0xc38   :  { %22892 = vmatpush3.bf16.msra.mxu1 %v22891_v5  ;;  %19928 = vmatpush3.msra.mxu0 %v30185_v54 }
 0xc39   :  { %22920 = vmatprep.subr.bf16.mxu1 %v30092_v38  ;;  %19930 = vmatmul.mubr.f32.vlgmr.msra.gmra.mrb[38].mxu0 %v9979_v60 }
 0xc3a   :  { %22935 = vmatprep.subr.bf16.mxu0 %v30092_v38  ;;  %20009 = vmatprep.mubr.msk.f32.mxu0 %vm23984_vm1, %v30093_v47 }
 0xc3b   :  { %19886 = vmatmul.mubr.f32.vlgmr.msra.gmra.mrb[16].mxu1 %v27745_v12  ;;  %v27935_v12 = vsub.f32 %v15684_v61, %v10415_v50  ;;  %v28023_v50 = vsub.f32 %v27988_v10, %v10433_v40 }
 0xc3c   :  { %22922 = vmatpush3.bf16.msra.mxu1 %v30186_v25  ;;  %19938 = vmatprep.mubr.msk.f32.mxu1 %vm23984_vm1, %v30093_v47  ;;  %v15678_v25 = vld [vmem:[%s29846_s4 + $0x180] sm:$0xff] }
 0xc3d   :  { %19936 = vmatprep.subr.mxu1 %v30093_v47  ;;  %v10532_v11 = vand.u32 4294901760, %v27935_v12  ;;  %v29992_v62 = vand.u32 4294901760, %v28023_v50 }
 0xc3f   :  { %v10533_v57 = vsub.f32 %v27935_v12, %v10532_v11 }
 0xc40   :  { %19937 = vmatpush3.msra.mxu1 %v30187_v33  ;;  %v10397_v33 = vand.u32 4294901760, %v15678_v25 }
 0xc41   :  { %19939 = vmatmul.mubr.f32.vlgmr.msra.gmra.mrb[18].mxu1 %v9975_v36  ;;  %22923 = vmatprep.subr.bf16.mxu1 %v30092_v38  ;;  %v10534_v60 = vand.u32 4294901760, %v10533_v57 }
 0xc42   :  { %22925 = vmatpush3.bf16.msra.mxu1 %v30188_v56  ;;  %19947 = vmatprep.mubr.msk.f32.mxu1 %vm23984_vm1, %v30093_v47 }
 0xc43   :  { %19945 = vmatprep.subr.mxu1 %v30093_v47 }
 0xc46   :  { %19946 = vmatpush3.msra.mxu1 %v30189_v49  ;;  %v27889_v49 = vsub.f32 %v15678_v25, %v10397_v33  ;;  %v10540_v25 = vsub.f32 %v27955_v51, %v10539_v20 }
 0xc47   :  { %22926 = vmatprep.subr.bf16.mxu1 %v30092_v38 }
 0xc48   :  { %v10490_v55 = vand.u32 4294901760, %v27889_v49 }
 0xc49   :  { %19948 = vmatmul.mubr.f32.vlgmr.msra.gmra.mrb[18].mxu1 %v9976_v31  ;;  %v27977_v31 = vld [vmem:[%s29846_s4 + $0x1d8] sm:$0xff] }
 0xc4a   :  { %22928 = vmatpush3.bf16.msra.mxu1 %v30184_v1  ;;  %19956 = vmatprep.mubr.msk.f32.mxu1 %vm23984_vm1, %v30093_v47  ;;  %v10491_v37 = vsub.f32 %v27889_v49, %v10490_v55 }
 0xc4b   :  { %19954 = vmatprep.subr.mxu1 %v30093_v47 }
 0xc4c   :  { %v10492_v44 = vand.u32 4294901760, %v10491_v37 }
 0xc4e   :  { %19955 = vmatpush3.msra.mxu1 %v30185_v54 }
 0xc4f   :  { %22929 = vmatprep.subr.bf16.mxu1 %v30092_v38 }
 0xc51   :  { %19957 = vmatmul.mubr.f32.vlgmr.msra.gmra.mrb[18].mxu1 %v9977_v13 }
 0xc52   :  { %22931 = vmatpush3.bf16.msra.mxu1 %v30190_v28  ;;  %19965 = vmatprep.mubr.msk.f32.mxu1 %vm23984_vm1, %v30093_v47 }
 0xc53   :  { %19963 = vmatprep.subr.mxu1 %v30093_v47 }
 0xc56   :  { %19964 = vmatpush3.msra.mxu1 %v30191_v7  ;;  %v15681_v7 = vld [vmem:[%s29846_s4 + $0x198] sm:$0xff] }
 0xc57   :  { %22932 = vmatprep.subr.bf16.mxu1 %v30092_v38  ;;  %v10406_v2 = vand.u32 4294901760, %v15681_v7 }
 0xc59   :  { %19966 = vmatmul.mubr.f32.vlgmr.msra.gmra.mrb[18].mxu1 %v9975_v36  ;;  %v27920_v27 = vsub.f32 %v15681_v7, %v10406_v2  ;;  %v28002_v7 = vld [vmem:[%s29846_s4 + $0x1e8] sm:$0xff] }
 0xc5a   :  { %22934 = vmatpush3.bf16.msra.mxu1 %v30184_v1  ;;  %19974 = vmatprep.mubr.msk.f32.mxu1 %vm23984_vm1, %v30093_v47  ;;  %v15679_v1 = vld [vmem:[%s29846_s4 + $0x188] sm:$0xff]  ;;  %v10436_v14 = vand.u32 4294901760, %v28002_v7 }
 0xc5b   :  { %19972 = vmatprep.subr.mxu1 %v30093_v47  ;;  %v10400_v56 = vand.u32 4294901760, %v15679_v1  ;;  %v10511_v41 = vand.u32 4294901760, %v27920_v27 }
 0xc5d   :  { %v27891_v28 = vsub.f32 %v15679_v1, %v10400_v56  ;;  %v27901_v9 = vpack.c.bf16 %v10400_v56, %v10397_v33  ;;  %v10512_v53 = vsub.f32 %v27920_v27, %v10511_v41  ;;  %v10546_v1 = vand.u32 4294901760, %v27979_v30 }
 0xc5e   :  { %19973 = vmatpush3.msra.mxu1 %v30185_v54  ;;  %v15680_v54 = vld [vmem:[%s29846_s4 + $0x190] sm:$0xff]  ;;  %v29995_v33 = vand.u32 4294901760, %v27981_v21  ;;  %v10427_v56 = vand.u32 4294901760, %v27972_v35 }
 0xc5f   :  { %22959 = vmatprep.subr.bf16.mxu1 %v30092_v38  ;;  %v10497_v48 = vand.u32 4294901760, %v27891_v28  ;;  %v10403_v63 = vand.u32 4294901760, %v15680_v54  ;;  %22937 = vmatpush3.bf16.msra.mxu0 %v27901_v9  ;;  %v10513_v16 = vand.u32 4294901760, %v10512_v53  ;;  %v10547_v46 = vsub.f32 %v27979_v30, %v10546_v1 }
 0xc60   :  { %22938 = vmatprep.subr.bf16.mxu0 %v30092_v38  ;;  %v10554_v61 = vsub.f32 %v27981_v21, %v29995_v33  ;;  %v28013_v37 = vsub.f32 %v27972_v35, %v10427_v56  ;;  %v15692_v35 = vld [vmem:[%s29846_s4 + $0x1f0] sm:$0xff] }
 0xc61   :  { %19975 = vmatmul.mubr.f32.vlgmr.msra.gmra.mrb[18].mxu1 %v9975_v36  ;;  %v10498_v18 = vsub.f32 %v27891_v28, %v10497_v48  ;;  %v27918_v34 = vsub.f32 %v15680_v54, %v10403_v63  ;;  %v27926_v32 = vpack.c.bf16 %v10406_v2, %v10403_v63  ;;  %v10526_v36 = vsub.f32 %v27933_v8, %v10525_v29 }
 0xc62   :  { %20044 = vmatprep.mubr.msk.f32.mxu1 %vm23984_vm1, %v30093_v47  ;;  %v10430_v54 = vand.u32 4294901760, %v27977_v31  ;;  %v10541_v2 = vand.u32 4294901760, %v10540_v25  ;;  %v29994_v39 = vand.u32 4294901760, %v28013_v37 }
 0xc63   :  { %v10499_v4 = vand.u32 4294901760, %v10498_v18  ;;  %v10504_v59 = vand.u32 4294901760, %v27918_v34  ;;  %22940 = vmatpush3.bf16.msra.mxu0 %v27926_v32  ;;  %v10527_v5 = vand.u32 4294901760, %v10526_v36 }
 0xc64   :  { %22941 = vmatprep.subr.bf16.mxu0 %v30092_v38  ;;  %v28016_v18 = vsub.f32 %v27977_v31, %v10430_v54  ;;  %v22969_v19 = vpack.c.bf16 %v10541_v2, %v10534_v60  ;;  %v15693_v31 = vld [vmem:[%s29846_s4 + $0x1f8] sm:$0xff] }
 0xc65   :  { %v22960_v43 = vpack.c.bf16 %v10499_v4, %v10492_v44  ;;  %v10505_v45 = vsub.f32 %v27918_v34, %v10504_v59  ;;  %v22966_v63 = vpack.c.bf16 %v10527_v5, %v10520_v15  ;;  %v10548_v44 = vand.u32 4294901760, %v10547_v46 }
 0xc66   :  { %v10555_v4 = vand.u32 4294901760, %v10554_v61  ;;  %v29993_v22 = vand.u32 4294901760, %v28016_v18  ;;  %v10439_v15 = vand.u32 4294901760, %v15692_v35  ;;  %v10442_v5 = vand.u32 4294901760, %v15693_v31 }
 0xc67   :  { %22961 = vmatpush3.bf16.msra.mxu1 %v22960_v43  ;;  %v10506_v24 = vand.u32 4294901760, %v10505_v45  ;;  %22943 = vmatpush3.bf16.msra.mxu0 %v27949_v17  ;;  %v28031_v43 = vsub.f32 %v28002_v7, %v10436_v14  ;;  %v10561_v45 = vsub.f32 %v28013_v37, %v29994_v39 }
 0xc68   :  { %22962 = vmatprep.subr.bf16.mxu1 %v30092_v38  ;;  %22944 = vmatprep.subr.bf16.mxu0 %v30092_v38  ;;  %v10568_v53 = vsub.f32 %v28016_v18, %v29993_v22  ;;  %v22972_v23 = vpack.c.bf16 %v10555_v4, %v10548_v44  ;;  %v28056_v60 = vsub.f32 %v15692_v35, %v10439_v15 }
 0xc69   :  { %v22963_v13 = vpack.c.bf16 %v10513_v16, %v10506_v24  ;;  %v10575_v24 = vsub.f32 %v28023_v50, %v29992_v62  ;;  %v29991_v16 = vand.u32 4294901760, %v28031_v43  ;;  %v10562_v52 = vand.u32 4294901760, %v10561_v45 }
 0xc6a   :  { %v10569_v3 = vand.u32 4294901760, %v10568_v53  ;;  %v28058_v25 = vsub.f32 %v15693_v31, %v10442_v5  ;;  %v28070_v4 = vpack.c.bf16 %v10430_v54, %v10427_v56  ;;  %v28075_v53 = vpack.c.bf16 %v10436_v14, %v10433_v40 }
 0xc6b   :  { %22964 = vmatpush3.bf16.msra.mxu1 %v22963_v13  ;;  %22946 = vmatpush3.bf16.msra.mxu0 %v27983_v0  ;;  %v10582_v36 = vsub.f32 %v28031_v43, %v29991_v16  ;;  %v10576_v57 = vand.u32 4294901760, %v10575_v24  ;;  %v28079_v24 = vpack.c.bf16 %v10442_v5, %v10439_v15  ;;  %v22984_v56 = vpack.c.bf16 %v27891_v28, %v27889_v49  ;;  %v15695_v49 = vld [vmem:[%s29847_s8 + $0x8] sm:$0xff] }
 0xc6c   :  { %22965 = vmatprep.subr.bf16.mxu1 %v30092_v38  ;;  %22947 = vmatprep.subr.bf16.mxu0 %v30092_v38  ;;  %v22975_v13 = vpack.c.bf16 %v10569_v3, %v10562_v52  ;;  %v29989_v2 = vand.u32 4294901760, %v28058_v25  ;;  %v22987_v54 = vpack.c.bf16 %v27920_v27, %v27918_v34  ;;  %v22990_v40 = vpack.c.bf16 %v27933_v8, %v27931_v58  ;;  %v11048_v8 = vld [vmem:[%s29847_s8] sm:$0xff] }
 0xc6d   :  { %v10583_v10 = vand.u32 4294901760, %v10582_v36  ;;  %v22993_v14 = vpack.c.bf16 %v27955_v51, %v27935_v12  ;;  %v22996_v35 = vpack.c.bf16 %v27981_v21, %v27979_v30  ;;  %v22999_v31 = vpack.c.bf16 %v28016_v18, %v28013_v37 }
 0xc6e   :  { %v10596_v61 = vsub.f32 %v28058_v25, %v29989_v2  ;;  %v23038_v28 = vpack.c.bf16 %v10525_v29, %v10518_v42  ;;  %v11545_v34 = vsel %vm6494_vm4, %v15695_v49, 0  ;;  %v30201_v12 = vand.u32 4294901760, %v27981_v21 }
 0xc6f   :  { %22967 = vmatpush3.bf16.msra.mxu1 %v22966_v63  ;;  %22949 = vmatpush3.bf16.msra.mxu0 %v28019_v6  ;;  %v22978_v7 = vpack.c.bf16 %v10583_v10, %v10576_v57  ;;  %v29990_v63 = vand.u32 4294901760, %v28056_v60  ;;  %v23005_v10 = vpack.c.bf16 %v28058_v25, %v28056_v60  ;;  %v28171_v58 = vand.u32 4294901760, %v11545_v34 }
 0xc70   :  { %22968 = vmatprep.subr.bf16.mxu1 %v30092_v38  ;;  %22950 = vmatprep.subr.bf16.mxu0 %v30092_v38  ;;  %v10597_v44 = vand.u32 4294901760, %v10596_v61  ;;  %v23044_v42 = vpack.c.bf16 %v30201_v12, %v10546_v1  ;;  %v30202_v30 = vand.u32 4294901760, %v28013_v37  ;;  %v30203_v21 = vand.u32 4294901760, %v28016_v18 }
 0xc71   :  { %v10589_v46 = vsub.f32 %v28056_v60, %v29990_v63  ;;  %v28189_v51 = vsub.f32 %v11545_v34, %v28171_v58  ;;  %v30204_v37 = vand.u32 4294901760, %v28023_v50  ;;  %v30205_v18 = vand.u32 4294901760, %v28031_v43 }
 0xc72   :  { %v23047_v1 = vpack.c.bf16 %v30203_v21, %v30202_v30  ;;  %v15703_v30 = vld [vmem:[%s29846_s4 + $0xb8] sm:$0xff]  ;;  %v28398_v21 = vld [vmem:[%s29846_s4 + $0xc0] sm:$0xff] }
 0xc73   :  { %22970 = vmatpush3.bf16.msra.mxu1 %v22969_v19  ;;  %v10590_v19 = vand.u32 4294901760, %v10589_v46  ;;  %22952 = vmatpush3.bf16.msra.mxu0 %v28070_v4 }
 0xc74   :  { %22971 = vmatprep.subr.bf16.mxu1 %v30092_v38  ;;  %22953 = vmatprep.subr.bf16.mxu0 %v30092_v38 }
 0xc75   :  { %v22981_v45 = vpack.c.bf16 %v10597_v44, %v10590_v19 }
 0xc77   :  { %22973 = vmatpush3.bf16.msra.mxu1 %v22972_v23  ;;  %22955 = vmatpush3.bf16.msra.mxu0 %v28075_v53 }
 0xc78   :  { %22974 = vmatprep.subr.bf16.mxu1 %v30092_v38  ;;  %22956 = vmatprep.subr.bf16.mxu0 %v30092_v38 }
 0xc7b   :  { %22976 = vmatpush3.bf16.msra.mxu1 %v22975_v13  ;;  %22958 = vmatpush3.bf16.msra.mxu0 %v28079_v24  ;;  %v23002_v13 = vpack.c.bf16 %v28031_v43, %v28023_v50 }
 0xc7c   :  { %22977 = vmatprep.subr.bf16.mxu1 %v30092_v38  ;;  %22983 = vmatprep.subr.bf16.mxu0 %v30092_v38 }
 0xc7f   :  { %22979 = vmatpush3.bf16.msra.mxu1 %v22978_v7 }
 0xc80   :  { %22980 = vmatprep.subr.bf16.mxu1 %v30092_v38 }
 0xc83   :  { %22982 = vmatpush3.bf16.msra.mxu1 %v22981_v45 }
 0xc84   :  { %23007 = vmatprep.subr.bf16.mxu1 %v30092_v38 }
 0xcc6   :  { %v9498_v23 = vpop.f32.mrb[32].mxu0 }
 0xcc7   :  { %v19782_v52 = vpop.f32.mrb[33].mxu0 }
 0xcce   :  { %v9347_v3 = vpop.f32.mrb[12].mxu1 }
 0xccf   :  { %v9499_v36 = vadd.f32 %v9498_v23, %v9347_v3  ;;  %v19747_v57 = vpop.f32.mrb[13].mxu1 }
 0xce6   :  { %v9691_v15 = vpop.f32.mrb[34].mxu0 }
 0xce7   :  { %v19852_v5 = vpop.f32.mrb[35].mxu0 }
 0xcee   :  { %v9602_v7 = vpop.f32.mrb[14].mxu1 }
 0xcef   :  { %v9603_v46 = vadd.f32 %v9602_v7, %v9499_v36  ;;  %v19817_v61 = vpop.f32.mrb[15].mxu1 }
 0xcf1   :  { %v9692_v19 = vadd.f32 %v9691_v15, %v9603_v46 }
 0xd06   :  { %v9897_v44 = vpop.f32.mrb[36].mxu0 }
 0xd07   :  { %v19922_v45 = vpop.f32.mrb[37].mxu0 }
 0xd08   :  { %v15696_v45 = vld [vmem:[%s29846_s4 + $0x80] sm:$0xff] }
 0xd0c   :  { %v9981_v23 = vpop.f32.mrb[38].mxu0 }
 0xd0d   :  { %v19931_v52 = vpop.f32.mrb[39].mxu0 }
 0xd0e   :  { %v9810_v3 = vpop.f32.mrb[16].mxu1  ;;  %v12036_v52 = vand.u32 4294901760, %v15696_v45 }
 0xd0f   :  { %v9811_v57 = vadd.f32 %v9810_v3, %v9692_v19  ;;  %v19887_v2 = vpop.f32.mrb[17].mxu1 }
 0xd11   :  { %v9898_v63 = vadd.f32 %v9897_v44, %v9811_v57  ;;  %v28351_v57 = vsub.f32 %v15696_v45, %v12036_v52 }
 0xd13   :  { %v28100_v16 = vadd.f32 %v9898_v63, %v27743_v26 }
 0xd34   :  { %v10375_v62 = vpop.f32.mrb[18].mxu1 }
 0xd35   :  { %v23728_v22 = vadd.f32 %v10375_v62, %v9981_v23  ;;  %v19976_v39 = vpop.f32.mrb[19].mxu1  ;;  %v11617_v62 = vand.u32 4294901760, %v28189_v51  ;;  %v15697_v23 = vld [vmem:[%s29846_s4 + $0x88] sm:$0xff] }
 0xd36   :  { %v23032_v39 = vpack.c.bf16 %v10497_v48, %v10490_v55  ;;  %v11045_v55 = vld [vmem:[#allocation3 + $0x18] sm:$0xff]  ;;  %v11046_v48 = vld [vmem:[#allocation3 + $0x20] sm:$0xff]  ;;  %v12039_v3 = vand.u32 4294901760, %v15697_v23 }
 0xd37   :  { %v28102_v33 = vand.u32 4294901760, %v23728_v22  ;;  %v11056_v27 = vand.u32 4294901760, %v11045_v55 }
 0xd39   :  { %v10478_v36 = vsub.f32 %v23728_v22, %v28102_v33  ;;  %20045 = vmatmul.mubr.f32.vlgmr.msra.gmra.mrb[20].mxu1 %v28102_v33  ;;  %v28182_v29 = vsub.f32 %v11045_v55, %v11056_v27 }
 0xd3a   :  { %23009 = vmatpush3.bf16.msra.mxu1 %v27901_v9  ;;  %20114 = vmatprep.mubr.msk.f32.mxu1 %vm23984_vm1, %v30093_v47 }
 0xd3b   :  { %v10479_v15 = vand.u32 4294901760, %v10478_v36  ;;  %23010 = vmatprep.subr.bf16.mxu1 %v30092_v38 }
 0xd3d   :  { %v10480_v2 = vsub.f32 %v10478_v36, %v10479_v15 }
 0xd3e   :  { %23012 = vmatpush3.bf16.msra.mxu1 %v27926_v32 }
 0xd3f   :  { %23013 = vmatprep.subr.bf16.mxu1 %v30092_v38  ;;  %v10481_v26 = vand.u32 4294901760, %v10480_v2  ;;  %v15699_v2 = vld [vmem:[%s29846_s4 + $0x98] sm:$0xff] }
 0xd40   :  { %v12045_v49 = vand.u32 4294901760, %v15699_v2 }
 0xd41   :  { %20010 = vmatmul.mubr.f32.vlgmr.msra.gmra.mrb[40].mxu0 %v10481_v26  ;;  %v12129_v26 = vand.u32 4294901760, %v28351_v57 }
 0xd42   :  { %22985 = vmatpush3.bf16.msra.mxu0 %v22984_v56  ;;  %23015 = vmatpush3.bf16.msra.mxu1 %v27949_v17  ;;  %v28371_v34 = vsub.f32 %v15699_v2, %v12045_v49 }
 0xd43   :  { %22986 = vmatprep.subr.bf16.mxu0 %v30092_v38  ;;  %23016 = vmatprep.subr.bf16.mxu1 %v30092_v38 }
 0xd44   :  { %20079 = vmatprep.mubr.msk.f32.mxu0 %vm23984_vm1, %v30093_v47 }
 0xd46   :  { %22988 = vmatpush3.bf16.msra.mxu0 %v22987_v54  ;;  %23018 = vmatpush3.bf16.msra.mxu1 %v27983_v0 }
 0xd47   :  { %22989 = vmatprep.subr.bf16.mxu0 %v30092_v38  ;;  %23019 = vmatprep.subr.bf16.mxu1 %v30092_v38 }
 0xd4a   :  { %22991 = vmatpush3.bf16.msra.mxu0 %v22990_v40  ;;  %23021 = vmatpush3.bf16.msra.mxu1 %v28019_v6  ;;  %v30206_v40 = vand.u32 4294901760, %v28056_v60 }
 0xd4b   :  { %22992 = vmatprep.subr.bf16.mxu0 %v30092_v38  ;;  %23022 = vmatprep.subr.bf16.mxu1 %v30092_v38 }
 0xd4e   :  { %22994 = vmatpush3.bf16.msra.mxu0 %v22993_v14  ;;  %23024 = vmatpush3.bf16.msra.mxu1 %v28070_v4  ;;  %v30207_v14 = vand.u32 4294901760, %v28058_v25 }
 0xd4f   :  { %22995 = vmatprep.subr.bf16.mxu0 %v30092_v38  ;;  %23025 = vmatprep.subr.bf16.mxu1 %v30092_v38 }
 0xd52   :  { %22997 = vmatpush3.bf16.msra.mxu0 %v22996_v35  ;;  %23027 = vmatpush3.bf16.msra.mxu1 %v28075_v53  ;;  %v23053_v35 = vpack.c.bf16 %v30207_v14, %v30206_v40  ;;  %v28422_v40 = vld [vmem:[%s29846_s4 + $0xd0] sm:$0xff]  ;;  %v28427_v14 = vld [vmem:[%s29846_s4 + $0xd8] sm:$0xff] }
 0xd53   :  { %22998 = vmatprep.subr.bf16.mxu0 %v30092_v38  ;;  %23028 = vmatprep.subr.bf16.mxu1 %v30092_v38 }
 0xd56   :  { %23000 = vmatpush3.bf16.msra.mxu0 %v22999_v31  ;;  %23030 = vmatpush3.bf16.msra.mxu1 %v28079_v24 }
 0xd57   :  { %23001 = vmatprep.subr.bf16.mxu0 %v30092_v38  ;;  %23055 = vmatprep.subr.bf16.mxu1 %v30092_v38 }
 0xd59   :  { %20115 = vmatmul.mubr.f32.vlgmr.msra.gmra.mrb[22].mxu1 %v10479_v15  ;;  %v15698_v15 = vld [vmem:[%s29846_s4 + $0x90] sm:$0xff] }
 0xd5a   :  { %23003 = vmatpush3.bf16.msra.mxu0 %v23002_v13  ;;  %23057 = vmatpush3.bf16.msra.mxu1 %v27901_v9  ;;  %v23035_v9 = vpack.c.bf16 %v10511_v41, %v10504_v59  ;;  %v23041_v59 = vpack.c.bf16 %v10539_v20, %v10532_v11  ;;  %v11047_v41 = vld [vmem:[#allocation3 + $0x28] sm:$0x3]  ;;  %v11050_v20 = vsel %vm6494_vm4, %v11048_v8, 0  ;;  %v12150_v8 = vand.u32 4294901760, %v28371_v34 }
 0xd5b   :  { %23004 = vmatprep.subr.bf16.mxu0 %v30092_v38  ;;  %23058 = vmatprep.subr.bf16.mxu1 %v30092_v38  ;;  %v28204_v63 = vand.u32 4294901760, %v11050_v20 }
 0xd5c   :  { %20184 = vmatprep.mubr.msk.f32.mxu1 %vm23984_vm1, %v30093_v47 }
 0xd5d   :  { %v28226_v50 = vsub.f32 %v11050_v20, %v28204_v63  ;;  %v15702_v20 = vld [vmem:[%s29846_s4 + $0xb0] sm:$0xff] }
 0xd5e   :  { %23006 = vmatpush3.bf16.msra.mxu0 %v23005_v10  ;;  %23060 = vmatpush3.bf16.msra.mxu1 %v27926_v32  ;;  %v11059_v32 = vand.u32 4294901760, %v11046_v48 }
 0xd5f   :  { %23031 = vmatprep.subr.bf16.mxu0 %v30092_v38  ;;  %23061 = vmatprep.subr.bf16.mxu1 %v30092_v38  ;;  %v11125_v7 = vand.u32 4294901760, %v28226_v50 }
 0xd60   :  { %v28184_v11 = vsub.f32 %v11046_v48, %v11059_v32  ;;  %v28228_v43 = vpack.c.bf16 %v11059_v32, %v11056_v27  ;;  %v15700_v27 = vld [vmem:[%s29846_s4 + $0xa0] sm:$0xff]  ;;  %v15701_v32 = vld [vmem:[%s29846_s4 + $0xa8] sm:$0xff] }
 0xd61   :  { %20080 = vmatmul.mubr.f32.vlgmr.msra.gmra.mrb[42].mxu0 %v10478_v36  ;;  %v11126_v46 = vsub.f32 %v28226_v50, %v11125_v7  ;;  %v28353_v36 = vsub.f32 %v15697_v23, %v12039_v3  ;;  %v12051_v12 = vand.u32 4294901760, %v15701_v32 }
 0xd62   :  { %23033 = vmatpush3.bf16.msra.mxu0 %v23032_v39  ;;  %23063 = vmatpush3.bf16.msra.mxu1 %v27949_v17  ;;  %v11053_v17 = vsel %vm6498_vm5, %v11047_v41, 0  ;;  %v11143_v22 = vand.u32 4294901760, %v28184_v11 }
 0xd63   :  { %23034 = vmatprep.subr.bf16.mxu0 %v30092_v38  ;;  %23064 = vmatprep.subr.bf16.mxu1 %v30092_v38  ;;  %v11127_v19 = vand.u32 4294901760, %v11126_v46  ;;  %v12136_v39 = vand.u32 4294901760, %v28353_v36 }
 0xd64   :  { %20149 = vmatprep.mubr.msk.f32.mxu0 %vm23984_vm1, %v30093_v47  ;;  %v11144_v54 = vsub.f32 %v28184_v11, %v11143_v22 }
 0xd65   :  { %v12137_v55 = vsub.f32 %v28353_v36, %v12136_v39 }
 0xd66   :  { %23036 = vmatpush3.bf16.msra.mxu0 %v23035_v9  ;;  %23066 = vmatpush3.bf16.msra.mxu1 %v27983_v0  ;;  %v28192_v0 = vand.u32 4294901760, %v11053_v17  ;;  %v11145_v13 = vand.u32 4294901760, %v11144_v54  ;;  %v12042_v9 = vand.u32 4294901760, %v15698_v15 }
 0xd67   :  { %23037 = vmatprep.subr.bf16.mxu0 %v30092_v38  ;;  %23067 = vmatprep.subr.bf16.mxu1 %v30092_v38  ;;  %v12138_v41 = vand.u32 4294901760, %v12137_v55 }
 0xd68   :  { %v28369_v48 = vsub.f32 %v15698_v15, %v12042_v9 }
 0xd6a   :  { %23039 = vmatpush3.bf16.msra.mxu0 %v23038_v28  ;;  %23069 = vmatpush3.bf16.msra.mxu1 %v28019_v6  ;;  %v11136_v6 = vand.u32 4294901760, %v28182_v29  ;;  %v12130_v28 = vsub.f32 %v28351_v57, %v12129_v26 }
 0xd6b   :  { %23040 = vmatprep.subr.bf16.mxu0 %v30092_v38  ;;  %23070 = vmatprep.subr.bf16.mxu1 %v30092_v38 }
 0xd6c   :  { %v11137_v56 = vsub.f32 %v28182_v29, %v11136_v6  ;;  %v28303_v44 = vpack.c.bf16 %v11143_v22, %v11136_v6  ;;  %v28402_v6 = vsub.f32 %v15701_v32, %v12051_v12  ;;  %v12054_v22 = vand.u32 4294901760, %v15702_v20 }
 0xd6e   :  { %23042 = vmatpush3.bf16.msra.mxu0 %v23041_v59  ;;  %23072 = vmatpush3.bf16.msra.mxu1 %v28070_v4  ;;  %v28207_v4 = vsub.f32 %v11053_v17, %v28192_v0  ;;  %v11138_v31 = vand.u32 4294901760, %v11137_v56  ;;  %v12131_v59 = vand.u32 4294901760, %v12130_v28  ;;  %v12048_v17 = vand.u32 4294901760, %v15700_v27 }
 0xd6f   :  { %23043 = vmatprep.subr.bf16.mxu0 %v30092_v38  ;;  %23073 = vmatprep.subr.bf16.mxu1 %v30092_v38  ;;  %v30006_v54 = vand.u32 4294901760, %v28402_v6 }
 0xd70   :  { %v28237_v10 = vand.u32 4294901760, %v28207_v4  ;;  %v28245_v60 = vpack.c.bf16 %v11145_v13, %v11138_v31  ;;  %v28431_v13 = vpack.c.bf16 %v12051_v12, %v12048_v17 }
 0xd72   :  { %23045 = vmatpush3.bf16.msra.mxu0 %v23044_v42  ;;  %23075 = vmatpush3.bf16.msra.mxu1 %v28075_v53  ;;  %v23050_v53 = vpack.c.bf16 %v30205_v18, %v30204_v37  ;;  %v11151_v25 = vsub.f32 %v28207_v4, %v28237_v10  ;;  %v23140_v42 = vpack.c.bf16 %v12138_v41, %v12131_v59  ;;  %v28470_v59 = vld [vmem:[%s29846_s4 + $0xe0] sm:$0xff]  ;;  %v28475_v41 = vld [vmem:[%s29846_s4 + $0xe8] sm:$0xff] }
 0xd73   :  { %23046 = vmatprep.subr.bf16.mxu0 %v30092_v38  ;;  %23076 = vmatprep.subr.bf16.mxu1 %v30092_v38  ;;  %v28410_v18 = vpack.c.bf16 %v12045_v49, %v12042_v9 }
 0xd74   :  { %v28256_v61 = vand.u32 4294901760, %v11151_v25  ;;  %v12165_v25 = vsub.f32 %v28402_v6, %v30006_v54 }
 0xd76   :  { %23048 = vmatpush3.bf16.msra.mxu0 %v23047_v1  ;;  %23078 = vmatpush3.bf16.msra.mxu1 %v28079_v24  ;;  %v11618_v24 = vsub.f32 %v28189_v51, %v11617_v62  ;;  %v28400_v1 = vsub.f32 %v15700_v27, %v12048_v17  ;;  %v12166_v2 = vand.u32 4294901760, %v12165_v25 }
 0xd77   :  { %23049 = vmatprep.subr.bf16.mxu0 %v30092_v38  ;;  %23097 = vmatprep.subr.bf16.mxu1 %v30092_v38 }
 0xd78   :  { %v11619_v5 = vand.u32 4294901760, %v11618_v24  ;;  %v12157_v56 = vand.u32 4294901760, %v28400_v1  ;;  %v28416_v24 = vsub.f32 %v15702_v20, %v12054_v22 }
 0xd79   :  { %20185 = vmatmul.mubr.f32.vlgmr.msra.gmra.mrb[24].mxu1 %v28102_v33 }
 0xd7a   :  { %23051 = vmatpush3.bf16.msra.mxu0 %v23050_v53  ;;  %23099 = vmatpush3.bf16.msra.mxu1 %v28228_v43  ;;  %v12057_v53 = vand.u32 4294901760, %v15703_v30  ;;  %v30005_v46 = vand.u32 4294901760, %v28416_v24 }
 0xd7b   :  { %23052 = vmatprep.subr.bf16.mxu0 %v30092_v38  ;;  %20245 = vmatprep.subr.mxu1 %v30093_v47 }
 0xd7c   :  { %20247 = vmatprep.mubr.msk.f32.mxu1 %vm23984_vm1, %v30093_v47  ;;  %v28429_v31 = vsub.f32 %v15703_v30, %v12057_v53  ;;  %v12172_v9 = vsub.f32 %v28416_v24, %v30005_v46 }
 0xd7e   :  { %23054 = vmatpush3.bf16.msra.mxu0 %v23053_v35  ;;  %20246 = vmatpush3.msra.mxu1 %v28192_v0  ;;  %v30004_v45 = vand.u32 4294901760, %v28429_v31  ;;  %v12173_v12 = vand.u32 4294901760, %v12172_v9 }
 0xd7f   :  { %20248 = vmatmul.mubr.f32.vlgmr.msra.gmra.mrb[26].mxu1 %v11619_v5  ;;  %23100 = vmatprep.subr.bf16.mxu1 %v30092_v38 }
 0xd80   :  { %23102 = vmatpush3.bf16.msra.mxu1 %v28245_v60  ;;  %23079 = vmatprep.subr.bf16.mxu0 %v30092_v38  ;;  %v12179_v28 = vsub.f32 %v28429_v31, %v30004_v45  ;;  %v15694_v45 = vld [vmem:[%s29842_s6 + $0x7] ss:$0 sm:$0xff] }
 0xd81   :  { %20150 = vmatmul.mubr.f32.vlgmr.msra.gmra.mrb[44].mxu0 %v28102_v33  ;;  %20254 = vmatprep.subr.mxu1 %v30093_v47  ;;  %v28269_v33 = vpack.c.bf16 %v28184_v11, %v28182_v29  ;;  %v12151_v11 = vsub.f32 %v28371_v34, %v12150_v8 }
 0xd82   :  { %23081 = vmatpush3.bf16.msra.mxu0 %v28228_v43  ;;  %20193 = vmatprep.mubr.msk.f32.mxu0 %vm23984_vm1, %v30093_v47 }
 0xd83   :  { %20191 = vmatprep.subr.mxu0 %v30093_v47  ;;  %20256 = vmatprep.mubr.msk.f32.mxu1 %vm23984_vm1, %v30093_v47  ;;  %v12152_v37 = vand.u32 4294901760, %v12151_v11  ;;  %v12180_v11 = vand.u32 4294901760, %v12179_v28 }
 0xd84   :  { %20255 = vmatpush3.msra.mxu1 %v28256_v61 }
 0xd85   :  { %23103 = vmatprep.subr.bf16.mxu1 %v30092_v38 }
 0xd86   :  { %20192 = vmatpush3.msra.mxu0 %v28192_v0 }
 0xd87   :  { %20194 = vmatmul.mubr.f32.vlgmr.msra.gmra.mrb[46].mxu0 %v11127_v19  ;;  %23082 = vmatprep.subr.bf16.mxu0 %v30092_v38 }
 0xd88   :  { %20257 = vmatmul.mubr.f32.vlgmr.msra.gmra.mrb[26].mxu1 %v28171_v58  ;;  %23084 = vmatpush3.bf16.msra.mxu0 %v28245_v60 }
 0xd89   :  { %23105 = vmatpush3.bf16.msra.mxu1 %v28269_v33  ;;  %20200 = vmatprep.subr.mxu0 %v30093_v47 }
 0xd8a   :  { %20263 = vmatprep.subr.mxu1 %v30093_v47  ;;  %20202 = vmatprep.mubr.msk.f32.mxu0 %vm23984_vm1, %v30093_v47 }
 0xd8b   :  { %20265 = vmatprep.mubr.msk.f32.mxu1 %vm23984_vm1, %v30093_v47 }
 0xd8c   :  { %20201 = vmatpush3.msra.mxu0 %v28256_v61 }
 0xd8d   :  { %20264 = vmatpush3.msra.mxu1 %v28207_v4  ;;  %23085 = vmatprep.subr.bf16.mxu0 %v30092_v38 }
 0xd8e   :  { %23106 = vmatprep.subr.bf16.mxu1 %v30092_v38 }
 0xd8f   :  { %20203 = vmatmul.mubr.f32.vlgmr.msra.gmra.mrb[46].mxu0 %v28204_v63 }
 0xd90   :  { %23087 = vmatpush3.bf16.msra.mxu0 %v28269_v33  ;;  %20266 = vmatmul.mubr.f32.vlgmr.msra.gmra.mrb[26].mxu1 %v28189_v51  ;;  %v28387_v51 = vpack.c.bf16 %v12039_v3, %v12036_v52  ;;  %v12066_v52 = vand.u32 4294901760, %v28422_v40  ;;  %v12069_v3 = vand.u32 4294901760, %v28427_v14 }
 0xd91   :  { %23108 = vmatpush3.bf16.msra.mxu1 %v28228_v43  ;;  %20209 = vmatprep.subr.mxu0 %v30093_v47 }
 0xd92   :  { %20272 = vmatprep.subr.mxu1 %v30093_v47  ;;  %20211 = vmatprep.mubr.msk.f32.mxu0 %vm23984_vm1, %v30093_v47  ;;  %v28462_v27 = vsub.f32 %v28422_v40, %v12066_v52  ;;  %v28465_v32 = vsub.f32 %v28427_v14, %v12069_v3  ;;  %v23149_v40 = vpack.c.bf16 %v12180_v11, %v12173_v12 }
 0xd93   :  { %20274 = vmatprep.mubr.msk.f32.mxu1 %vm23984_vm1, %v30093_v47 }
 0xd94   :  { %20210 = vmatpush3.msra.mxu0 %v28207_v4  ;;  %v30001_v30 = vand.u32 4294901760, %v28462_v27 }
 0xd95   :  { %20273 = vmatpush3.msra.mxu1 %v28192_v0  ;;  %23088 = vmatprep.subr.bf16.mxu0 %v30092_v38 }
 0xd96   :  { %23109 = vmatprep.subr.bf16.mxu1 %v30092_v38 }
 0xd97   :  { %20212 = vmatmul.mubr.f32.vlgmr.msra.gmra.mrb[46].mxu0 %v28226_v50  ;;  %v12060_v50 = vand.u32 4294901760, %v28398_v21 }
 0xd98   :  { %23090 = vmatpush3.bf16.msra.mxu0 %v28228_v43  ;;  %20275 = vmatmul.mubr.f32.vlgmr.msra.gmra.mrb[26].mxu1 %v11617_v62  ;;  %v28407_v62 = vld [vmem:[%s29846_s4 + $0xc8] sm:$0xff] }
 0xd99   :  { %23111 = vmatpush3.bf16.msra.mxu1 %v28303_v44  ;;  %20218 = vmatprep.subr.mxu0 %v30093_v47  ;;  %v12063_v5 = vand.u32 4294901760, %v28407_v62  ;;  %v28442_v19 = vsub.f32 %v28398_v21, %v12060_v50  ;;  %v30000_v21 = vand.u32 4294901760, %v28465_v32 }
 0xd9a   :  { %20281 = vmatprep.subr.mxu1 %v30093_v47  ;;  %20220 = vmatprep.mubr.msk.f32.mxu0 %vm23984_vm1, %v30093_v47 }
 0xd9b   :  { %20283 = vmatprep.mubr.msk.f32.mxu1 %vm23984_vm1, %v30093_v47  ;;  %v28447_v23 = vsub.f32 %v28407_v62, %v12063_v5  ;;  %v30003_v49 = vand.u32 4294901760, %v28442_v19  ;;  %v15710_v62 = vld [vmem:[%s29846_s4 + $0xf0] sm:$0xff] }
 0xd9c   :  { %20219 = vmatpush3.msra.mxu0 %v28192_v0 }
 0xd9d   :  { %20282 = vmatpush3.msra.mxu1 %v28237_v10  ;;  %23091 = vmatprep.subr.bf16.mxu0 %v30092_v38  ;;  %v30002_v55 = vand.u32 4294901760, %v28447_v23 }
 0xd9e   :  { %23112 = vmatprep.subr.bf16.mxu1 %v30092_v38 }
 0xd9f   :  { %20221 = vmatmul.mubr.f32.vlgmr.msra.gmra.mrb[46].mxu0 %v11125_v7  ;;  %v12158_v7 = vsub.f32 %v28400_v1, %v12157_v56  ;;  %v12193_v20 = vsub.f32 %v28447_v23, %v30002_v55 }
 0xda0   :  { %23093 = vmatpush3.bf16.msra.mxu0 %v28303_v44  ;;  %20284 = vmatmul.mubr.f32.vlgmr.msra.gmra.mrb[26].mxu1 %v28171_v58 }
 0xda1   :  { %23114 = vmatpush3.bf16.msra.mxu1 %v28228_v43  ;;  %20227 = vmatprep.subr.mxu0 %v30093_v47  ;;  %v12159_v15 = vand.u32 4294901760, %v12158_v7  ;;  %v12194_v14 = vand.u32 4294901760, %v12193_v20  ;;  %v12207_v7 = vsub.f32 %v28465_v32, %v30000_v21 }
 0xda2   :  { %20290 = vmatprep.subr.mxu1 %v30093_v47  ;;  %20229 = vmatprep.mubr.msk.f32.mxu0 %vm23984_vm1, %v30093_v47 }
 0xda3   :  { %20292 = vmatprep.mubr.msk.f32.mxu1 %vm23984_vm1, %v30093_v47  ;;  %v23146_v17 = vpack.c.bf16 %v12166_v2, %v12159_v15  ;;  %v12078_v2 = vand.u32 4294901760, %v15710_v62  ;;  %v12208_v12 = vand.u32 4294901760, %v12207_v7 }
 0xda4   :  { %20228 = vmatpush3.msra.mxu0 %v28237_v10 }
 0xda5   :  { %20291 = vmatpush3.msra.mxu1 %v28192_v0  ;;  %23094 = vmatprep.subr.bf16.mxu0 %v30092_v38  ;;  %v28516_v20 = vsub.f32 %v15710_v62, %v12078_v2  ;;  %v28530_v62 = vpack.c.bf16 %v12069_v3, %v12066_v52 }
 0xda6   :  { %23139 = vmatprep.subr.bf16.mxu1 %v30092_v38 }
 0xda7   :  { %20230 = vmatmul.mubr.f32.vlgmr.msra.gmra.mrb[46].mxu0 %v28204_v63 }
 0xda8   :  { %23096 = vmatpush3.bf16.msra.mxu0 %v28228_v43  ;;  %20293 = vmatmul.mubr.f32.vlgmr.msra.gmra.mrb[26].mxu1 %v28171_v58  ;;  %v12143_v58 = vand.u32 4294901760, %v28369_v48 }
 0xda9   :  { %20236 = vmatprep.subr.mxu0 %v30093_v47  ;;  %20238 = vmatprep.mubr.msk.f32.mxu0 %vm23984_vm1, %v30093_v47 }
 0xdaa   :  { %20362 = vmatprep.mubr.msk.f32.mxu1 %vm23984_vm1, %v30093_v47  ;;  %v12144_v29 = vsub.f32 %v28369_v48, %v12143_v58  ;;  %23141 = vmatpush3.bf16.msra.mxu1 %v23140_v42  ;;  %v12186_v42 = vsub.f32 %v28442_v19, %v30003_v49 }
 0xdab   :  { %23142 = vmatprep.subr.bf16.mxu1 %v30092_v38 }
 0xdac   :  { %20237 = vmatpush3.msra.mxu0 %v28192_v0 }
 0xdad   :  { %23115 = vmatprep.subr.bf16.mxu0 %v30092_v38 }
 0xdaf   :  { %20239 = vmatmul.mubr.f32.vlgmr.msra.gmra.mrb[46].mxu0 %v28204_v63  ;;  %v12145_v63 = vand.u32 4294901760, %v12144_v29  ;;  %v28480_v29 = vpack.c.bf16 %v12057_v53, %v12054_v22  ;;  %v15711_v22 = vld [vmem:[%s29846_s4 + $0xf8] sm:$0xff]  ;;  %v12075_v53 = vand.u32 4294901760, %v28475_v41 }
 0xdb0   :  { %20327 = vmatprep.mubr.msk.f32.mxu0 %vm23984_vm1, %v30093_v47  ;;  %23117 = vmatpush3.bf16.msra.mxu0 %v28387_v51  ;;  %v12081_v9 = vand.u32 4294901760, %v15711_v22 }
 0xdb1   :  { %23118 = vmatprep.subr.bf16.mxu0 %v30092_v38  ;;  %v23143_v35 = vpack.c.bf16 %v12152_v37, %v12145_v63  ;;  %v12187_v63 = vand.u32 4294901760, %v12186_v42  ;;  %v12072_v37 = vand.u32 4294901760, %v28470_v59  ;;  %v28508_v15 = vsub.f32 %v28475_v41, %v12075_v53 }
 0xdb2   :  { %v28511_v42 = vpack.c.bf16 %v12063_v5, %v12060_v50  ;;  %v28518_v41 = vsub.f32 %v15711_v22, %v12081_v9  ;;  %v29998_v5 = vand.u32 4294901760, %v28516_v20 }
 0xdb3   :  { %23144 = vmatpush3.bf16.msra.mxu1 %v23143_v35  ;;  %v12200_v35 = vsub.f32 %v28462_v27, %v30001_v30  ;;  %v28505_v25 = vsub.f32 %v28470_v59, %v12072_v37  ;;  %v23152_v28 = vpack.c.bf16 %v12194_v14, %v12187_v63  ;;  %v29996_v59 = vand.u32 4294901760, %v28508_v15 }
 0xdb4   :  { %23120 = vmatpush3.bf16.msra.mxu0 %v28410_v18  ;;  %23145 = vmatprep.subr.bf16.mxu1 %v30092_v38  ;;  %v12228_v7 = vsub.f32 %v28516_v20, %v29998_v5 }
 0xdb5   :  { %23121 = vmatprep.subr.bf16.mxu0 %v30092_v38  ;;  %v29999_v11 = vand.u32 4294901760, %v28505_v25  ;;  %v12221_v50 = vsub.f32 %v28508_v15, %v29996_v59 }
 0xdb6   :  { %v12229_v3 = vand.u32 4294901760, %v12228_v7 }
 0xdb7   :  { %23147 = vmatpush3.bf16.msra.mxu1 %v23146_v17  ;;  %v12201_v17 = vand.u32 4294901760, %v12200_v35  ;;  %v12214_v63 = vsub.f32 %v28505_v25, %v29999_v11  ;;  %v12222_v35 = vand.u32 4294901760, %v12221_v50  ;;  %v23167_v50 = vpack.c.bf16 %v28371_v34, %v28369_v48  ;;  %v28651_v48 = vld [vmem:[%s29846_s4 + $0x18] sm:$0xff] }
 0xdb8   :  { %23123 = vmatpush3.bf16.msra.mxu0 %v28431_v13  ;;  %23148 = vmatprep.subr.bf16.mxu1 %v30092_v38  ;;  %v30208_v34 = vand.u32 4294901760, %v28402_v6 }
 0xdb9   :  { %23124 = vmatprep.subr.bf16.mxu0 %v30092_v38  ;;  %v23155_v14 = vpack.c.bf16 %v12208_v12, %v12201_v17  ;;  %v12215_v22 = vand.u32 4294901760, %v12214_v63  ;;  %v28545_v12 = vpack.c.bf16 %v12075_v53, %v12072_v37  ;;  %v28549_v63 = vpack.c.bf16 %v12081_v9, %v12078_v2 }
 0xdba   :  { %v23170_v37 = vpack.c.bf16 %v28402_v6, %v28400_v1  ;;  %v23176_v9 = vpack.c.bf16 %v28447_v23, %v28442_v19 }
 0xdbb   :  { %23150 = vmatpush3.bf16.msra.mxu1 %v23149_v40  ;;  %v29997_v40 = vand.u32 4294901760, %v28518_v41  ;;  %v23158_v52 = vpack.c.bf16 %v12222_v35, %v12215_v22  ;;  %v23173_v22 = vpack.c.bf16 %v28429_v31, %v28416_v24 }
 0xdbc   :  { %23126 = vmatpush3.bf16.msra.mxu0 %v28480_v29  ;;  %23151 = vmatprep.subr.bf16.mxu1 %v30092_v38 }
 0xdbd   :  { %23127 = vmatprep.subr.bf16.mxu0 %v30092_v38  ;;  %v12235_v59 = vsub.f32 %v28518_v41, %v29997_v40 }
 0xdbf   :  { %23153 = vmatpush3.bf16.msra.mxu1 %v23152_v28  ;;  %v12236_v28 = vand.u32 4294901760, %v12235_v59  ;;  %v23164_v59 = vpack.c.bf16 %v28353_v36, %v28351_v57  ;;  %v23215_v57 = vpack.c.bf16 %v12150_v8, %v12143_v58  ;;  %v23218_v58 = vpack.c.bf16 %v30208_v34, %v12157_v56  ;;  %v28662_v8 = vld [vmem:[%s29846_s4 + $0x20] sm:$0xff] }
 0xdc0   :  { %23129 = vmatpush3.bf16.msra.mxu0 %v28511_v42  ;;  %23154 = vmatprep.subr.bf16.mxu1 %v30092_v38 }
 0xdc1   :  { %23130 = vmatprep.subr.bf16.mxu0 %v30092_v38  ;;  %v23161_v17 = vpack.c.bf16 %v12236_v28, %v12229_v3  ;;  %v23182_v3 = vpack.c.bf16 %v28508_v15, %v28505_v25  ;;  %v23185_v28 = vpack.c.bf16 %v28518_v41, %v28516_v20 }
 0xdc3   :  { %23156 = vmatpush3.bf16.msra.mxu1 %v23155_v14 }
 0xdc4   :  { %23132 = vmatpush3.bf16.msra.mxu0 %v28530_v62  ;;  %23157 = vmatprep.subr.bf16.mxu1 %v30092_v38 }
 0xdc5   :  { %23133 = vmatprep.subr.bf16.mxu0 %v30092_v38 }
 0xdc7   :  { %23159 = vmatpush3.bf16.msra.mxu1 %v23158_v52  ;;  %v23179_v52 = vpack.c.bf16 %v28465_v32, %v28462_v27 }
 0xdc8   :  { %23160 = vmatprep.subr.bf16.mxu1 %v30092_v38  ;;  %23135 = vmatpush3.bf16.msra.mxu0 %v28545_v12 }
 0xdc9   :  { %23136 = vmatprep.subr.bf16.mxu0 %v30092_v38 }
 0xdcb   :  { %23162 = vmatpush3.bf16.msra.mxu1 %v23161_v17 }
 0xdcc   :  { %23187 = vmatprep.subr.bf16.mxu1 %v30092_v38  ;;  %23138 = vmatpush3.bf16.msra.mxu0 %v28549_v63 }
 0xdcd   :  { %23163 = vmatprep.subr.bf16.mxu0 %v30092_v38 }
 0xe0c   :  { %v10634_v14 = vpop.f32.mrb[20].mxu1 }
 0xe0d   :  { %v20046_v53 = vpop.f32.mrb[21].mxu1 }
 0xe14   :  { %v10483_v2 = vpop.f32.mrb[40].mxu0 }
 0xe15   :  { %v10635_v35 = vadd.f32 %v10634_v14, %v10483_v2  ;;  %v20011_v7 = vpop.f32.mrb[41].mxu0 }
 0xe2c   :  { %v10827_v17 = vpop.f32.mrb[22].mxu1 }
 0xe2d   :  { %v20116_v53 = vpop.f32.mrb[23].mxu1 }
 0xe34   :  { %v10738_v40 = vpop.f32.mrb[42].mxu0 }
 0xe35   :  { %v10739_v5 = vadd.f32 %v10738_v40, %v10635_v35  ;;  %v20081_v11 = vpop.f32.mrb[43].mxu0  ;;  %v28632_v40 = vld [vmem:[%s29846_s4 + $0x8] sm:$0xff]  ;;  %v28698_v35 = vld [vmem:[%s29846_s4 + $0x38] sm:$0xff] }
 0xe36   :  { %v30014_v53 = vand.u32 4294901760, %v28698_v35 }
 0xe37   :  { %v10828_v21 = vadd.f32 %v10827_v17, %v10739_v5 }
 0xe4c   :  { %v11033_v30 = vpop.f32.mrb[24].mxu1 }
 0xe4d   :  { %v20186_v55 = vpop.f32.mrb[25].mxu1 }
 0xe54   :  { %v10946_v49 = vpop.f32.mrb[44].mxu0 }
 0xe55   :  { %v10947_v14 = vadd.f32 %v10946_v49, %v10828_v21  ;;  %v20151_v2 = vpop.f32.mrb[45].mxu0  ;;  %v23212_v21 = vpack.c.bf16 %v12136_v39, %v12129_v26  ;;  %v12680_v26 = vand.u32 4294901760, %v28632_v40  ;;  %v28646_v39 = vld [vmem:[%s29846_s4 + $0x10] sm:$0xff] }
 0xe56   :  { %v12683_v56 = vand.u32 4294901760, %v28646_v39  ;;  %v30212_v2 = vand.u32 4294901760, %v28447_v23  ;;  %v28748_v23 = vld [vmem:[%s29846_s4 + $0x48] sm:$0xff] }
 0xe57   :  { %v11034_v7 = vadd.f32 %v11033_v30, %v10947_v14  ;;  %v28678_v6 = vsub.f32 %v28632_v40, %v12680_v26  ;;  %v30211_v14 = vand.u32 4294901760, %v28442_v19  ;;  %v28743_v19 = vld [vmem:[%s29846_s4 + $0x40] sm:$0xff] }
 0xe59   :  { %v11037_v46 = vadd.f32 %v11034_v7, %v28100_v16  ;;  %v23224_v7 = vpack.c.bf16 %v30212_v2, %v30211_v14  ;;  %v28785_v2 = vld [vmem:[%s29846_s4 + $0x58] sm:$0xff] }
 0xe5b   :  { %v11042_v54 = vadd.f32 %v15694_v45, %v11037_v46 }
 0xe5d   :  { %11043 = vst.msk [vmem:[%s29848_s9] sm:$0xff] %vm57_vm0, %v11042_v54 }
 0xe7b   :  { %v12015_v11 = vpop.f32.mrb[26].mxu1 }
 0xe7c   :  { %v28577_v5 = vand.u32 4294901760, %v12015_v11  ;;  %v20294_v55 = vpop.f32.mrb[27].mxu1 }
 0xe7e   :  { %v12117_v49 = vsub.f32 %v12015_v11, %v28577_v5  ;;  %20363 = vmatmul.mubr.f32.vlgmr.msra.gmra.mrb[28].mxu1 %v28577_v5 }
 0xe7f   :  { %23189 = vmatpush3.bf16.msra.mxu1 %v28387_v51  ;;  %20432 = vmatprep.mubr.msk.f32.mxu1 %vm23984_vm1, %v30093_v47 }
 0xe80   :  { %v12118_v16 = vand.u32 4294901760, %v12117_v49  ;;  %23190 = vmatprep.subr.bf16.mxu1 %v30092_v38 }
 0xe82   :  { %v12119_v46 = vsub.f32 %v12117_v49, %v12118_v16  ;;  %v28585_v45 = vpop.f32.mrb[46].mxu0 }
 0xe83   :  { %23192 = vmatpush3.bf16.msra.mxu1 %v28410_v18  ;;  %v20240_v54 = vpop.f32.mrb[47].mxu0 }
 0xe84   :  { %v12120_v30 = vand.u32 4294901760, %v12119_v46  ;;  %23193 = vmatprep.subr.bf16.mxu1 %v30092_v38 }
 0xe86   :  { %20328 = vmatmul.mubr.f32.vlgmr.msra.gmra.mrb[48].mxu0 %v12120_v30  ;;  %v28762_v30 = vsub.f32 %v28698_v35, %v30014_v53 }
 0xe87   :  { %23165 = vmatpush3.bf16.msra.mxu0 %v23164_v59  ;;  %23195 = vmatpush3.bf16.msra.mxu1 %v28431_v13 }
 0xe88   :  { %23166 = vmatprep.subr.bf16.mxu0 %v30092_v38  ;;  %23196 = vmatprep.subr.bf16.mxu1 %v30092_v38 }
 0xe89   :  { %20397 = vmatprep.mubr.msk.f32.mxu0 %vm23984_vm1, %v30093_v47 }
 0xe8b   :  { %23168 = vmatpush3.bf16.msra.mxu0 %v23167_v50  ;;  %23198 = vmatpush3.bf16.msra.mxu1 %v28480_v29  ;;  %v30209_v50 = vand.u32 4294901760, %v28416_v24  ;;  %v30011_v24 = vand.u32 4294901760, %v28678_v6 }
 0xe8c   :  { %23169 = vmatprep.subr.bf16.mxu0 %v30092_v38  ;;  %23199 = vmatprep.subr.bf16.mxu1 %v30092_v38 }
 0xe8d   :  { %v12778_v55 = vsub.f32 %v28678_v6, %v30011_v24 }
 0xe8f   :  { %23171 = vmatpush3.bf16.msra.mxu0 %v23170_v37  ;;  %23201 = vmatpush3.bf16.msra.mxu1 %v28511_v42  ;;  %v30210_v37 = vand.u32 4294901760, %v28429_v31  ;;  %v28706_v31 = vsub.f32 %v28646_v39, %v12683_v56 }
 0xe90   :  { %23172 = vmatprep.subr.bf16.mxu0 %v30092_v38  ;;  %23202 = vmatprep.subr.bf16.mxu1 %v30092_v38 }
 0xe93   :  { %23174 = vmatpush3.bf16.msra.mxu0 %v23173_v22  ;;  %23204 = vmatpush3.bf16.msra.mxu1 %v28530_v62  ;;  %v23221_v22 = vpack.c.bf16 %v30210_v37, %v30209_v50  ;;  %v30015_v50 = vand.u32 4294901760, %v28748_v23 }
 0xe94   :  { %23175 = vmatprep.subr.bf16.mxu0 %v30092_v38  ;;  %23205 = vmatprep.subr.bf16.mxu1 %v30092_v38 }
 0xe97   :  { %23177 = vmatpush3.bf16.msra.mxu0 %v23176_v9  ;;  %23207 = vmatpush3.bf16.msra.mxu1 %v28545_v12  ;;  %v28693_v9 = vld [vmem:[%s29846_s4 + $0x30] sm:$0xff] }
 0xe98   :  { %23178 = vmatprep.subr.bf16.mxu0 %v30092_v38  ;;  %23208 = vmatprep.subr.bf16.mxu1 %v30092_v38  ;;  %v30018_v17 = vand.u32 4294901760, %v28693_v9 }
 0xe9a   :  { %v28757_v54 = vsub.f32 %v28693_v9, %v30018_v17 }
 0xe9b   :  { %23180 = vmatpush3.bf16.msra.mxu0 %v23179_v52  ;;  %23210 = vmatpush3.bf16.msra.mxu1 %v28549_v63 }
 0xe9c   :  { %23181 = vmatprep.subr.bf16.mxu0 %v30092_v38  ;;  %23235 = vmatprep.subr.bf16.mxu1 %v30092_v38 }
 0xe9e   :  { %20433 = vmatmul.mubr.f32.vlgmr.msra.gmra.mrb[30].mxu1 %v12118_v16 }
 0xe9f   :  { %23183 = vmatpush3.bf16.msra.mxu0 %v23182_v3  ;;  %23237 = vmatpush3.bf16.msra.mxu1 %v28387_v51  ;;  %v28627_v51 = vld [vmem:[%s29846_s4] sm:$0xff] }
 0xea0   :  { %23184 = vmatprep.subr.bf16.mxu0 %v30092_v38  ;;  %23238 = vmatprep.subr.bf16.mxu1 %v30092_v38  ;;  %v12677_v36 = vand.u32 4294901760, %v28627_v51 }
 0xea1   :  { %20502 = vmatprep.mubr.msk.f32.mxu1 %vm23984_vm1, %v30093_v47 }
 0xea2   :  { %v28673_v1 = vsub.f32 %v28627_v51, %v12677_v36 }
 0xea3   :  { %23186 = vmatpush3.bf16.msra.mxu0 %v23185_v28  ;;  %23240 = vmatpush3.bf16.msra.mxu1 %v28410_v18  ;;  %v28667_v18 = vld [vmem:[%s29846_s4 + $0x28] sm:$0xff] }
 0xea4   :  { %23211 = vmatprep.subr.bf16.mxu0 %v30092_v38  ;;  %23241 = vmatprep.subr.bf16.mxu1 %v30092_v38  ;;  %v12692_v59 = vand.u32 4294901760, %v28667_v18  ;;  %v30012_v52 = vand.u32 4294901760, %v28673_v1 }
 0xea6   :  { %20398 = vmatmul.mubr.f32.vlgmr.msra.gmra.mrb[50].mxu0 %v12117_v49  ;;  %v28723_v28 = vsub.f32 %v28667_v18, %v12692_v59  ;;  %v12771_v11 = vsub.f32 %v28673_v1, %v30012_v52  ;;  %v30010_v49 = vand.u32 4294901760, %v28706_v31 }
 0xea7   :  { %23213 = vmatpush3.bf16.msra.mxu0 %v23212_v21  ;;  %23243 = vmatpush3.bf16.msra.mxu1 %v28431_v13  ;;  %v12686_v13 = vand.u32 4294901760, %v28651_v48  ;;  %v30213_v21 = vand.u32 4294901760, %v28462_v27 }
 0xea8   :  { %23214 = vmatprep.subr.bf16.mxu0 %v30092_v38  ;;  %23244 = vmatprep.subr.bf16.mxu1 %v30092_v38  ;;  %v30009_v46 = vand.u32 4294901760, %v28723_v28  ;;  %v12772_v37 = vand.u32 4294901760, %v12771_v11  ;;  %v12785_v14 = vsub.f32 %v28706_v31, %v30010_v49  ;;  %v30017_v11 = vand.u32 4294901760, %v28757_v54 }
 0xea9   :  { %20467 = vmatprep.mubr.msk.f32.mxu0 %vm23984_vm1, %v30093_v47  ;;  %v28711_v3 = vsub.f32 %v28651_v48, %v12686_v13  ;;  %v30216_v49 = vand.u32 4294901760, %v28508_v15 }
 0xeab   :  { %23216 = vmatpush3.bf16.msra.mxu0 %v23215_v57  ;;  %23246 = vmatpush3.bf16.msra.mxu1 %v28480_v29  ;;  %v12689_v29 = vand.u32 4294901760, %v28662_v8  ;;  %v30008_v16 = vand.u32 4294901760, %v28711_v3  ;;  %v30214_v57 = vand.u32 4294901760, %v28465_v32  ;;  %v28780_v32 = vld [vmem:[%s29846_s4 + $0x50] sm:$0xff] }
 0xeac   :  { %23217 = vmatprep.subr.bf16.mxu0 %v30092_v38  ;;  %23247 = vmatprep.subr.bf16.mxu1 %v30092_v38 }
 0xead   :  { %v23227_v34 = vpack.c.bf16 %v30214_v57, %v30213_v21  ;;  %v12792_v27 = vsub.f32 %v28711_v3, %v30008_v16  ;;  %v28805_v57 = vsub.f32 %v28748_v23, %v30015_v50  ;;  %v30019_v16 = vand.u32 4294901760, %v28785_v2  ;;  %v28819_v50 = vld [vmem:[%s29846_s4 + $0x60] sm:$0xff] }
 0xeaf   :  { %23219 = vmatpush3.bf16.msra.mxu0 %v23218_v58  ;;  %23249 = vmatpush3.bf16.msra.mxu1 %v28511_v42  ;;  %v28718_v42 = vsub.f32 %v28662_v8, %v12689_v29  ;;  %v30013_v58 = vand.u32 4294901760, %v28743_v19  ;;  %v12793_v53 = vand.u32 4294901760, %v12792_v27  ;;  %v30217_v27 = vand.u32 4294901760, %v28516_v20  ;;  %v28861_v20 = vld [vmem:[%s29846_s4 + $0x78] sm:$0xff] }
 0xeb0   :  { %23220 = vmatprep.subr.bf16.mxu0 %v30092_v38  ;;  %23250 = vmatprep.subr.bf16.mxu1 %v30092_v38 }
 0xeb1   :  { %v28800_v21 = vsub.f32 %v28743_v19, %v30013_v58  ;;  %v12786_v58 = vand.u32 4294901760, %v12785_v14  ;;  %v28843_v14 = vsub.f32 %v28785_v2, %v30019_v16  ;;  %v28856_v16 = vld [vmem:[%s29846_s4 + $0x70] sm:$0xff] }
 0xeb3   :  { %23222 = vmatpush3.bf16.msra.mxu0 %v23221_v22  ;;  %23252 = vmatpush3.bf16.msra.mxu1 %v28530_v62  ;;  %v30007_v62 = vand.u32 4294901760, %v28718_v42  ;;  %v12779_v22 = vand.u32 4294901760, %v12778_v55  ;;  %v30016_v55 = vand.u32 4294901760, %v28762_v30  ;;  %v12847_v40 = vand.u32 4294901760, %v28843_v14 }
 0xeb4   :  { %23223 = vmatprep.subr.bf16.mxu0 %v30092_v38  ;;  %23253 = vmatprep.subr.bf16.mxu1 %v30092_v38 }
 0xeb5   :  { %v23284_v52 = vpack.c.bf16 %v12779_v22, %v12772_v37  ;;  %v30020_v37 = vand.u32 4294901760, %v28805_v57 }
 0xeb7   :  { %23225 = vmatpush3.bf16.msra.mxu0 %v23224_v7  ;;  %23255 = vmatpush3.bf16.msra.mxu1 %v28545_v12  ;;  %v12799_v12 = vsub.f32 %v28718_v42, %v30007_v62  ;;  %v12806_v7 = vsub.f32 %v28723_v28, %v30009_v46  ;;  %v12707_v62 = vand.u32 4294901760, %v28780_v32  ;;  %v30215_v46 = vand.u32 4294901760, %v28505_v25 }
 0xeb8   :  { %23226 = vmatprep.subr.bf16.mxu0 %v30092_v38  ;;  %23256 = vmatprep.subr.bf16.mxu1 %v30092_v38 }
 0xeb9   :  { %v23230_v24 = vpack.c.bf16 %v30216_v49, %v30215_v46  ;;  %v12800_v25 = vand.u32 4294901760, %v12799_v12  ;;  %v12807_v15 = vand.u32 4294901760, %v12806_v7  ;;  %v12813_v49 = vsub.f32 %v28757_v54, %v30017_v11 }
 0xeba   :  { %v12820_v46 = vsub.f32 %v28762_v30, %v30016_v55  ;;  %v28838_v22 = vsub.f32 %v28780_v32, %v12707_v62  ;;  %v30218_v12 = vand.u32 4294901760, %v28518_v41  ;;  %v23287_v55 = vpack.c.bf16 %v12793_v53, %v12786_v58 }
 0xebb   :  { %23228 = vmatpush3.bf16.msra.mxu0 %v23227_v34  ;;  %23258 = vmatpush3.bf16.msra.mxu1 %v28549_v63  ;;  %v28824_v63 = vld [vmem:[%s29846_s4 + $0x68] sm:$0xff]  ;;  %v12826_v34 = vand.u32 4294901760, %v28800_v21  ;;  %v12713_v11 = vand.u32 4294901760, %v28819_v50  ;;  %v28867_v41 = vpack.c.bf16 %v12680_v26, %v12677_v36 }
 0xebc   :  { %23229 = vmatprep.subr.bf16.mxu0 %v30092_v38  ;;  %23283 = vmatprep.subr.bf16.mxu1 %v30092_v38  ;;  %v23233_v7 = vpack.c.bf16 %v30218_v12, %v30217_v27  ;;  %v12716_v17 = vand.u32 4294901760, %v28824_v63  ;;  %v12821_v53 = vand.u32 4294901760, %v12820_v46  ;;  %v12834_v27 = vsub.f32 %v28805_v57, %v30020_v37 }
 0xebd   :  { %v12827_v58 = vsub.f32 %v28800_v21, %v12826_v34  ;;  %v12840_v51 = vand.u32 4294901760, %v28838_v22  ;;  %v28882_v36 = vsub.f32 %v28819_v50, %v12713_v11  ;;  %v12848_v37 = vsub.f32 %v28843_v14, %v12847_v40 }
 0xebe   :  { %20503 = vmatmul.mubr.f32.vlgmr.msra.gmra.mrb[32].mxu1 %v28577_v5  ;;  %v28887_v26 = vsub.f32 %v28824_v63, %v12716_v17  ;;  %v12835_v12 = vand.u32 4294901760, %v12834_v27  ;;  %v28985_v32 = vpack.c.bf16 %v12716_v17, %v12713_v11  ;;  %v23314_v11 = vpack.c.bf16 %v28723_v28, %v28718_v42 }
 0xebf   :  { %23231 = vmatpush3.bf16.msra.mxu0 %v23230_v24  ;;  %23285 = vmatpush3.bf16.msra.mxu1 %v23284_v52  ;;  %v23290_v52 = vpack.c.bf16 %v12807_v15, %v12800_v25  ;;  %v12814_v24 = vand.u32 4294901760, %v12813_v49  ;;  %v12719_v25 = vand.u32 4294901760, %v28856_v16  ;;  %v12722_v15 = vand.u32 4294901760, %v28861_v20 }
 0xec0   :  { %23232 = vmatprep.subr.bf16.mxu0 %v30092_v38  ;;  %23286 = vmatprep.subr.bf16.mxu1 %v30092_v38  ;;  %v12828_v46 = vand.u32 4294901760, %v12827_v58  ;;  %v12854_v39 = vand.u32 4294901760, %v28882_v36  ;;  %v30021_v48 = vand.u32 4294901760, %v28887_v26  ;;  %v23317_v63 = vpack.c.bf16 %v28762_v30, %v28757_v54 }
 0xec1   :  { %20572 = vmatprep.mubr.msk.f32.mxu1 %vm23984_vm1, %v30093_v47  ;;  %v23293_v49 = vpack.c.bf16 %v12821_v53, %v12814_v24  ;;  %v12849_v53 = vand.u32 4294901760, %v12848_v37 }
 0xec2   :  { %v12855_v58 = vsub.f32 %v28882_v36, %v12854_v39  ;;  %v12862_v27 = vsub.f32 %v28887_v26, %v30021_v48 }
 0xec3   :  { %23234 = vmatpush3.bf16.msra.mxu0 %v23233_v7  ;;  %23288 = vmatpush3.bf16.msra.mxu1 %v23287_v55  ;;  %v28897_v55 = vpack.c.bf16 %v12686_v13, %v12683_v56  ;;  %v12841_v7 = vsub.f32 %v28838_v22, %v12840_v51  ;;  %v28917_v56 = vsub.f32 %v28861_v20, %v12722_v15 }
 0xec4   :  { %23259 = vmatprep.subr.bf16.mxu0 %v30092_v38  ;;  %23289 = vmatprep.subr.bf16.mxu1 %v30092_v38  ;;  %v28927_v13 = vpack.c.bf16 %v12692_v59, %v12689_v29  ;;  %v30219_v29 = vand.u32 4294901760, %v28693_v9  ;;  %v30220_v59 = vand.u32 4294901760, %v28698_v35  ;;  %v30221_v9 = vand.u32 4294901760, %v28743_v19 }
 0xec5   :  { %v12842_v24 = vand.u32 4294901760, %v12841_v7  ;;  %v12875_v18 = vand.u32 4294901760, %v28917_v56  ;;  %v30222_v35 = vand.u32 4294901760, %v28748_v23  ;;  %v30223_v19 = vand.u32 4294901760, %v28785_v2 }
 0xec6   :  { %20468 = vmatmul.mubr.f32.vlgmr.msra.gmra.mrb[52].mxu0 %v28577_v5  ;;  %v28912_v5 = vsub.f32 %v28856_v16, %v12719_v25  ;;  %v28944_v37 = vpack.c.bf16 %v30220_v59, %v30219_v29  ;;  %v23308_v16 = vpack.c.bf16 %v28678_v6, %v28673_v1  ;;  %v23311_v2 = vpack.c.bf16 %v28711_v3, %v28706_v31 }
 0xec7   :  { %23261 = vmatpush3.bf16.msra.mxu0 %v28867_v41  ;;  %23291 = vmatpush3.bf16.msra.mxu1 %v23290_v52  ;;  %v23296_v52 = vpack.c.bf16 %v12835_v12, %v12828_v46  ;;  %v12856_v46 = vand.u32 4294901760, %v12855_v58  ;;  %v12863_v12 = vand.u32 4294901760, %v12862_v27  ;;  %v12876_v48 = vsub.f32 %v28917_v56, %v12875_v18 }
 0xec8   :  { %23262 = vmatprep.subr.bf16.mxu0 %v30092_v38  ;;  %23292 = vmatprep.subr.bf16.mxu1 %v30092_v38  ;;  %v12868_v8 = vand.u32 4294901760, %v28912_v5  ;;  %v28963_v27 = vand.u32 4294901760, %v28585_v45  ;;  %v28972_v23 = vpack.c.bf16 %v30223_v19, %v12707_v62  ;;  %v23320_v20 = vpack.c.bf16 %v28805_v57, %v28800_v21  ;;  %v15714_v19 = vld [vmem:[%s29846_s4 + $0x108] sm:$0xff] }
 0xec9   :  { %20537 = vmatprep.mubr.msk.f32.mxu0 %vm23984_vm1, %v30093_v47  ;;  %v12877_v58 = vand.u32 4294901760, %v12876_v48  ;;  %v23329_v59 = vpack.c.bf16 %v28917_v56, %v28912_v5 }
 0xeca   :  { %v12869_v7 = vsub.f32 %v28912_v5, %v12868_v8  ;;  %v28976_v48 = vsub.f32 %v28585_v45, %v28963_v27  ;;  %v28997_v45 = vpack.c.bf16 %v12722_v15, %v12719_v25  ;;  %v23323_v25 = vpack.c.bf16 %v28843_v14, %v28838_v22 }
 0xecb   :  { %23264 = vmatpush3.bf16.msra.mxu0 %v28897_v55  ;;  %23294 = vmatpush3.bf16.msra.mxu1 %v23293_v49  ;;  %v23299_v49 = vpack.c.bf16 %v12849_v53, %v12842_v24  ;;  %v23302_v24 = vpack.c.bf16 %v12863_v12, %v12856_v46  ;;  %v23326_v15 = vpack.c.bf16 %v28887_v26, %v28882_v36  ;;  %v30225_v46 = vand.u32 4294901760, %v28678_v6 }
 0xecc   :  { %23265 = vmatprep.subr.bf16.mxu0 %v30092_v38  ;;  %23295 = vmatprep.subr.bf16.mxu1 %v30092_v38  ;;  %v12870_v53 = vand.u32 4294901760, %v12869_v7  ;;  %v12759_v62 = vand.u32 4294901760, %v28976_v48  ;;  %v30227_v7 = vand.u32 4294901760, %v28711_v3  ;;  %v30229_v6 = vand.u32 4294901760, %v28723_v28 }
 0xecd   :  { %v30231_v3 = vand.u32 4294901760, %v28762_v30  ;;  %v30232_v28 = vand.u32 4294901760, %v28805_v57  ;;  %v23371_v30 = vpack.c.bf16 %v12847_v40, %v12840_v51  ;;  %v30233_v57 = vand.u32 4294901760, %v28887_v26 }
 0xece   :  { %v23305_v29 = vpack.c.bf16 %v12877_v58, %v12870_v53  ;;  %v12760_v17 = vsub.f32 %v28976_v48, %v12759_v62  ;;  %v23377_v22 = vpack.c.bf16 %v12875_v18, %v12868_v8 }
 0xecf   :  { %23267 = vmatpush3.bf16.msra.mxu0 %v28927_v13  ;;  %23297 = vmatpush3.bf16.msra.mxu1 %v23296_v52  ;;  %v28960_v52 = vpack.c.bf16 %v30222_v35, %v30221_v9 }
 0xed0   :  { %23268 = vmatprep.subr.bf16.mxu0 %v30092_v38  ;;  %23298 = vmatprep.subr.bf16.mxu1 %v30092_v38  ;;  %v12761_v50 = vand.u32 4294901760, %v12760_v17  ;;  %v15718_v17 = vld [vmem:[%s29846_s4 + $0x128] sm:$0xff] }
 0xed3   :  { %23270 = vmatpush3.bf16.msra.mxu0 %v28944_v37  ;;  %23300 = vmatpush3.bf16.msra.mxu1 %v23299_v49  ;;  %v30224_v49 = vand.u32 4294901760, %v28673_v1  ;;  %v30228_v1 = vand.u32 4294901760, %v28718_v42  ;;  %v15712_v42 = vld [vmem:[%s29847_s8 + $0x10] sm:$0xff] }
 0xed4   :  { %23271 = vmatprep.subr.bf16.mxu0 %v30092_v38  ;;  %23301 = vmatprep.subr.bf16.mxu1 %v30092_v38 }
 0xed5   :  { %v23356_v12 = vpack.c.bf16 %v30225_v46, %v30224_v49 }
 0xed7   :  { %23273 = vmatpush3.bf16.msra.mxu0 %v28960_v52  ;;  %23303 = vmatpush3.bf16.msra.mxu1 %v23302_v24 }
 0xed8   :  { %23274 = vmatprep.subr.bf16.mxu0 %v30092_v38  ;;  %23304 = vmatprep.subr.bf16.mxu1 %v30092_v38 }
 0xedb   :  { %23276 = vmatpush3.bf16.msra.mxu0 %v28972_v23  ;;  %23306 = vmatpush3.bf16.msra.mxu1 %v23305_v29 }
 0xedc   :  { %23277 = vmatprep.subr.bf16.mxu0 %v30092_v38  ;;  %23331 = vmatprep.subr.bf16.mxu1 %v30092_v38 }
 0xede   :  { %20573 = vmatmul.mubr.f32.vlgmr.msra.gmra.mrb[34].mxu1 %v28963_v27 }
 0xedf   :  { %23279 = vmatpush3.bf16.msra.mxu0 %v28985_v32  ;;  %23333 = vmatpush3.bf16.msra.mxu1 %v28867_v41 }
 0xee0   :  { %23280 = vmatprep.subr.bf16.mxu0 %v30092_v38  ;;  %23334 = vmatprep.subr.bf16.mxu1 %v30092_v38 }
 0xee1   :  { %20642 = vmatprep.mubr.msk.f32.mxu1 %vm23984_vm1, %v30093_v47 }
 0xee3   :  { %23282 = vmatpush3.bf16.msra.mxu0 %v28997_v45  ;;  %23336 = vmatpush3.bf16.msra.mxu1 %v28897_v55 }
 0xee4   :  { %23307 = vmatprep.subr.bf16.mxu0 %v30092_v38  ;;  %23337 = vmatprep.subr.bf16.mxu1 %v30092_v38 }
 0xee6   :  { %20538 = vmatmul.mubr.f32.vlgmr.msra.gmra.mrb[54].mxu0 %v12761_v50 }
 0xee7   :  { %23309 = vmatpush3.bf16.msra.mxu0 %v23308_v16  ;;  %23339 = vmatpush3.bf16.msra.mxu1 %v28927_v13 }
 0xee8   :  { %23310 = vmatprep.subr.bf16.mxu0 %v30092_v38  ;;  %23340 = vmatprep.subr.bf16.mxu1 %v30092_v38 }
 0xee9   :  { %20607 = vmatprep.mubr.msk.f32.mxu0 %vm23984_vm1, %v30093_v47 }
 0xeeb   :  { %23312 = vmatpush3.bf16.msra.mxu0 %v23311_v2  ;;  %23342 = vmatpush3.bf16.msra.mxu1 %v28944_v37  ;;  %v13825_v2 = vand.u32 4294901760, %v15718_v17 }
 0xeec   :  { %23313 = vmatprep.subr.bf16.mxu0 %v30092_v38  ;;  %23343 = vmatprep.subr.bf16.mxu1 %v30092_v38 }
 0xeef   :  { %23315 = vmatpush3.bf16.msra.mxu0 %v23314_v11  ;;  %23345 = vmatpush3.bf16.msra.mxu1 %v28960_v52  ;;  %v15719_v11 = vld [vmem:[%s29846_s4 + $0x130] sm:$0xff] }
 0xef0   :  { %23316 = vmatprep.subr.bf16.mxu0 %v30092_v38  ;;  %23346 = vmatprep.subr.bf16.mxu1 %v30092_v38 }
 0xef3   :  { %23318 = vmatpush3.bf16.msra.mxu0 %v23317_v63  ;;  %23348 = vmatpush3.bf16.msra.mxu1 %v28972_v23 }
 0xef4   :  { %23319 = vmatprep.subr.bf16.mxu0 %v30092_v38  ;;  %23349 = vmatprep.subr.bf16.mxu1 %v30092_v38 }
 0xef7   :  { %23321 = vmatpush3.bf16.msra.mxu0 %v23320_v20  ;;  %23351 = vmatpush3.bf16.msra.mxu1 %v28985_v32 }
 0xef8   :  { %23322 = vmatprep.subr.bf16.mxu0 %v30092_v38  ;;  %23352 = vmatprep.subr.bf16.mxu1 %v30092_v38 }
 0xefb   :  { %23324 = vmatpush3.bf16.msra.mxu0 %v23323_v25  ;;  %23354 = vmatpush3.bf16.msra.mxu1 %v28997_v45 }
 0xefc   :  { %23325 = vmatprep.subr.bf16.mxu0 %v30092_v38  ;;  %23379 = vmatprep.subr.bf16.mxu1 %v30092_v38 }
 0xefe   :  { %20643 = vmatmul.mubr.f32.vlgmr.msra.gmra.mrb[36].mxu1 %v12759_v62 }
 0xeff   :  { %23327 = vmatpush3.bf16.msra.mxu0 %v23326_v15  ;;  %23381 = vmatpush3.bf16.msra.mxu1 %v28867_v41  ;;  %v30226_v41 = vand.u32 4294901760, %v28706_v31  ;;  %v30230_v31 = vand.u32 4294901760, %v28757_v54  ;;  %v13319_v54 = vsel %vm6494_vm4, %v15712_v42, 0 }
 0xf00   :  { %23328 = vmatprep.subr.bf16.mxu0 %v30092_v38  ;;  %23382 = vmatprep.subr.bf16.mxu1 %v30092_v38  ;;  %v13389_v21 = vand.u32 4294901760, %v13319_v54 }
 0xf01   :  { %20712 = vmatprep.mubr.msk.f32.mxu1 %vm23984_vm1, %v30093_v47  ;;  %v23359_v9 = vpack.c.bf16 %v30227_v7, %v30226_v41 }
 0xf02   :  { %v13390_v35 = vsub.f32 %v13319_v54, %v13389_v21 }
 0xf03   :  { %23330 = vmatpush3.bf16.msra.mxu0 %v23329_v59  ;;  %23384 = vmatpush3.bf16.msra.mxu1 %v28897_v55  ;;  %v23362_v55 = vpack.c.bf16 %v30229_v6, %v30228_v1  ;;  %v15720_v59 = vld [vmem:[%s29846_s4 + $0x138] sm:$0xff]  ;;  %v13828_v6 = vand.u32 4294901760, %v15719_v11 }
 0xf04   :  { %23355 = vmatprep.subr.bf16.mxu0 %v30092_v38  ;;  %23385 = vmatprep.subr.bf16.mxu1 %v30092_v38  ;;  %v13391_v14 = vand.u32 4294901760, %v13390_v35 }
 0xf05   :  { %v29212_v54 = vsub.f32 %v15719_v11, %v13828_v6 }
 0xf06   :  { %20608 = vmatmul.mubr.f32.vlgmr.msra.gmra.mrb[56].mxu0 %v28976_v48  ;;  %v13392_v51 = vsub.f32 %v13390_v35, %v13391_v14  ;;  %v13813_v48 = vand.u32 4294901760, %v15714_v19 }
 0xf07   :  { %23357 = vmatpush3.bf16.msra.mxu0 %v23356_v12  ;;  %23387 = vmatpush3.bf16.msra.mxu1 %v28927_v13  ;;  %v23365_v13 = vpack.c.bf16 %v30231_v3, %v30230_v31  ;;  %v29191_v12 = vsub.f32 %v15718_v17, %v13825_v2 }
 0xf08   :  { %23358 = vmatprep.subr.bf16.mxu0 %v30092_v38  ;;  %23388 = vmatprep.subr.bf16.mxu1 %v30092_v38  ;;  %v13393_v40 = vand.u32 4294901760, %v13392_v51  ;;  %v29178_v20 = vsub.f32 %v15714_v19, %v13813_v48 }
 0xf09   :  { %20677 = vmatprep.mubr.msk.f32.mxu0 %vm23984_vm1, %v30093_v47  ;;  %v30032_v3 = vand.u32 4294901760, %v29191_v12 }
 0xf0b   :  { %23360 = vmatpush3.bf16.msra.mxu0 %v23359_v9  ;;  %23390 = vmatpush3.bf16.msra.mxu1 %v28944_v37  ;;  %v23368_v37 = vpack.c.bf16 %v30232_v28, %v12826_v34  ;;  %v23374_v34 = vpack.c.bf16 %v30233_v57, %v12854_v39  ;;  %v13910_v9 = vand.u32 4294901760, %v29178_v20  ;;  %v13939_v57 = vsub.f32 %v29191_v12, %v30032_v3 }
 0xf0c   :  { %23361 = vmatprep.subr.bf16.mxu0 %v30092_v38  ;;  %23391 = vmatprep.subr.bf16.mxu1 %v30092_v38 }
 0xf0d   :  { %v13911_v28 = vsub.f32 %v29178_v20, %v13910_v9 }
 0xf0f   :  { %23363 = vmatpush3.bf16.msra.mxu0 %v23362_v55  ;;  %23393 = vmatpush3.bf16.msra.mxu1 %v28960_v52 }
 0xf10   :  { %23364 = vmatprep.subr.bf16.mxu0 %v30092_v38  ;;  %23394 = vmatprep.subr.bf16.mxu1 %v30092_v38 }
 0xf13   :  { %23366 = vmatpush3.bf16.msra.mxu0 %v23365_v13  ;;  %23396 = vmatpush3.bf16.msra.mxu1 %v28972_v23  ;;  %v15715_v23 = vld [vmem:[%s29846_s4 + $0x110] sm:$0xff]  ;;  %v13831_v13 = vand.u32 4294901760, %v15720_v59 }
 0xf14   :  { %23367 = vmatprep.subr.bf16.mxu0 %v30092_v38  ;;  %23397 = vmatprep.subr.bf16.mxu1 %v30092_v38  ;;  %v13816_v62 = vand.u32 4294901760, %v15715_v23 }
 0xf16   :  { %v29180_v25 = vsub.f32 %v15715_v23, %v13816_v62 }
 0xf17   :  { %23369 = vmatpush3.bf16.msra.mxu0 %v23368_v37  ;;  %23399 = vmatpush3.bf16.msra.mxu1 %v28985_v32  ;;  %v15716_v32 = vld [vmem:[%s29846_s4 + $0x118] sm:$0xff] }
 0xf18   :  { %23370 = vmatprep.subr.bf16.mxu0 %v30092_v38  ;;  %23400 = vmatprep.subr.bf16.mxu1 %v30092_v38  ;;  %v13819_v16 = vand.u32 4294901760, %v15716_v32  ;;  %v13917_v1 = vand.u32 4294901760, %v29180_v25 }
 0xf1a   :  { %v29187_v49 = vsub.f32 %v15716_v32, %v13819_v16  ;;  %v29193_v41 = vpack.c.bf16 %v13819_v16, %v13816_v62  ;;  %v13918_v37 = vsub.f32 %v29180_v25, %v13917_v1 }
 0xf1b   :  { %23372 = vmatpush3.bf16.msra.mxu0 %v23371_v30  ;;  %23402 = vmatpush3.bf16.msra.mxu1 %v28997_v45  ;;  %v15717_v45 = vld [vmem:[%s29846_s4 + $0x120] sm:$0xff] }
 0xf1c   :  { %23373 = vmatprep.subr.bf16.mxu0 %v30092_v38  ;;  %23421 = vmatprep.subr.bf16.mxu1 %v30092_v38  ;;  %v13822_v50 = vand.u32 4294901760, %v15717_v45  ;;  %v13924_v55 = vand.u32 4294901760, %v29187_v49  ;;  %v13919_v51 = vand.u32 4294901760, %v13918_v37 }
 0xf1e   :  { %20713 = vmatmul.mubr.f32.vlgmr.msra.gmra.mrb[38].mxu1 %v28963_v27  ;;  %v29189_v46 = vsub.f32 %v15717_v45, %v13822_v50  ;;  %v13925_v30 = vsub.f32 %v29187_v49, %v13924_v55  ;;  %v29262_v45 = vpack.c.bf16 %v13831_v13, %v13828_v6  ;;  %v29276_v6 = vld [vmem:[%s29846_s4 + $0x170] sm:$0xff] }
 0xf1f   :  { %23375 = vmatpush3.bf16.msra.mxu0 %v23374_v34  ;;  %20801 = vmatprep.mubr.msk.f32.mxu1 %vm23984_vm1, %v30093_v47  ;;  %v29223_v34 = vsub.f32 %v15720_v59, %v13831_v13  ;;  %v29281_v13 = vld [vmem:[%s29846_s4 + $0x178] sm:$0xff] }
 0xf20   :  { %23376 = vmatprep.subr.bf16.mxu0 %v30092_v38  ;;  %v13931_v31 = vand.u32 4294901760, %v29189_v46 }
 0xf23   :  { %23378 = vmatpush3.bf16.msra.mxu0 %v23377_v22 }
 0xf24   :  { %23403 = vmatprep.subr.bf16.mxu0 %v30092_v38 }
 0xf26   :  { %20678 = vmatmul.mubr.f32.vlgmr.msra.gmra.mrb[58].mxu0 %v28963_v27  ;;  %v15713_v27 = vld [vmem:[%s29846_s4 + $0x100] sm:$0xff] }
 0xf27   :  { %23405 = vmatpush3.bf16.msra.mxu0 %v28228_v43  ;;  %20721 = vmatprep.mubr.msk.f32.mxu0 %vm23984_vm1, %v30093_v47  ;;  %v13810_v29 = vand.u32 4294901760, %v15713_v27 }
 0xf28   :  { %20719 = vmatprep.subr.mxu0 %v30093_v47 }
 0xf29   :  { %v29176_v63 = vsub.f32 %v15713_v27, %v13810_v29  ;;  %v29182_v15 = vpack.c.bf16 %v13813_v48, %v13810_v29  ;;  %v13940_v27 = vand.u32 4294901760, %v13939_v57  ;;  %v29252_v29 = vld [vmem:[%s29846_s4 + $0x160] sm:$0xff]  ;;  %v29257_v48 = vld [vmem:[%s29846_s4 + $0x168] sm:$0xff] }
 0xf2a   :  { %v13849_v37 = vand.u32 4294901760, %v29257_v48 }
 0xf2b   :  { %20720 = vmatpush3.msra.mxu0 %v28192_v0  ;;  %v13903_v7 = vand.u32 4294901760, %v29176_v63  ;;  %23423 = vmatpush3.bf16.msra.mxu1 %v29182_v15 }
 0xf2c   :  { %20722 = vmatmul.mubr.f32.vlgmr.msra.gmra.mrb[60].mxu0 %v13393_v40  ;;  %23406 = vmatprep.subr.bf16.mxu0 %v30092_v38  ;;  %v30031_v40 = vand.u32 4294901760, %v29212_v54 }
 0xf2d   :  { %23408 = vmatpush3.bf16.msra.mxu0 %v28245_v60  ;;  %20730 = vmatprep.mubr.msk.f32.mxu0 %vm23984_vm1, %v30093_v47  ;;  %v13904_v42 = vsub.f32 %v29176_v63, %v13903_v7 }
 0xf2e   :  { %20728 = vmatprep.subr.mxu0 %v30093_v47  ;;  %23424 = vmatprep.subr.bf16.mxu1 %v30092_v38 }
 0xf2f   :  { %v13905_v22 = vand.u32 4294901760, %v13904_v42  ;;  %23426 = vmatpush3.bf16.msra.mxu1 %v29193_v41 }
 0xf30   :  { %23427 = vmatprep.subr.bf16.mxu1 %v30092_v38 }
 0xf31   :  { %20729 = vmatpush3.msra.mxu0 %v28256_v61 }
 0xf32   :  { %23409 = vmatprep.subr.bf16.mxu0 %v30092_v38 }
 0xf34   :  { %20731 = vmatmul.mubr.f32.vlgmr.msra.gmra.mrb[60].mxu0 %v13389_v21 }
 0xf35   :  { %23411 = vmatpush3.bf16.msra.mxu0 %v28269_v33  ;;  %20739 = vmatprep.mubr.msk.f32.mxu0 %vm23984_vm1, %v30093_v47 }
 0xf36   :  { %20737 = vmatprep.subr.mxu0 %v30093_v47 }
 0xf39   :  { %20738 = vmatpush3.msra.mxu0 %v28207_v4 }
 0xf3a   :  { %23412 = vmatprep.subr.bf16.mxu0 %v30092_v38 }
 0xf3c   :  { %20740 = vmatmul.mubr.f32.vlgmr.msra.gmra.mrb[60].mxu0 %v13390_v35  ;;  %v15721_v35 = vld [vmem:[%s29846_s4 + $0x140] sm:$0xff] }
 0xf3d   :  { %23414 = vmatpush3.bf16.msra.mxu0 %v28228_v43  ;;  %20748 = vmatprep.mubr.msk.f32.mxu0 %vm23984_vm1, %v30093_v47 }
 0xf3e   :  { %20746 = vmatprep.subr.mxu0 %v30093_v47 }
 0xf41   :  { %20747 = vmatpush3.msra.mxu0 %v28192_v0 }
 0xf42   :  { %23415 = vmatprep.subr.bf16.mxu0 %v30092_v38 }
 0xf44   :  { %20749 = vmatmul.mubr.f32.vlgmr.msra.gmra.mrb[60].mxu0 %v13391_v14  ;;  %v13912_v14 = vand.u32 4294901760, %v13911_v28  ;;  %v13846_v28 = vand.u32 4294901760, %v29252_v29 }
 0xf45   :  { %23417 = vmatpush3.bf16.msra.mxu0 %v28303_v44  ;;  %20757 = vmatprep.mubr.msk.f32.mxu0 %vm23984_vm1, %v30093_v47 }
 0xf46   :  { %20755 = vmatprep.subr.mxu0 %v30093_v47 }
 0xf49   :  { %20756 = vmatpush3.msra.mxu0 %v28237_v10 }
 0xf4a   :  { %23418 = vmatprep.subr.bf16.mxu0 %v30092_v38 }
 0xf4c   :  { %20758 = vmatmul.mubr.f32.vlgmr.msra.gmra.mrb[60].mxu0 %v13389_v21 }
 0xf4d   :  { %23420 = vmatpush3.bf16.msra.mxu0 %v28228_v43  ;;  %20766 = vmatprep.mubr.msk.f32.mxu0 %vm23984_vm1, %v30093_v47 }
 0xf4e   :  { %20764 = vmatprep.subr.mxu0 %v30093_v47 }
 0xf51   :  { %20765 = vmatpush3.msra.mxu0 %v28192_v0  ;;  %v12273_v36 = vpop.f32.mrb[28].mxu1 }
 0xf52   :  { %v20364_v26 = vpop.f32.mrb[29].mxu1  ;;  %23445 = vmatprep.subr.bf16.mxu0 %v30092_v38 }
 0xf53   :  { %v13926_v26 = vand.u32 4294901760, %v13925_v30 }
 0xf54   :  { %20767 = vmatmul.mubr.f32.vlgmr.msra.gmra.mrb[60].mxu0 %v13389_v21  ;;  %v13932_v21 = vsub.f32 %v29189_v46, %v13931_v31 }
 0xf55   :  { %20836 = vmatprep.mubr.msk.f32.mxu0 %vm23984_vm1, %v30093_v47  ;;  %v23449_v32 = vpack.c.bf16 %v13926_v26, %v13919_v51  ;;  %v29296_v51 = vsub.f32 %v29252_v29, %v13846_v28  ;;  %v23473_v29 = vpack.c.bf16 %v29187_v49, %v29180_v25  ;;  %v30235_v25 = vand.u32 4294901760, %v29212_v54 }
 0xf56   :  { %v30236_v49 = vand.u32 4294901760, %v29223_v34 }
 0xf59   :  { %v12122_v39 = vpop.f32.mrb[48].mxu0 }
 0xf5a   :  { %v12274_v5 = vadd.f32 %v12273_v36, %v12122_v39  ;;  %v20329_v56 = vpop.f32.mrb[49].mxu0  ;;  %v15722_v36 = vld [vmem:[%s29846_s4 + $0x148] sm:$0xff]  ;;  %v30028_v39 = vand.u32 4294901760, %v29223_v34 }
 0xf5b   :  { %v23446_v56 = vpack.c.bf16 %v13912_v14, %v13905_v22  ;;  %v13837_v23 = vand.u32 4294901760, %v15722_v36 }
 0xf5c   :  { %v13953_v19 = vsub.f32 %v29223_v34, %v30028_v39 }
 0xf5d   :  { %23447 = vmatpush3.bf16.msra.mxu0 %v23446_v56  ;;  %v13852_v56 = vand.u32 4294901760, %v29276_v6 }
 0xf5e   :  { %23448 = vmatprep.subr.bf16.mxu0 %v30092_v38 }
 0xf61   :  { %23450 = vmatpush3.bf16.msra.mxu0 %v23449_v32 }
 0xf62   :  { %23451 = vmatprep.subr.bf16.mxu0 %v30092_v38 }
 0xf71   :  { %v12466_v8 = vpop.f32.mrb[30].mxu1 }
 0xf72   :  { %v20434_v18 = vpop.f32.mrb[31].mxu1 }
 0xf73   :  { %v29241_v18 = vpack.c.bf16 %v13825_v2, %v13822_v50  ;;  %v13954_v50 = vand.u32 4294901760, %v13953_v19  ;;  %v29265_v2 = vsub.f32 %v15722_v36, %v13837_v23  ;;  %v29301_v36 = vsub.f32 %v29257_v48, %v13849_v37 }
 0xf74   :  { %v30025_v19 = vand.u32 4294901760, %v29296_v51  ;;  %v23476_v48 = vpack.c.bf16 %v29191_v12, %v29189_v46  ;;  %v15729_v46 = vld [vmem:[%s29847_s8 + $0x18] sm:$0xff] }
 0xf75   :  { %23429 = vmatpush3.bf16.msra.mxu1 %v29241_v18 }
 0xf76   :  { %23430 = vmatprep.subr.bf16.mxu1 %v30092_v38 }
 0xf79   :  { %v12377_v52 = vpop.f32.mrb[50].mxu0  ;;  %23432 = vmatpush3.bf16.msra.mxu1 %v29262_v45 }
 0xf7a   :  { %v12378_v24 = vadd.f32 %v12377_v52, %v12274_v5  ;;  %v20399_v53 = vpop.f32.mrb[51].mxu0  ;;  %v15723_v5 = vld [vmem:[%s29846_s4 + $0x150] sm:$0xff]  ;;  %v13834_v52 = vand.u32 4294901760, %v15721_v35  ;;  %23433 = vmatprep.subr.bf16.mxu1 %v30092_v38 }
 0xf7b   :  { %v13933_v53 = vand.u32 4294901760, %v13932_v21  ;;  %v13840_v17 = vand.u32 4294901760, %v15723_v5  ;;  %v30022_v21 = vand.u32 4294901760, %v29265_v2 }
 0xf7c   :  { %v29153_v58 = vadd.f32 %v12466_v8, %v12378_v24  ;;  %v13946_v8 = vsub.f32 %v29212_v54, %v30031_v40  ;;  %v15724_v24 = vld [vmem:[%s29846_s4 + $0x158] sm:$0xff]  ;;  %v29260_v62 = vsub.f32 %v15721_v35, %v13834_v52  ;;  %v29286_v35 = vpack.c.bf16 %v13837_v23, %v13834_v52 }
 0xf7d   :  { %v13843_v11 = vand.u32 4294901760, %v15724_v24  ;;  %v29269_v42 = vsub.f32 %v15723_v5, %v13840_v17  ;;  %v23452_v30 = vpack.c.bf16 %v13940_v27, %v13933_v53  ;;  %v13967_v26 = vsub.f32 %v29265_v2, %v30022_v21 }
 0xf7e   :  { %v13947_v16 = vand.u32 4294901760, %v13946_v8  ;;  %v30023_v59 = vand.u32 4294901760, %v29260_v62  ;;  %v13855_v8 = vand.u32 4294901760, %v29281_v13  ;;  %v30027_v23 = vand.u32 4294901760, %v29301_v36  ;;  %23435 = vmatpush3.bf16.msra.mxu1 %v29286_v35 }
 0xf7f   :  { %v29284_v57 = vsub.f32 %v15724_v24, %v13843_v11  ;;  %v30026_v14 = vand.u32 4294901760, %v29269_v42  ;;  %v29311_v24 = vpack.c.bf16 %v13843_v11, %v13840_v17  ;;  %23453 = vmatpush3.bf16.msra.mxu0 %v23452_v30  ;;  %v13968_v21 = vand.u32 4294901760, %v13967_v26  ;;  %23436 = vmatprep.subr.bf16.mxu1 %v30092_v38 }
 0xf80   :  { %v13960_v22 = vsub.f32 %v29260_v62, %v30023_v59  ;;  %v23455_v52 = vpack.c.bf16 %v13954_v50, %v13947_v16  ;;  %v29323_v17 = vsub.f32 %v29276_v6, %v13852_v56  ;;  %v29326_v16 = vsub.f32 %v29281_v13, %v13855_v8  ;;  %23454 = vmatprep.subr.bf16.mxu0 %v30092_v38 }
 0xf81   :  { %v30024_v5 = vand.u32 4294901760, %v29284_v57  ;;  %v13974_v27 = vsub.f32 %v29269_v42, %v30026_v14  ;;  %v13988_v30 = vsub.f32 %v29296_v51, %v30025_v19 }
 0xf82   :  { %v13961_v53 = vand.u32 4294901760, %v13960_v22  ;;  %v13995_v22 = vsub.f32 %v29301_v36, %v30027_v23  ;;  %23438 = vmatpush3.bf16.msra.mxu1 %v29311_v24  ;;  %v30030_v13 = vand.u32 4294901760, %v29323_v17 }
 0xf83   :  { %v13981_v59 = vsub.f32 %v29284_v57, %v30024_v5  ;;  %v13975_v11 = vand.u32 4294901760, %v13974_v27  ;;  %23456 = vmatpush3.bf16.msra.mxu0 %v23455_v52  ;;  %23439 = vmatprep.subr.bf16.mxu1 %v30092_v38  ;;  %v13989_v27 = vand.u32 4294901760, %v13988_v30 }
 0xf84   :  { %v23458_v6 = vpack.c.bf16 %v13968_v21, %v13961_v53  ;;  %23457 = vmatprep.subr.bf16.mxu0 %v30092_v38  ;;  %v13996_v14 = vand.u32 4294901760, %v13995_v22  ;;  %v14002_v21 = vsub.f32 %v29323_v17, %v30030_v13  ;;  %v23482_v22 = vpack.c.bf16 %v29265_v2, %v29260_v62 }
 0xf85   :  { %v13982_v26 = vand.u32 4294901760, %v13981_v59 }
 0xf86   :  { %v23464_v30 = vpack.c.bf16 %v13996_v14, %v13989_v27  ;;  %v14003_v39 = vand.u32 4294901760, %v14002_v21  ;;  %v29360_v14 = vpack.c.bf16 %v13855_v8, %v13852_v56  ;;  %v23479_v8 = vpack.c.bf16 %v29223_v34, %v29212_v54 }
 0xf87   :  { %23459 = vmatpush3.bf16.msra.mxu0 %v23458_v6  ;;  %v23461_v19 = vpack.c.bf16 %v13982_v26, %v13975_v11  ;;  %v23485_v26 = vpack.c.bf16 %v29284_v57, %v29269_v42  ;;  %v23488_v27 = vpack.c.bf16 %v29301_v36, %v29296_v51  ;;  %v23491_v21 = vpack.c.bf16 %v29326_v16, %v29323_v17 }
 0xf88   :  { %23460 = vmatprep.subr.bf16.mxu0 %v30092_v38  ;;  %v30241_v34 = vand.u32 4294901760, %v29296_v51 }
 0xf8b   :  { %23462 = vmatpush3.bf16.msra.mxu0 %v23461_v19 }
 0xf8c   :  { %23463 = vmatprep.subr.bf16.mxu0 %v30092_v38 }
 0xf8f   :  { %23465 = vmatpush3.bf16.msra.mxu0 %v23464_v30 }
 0xf90   :  { %23466 = vmatprep.subr.bf16.mxu0 %v30092_v38 }
 0xf91   :  { %v12672_v32 = vpop.f32.mrb[32].mxu1 }
 0xf92   :  { %v20504_v50 = vpop.f32.mrb[33].mxu1 }
 0xf93   :  { %v30029_v50 = vand.u32 4294901760, %v29326_v16 }
 0xf95   :  { %v14009_v59 = vsub.f32 %v29326_v16, %v30029_v50 }
 0xf97   :  { %v14010_v6 = vand.u32 4294901760, %v14009_v59 }
 0xf99   :  { %v12585_v5 = vpop.f32.mrb[52].mxu0  ;;  %v23467_v11 = vpack.c.bf16 %v14010_v6, %v14003_v39 }
 0xf9a   :  { %v12586_v52 = vadd.f32 %v12585_v5, %v29153_v58  ;;  %v20469_v53 = vpop.f32.mrb[53].mxu0  ;;  %v29356_v58 = vpack.c.bf16 %v13849_v37, %v13846_v28  ;;  %v23470_v5 = vpack.c.bf16 %v29178_v20, %v29176_v63  ;;  %v30234_v63 = vand.u32 4294901760, %v29191_v12 }
 0xf9b   :  { %23468 = vmatpush3.bf16.msra.mxu0 %v23467_v11  ;;  %v30237_v12 = vand.u32 4294901760, %v29260_v62 }
 0xf9c   :  { %v12673_v23 = vadd.f32 %v12672_v32, %v12586_v52  ;;  %23493 = vmatprep.subr.bf16.mxu0 %v30092_v38  ;;  %23441 = vmatpush3.bf16.msra.mxu1 %v29356_v58  ;;  %v23524_v20 = vpack.c.bf16 %v30234_v63, %v13931_v31  ;;  %v30240_v31 = vand.u32 4294901760, %v29284_v57 }
 0xf9d   :  { %23442 = vmatprep.subr.bf16.mxu1 %v30092_v38 }
 0xfa0   :  { %23444 = vmatpush3.bf16.msra.mxu1 %v29360_v14 }
 0xfa1   :  { %23469 = vmatprep.subr.bf16.mxu1 %v30092_v38 }
 0xfb1   :  { %v12914_v39 = vpop.f32.mrb[34].mxu1 }
 0xfb2   :  { %v20574_v19 = vpop.f32.mrb[35].mxu1 }
 0xfb9   :  { %v12763_v28 = vpop.f32.mrb[54].mxu0 }
 0xfba   :  { %v12764_v37 = vadd.f32 %v12763_v28, %v12673_v23  ;;  %v20539_v32 = vpop.f32.mrb[55].mxu0 }
 0xfbc   :  { %v12915_v56 = vadd.f32 %v12914_v39, %v12764_v37 }
 0xfd1   :  { %v13107_v59 = vpop.f32.mrb[36].mxu1 }
 0xfd2   :  { %v20644_v52 = vpop.f32.mrb[37].mxu1 }
 0xfd9   :  { %v13018_v23 = vpop.f32.mrb[56].mxu0 }
 0xfda   :  { %v13019_v53 = vadd.f32 %v13018_v23, %v12915_v56  ;;  %v20609_v30 = vpop.f32.mrb[57].mxu0 }
 0xfdc   :  { %v13108_v6 = vadd.f32 %v13107_v59, %v13019_v53 }
 0xff1   :  { %v13313_v11 = vpop.f32.mrb[38].mxu1 }
 0xff2   :  { %v20714_v39 = vpop.f32.mrb[39].mxu1 }
 0xff9   :  { %v13226_v19 = vpop.f32.mrb[58].mxu0 }
 0xffa   :  { %v13227_v28 = vadd.f32 %v13226_v19, %v13108_v6  ;;  %v20679_v37 = vpop.f32.mrb[59].mxu0 }
 0xffc   :  { %v29380_v32 = vadd.f32 %v13313_v11, %v13227_v28 }
0x1027   :  { %v13789_v50 = vpop.f32.mrb[60].mxu0 }
0x1028   :  { %v29382_v13 = vand.u32 4294901760, %v13789_v50  ;;  %v20768_v40 = vpop.f32.mrb[61].mxu0 }
0x1029   :  { %v23518_v40 = vpack.c.bf16 %v13910_v9, %v13903_v7  ;;  %v30238_v7 = vand.u32 4294901760, %v29265_v2  ;;  %v30243_v2 = vand.u32 4294901760, %v29323_v17 }
0x102a   :  { %v13891_v3 = vsub.f32 %v13789_v50, %v29382_v13  ;;  %20837 = vmatmul.mubr.f32.vlgmr.msra.gmra.mrb[62].mxu0 %v29382_v13  ;;  %v15736_v50 = vld [vmem:[%s29846_s4 + $0x1b0] sm:$0xff] }
0x102b   :  { %23495 = vmatpush3.bf16.msra.mxu0 %v29182_v15  ;;  %20906 = vmatprep.mubr.msk.f32.mxu0 %vm23984_vm1, %v30093_v47  ;;  %v23530_v9 = vpack.c.bf16 %v30238_v7, %v30237_v12  ;;  %v14962_v30 = vand.u32 4294901760, %v15736_v50  ;;  %v15739_v12 = vld [vmem:[%s29846_s4 + $0x1c8] sm:$0xff] }
0x102c   :  { %v13892_v56 = vand.u32 4294901760, %v13891_v3  ;;  %23496 = vmatprep.subr.bf16.mxu0 %v30092_v38 }
0x102e   :  { %v13893_v59 = vsub.f32 %v13891_v3, %v13892_v56 }
0x102f   :  { %23498 = vmatpush3.bf16.msra.mxu0 %v29193_v41 }
0x1030   :  { %v13894_v52 = vand.u32 4294901760, %v13893_v59  ;;  %23499 = vmatprep.subr.bf16.mxu0 %v30092_v38  ;;  %v29577_v59 = vsub.f32 %v15736_v50, %v14962_v30 }
0x1032   :  { %20802 = vmatmul.mubr.f32.vlgmr.msra.gmra.mrb[40].mxu1 %v13894_v52 }
0x1033   :  { %23471 = vmatpush3.bf16.msra.mxu1 %v23470_v5  ;;  %23501 = vmatpush3.bf16.msra.mxu0 %v29241_v18 }
0x1034   :  { %23472 = vmatprep.subr.bf16.mxu1 %v30092_v38  ;;  %23502 = vmatprep.subr.bf16.mxu0 %v30092_v38 }
0x1035   :  { %20871 = vmatprep.mubr.msk.f32.mxu1 %vm23984_vm1, %v30093_v47 }
0x1037   :  { %23474 = vmatpush3.bf16.msra.mxu1 %v23473_v29  ;;  %23504 = vmatpush3.bf16.msra.mxu0 %v29262_v45 }
0x1038   :  { %23475 = vmatprep.subr.bf16.mxu1 %v30092_v38  ;;  %23505 = vmatprep.subr.bf16.mxu0 %v30092_v38 }
0x103b   :  { %23477 = vmatpush3.bf16.msra.mxu1 %v23476_v48  ;;  %23507 = vmatpush3.bf16.msra.mxu0 %v29286_v35  ;;  %v15737_v48 = vld [vmem:[%s29846_s4 + $0x1b8] sm:$0xff] }
0x103c   :  { %23478 = vmatprep.subr.bf16.mxu1 %v30092_v38  ;;  %23508 = vmatprep.subr.bf16.mxu0 %v30092_v38  ;;  %v14965_v19 = vand.u32 4294901760, %v15737_v48 }
0x103e   :  { %v29588_v63 = vsub.f32 %v15737_v48, %v14965_v19 }
0x103f   :  { %23480 = vmatpush3.bf16.msra.mxu1 %v23479_v8  ;;  %23510 = vmatpush3.bf16.msra.mxu0 %v29311_v24 }
0x1040   :  { %23481 = vmatprep.subr.bf16.mxu1 %v30092_v38  ;;  %23511 = vmatprep.subr.bf16.mxu0 %v30092_v38 }
0x1043   :  { %23483 = vmatpush3.bf16.msra.mxu1 %v23482_v22  ;;  %23513 = vmatpush3.bf16.msra.mxu0 %v29356_v58 }
0x1044   :  { %23484 = vmatprep.subr.bf16.mxu1 %v30092_v38  ;;  %23514 = vmatprep.subr.bf16.mxu0 %v30092_v38 }
0x1047   :  { %23486 = vmatpush3.bf16.msra.mxu1 %v23485_v26  ;;  %23516 = vmatpush3.bf16.msra.mxu0 %v29360_v14 }
0x1048   :  { %23487 = vmatprep.subr.bf16.mxu1 %v30092_v38  ;;  %23541 = vmatprep.subr.bf16.mxu0 %v30092_v38 }
0x104a   :  { %20907 = vmatmul.mubr.f32.vlgmr.msra.gmra.mrb[64].mxu0 %v13892_v56 }
0x104b   :  { %23489 = vmatpush3.bf16.msra.mxu1 %v23488_v27  ;;  %23543 = vmatpush3.bf16.msra.mxu0 %v29182_v15  ;;  %v23521_v15 = vpack.c.bf16 %v13924_v55, %v13917_v1  ;;  %v14453_v1 = vsel %vm6494_vm4, %v15729_v46, 0  ;;  %v30239_v55 = vand.u32 4294901760, %v29269_v42  ;;  %v30244_v42 = vand.u32 4294901760, %v29326_v16 }
0x104c   :  { %23490 = vmatprep.subr.bf16.mxu1 %v30092_v38  ;;  %23544 = vmatprep.subr.bf16.mxu0 %v30092_v38  ;;  %v14523_v54 = vand.u32 4294901760, %v14453_v1  ;;  %v15079_v46 = vand.u32 4294901760, %v29577_v59 }
0x104d   :  { %20976 = vmatprep.mubr.msk.f32.mxu0 %vm23984_vm1, %v30093_v47  ;;  %v23539_v57 = vpack.c.bf16 %v30244_v42, %v30243_v2  ;;  %v14971_v2 = vand.u32 4294901760, %v15739_v12  ;;  %v29617_v42 = vld [vmem:[%s29846_s4 + $0x1e0] sm:$0xff] }
0x104f   :  { %23492 = vmatpush3.bf16.msra.mxu1 %v23491_v21  ;;  %23546 = vmatpush3.bf16.msra.mxu0 %v29193_v41  ;;  %v23527_v41 = vpack.c.bf16 %v30236_v49, %v30235_v25 }
0x1050   :  { %23517 = vmatprep.subr.bf16.mxu1 %v30092_v38  ;;  %23547 = vmatprep.subr.bf16.mxu0 %v30092_v38 }
0x1052   :  { %20872 = vmatmul.mubr.f32.vlgmr.msra.gmra.mrb[42].mxu1 %v13891_v3  ;;  %v23533_v3 = vpack.c.bf16 %v30240_v31, %v30239_v55  ;;  %v15080_v31 = vsub.f32 %v29577_v59, %v15079_v46 }
0x1053   :  { %23519 = vmatpush3.bf16.msra.mxu1 %v23518_v40  ;;  %23549 = vmatpush3.bf16.msra.mxu0 %v29241_v18  ;;  %v30242_v18 = vand.u32 4294901760, %v29301_v36 }
0x1054   :  { %23520 = vmatprep.subr.bf16.mxu1 %v30092_v38  ;;  %23550 = vmatprep.subr.bf16.mxu0 %v30092_v38 }
0x1055   :  { %20941 = vmatprep.mubr.msk.f32.mxu1 %vm23984_vm1, %v30093_v47  ;;  %v23536_v62 = vpack.c.bf16 %v30242_v18, %v30241_v34  ;;  %v15741_v34 = vld [vmem:[%s29846_s4 + $0x1d8] sm:$0xff] }
0x1057   :  { %23522 = vmatpush3.bf16.msra.mxu1 %v23521_v15  ;;  %23552 = vmatpush3.bf16.msra.mxu0 %v29262_v45  ;;  %v14524_v45 = vsub.f32 %v14453_v1, %v14523_v54  ;;  %v15740_v1 = vld [vmem:[%s29846_s4 + $0x1d0] sm:$0xff] }
0x1058   :  { %23523 = vmatprep.subr.bf16.mxu1 %v30092_v38  ;;  %23553 = vmatprep.subr.bf16.mxu0 %v30092_v38 }
0x105b   :  { %23525 = vmatpush3.bf16.msra.mxu1 %v23524_v20  ;;  %23555 = vmatpush3.bf16.msra.mxu0 %v29286_v35  ;;  %v14525_v35 = vand.u32 4294901760, %v14524_v45  ;;  %v15738_v20 = vld [vmem:[%s29846_s4 + $0x1c0] sm:$0xff] }
0x105c   :  { %23526 = vmatprep.subr.bf16.mxu1 %v30092_v38  ;;  %23556 = vmatprep.subr.bf16.mxu0 %v30092_v38 }
0x105d   :  { %v14526_v51 = vsub.f32 %v14524_v45, %v14525_v35 }
0x105f   :  { %23528 = vmatpush3.bf16.msra.mxu1 %v23527_v41  ;;  %23558 = vmatpush3.bf16.msra.mxu0 %v29311_v24  ;;  %v14527_v36 = vand.u32 4294901760, %v14526_v51  ;;  %v15735_v24 = vld [vmem:[%s29846_s4 + $0x1a8] sm:$0xff] }
0x1060   :  { %23529 = vmatprep.subr.bf16.mxu1 %v30092_v38  ;;  %23559 = vmatprep.subr.bf16.mxu0 %v30092_v38 }
0x1063   :  { %23531 = vmatpush3.bf16.msra.mxu1 %v23530_v9  ;;  %23561 = vmatpush3.bf16.msra.mxu0 %v29356_v58  ;;  %v15086_v9 = vand.u32 4294901760, %v29588_v63 }
0x1064   :  { %23532 = vmatprep.subr.bf16.mxu1 %v30092_v38  ;;  %23562 = vmatprep.subr.bf16.mxu0 %v30092_v38 }
0x1067   :  { %23534 = vmatpush3.bf16.msra.mxu1 %v23533_v3  ;;  %23564 = vmatpush3.bf16.msra.mxu0 %v29360_v14 }
0x1068   :  { %23535 = vmatprep.subr.bf16.mxu1 %v30092_v38  ;;  %23583 = vmatprep.subr.bf16.mxu0 %v30092_v38 }
0x106a   :  { %20977 = vmatmul.mubr.f32.vlgmr.msra.gmra.mrb[66].mxu0 %v29382_v13 }
0x106b   :  { %23537 = vmatpush3.bf16.msra.mxu1 %v23536_v62  ;;  %21065 = vmatprep.mubr.msk.f32.mxu0 %vm23984_vm1, %v30093_v47 }
0x106c   :  { %23538 = vmatprep.subr.bf16.mxu1 %v30092_v38 }
0x106f   :  { %23540 = vmatpush3.bf16.msra.mxu1 %v23539_v57  ;;  %v29622_v57 = vld [vmem:[%s29846_s4 + $0x1e8] sm:$0xff] }
0x1070   :  { %23565 = vmatprep.subr.bf16.mxu1 %v30092_v38 }
0x1072   :  { %20942 = vmatmul.mubr.f32.vlgmr.msra.gmra.mrb[44].mxu1 %v29382_v13  ;;  %v14959_v13 = vand.u32 4294901760, %v15735_v24 }
0x1073   :  { %23567 = vmatpush3.bf16.msra.mxu1 %v28228_v43  ;;  %20985 = vmatprep.mubr.msk.f32.mxu1 %vm23984_vm1, %v30093_v47 }
0x1074   :  { %20983 = vmatprep.subr.mxu1 %v30093_v47  ;;  %v29556_v26 = vsub.f32 %v15735_v24, %v14959_v13  ;;  %v14983_v24 = vand.u32 4294901760, %v29622_v57 }
0x1076   :  { %v15072_v39 = vand.u32 4294901760, %v29556_v26 }
0x1077   :  { %20984 = vmatpush3.msra.mxu1 %v28192_v0 }
0x1078   :  { %20986 = vmatmul.mubr.f32.vlgmr.msra.gmra.mrb[46].mxu1 %v14527_v36  ;;  %23568 = vmatprep.subr.bf16.mxu1 %v30092_v38  ;;  %v15073_v15 = vsub.f32 %v29556_v26, %v15072_v39  ;;  %v29627_v36 = vpack.c.bf16 %v14965_v19, %v14962_v30 }
0x1079   :  { %23570 = vmatpush3.bf16.msra.mxu1 %v28245_v60  ;;  %20994 = vmatprep.mubr.msk.f32.mxu1 %vm23984_vm1, %v30093_v47 }
0x107a   :  { %20992 = vmatprep.subr.mxu1 %v30093_v47  ;;  %v15074_v62 = vand.u32 4294901760, %v15073_v15 }
0x107d   :  { %20993 = vmatpush3.msra.mxu1 %v28256_v61  ;;  %v15733_v61 = vld [vmem:[%s29846_s4 + $0x198] sm:$0xff] }
0x107e   :  { %23571 = vmatprep.subr.bf16.mxu1 %v30092_v38  ;;  %v14953_v17 = vand.u32 4294901760, %v15733_v61 }
0x1080   :  { %20995 = vmatmul.mubr.f32.vlgmr.msra.gmra.mrb[46].mxu1 %v14523_v54  ;;  %v29552_v8 = vsub.f32 %v15733_v61, %v14953_v17 }
0x1081   :  { %23573 = vmatpush3.bf16.msra.mxu1 %v28269_v33  ;;  %21003 = vmatprep.mubr.msk.f32.mxu1 %vm23984_vm1, %v30093_v47 }
0x1082   :  { %21001 = vmatprep.subr.mxu1 %v30093_v47  ;;  %v15058_v6 = vand.u32 4294901760, %v29552_v8 }
0x1084   :  { %v15059_v52 = vsub.f32 %v29552_v8, %v15058_v6 }
0x1085   :  { %21002 = vmatpush3.msra.mxu1 %v28207_v4  ;;  %v15730_v4 = vld [vmem:[%s29846_s4 + $0x180] sm:$0xff] }
0x1086   :  { %23574 = vmatprep.subr.bf16.mxu1 %v30092_v38  ;;  %v14944_v60 = vand.u32 4294901760, %v15730_v4  ;;  %v15060_v7 = vand.u32 4294901760, %v15059_v52 }
0x1088   :  { %21004 = vmatmul.mubr.f32.vlgmr.msra.gmra.mrb[46].mxu1 %v14524_v45  ;;  %v29541_v58 = vsub.f32 %v15730_v4, %v14944_v60  ;;  %v15087_v45 = vsub.f32 %v29588_v63, %v15086_v9  ;;  %v14974_v4 = vand.u32 4294901760, %v15740_v1 }
0x1089   :  { %23576 = vmatpush3.bf16.msra.mxu1 %v28228_v43  ;;  %21012 = vmatprep.mubr.msk.f32.mxu1 %vm23984_vm1, %v30093_v47 }
0x108a   :  { %21010 = vmatprep.subr.mxu1 %v30093_v47  ;;  %v15037_v21 = vand.u32 4294901760, %v29541_v58 }
0x108c   :  { %v15038_v28 = vsub.f32 %v29541_v58, %v15037_v21 }
0x108d   :  { %21011 = vmatpush3.msra.mxu1 %v28192_v0 }
0x108e   :  { %23577 = vmatprep.subr.bf16.mxu1 %v30092_v38  ;;  %v15039_v25 = vand.u32 4294901760, %v15038_v28 }
0x1090   :  { %21013 = vmatmul.mubr.f32.vlgmr.msra.gmra.mrb[46].mxu1 %v14525_v35 }
0x1091   :  { %23579 = vmatpush3.bf16.msra.mxu1 %v28303_v44  ;;  %21021 = vmatprep.mubr.msk.f32.mxu1 %vm23984_vm1, %v30093_v47  ;;  %v15734_v44 = vld [vmem:[%s29846_s4 + $0x1a0] sm:$0xff] }
0x1092   :  { %21019 = vmatprep.subr.mxu1 %v30093_v47  ;;  %v14956_v16 = vand.u32 4294901760, %v15734_v44 }
0x1094   :  { %v29554_v22 = vsub.f32 %v15734_v44, %v14956_v16  ;;  %v29606_v3 = vpack.c.bf16 %v14959_v13, %v14956_v16  ;;  %v14980_v44 = vand.u32 4294901760, %v29617_v42  ;;  %v29646_v16 = vld [vmem:[%s29846_s4 + $0x1f8] sm:$0xff] }
0x1095   :  { %21020 = vmatpush3.msra.mxu1 %v28237_v10  ;;  %v15732_v10 = vld [vmem:[%s29846_s4 + $0x190] sm:$0xff] }
0x1096   :  { %23580 = vmatprep.subr.bf16.mxu1 %v30092_v38  ;;  %v14950_v33 = vand.u32 4294901760, %v15732_v10  ;;  %v15065_v11 = vand.u32 4294901760, %v29554_v22 }
0x1098   :  { %21022 = vmatmul.mubr.f32.vlgmr.msra.gmra.mrb[46].mxu1 %v14523_v54  ;;  %v29545_v5 = vsub.f32 %v15732_v10, %v14950_v33  ;;  %v29558_v27 = vpack.c.bf16 %v14953_v17, %v14950_v33  ;;  %v15066_v40 = vsub.f32 %v29554_v22, %v15065_v11  ;;  %v15088_v10 = vand.u32 4294901760, %v15087_v45  ;;  %v29641_v17 = vld [vmem:[%s29846_s4 + $0x1f0] sm:$0xff] }
0x1099   :  { %23582 = vmatpush3.bf16.msra.mxu1 %v28228_v43  ;;  %21030 = vmatprep.mubr.msk.f32.mxu1 %vm23984_vm1, %v30093_v47  ;;  %v15731_v43 = vld [vmem:[%s29846_s4 + $0x188] sm:$0xff]  ;;  %v29634_v33 = vsub.f32 %v15740_v1, %v14974_v4  ;;  %v14986_v15 = vand.u32 4294901760, %v29641_v17 }
0x109a   :  { %21028 = vmatprep.subr.mxu1 %v30093_v47  ;;  %v15051_v53 = vand.u32 4294901760, %v29545_v5  ;;  %v15067_v18 = vand.u32 4294901760, %v15066_v40 }
0x109b   :  { %v15107_v28 = vand.u32 4294901760, %v29634_v33 }
0x109c   :  { %v15052_v56 = vsub.f32 %v29545_v5, %v15051_v53  ;;  %v23614_v13 = vpack.c.bf16 %v15074_v62, %v15067_v18 }
0x109d   :  { %21029 = vmatpush3.msra.mxu1 %v28192_v0  ;;  %v14947_v0 = vand.u32 4294901760, %v15731_v43 }
0x109e   :  { %23607 = vmatprep.subr.bf16.mxu1 %v30092_v38  ;;  %v15053_v41 = vand.u32 4294901760, %v15052_v56  ;;  %v29662_v56 = vsub.f32 %v29622_v57, %v14983_v24 }
0x109f   :  { %v29543_v14 = vsub.f32 %v15731_v43, %v14947_v0  ;;  %v29547_v29 = vpack.c.bf16 %v14947_v0, %v14944_v60  ;;  %v15081_v43 = vand.u32 4294901760, %v15080_v31  ;;  %v29630_v60 = vsub.f32 %v15739_v12, %v14971_v2 }
0x10a0   :  { %21031 = vmatmul.mubr.f32.vlgmr.msra.gmra.mrb[46].mxu1 %v14523_v54  ;;  %v14968_v54 = vand.u32 4294901760, %v15738_v20  ;;  %v23611_v35 = vpack.c.bf16 %v15060_v7, %v15053_v41  ;;  %v14977_v0 = vand.u32 4294901760, %v15741_v34  ;;  %v15108_v12 = vsub.f32 %v29634_v33, %v15107_v28 }
0x10a1   :  { %21100 = vmatprep.mubr.msk.f32.mxu1 %vm23984_vm1, %v30093_v47  ;;  %v15044_v23 = vand.u32 4294901760, %v29543_v14  ;;  %23585 = vmatpush3.bf16.msra.mxu0 %v29547_v29  ;;  %v15100_v50 = vand.u32 4294901760, %v29630_v60  ;;  %v30035_v1 = vand.u32 4294901760, %v29662_v56 }
0x10a2   :  { %23586 = vmatprep.subr.bf16.mxu0 %v30092_v38  ;;  %v29625_v51 = vsub.f32 %v15738_v20, %v14968_v54  ;;  %v29649_v48 = vsub.f32 %v15741_v34, %v14977_v0  ;;  %v29651_v30 = vpack.c.bf16 %v14971_v2, %v14968_v54  ;;  %v14989_v20 = vand.u32 4294901760, %v29646_v16 }
0x10a3   :  { %v15045_v37 = vsub.f32 %v29543_v14, %v15044_v23  ;;  %v15101_v52 = vsub.f32 %v29630_v60, %v15100_v50  ;;  %v29684_v54 = vsub.f32 %v29641_v17, %v14986_v15  ;;  %v15109_v18 = vand.u32 4294901760, %v15108_v12 }
0x10a4   :  { %v15093_v61 = vand.u32 4294901760, %v29625_v51  ;;  %v30037_v40 = vand.u32 4294901760, %v29649_v48  ;;  %v29687_v34 = vsub.f32 %v29646_v16, %v14989_v20  ;;  %v15129_v45 = vsub.f32 %v29662_v56, %v30035_v1 }
0x10a5   :  { %v15046_v49 = vand.u32 4294901760, %v15045_v37  ;;  %23588 = vmatpush3.bf16.msra.mxu0 %v29558_v27  ;;  %v29659_v37 = vsub.f32 %v29617_v42, %v14980_v44  ;;  %v30034_v57 = vand.u32 4294901760, %v29684_v54 }
0x10a6   :  { %23589 = vmatprep.subr.bf16.mxu0 %v30092_v38  ;;  %v15094_v19 = vsub.f32 %v29625_v51, %v15093_v61  ;;  %v15115_v31 = vsub.f32 %v29649_v48, %v30037_v40 }
0x10a7   :  { %v23608_v55 = vpack.c.bf16 %v15046_v49, %v15039_v25  ;;  %v23617_v25 = vpack.c.bf16 %v15088_v10, %v15081_v43  ;;  %v29672_v49 = vpack.c.bf16 %v14977_v0, %v14974_v4  ;;  %v30036_v7 = vand.u32 4294901760, %v29659_v37 }
0x10a8   :  { %v15095_v41 = vand.u32 4294901760, %v15094_v19  ;;  %v15116_v42 = vand.u32 4294901760, %v15115_v31  ;;  %v15130_v10 = vand.u32 4294901760, %v15129_v45  ;;  %v15136_v0 = vsub.f32 %v29684_v54, %v30034_v57 }
0x10a9   :  { %23609 = vmatpush3.bf16.msra.mxu1 %v23608_v55  ;;  %23591 = vmatpush3.bf16.msra.mxu0 %v29606_v3  ;;  %v15102_v55 = vand.u32 4294901760, %v15101_v52  ;;  %v15122_v62 = vsub.f32 %v29659_v37, %v30036_v7 }
0x10aa   :  { %23610 = vmatprep.subr.bf16.mxu1 %v30092_v38  ;;  %23592 = vmatprep.subr.bf16.mxu0 %v30092_v38  ;;  %v23623_v43 = vpack.c.bf16 %v15116_v42, %v15109_v18  ;;  %v23635_v18 = vpack.c.bf16 %v29552_v8, %v29545_v5  ;;  %v23650_v42 = vpack.c.bf16 %v29662_v56, %v29659_v37  ;;  %v30245_v5 = vand.u32 4294901760, %v29649_v48 }
0x10ab   :  { %v23620_v2 = vpack.c.bf16 %v15102_v55, %v15095_v41  ;;  %v15123_v4 = vand.u32 4294901760, %v15122_v62  ;;  %v29716_v41 = vpack.c.bf16 %v14989_v20, %v14986_v15  ;;  %v23632_v55 = vpack.c.bf16 %v29543_v14, %v29541_v58 }
0x10ac   :  { %v23641_v15 = vpack.c.bf16 %v29588_v63, %v29577_v59  ;;  %v23644_v20 = vpack.c.bf16 %v29630_v60, %v29625_v51  ;;  %v23686_v58 = vpack.c.bf16 %v15072_v39, %v15065_v11  ;;  %v23692_v14 = vpack.c.bf16 %v15100_v50, %v15093_v61 }
0x10ad   :  { %23612 = vmatpush3.bf16.msra.mxu1 %v23611_v35  ;;  %23594 = vmatpush3.bf16.msra.mxu0 %v29627_v36  ;;  %v30033_v35 = vand.u32 4294901760, %v29687_v34  ;;  %v23626_v16 = vpack.c.bf16 %v15130_v10, %v15123_v4  ;;  %v23653_v4 = vpack.c.bf16 %v29687_v34, %v29684_v54  ;;  %v23695_v8 = vpack.c.bf16 %v30245_v5, %v15107_v28 }
0x10ae   :  { %23613 = vmatprep.subr.bf16.mxu1 %v30092_v38  ;;  %23595 = vmatprep.subr.bf16.mxu0 %v30092_v38 }
0x10af   :  { %v15143_v17 = vsub.f32 %v29687_v34, %v30033_v35 }
0x10b1   :  { %23615 = vmatpush3.bf16.msra.mxu1 %v23614_v13  ;;  %23597 = vmatpush3.bf16.msra.mxu0 %v29651_v30  ;;  %v15137_v13 = vand.u32 4294901760, %v15136_v0  ;;  %v15144_v19 = vand.u32 4294901760, %v15143_v17 }
0x10b2   :  { %23616 = vmatprep.subr.bf16.mxu1 %v30092_v38  ;;  %23598 = vmatprep.subr.bf16.mxu0 %v30092_v38 }
0x10b3   :  { %v23629_v52 = vpack.c.bf16 %v15144_v19, %v15137_v13 }
0x10b5   :  { %23618 = vmatpush3.bf16.msra.mxu1 %v23617_v25  ;;  %23600 = vmatpush3.bf16.msra.mxu0 %v29672_v49  ;;  %v29712_v25 = vpack.c.bf16 %v14983_v24, %v14980_v44  ;;  %v23638_v44 = vpack.c.bf16 %v29556_v26, %v29554_v22  ;;  %v30246_v22 = vand.u32 4294901760, %v29659_v37  ;;  %v30247_v26 = vand.u32 4294901760, %v29662_v56  ;;  %v23981_v37 = vld [vmem:[%s29842_s6 + $0x7] ss:$0 sm:$0xff] }
0x10b6   :  { %23619 = vmatprep.subr.bf16.mxu1 %v30092_v38  ;;  %23601 = vmatprep.subr.bf16.mxu0 %v30092_v38 }
0x10b9   :  { %23621 = vmatpush3.bf16.msra.mxu1 %v23620_v2  ;;  %23603 = vmatpush3.bf16.msra.mxu0 %v29712_v25  ;;  %v23647_v2 = vpack.c.bf16 %v29649_v48, %v29634_v33 }
0x10ba   :  { %23622 = vmatprep.subr.bf16.mxu1 %v30092_v38  ;;  %23604 = vmatprep.subr.bf16.mxu0 %v30092_v38 }
0x10bd   :  { %23624 = vmatpush3.bf16.msra.mxu1 %v23623_v43  ;;  %23606 = vmatpush3.bf16.msra.mxu0 %v29716_v41 }
0x10be   :  { %23625 = vmatprep.subr.bf16.mxu1 %v30092_v38  ;;  %23631 = vmatprep.subr.bf16.mxu0 %v30092_v38 }
0x10c1   :  { %23627 = vmatpush3.bf16.msra.mxu1 %v23626_v16 }
0x10c2   :  { %23628 = vmatprep.subr.bf16.mxu1 %v30092_v38 }
0x10c5   :  { %23630 = vmatpush3.bf16.msra.mxu1 %v23629_v52 }
0x10c6   :  { %23655 = vmatprep.subr.bf16.mxu1 %v30092_v38 }
0x10fd   :  { %v14047_v12 = vpop.f32.mrb[62].mxu0 }
0x10fe   :  { %v20838_v31 = vpop.f32.mrb[63].mxu0 }
0x1105   :  { %v13896_v24 = vpop.f32.mrb[40].mxu1 }
0x1106   :  { %v14048_v62 = vadd.f32 %v14047_v12, %v13896_v24  ;;  %v20803_v45 = vpop.f32.mrb[41].mxu1 }
0x111d   :  { %v14240_v43 = vpop.f32.mrb[64].mxu0 }
0x111e   :  { %v20908_v10 = vpop.f32.mrb[65].mxu0 }
0x1125   :  { %v14151_v0 = vpop.f32.mrb[42].mxu1 }
0x1126   :  { %v14152_v17 = vadd.f32 %v14151_v0, %v14048_v62  ;;  %v20873_v16 = vpop.f32.mrb[43].mxu1 }
0x1128   :  { %v14241_v13 = vadd.f32 %v14240_v43, %v14152_v17 }
0x113d   :  { %v14446_v19 = vpop.f32.mrb[66].mxu0 }
0x113e   :  { %v20978_v52 = vpop.f32.mrb[67].mxu0 }
0x1145   :  { %v14359_v12 = vpop.f32.mrb[44].mxu1 }
0x1146   :  { %v14360_v31 = vadd.f32 %v14359_v12, %v14241_v13  ;;  %v20943_v24 = vpop.f32.mrb[45].mxu1 }
0x1148   :  { %v14447_v45 = vadd.f32 %v14446_v19, %v14360_v31 }
0x114a   :  { %v29737_v35 = vadd.f32 %v14447_v45, %v29380_v32 }
0x1173   :  { %v14923_v57 = vpop.f32.mrb[46].mxu1 }
0x1174   :  { %v29739_v1 = vand.u32 4294901760, %v14923_v57  ;;  %v21032_v7 = vpop.f32.mrb[47].mxu1 }
0x1175   :  { %v23680_v7 = vpack.c.bf16 %v15044_v23, %v15037_v21  ;;  %v30248_v21 = vand.u32 4294901760, %v29684_v54  ;;  %v30249_v23 = vand.u32 4294901760, %v29687_v34 }
0x1176   :  { %v15025_v40 = vsub.f32 %v14923_v57, %v29739_v1  ;;  %21101 = vmatmul.mubr.f32.vlgmr.msra.gmra.mrb[48].mxu1 %v29739_v1 }
0x1177   :  { %23657 = vmatpush3.bf16.msra.mxu1 %v29547_v29  ;;  %21170 = vmatprep.mubr.msk.f32.mxu1 %vm23984_vm1, %v30093_v47 }
0x1178   :  { %v15026_v62 = vand.u32 4294901760, %v15025_v40  ;;  %23658 = vmatprep.subr.bf16.mxu1 %v30092_v38 }
0x117a   :  { %v15027_v43 = vsub.f32 %v15025_v40, %v15026_v62 }
0x117b   :  { %23660 = vmatpush3.bf16.msra.mxu1 %v29558_v27 }
0x117c   :  { %v15028_v32 = vand.u32 4294901760, %v15027_v43  ;;  %23661 = vmatprep.subr.bf16.mxu1 %v30092_v38 }
0x117e   :  { %21066 = vmatmul.mubr.f32.vlgmr.msra.gmra.mrb[68].mxu0 %v15028_v32 }
0x117f   :  { %23633 = vmatpush3.bf16.msra.mxu0 %v23632_v55  ;;  %23663 = vmatpush3.bf16.msra.mxu1 %v29606_v3 }
0x1180   :  { %23634 = vmatprep.subr.bf16.mxu0 %v30092_v38  ;;  %23664 = vmatprep.subr.bf16.mxu1 %v30092_v38 }
0x1181   :  { %21135 = vmatprep.mubr.msk.f32.mxu0 %vm23984_vm1, %v30093_v47 }
0x1183   :  { %23636 = vmatpush3.bf16.msra.mxu0 %v23635_v18  ;;  %23666 = vmatpush3.bf16.msra.mxu1 %v29627_v36 }
0x1184   :  { %23637 = vmatprep.subr.bf16.mxu0 %v30092_v38  ;;  %23667 = vmatprep.subr.bf16.mxu1 %v30092_v38 }
0x1187   :  { %23639 = vmatpush3.bf16.msra.mxu0 %v23638_v44  ;;  %23669 = vmatpush3.bf16.msra.mxu1 %v29651_v30 }
0x1188   :  { %23640 = vmatprep.subr.bf16.mxu0 %v30092_v38  ;;  %23670 = vmatprep.subr.bf16.mxu1 %v30092_v38 }
0x118b   :  { %23642 = vmatpush3.bf16.msra.mxu0 %v23641_v15  ;;  %23672 = vmatpush3.bf16.msra.mxu1 %v29672_v49 }
0x118c   :  { %23643 = vmatprep.subr.bf16.mxu0 %v30092_v38  ;;  %23673 = vmatprep.subr.bf16.mxu1 %v30092_v38 }
0x118f   :  { %23645 = vmatpush3.bf16.msra.mxu0 %v23644_v20  ;;  %23675 = vmatpush3.bf16.msra.mxu1 %v29712_v25 }
0x1190   :  { %23646 = vmatprep.subr.bf16.mxu0 %v30092_v38  ;;  %23676 = vmatprep.subr.bf16.mxu1 %v30092_v38 }
0x1193   :  { %23648 = vmatpush3.bf16.msra.mxu0 %v23647_v2  ;;  %23678 = vmatpush3.bf16.msra.mxu1 %v29716_v41 }
0x1194   :  { %23649 = vmatprep.subr.bf16.mxu0 %v30092_v38  ;;  %23703 = vmatprep.subr.bf16.mxu1 %v30092_v38 }
0x1196   :  { %21171 = vmatmul.mubr.f32.vlgmr.msra.gmra.mrb[50].mxu1 %v15026_v62 }
0x1197   :  { %23651 = vmatpush3.bf16.msra.mxu0 %v23650_v42  ;;  %23705 = vmatpush3.bf16.msra.mxu1 %v29547_v29  ;;  %v23683_v29 = vpack.c.bf16 %v15058_v6, %v15051_v53  ;;  %v23701_v53 = vpack.c.bf16 %v30249_v23, %v30248_v21 }
0x1198   :  { %23652 = vmatprep.subr.bf16.mxu0 %v30092_v38  ;;  %23706 = vmatprep.subr.bf16.mxu1 %v30092_v38 }
0x1199   :  { %21240 = vmatprep.mubr.msk.f32.mxu1 %vm23984_vm1, %v30093_v47 }
0x119b   :  { %23654 = vmatpush3.bf16.msra.mxu0 %v23653_v4  ;;  %23708 = vmatpush3.bf16.msra.mxu1 %v29558_v27  ;;  %v23698_v27 = vpack.c.bf16 %v30247_v26, %v30246_v22 }
0x119c   :  { %23679 = vmatprep.subr.bf16.mxu0 %v30092_v38  ;;  %23709 = vmatprep.subr.bf16.mxu1 %v30092_v38 }
0x119e   :  { %21136 = vmatmul.mubr.f32.vlgmr.msra.gmra.mrb[70].mxu0 %v15025_v40 }
0x119f   :  { %23681 = vmatpush3.bf16.msra.mxu0 %v23680_v7  ;;  %23711 = vmatpush3.bf16.msra.mxu1 %v29606_v3 }
0x11a0   :  { %23682 = vmatprep.subr.bf16.mxu0 %v30092_v38  ;;  %23712 = vmatprep.subr.bf16.mxu1 %v30092_v38 }
0x11a1   :  { %21205 = vmatprep.mubr.msk.f32.mxu0 %vm23984_vm1, %v30093_v47  ;;  %v23689_v47 = vpack.c.bf16 %v15086_v9, %v15079_v46 }
0x11a3   :  { %23684 = vmatpush3.bf16.msra.mxu0 %v23683_v29  ;;  %23714 = vmatpush3.bf16.msra.mxu1 %v29627_v36 }
0x11a4   :  { %23685 = vmatprep.subr.bf16.mxu0 %v30092_v38  ;;  %23715 = vmatprep.subr.bf16.mxu1 %v30092_v38 }
0x11a7   :  { %23687 = vmatpush3.bf16.msra.mxu0 %v23686_v58  ;;  %23717 = vmatpush3.bf16.msra.mxu1 %v29651_v30 }
0x11a8   :  { %23688 = vmatprep.subr.bf16.mxu0 %v30092_v38  ;;  %23718 = vmatprep.subr.bf16.mxu1 %v30092_v38 }
0x11ab   :  { %23690 = vmatpush3.bf16.msra.mxu0 %v23689_v47  ;;  %23720 = vmatpush3.bf16.msra.mxu1 %v29672_v49 }
0x11ac   :  { %23691 = vmatprep.subr.bf16.mxu0 %v30092_v38  ;;  %23721 = vmatprep.subr.bf16.mxu1 %v30092_v38 }
0x11af   :  { %23693 = vmatpush3.bf16.msra.mxu0 %v23692_v14  ;;  %23723 = vmatpush3.bf16.msra.mxu1 %v29712_v25 }
0x11b0   :  { %23694 = vmatprep.subr.bf16.mxu0 %v30092_v38  ;;  %23724 = vmatprep.subr.bf16.mxu1 %v30092_v38 }
0x11b3   :  { %23696 = vmatpush3.bf16.msra.mxu0 %v23695_v8  ;;  %23726 = vmatpush3.bf16.msra.mxu1 %v29716_v41 }
0x11b4   :  { %23697 = vmatprep.subr.bf16.mxu0 %v30092_v38 }
0x11b6   :  { %21241 = vmatmul.mubr.f32.vlgmr.msra.gmra.mrb[52].mxu1 %v29739_v1 }
0x11b7   :  { %23699 = vmatpush3.bf16.msra.mxu0 %v23698_v27 }
0x11b8   :  { %23700 = vmatprep.subr.bf16.mxu0 %v30092_v38 }
0x11bb   :  { %23702 = vmatpush3.bf16.msra.mxu0 %v23701_v53 }
0x11be   :  { %21206 = vmatmul.mubr.f32.vlgmr.msra.gmra.mrb[72].mxu0 %v29739_v1 }
0x1249   :  { %v15181_v6 = vpop.f32.mrb[48].mxu1 }
0x124a   :  { %v21102_v11 = vpop.f32.mrb[49].mxu1 }
0x1251   :  { %v15030_v39 = vpop.f32.mrb[68].mxu0 }
0x1252   :  { %v15182_v59 = vadd.f32 %v15181_v6, %v15030_v39  ;;  %v21067_v63 = vpop.f32.mrb[69].mxu0 }
0x1269   :  { %v15374_v46 = vpop.f32.mrb[50].mxu1 }
0x126a   :  { %v21172_v9 = vpop.f32.mrb[51].mxu1 }
0x1271   :  { %v15285_v3 = vpop.f32.mrb[70].mxu0 }
0x1272   :  { %v15286_v51 = vadd.f32 %v15285_v3, %v15182_v59  ;;  %v21137_v36 = vpop.f32.mrb[71].mxu0 }
0x1274   :  { %v15375_v60 = vadd.f32 %v15374_v46, %v15286_v51 }
0x1289   :  { %v15580_v61 = vpop.f32.mrb[52].mxu1 }
0x128a   :  { %v21242_v33 = vpop.f32.mrb[53].mxu1 }
0x1291   :  { %v15493_v50 = vpop.f32.mrb[72].mxu0 }
0x1292   :  { %v15494_v48 = vadd.f32 %v15493_v50, %v15375_v60  ;;  %v21207_v30 = vpop.f32.mrb[73].mxu0 }
0x1294   :  { %v15581_v38 = vadd.f32 %v15580_v61, %v15494_v48 }
0x1296   :  { %v15584_v28 = vadd.f32 %v15581_v38, %v29737_v35 }
0x1298   :  { %v15585_v56 = vadd.f32 %v23981_v37, %v15584_v28 }
0x129a   :  { %15746 = vst.msk [vmem:[%s29848_s9 + $0x8] sm:$0xff] %vm57_vm0, %v15585_v56 }

</bundles_post_ra>
